<compile_context>
chip_gen: v5e
topology: v5e:2x2
jax: 0.10.0
libtpu: 0.0.40
codegen_flags: <defaults>
</compile_context>

<pallas_src>
import math
from functools import partial

import jax
import jax.numpy as jnp
from jax.experimental import pallas as pl
from jax.experimental.pallas import tpu as pltpu


def _round_up(x, m):
    return ((x + m - 1) // m) * m


def _pad_rows(a, rows):
    return jnp.pad(a, ((0, rows - a.shape[0]), (0, 0))) if rows > a.shape[0] else a


# ----------------------------------------------------------------------------
# Pallas kernel 1: tiled dense matmul (MXU, f32 inputs cast to bf16 in-kernel,
#                  f32 accumulate) with optional fused bias epilogue
# ----------------------------------------------------------------------------
def _matmul_kernel(a_ref, b_ref, o_ref):
    o_ref[...] = jnp.dot(a_ref[...].astype(jnp.bfloat16),
                         b_ref[...].astype(jnp.bfloat16),
                         preferred_element_type=jnp.float32)


def _matmul_bias_kernel(a_ref, b_ref, bias_ref, o_ref):
    o_ref[...] = (jnp.dot(a_ref[...].astype(jnp.bfloat16),
                          b_ref[...].astype(jnp.bfloat16),
                          preferred_element_type=jnp.float32) + bias_ref[...])


def pallas_matmul(a, b, bias=None):
    """[M,K] @ [K,N] (+ bias) -> [M,N] float32.  bf16 cast happens inside the kernel."""
    M, K = a.shape
    N = b.shape[1]

    # tm=128 -> grids with M >= 256 expose >= 2 parallel steps (v7x has 2 TensorCores).
    tm = min(128, _round_up(M, 8))
    Mp = _round_up(M, tm)
    a = _pad_rows(a, Mp)                     # no-op when already aligned

    if N > 512 and N % 128 == 0:
        tn = 512 if N % 512 == 0 else 128
    else:
        tn = N                               # full-dim block (always legal)

    in_specs = [pl.BlockSpec((tm, K), lambda i, j: (i, 0)),
                pl.BlockSpec((K, tn), lambda i, j: (0, j))]
    args = [a, b]
    kern = _matmul_kernel
    if bias is not None:
        in_specs.append(pl.BlockSpec((1, tn), lambda i, j: (0, j)))
        args.append(bias.reshape(1, N).astype(jnp.float32))
        kern = _matmul_bias_kernel

    # TODO(synk): add a K grid axis + VMEM accumulator if hidden grows beyond ~256.
    out = pl.pallas_call(
        kern,
        out_shape=jax.ShapeDtypeStruct((Mp, N), jnp.float32),
        grid=(Mp // tm, N // tn),
        in_specs=in_specs,
        out_specs=pl.BlockSpec((tm, tn), lambda i, j: (i, j)),
        compiler_params=pltpu.CompilerParams(
            dimension_semantics=("parallel", "parallel")),
    )(*args)
    return out[:M] if Mp > M else out


# ----------------------------------------------------------------------------
# Pallas kernel 2: fused (residual +) LayerNorm (+ exact-erf GELU) (+ output head)
# ----------------------------------------------------------------------------
_SQRT_HALF = 1.0 / math.sqrt(2.0)
_ERF_P = 0.3275911
_ERF_A = (0.254829592, -0.284496736, 1.421413741, -1.453152027, 1.061405429)


def _erf(x):
    # Abramowitz & Stegun 7.1.26 (|err| < 1.5e-7): matches torch's exact-erf GELU to
    # f32 precision using only the EUP-native exp().
    sgn = jnp.where(x >= 0.0, 1.0, -1.0)
    a = jnp.abs(x)
    t = 1.0 / (1.0 + _ERF_P * a)
    a1, a2, a3, a4, a5 = _ERF_A
    poly = ((((a5 * t + a4) * t + a3) * t + a2) * t + a1) * t
    return sgn * (1.0 - poly * jnp.exp(-a * a))


def _gelu(x):
    # torch.nn.GELU() default (approximate='none')
    return 0.5 * x * (1.0 + _erf(x * _SQRT_HALF))


def _ln_compute(x, g, b, eps, do_gelu):
    mu = jnp.mean(x, axis=-1, keepdims=True)
    xc = x - mu
    var = jnp.mean(xc * xc, axis=-1, keepdims=True)
    y = xc * jax.lax.rsqrt(var + eps) * g + b
    return _gelu(y) if do_gelu else y


def _ln_kernel(x_ref, g_ref, b_ref, o_ref, *, eps, do_gelu):
    o_ref[...] = _ln_compute(x_ref[...], g_ref[...], b_ref[...], eps, do_gelu)


def _ln_res_kernel(x_ref, r_ref, g_ref, b_ref, o_ref, *, eps, do_gelu):
    o_ref[...] = _ln_compute(x_ref[...] + r_ref[...], g_ref[...], b_ref[...],
                             eps, do_gelu)


def _ln_head_kernel(x_ref, g_ref, b_ref, w_ref, bh_ref, o_ref, *, eps, do_gelu):
    y = _ln_compute(x_ref[...], g_ref[...], b_ref[...], eps, do_gelu)
    o_ref[...] = (jnp.dot(y.astype(jnp.bfloat16), w_ref[...].astype(jnp.bfloat16),
                          preferred_element_type=jnp.float32) + bh_ref[...])


_LN_TILE = 512     # HBM-bound: big row tiles (~85% of HBM roofline vs ~29% at 128)


def pallas_layernorm(x, gamma, beta, residual=None, *, eps=1e-5, do_gelu=False):
    M, D = x.shape
    TM = min(_LN_TILE, _round_up(M, 8))
    Mp = _round_up(M, TM)

    g = gamma.reshape(1, D).astype(jnp.float32)
    b = beta.reshape(1, D).astype(jnp.float32)
    row_spec = pl.BlockSpec((TM, D), lambda i: (i, 0))
    vec_spec = pl.BlockSpec((1, D), lambda i: (0, 0))

    if residual is None:
        kern = partial(_ln_kernel, eps=eps, do_gelu=do_gelu)
        in_specs = [row_spec, vec_spec, vec_spec]
        args = (_pad_rows(x, Mp), g, b)
    else:
        kern = partial(_ln_res_kernel, eps=eps, do_gelu=do_gelu)
        in_specs = [row_spec, row_spec, vec_spec, vec_spec]
        args = (_pad_rows(x, Mp), _pad_rows(residual, Mp), g, b)

    out = pl.pallas_call(
        kern,
        out_shape=jax.ShapeDtypeStruct((Mp, D), jnp.float32),
        grid=(Mp // TM,),
        in_specs=in_specs,
        out_specs=row_spec,
        compiler_params=pltpu.CompilerParams(dimension_semantics=("parallel",)),
    )(*args)
    return out[:M] if Mp > M else out


def pallas_layernorm_head(x, gamma, beta, w_head, b_head, *, eps=1e-5, do_gelu=True):
    """LayerNorm (+GELU) fused with the final output Linear.  The tiny head weight is
    zero-padded to 128 lanes so the store is lane-dense; the [:, :n_out] slice is done
    outside on a tiny array."""
    M, D = x.shape
    n_out = w_head.shape[1]
    P = _round_up(n_out, 128)
    wp = jnp.zeros((D, P), jnp.float32).at[:, :n_out].set(w_head)
    bp = jnp.zeros((1, P), jnp.float32).at[:, :n_out].set(b_head.reshape(1, n_out))

    TM = min(_LN_TILE, _round_up(M, 8))
    Mp = _round_up(M, TM)
    g = gamma.reshape(1, D).astype(jnp.float32)
    b = beta.reshape(1, D).astype(jnp.float32)

    out = pl.pallas_call(
        partial(_ln_head_kernel, eps=eps, do_gelu=do_gelu),
        out_shape=jax.ShapeDtypeStruct((Mp, P), jnp.float32),
        grid=(Mp // TM,),
        in_specs=[pl.BlockSpec((TM, D), lambda i: (i, 0)),
                  pl.BlockSpec((1, D), lambda i: (0, 0)),
                  pl.BlockSpec((1, D), lambda i: (0, 0)),
                  pl.BlockSpec((D, P), lambda i: (0, 0)),
                  pl.BlockSpec((1, P), lambda i: (0, 0))],
        out_specs=pl.BlockSpec((TM, P), lambda i: (i, 0)),
        compiler_params=pltpu.CompilerParams(dimension_semantics=("parallel",)),
    )(_pad_rows(x, Mp), g, b, wp, bp)
    return out[:M, :n_out]


# ----------------------------------------------------------------------------
# Pallas kernel 3: GATv2 per-edge attention logits with FUSED lin_edge projection
#   e    = edge_attr @ We                         (MXU, resident weight)
#   z    = x_l[src] + x_r[dst] + e
#   logit[e, h] = sum_c att[h,c] * leaky_relu(z)[e, h*C+c]
# The per-head weighted reduce is a block-diagonal [H*C, H] matrix -> tiny MXU matmul.
# ----------------------------------------------------------------------------
def _gat_logit_kernel(xl_ref, xr_ref, ea_ref, we_ref, a_ref, o_ref, *, neg_slope):
    e = jnp.dot(ea_ref[...].astype(jnp.bfloat16), we_ref[...].astype(jnp.bfloat16),
                preferred_element_type=jnp.float32)
    z = xl_ref[...] + xr_ref[...] + e
    z = jnp.where(z >= 0.0, z, neg_slope * z)               # leaky_relu
    o_ref[...] = jnp.dot(z.astype(jnp.bfloat16), a_ref[...].astype(jnp.bfloat16),
                         preferred_element_type=jnp.float32)


def pallas_gat_logits(xl, xr, ea, We, att_mat, neg_slope):
    M, HC = xl.shape
    K = ea.shape[1]
    H = att_mat.shape[1]
    TE = min(512, _round_up(M, 8))
    Mp = _round_up(M, TE)

    def row(cols):
        return pl.BlockSpec((TE, cols), lambda e: (e, 0))

    out = pl.pallas_call(
        partial(_gat_logit_kernel, neg_slope=neg_slope),
        out_shape=jax.ShapeDtypeStruct((Mp, H), jnp.float32),
        grid=(Mp // TE,),
        in_specs=[row(HC), row(HC), row(K),
                  pl.BlockSpec((K, HC), lambda e: (0, 0)),      # resident lin_edge W
                  pl.BlockSpec((HC, H), lambda e: (0, 0))],     # resident block-diag att
        out_specs=pl.BlockSpec((TE, H), lambda e: (e, 0)),
        compiler_params=pltpu.CompilerParams(dimension_semantics=("parallel",)),
    )(_pad_rows(xl, Mp), _pad_rows(xr, Mp), _pad_rows(ea, Mp),
      We.astype(jnp.float32), att_mat.astype(jnp.float32))
    return out[:M] if Mp > M else out


# ----------------------------------------------------------------------------
# Pallas kernel 4: NNConv edge messages as ONE full-depth MXU matmul
#   z[e, k*D + d] = ea[e, k] * x_src[e, d]        (bf16 VMEM scratch, aligned stores)
#   msg[e]        = z[e] @ reshape(Wnn, (K*D, D)) + x_src[e] @ reshape(bnn, (D, D))
# ----------------------------------------------------------------------------
def _nnconv_kernel(ea_ref, x_ref, w2_ref, bnn_ref, o_ref, z_ref, *, K, D, group):
    x = x_ref[...]                                            # (TE, D) f32
    # Build the per-edge outer product; group k's so every scratch store covers a
    # multiple of 128 lanes (e.g. group=2 for D=64).
    for k0 in range(0, K, group):
        cols = [ea_ref[:, k:k + 1] * x for k in range(k0, k0 + group)]
        chunk = cols[0] if group == 1 else jnp.concatenate(cols, axis=1)
        z_ref[:, k0 * D:(k0 + group) * D] = chunk.astype(jnp.bfloat16)
    # Single contraction of depth K*D (full MXU systolic depth) + tiny bias-matrix
    # epilogue; both resident weights are bf16.
    o_ref[...] = (jnp.dot(z_ref[...], w2_ref[...], preferred_element_type=jnp.float32)
                  + jnp.dot(x.astype(jnp.bfloat16), bnn_ref[...],
                            preferred_element_type=jnp.float32))


def pallas_nnconv_messages(edge_attr, x_src, Wnn, bnn):
    E, K = edge_attr.shape
    D = x_src.shape[1]

    # VMEM budget: keep the bf16 z scratch <= ~8 MiB (safe on v7x's 64 MiB VMEM while
    # leaving room for double-buffered inputs and the resident reshaped Wnn).
    budget_rows = max(16, (8 * 1024 * 1024) // (K * D * 2))
    cap = 16
    while cap * 2 <= min(512, budget_rows):
        cap *= 2
    TE = _round_up(E, 8) if E <= cap else cap
    Ep = _round_up(E, TE)

    ea = _pad_rows(edge_attr, Ep)            # no-op: edge set is pre-padded upstream
    xs = _pad_rows(x_src, Ep)
    # W2[k*D + d, o] = Wnn[k, d*D + o]  (row-major reshape, no transpose needed)
    W2 = Wnn.reshape(K * D, D).astype(jnp.bfloat16)
    Bnn = bnn.reshape(D, D).astype(jnp.bfloat16)

    if D % 128 == 0:
        group = 1
    elif 128 % D == 0 and K % (128 // D) == 0:
        group = 128 // D
    else:
        group = 1                            # correct but lane-misaligned stores

    out = pl.pallas_call(
        partial(_nnconv_kernel, K=K, D=D, group=group),
        out_shape=jax.ShapeDtypeStruct((Ep, D), jnp.float32),
        grid=(Ep // TE,),
        in_specs=[
            pl.BlockSpec((TE, K), lambda e: (e, 0)),
            pl.BlockSpec((TE, D), lambda e: (e, 0)),
            pl.BlockSpec((K * D, D), lambda e: (0, 0)),   # resident reshaped edge-NN W
            pl.BlockSpec((D, D), lambda e: (0, 0)),       # resident bias matrix
        ],
        out_specs=pl.BlockSpec((TE, D), lambda e: (e, 0)),
        scratch_shapes=[pltpu.VMEM((TE, K * D), jnp.bfloat16)],
        compiler_params=pltpu.CompilerParams(
            dimension_semantics=("parallel",),
            vmem_limit_bytes=32 * 1024 * 1024),
    )(ea, xs, W2, Bnn)
    return out[:E] if Ep > E else out


# ----------------------------------------------------------------------------
# Graph layers (Pallas compute + JAX gather/scatter glue)
# ----------------------------------------------------------------------------
def _pad_edge_set(src, dst, attr, dummy_dst):
    """Pad an edge set once to the edge-kernel tile.  Dummy edges point at scratch
    segment `dummy_dst` (== num_nodes) so their contribution is dropped."""
    E = src.shape[0]
    Ep = _round_up(E, 16) if E <= 512 else _round_up(E, 512)
    if Ep == E:
        return src, dst, attr
    pad = Ep - E
    src = jnp.concatenate([src, jnp.zeros((pad,), src.dtype)])
    dst = jnp.concatenate([dst, jnp.full((pad,), dummy_dst, dst.dtype)])
    attr = jnp.concatenate([attr, jnp.zeros((pad, attr.shape[1]), attr.dtype)])
    return src, dst, attr


def gatv2_conv(x, src_g, dst_g, ea_g, n_nodes, p):
    """GATv2Conv(hidden, 32, heads=hidden//32, negative_slope=0.1, edge_dim=hidden);
    concat=True, add_self_loops=True (fill_value='mean', applied upstream), eval mode."""
    N = n_nodes
    H, C = p["att"].shape
    HC = H * C

    # lin_l and lin_r consume the same x -> one fused matmul with fused bias.
    W_lr = jnp.concatenate([p["Wl"], p["Wr"]], axis=1)
    b_lr = jnp.concatenate([p["bl"], p["br"]])
    x_lr = pallas_matmul(x, W_lr, b_lr)                  # [N, 2*HC]
    x_l, x_r = x_lr[:, :HC], x_lr[:, HC:]

    # TODO(synk): data-dependent gathers stay in plain JAX glue.
    xl_e = x_l[src_g]                                    # x_j  [E', HC]
    xr_e = x_r[jnp.minimum(dst_g, N - 1)]                # x_i  [E', HC] (clamp dummies)

    # Block-diagonal attention matrix: A[h*C+c, h'] = att[h, c] * delta(h, h').
    A = (p["att"][:, :, None]
         * jnp.eye(H, dtype=jnp.float32)[:, None, :]).reshape(HC, H)
    logits = pallas_gat_logits(xl_e, xr_e, ea_g, p["We"], A, neg_slope=0.1)   # [E', H]

    # segment softmax over destination node (torch_geometric.utils.softmax)
    # TODO(synk): segment max / segment sum scatters stay in plain JAX.
    seg_max = jax.ops.segment_max(logits, dst_g, num_segments=N + 1)
    alpha = jnp.exp(logits - seg_max[dst_g])
    denom = jax.ops.segment_sum(alpha, dst_g, num_segments=N + 1) + 1e-16
    alpha = alpha / denom[dst_g]                         # [E', H]

    Eg = xl_e.shape[0]
    msg = (xl_e.reshape(Eg, H, C) * alpha[:, :, None]).reshape(Eg, HC)
    out = jax.ops.segment_sum(msg, dst_g, num_segments=N + 1)[:N]
    return out + p["bias"]


def nnconv(x, src_n, dst_n, ea_n, n_nodes, p):
    """NNConv(D, D, nn=Linear(hidden, D*D)); aggr='add', root_weight, bias."""
    N = n_nodes
    msg = pallas_nnconv_messages(ea_n, x[src_n], p["Wnn"], p["bnn"])       # [E, D]
    agg = jax.ops.segment_sum(msg, dst_n, num_segments=N + 1)[:N]          # scatter-add
    return agg + pallas_matmul(x, p["Wroot"], p["bias"])   # root weight + bias fused


def gnn_forward(params, x, edge_index, edge_attr, batch):
    del batch  # unused by the reference forward
    src, dst = edge_index[0], edge_index[1]
    N = x.shape[0]

    x = pallas_matmul(x, params["node_enc_W"])                               # bias=False
    edge_attr = pallas_matmul(edge_attr, params["edge_enc_W"], params["edge_enc_b"])

    # --- GATv2 edge set: add self loops (fill_value='mean'), computed ONCE, pad once.
    ones = jnp.ones((src.shape[0],), jnp.float32)
    deg = jax.ops.segment_sum(ones, dst, num_segments=N)
    loop_attr = (jax.ops.segment_sum(edge_attr, dst, num_segments=N)
                 / jnp.maximum(deg, 1.0)[:, None])
    ar = jnp.arange(N, dtype=src.dtype)
    src_g = jnp.concatenate([src, ar])
    dst_g = jnp.concatenate([dst, ar])
    ea_g = jnp.concatenate([edge_attr, loop_attr], axis=0)
    src_g, dst_g, ea_g = _pad_edge_set(src_g, dst_g, ea_g, dummy_dst=N)

    # --- NNConv edge set (original edges), padded once.
    src_n, dst_n, ea_n = _pad_edge_set(src, dst, edge_attr, dummy_dst=N)

    # GraphTransEncoderLayer: x = dropout(gelu(LayerNorm(x + GATv2(x))))  (dropout=id)
    for p in params["encoder"]:
        x1 = gatv2_conv(x, src_g, dst_g, ea_g, N, p["gat"])
        x = pallas_layernorm(x, p["ln_g"], p["ln_b"], residual=x1, do_gelu=True)

    dec = params["decoder"]
    h = nnconv(x, src_n, dst_n, ea_n, N, dec[0]["conv"])
    # DeepGCNLayer block='res+':  out = inp + conv(dropout(gelu(norm(inp))))
    for p in dec:
        inp = x + h
        hh = pallas_layernorm(inp, p["ln_g"], p["ln_b"], do_gelu=True)
        h = inp + nnconv(hh, src_n, dst_n, ea_n, N, p["conv"])

    # x = decoder[0].act(decoder[0].norm(h)); return output(x)   (head fused into LN)
    return pallas_layernorm_head(h, dec[0]["ln_g"], dec[0]["ln_b"],
                                 params["out_W"], params["out_b"], do_gelu=True)


# ----------------------------------------------------------------------------
# Deterministic parameter init (synthetic; GNN.out_encoder and
# GraphTransEncoderLayer.lin are never used by forward -> omitted)
# ----------------------------------------------------------------------------
def init_params(key, in_channels=6, hidden_channels=64, decoder_hidden=64,
                edge_dim=4, num_layers=2, num_attentive_layers=2):
    assert hidden_channels % 32 == 0
    heads, C = hidden_channels // 32, 32
    keys = iter(jax.random.split(key, 128))

    def dense(fan_in, fan_out, bias=True):
        W = jax.random.normal(next(keys), (fan_in, fan_out), jnp.float32) / jnp.sqrt(fan_in)
        if not bias:
            return W
        b = 0.01 * jax.random.normal(next(keys), (fan_out,), jnp.float32)
        return W, b

    params = {"node_enc_W": dense(in_channels, hidden_channels, bias=False)}
    params["edge_enc_W"], params["edge_enc_b"] = dense(edge_dim, hidden_channels)

    enc = []
    for _ in range(num_attentive_layers):
        Wl, bl = dense(hidden_channels, heads * C)
        Wr, br = dense(hidden_channels, heads * C)
        gat = dict(
            Wl=Wl, bl=bl, Wr=Wr, br=br,
            We=dense(hidden_channels, heads * C, bias=False),
            att=jax.random.normal(next(keys), (heads, C), jnp.float32) / jnp.sqrt(C),
            bias=jnp.zeros((heads * C,), jnp.float32),
        )
        enc.append(dict(gat=gat,
                        ln_g=jnp.ones((hidden_channels,), jnp.float32),
                        ln_b=jnp.zeros((hidden_channels,), jnp.float32)))
    params["encoder"] = enc

    D = decoder_hidden
    decl = []
    for _ in range(num_layers):
        Wnn, bnn = dense(hidden_channels, D * D)
        conv = dict(Wnn=Wnn, bnn=bnn,
                    Wroot=dense(D, D, bias=False),
                    bias=jnp.zeros((D,), jnp.float32))
        decl.append(dict(conv=conv,
                         ln_g=jnp.ones((D,), jnp.float32),
                         ln_b=jnp.zeros((D,), jnp.float32)))
    params["decoder"] = decl

    params["out_W"], params["out_b"] = dense(D, 2)
    return params


if __name__ == "__main__":
    key = jax.random.PRNGKey(0)
    kx, ks, kd, ke, kp = jax.random.split(key, 5)

    N, E = 16, 32
    in_channels, hidden, dec_h, edge_dim = 6, 64, 64, 4

    x = jax.random.normal(kx, (N, in_channels), jnp.float32)
    src = jax.random.randint(ks, (E,), 0, N, dtype=jnp.int32)
    dst = jax.random.randint(kd, (E,), 0, N, dtype=jnp.int32)
    dst = jnp.where(dst == src, (dst + 1) % N, dst)   # no pre-existing self loops
    edge_index = jnp.stack([src, dst])
    edge_attr = jax.random.normal(ke, (E, edge_dim), jnp.float32)
    batch = jnp.zeros((N,), jnp.int32)

    params = init_params(kp, in_channels, hidden, dec_h, edge_dim,
                         num_layers=2, num_attentive_layers=2)

    out = jax.jit(gnn_forward)(params, x, edge_index, edge_attr, batch)
    out = jax.block_until_ready(out)
    assert out.shape == (N, 2) and out.dtype == jnp.float32
    print("KERNEL_OK")
</pallas_src>

<mosaic_0001>
module attributes {stable_mosaic.version = 11 : i64} {
  func.func @_matmul_bias_kernel(%arg0: i32, %arg1: i32, %arg2: memref<32x4xf32, #tpu.memory_space<vmem>>, %arg3: memref<4x64xf32, #tpu.memory_space<vmem>>, %arg4: memref<1x64xf32, #tpu.memory_space<vmem>>, %arg5: memref<32x64xf32, #tpu.memory_space<vmem>>) attributes {dimension_semantics = [#tpu.dimension_semantics<parallel>, #tpu.dimension_semantics<parallel>], iteration_bounds = array<i64: 1, 1>, scalar_prefetch = 0 : i64, scratch_operands = 0 : i64, tpu.core_type = #tpu.core_type<tc>, window_params = [{transform_indices = @transform_0, window_bounds = array<i64: 32, 4>}, {transform_indices = @transform_1, window_bounds = array<i64: 4, 64>}, {transform_indices = @transform_2, window_bounds = array<i64: 1, 64>}, {transform_indices = @transform_3, window_bounds = array<i64: 32, 64>}]} {
    %c0 = arith.constant 0 : index
    %c0_0 = arith.constant 0 : index
    %0 = vector.load %arg2[%c0, %c0_0] : memref<32x4xf32, #tpu.memory_space<vmem>>, vector<32x4xf32>
    %1 = arith.truncf %0 : vector<32x4xf32> to vector<32x4xbf16>
    %c0_1 = arith.constant 0 : index
    %c0_2 = arith.constant 0 : index
    %2 = vector.load %arg3[%c0_1, %c0_2] : memref<4x64xf32, #tpu.memory_space<vmem>>, vector<4x64xf32>
    %3 = arith.truncf %2 : vector<4x64xf32> to vector<4x64xbf16>
    %cst = arith.constant dense<0.000000e+00> : vector<32x64xf32>
    %4 = tpu.matmul %1, %3, %cst {dimension_numbers = #tpu.dot_dimension_numbers<[1], [0], [0], [1], [0, 0, 1, 1], [], []>} : vector<32x4xbf16>, vector<4x64xbf16>, vector<32x64xf32> -> vector<32x64xf32>
    %c0_3 = arith.constant 0 : index
    %c0_4 = arith.constant 0 : index
    %5 = vector.load %arg4[%c0_3, %c0_4] : memref<1x64xf32, #tpu.memory_space<vmem>>, vector<1x64xf32>
    %6 = vector.broadcast %5 : vector<1x64xf32> to vector<32x64xf32>
    %7 = arith.addf %4, %6 : vector<32x64xf32>
    %c0_5 = arith.constant 0 : index
    %c0_6 = arith.constant 0 : index
    %8 = vector.load %arg5[%c0_5, %c0_6] : memref<32x64xf32, #tpu.memory_space<vmem>>, vector<32x64xf32>
    tpu.vector_store %arg5[%c0_5, %c0_6], %7 {strides = array<i32>} : memref<32x64xf32, #tpu.memory_space<vmem>>, vector<32x64xf32>,
    return
  }
  func.func @transform_0(%arg0: i32, %arg1: i32) -> (i32, i32) {
    %c0_i32 = arith.constant 0 : i32
    %c0_i32_0 = arith.constant 0 : i32
    return %arg0, %c0_i32 : i32, i32
  }
  func.func @transform_1(%arg0: i32, %arg1: i32) -> (i32, i32) {
    %c0_i32 = arith.constant 0 : i32
    %c0_i32_0 = arith.constant 0 : i32
    return %c0_i32, %arg1 : i32, i32
  }
  func.func @transform_2(%arg0: i32, %arg1: i32) -> (i32, i32) {
    %c0_i32 = arith.constant 0 : i32
    %c0_i32_0 = arith.constant 0 : i32
    return %c0_i32, %arg1 : i32, i32
  }
  func.func @transform_3(%arg0: i32, %arg1: i32) -> (i32, i32) {
    %c0_i32 = arith.constant 0 : i32
    return %arg0, %arg1 : i32, i32
  }
}

module attributes {stable_mosaic.version = 11 : i64} {
  func.func @_matmul_kernel(%arg0: i32, %arg1: i32, %arg2: memref<16x6xf32, #tpu.memory_space<vmem>>, %arg3: memref<6x64xf32, #tpu.memory_space<vmem>>, %arg4: memref<16x64xf32, #tpu.memory_space<vmem>>) attributes {dimension_semantics = [#tpu.dimension_semantics<parallel>, #tpu.dimension_semantics<parallel>], iteration_bounds = array<i64: 1, 1>, scalar_prefetch = 0 : i64, scratch_operands = 0 : i64, tpu.core_type = #tpu.core_type<tc>, window_params = [{transform_indices = @transform_0, window_bounds = array<i64: 16, 6>}, {transform_indices = @transform_1, window_bounds = array<i64: 6, 64>}, {transform_indices = @transform_2, window_bounds = array<i64: 16, 64>}]} {
    %c0 = arith.constant 0 : index
    %c0_0 = arith.constant 0 : index
    %0 = vector.load %arg2[%c0, %c0_0] : memref<16x6xf32, #tpu.memory_space<vmem>>, vector<16x6xf32>
    %1 = arith.truncf %0 : vector<16x6xf32> to vector<16x6xbf16>
    %c0_1 = arith.constant 0 : index
    %c0_2 = arith.constant 0 : index
    %2 = vector.load %arg3[%c0_1, %c0_2] : memref<6x64xf32, #tpu.memory_space<vmem>>, vector<6x64xf32>
    %3 = arith.truncf %2 : vector<6x64xf32> to vector<6x64xbf16>
    %cst = arith.constant dense<0.000000e+00> : vector<16x64xf32>
    %4 = tpu.matmul %1, %3, %cst {dimension_numbers = #tpu.dot_dimension_numbers<[1], [0], [0], [1], [0, 0, 1, 1], [], []>} : vector<16x6xbf16>, vector<6x64xbf16>, vector<16x64xf32> -> vector<16x64xf32>
    %c0_3 = arith.constant 0 : index
    %c0_4 = arith.constant 0 : index
    %5 = vector.load %arg4[%c0_3, %c0_4] : memref<16x64xf32, #tpu.memory_space<vmem>>, vector<16x64xf32>
    tpu.vector_store %arg4[%c0_3, %c0_4], %4 {strides = array<i32>} : memref<16x64xf32, #tpu.memory_space<vmem>>, vector<16x64xf32>,
    return
  }
  func.func @transform_0(%arg0: i32, %arg1: i32) -> (i32, i32) {
    %c0_i32 = arith.constant 0 : i32
    %c0_i32_0 = arith.constant 0 : i32
    return %arg0, %c0_i32 : i32, i32
  }
  func.func @transform_1(%arg0: i32, %arg1: i32) -> (i32, i32) {
    %c0_i32 = arith.constant 0 : i32
    %c0_i32_0 = arith.constant 0 : i32
    return %c0_i32, %arg1 : i32, i32
  }
  func.func @transform_2(%arg0: i32, %arg1: i32) -> (i32, i32) {
    %c0_i32 = arith.constant 0 : i32
    return %arg0, %arg1 : i32, i32
  }
}

module attributes {stable_mosaic.version = 11 : i64} {
  func.func @_matmul_bias_kernel(%arg0: i32, %arg1: i32, %arg2: memref<16x64xf32, #tpu.memory_space<vmem>>, %arg3: memref<64x128xf32, #tpu.memory_space<vmem>>, %arg4: memref<1x128xf32, #tpu.memory_space<vmem>>, %arg5: memref<16x128xf32, #tpu.memory_space<vmem>>) attributes {dimension_semantics = [#tpu.dimension_semantics<parallel>, #tpu.dimension_semantics<parallel>], iteration_bounds = array<i64: 1, 1>, scalar_prefetch = 0 : i64, scratch_operands = 0 : i64, tpu.core_type = #tpu.core_type<tc>, window_params = [{transform_indices = @transform_0, window_bounds = array<i64: 16, 64>}, {transform_indices = @transform_1, window_bounds = array<i64: 64, 128>}, {transform_indices = @transform_2, window_bounds = array<i64: 1, 128>}, {transform_indices = @transform_3, window_bounds = array<i64: 16, 128>}]} {
    %c0 = arith.constant 0 : index
    %c0_0 = arith.constant 0 : index
    %0 = vector.load %arg2[%c0, %c0_0] : memref<16x64xf32, #tpu.memory_space<vmem>>, vector<16x64xf32>
    %1 = arith.truncf %0 : vector<16x64xf32> to vector<16x64xbf16>
    %c0_1 = arith.constant 0 : index
    %c0_2 = arith.constant 0 : index
    %2 = vector.load %arg3[%c0_1, %c0_2] : memref<64x128xf32, #tpu.memory_space<vmem>>, vector<64x128xf32>
    %3 = arith.truncf %2 : vector<64x128xf32> to vector<64x128xbf16>
    %cst = arith.constant dense<0.000000e+00> : vector<16x128xf32>
    %4 = tpu.matmul %1, %3, %cst {dimension_numbers = #tpu.dot_dimension_numbers<[1], [0], [0], [1], [0, 0, 1, 1], [], []>} : vector<16x64xbf16>, vector<64x128xbf16>, vector<16x128xf32> -> vector<16x128xf32>
    %c0_3 = arith.constant 0 : index
    %c0_4 = arith.constant 0 : index
    %5 = vector.load %arg4[%c0_3, %c0_4] : memref<1x128xf32, #tpu.memory_space<vmem>>, vector<1x128xf32>
    %6 = vector.broadcast %5 : vector<1x128xf32> to vector<16x128xf32>
    %7 = arith.addf %4, %6 : vector<16x128xf32>
    %c0_5 = arith.constant 0 : index
    %c0_6 = arith.constant 0 : index
    %8 = vector.load %arg5[%c0_5, %c0_6] : memref<16x128xf32, #tpu.memory_space<vmem>>, vector<16x128xf32>
    tpu.vector_store %arg5[%c0_5, %c0_6], %7 {strides = array<i32>} : memref<16x128xf32, #tpu.memory_space<vmem>>, vector<16x128xf32>,
    return
  }
  func.func @transform_0(%arg0: i32, %arg1: i32) -> (i32, i32) {
    %c0_i32 = arith.constant 0 : i32
    %c0_i32_0 = arith.constant 0 : i32
    return %arg0, %c0_i32 : i32, i32
  }
  func.func @transform_1(%arg0: i32, %arg1: i32) -> (i32, i32) {
    %c0_i32 = arith.constant 0 : i32
    %c0_i32_0 = arith.constant 0 : i32
    return %c0_i32, %arg1 : i32, i32
  }
  func.func @transform_2(%arg0: i32, %arg1: i32) -> (i32, i32) {
    %c0_i32 = arith.constant 0 : i32
    %c0_i32_0 = arith.constant 0 : i32
    return %c0_i32, %arg1 : i32, i32
  }
  func.func @transform_3(%arg0: i32, %arg1: i32) -> (i32, i32) {
    %c0_i32 = arith.constant 0 : i32
    return %arg0, %arg1 : i32, i32
  }
}

module attributes {stable_mosaic.version = 11 : i64} {
  func.func @_gat_logit_kernel(%arg0: i32, %arg1: memref<48x64xf32, #tpu.memory_space<vmem>>, %arg2: memref<48x64xf32, #tpu.memory_space<vmem>>, %arg3: memref<48x64xf32, #tpu.memory_space<vmem>>, %arg4: memref<64x64xf32, #tpu.memory_space<vmem>>, %arg5: memref<64x2xf32, #tpu.memory_space<vmem>>, %arg6: memref<48x2xf32, #tpu.memory_space<vmem>>) attributes {dimension_semantics = [#tpu.dimension_semantics<parallel>], iteration_bounds = array<i64: 1>, scalar_prefetch = 0 : i64, scratch_operands = 0 : i64, tpu.core_type = #tpu.core_type<tc>, window_params = [{transform_indices = @transform_0, window_bounds = array<i64: 48, 64>}, {transform_indices = @transform_1, window_bounds = array<i64: 48, 64>}, {transform_indices = @transform_2, window_bounds = array<i64: 48, 64>}, {pipeline_mode = #tpu.pipeline_mode<synchronous>, transform_indices = @transform_3, window_bounds = array<i64: 64, 64>}, {pipeline_mode = #tpu.pipeline_mode<synchronous>, transform_indices = @transform_4, window_bounds = array<i64: 64, 2>}, {transform_indices = @transform_5, window_bounds = array<i64: 48, 2>}]} {
    %c0 = arith.constant 0 : index
    %c0_0 = arith.constant 0 : index
    %0 = vector.load %arg3[%c0, %c0_0] : memref<48x64xf32, #tpu.memory_space<vmem>>, vector<48x64xf32>
    %1 = arith.truncf %0 : vector<48x64xf32> to vector<48x64xbf16>
    %c0_1 = arith.constant 0 : index
    %c0_2 = arith.constant 0 : index
    %2 = vector.load %arg4[%c0_1, %c0_2] : memref<64x64xf32, #tpu.memory_space<vmem>>, vector<64x64xf32>
    %3 = arith.truncf %2 : vector<64x64xf32> to vector<64x64xbf16>
    %cst = arith.constant dense<0.000000e+00> : vector<48x64xf32>
    %4 = tpu.matmul %1, %3, %cst {dimension_numbers = #tpu.dot_dimension_numbers<[1], [0], [0], [1], [0, 0, 1, 1], [], []>} : vector<48x64xbf16>, vector<64x64xbf16>, vector<48x64xf32> -> vector<48x64xf32>
    %c0_3 = arith.constant 0 : index
    %c0_4 = arith.constant 0 : index
    %5 = vector.load %arg1[%c0_3, %c0_4] : memref<48x64xf32, #tpu.memory_space<vmem>>, vector<48x64xf32>
    %c0_5 = arith.constant 0 : index
    %c0_6 = arith.constant 0 : index
    %6 = vector.load %arg2[%c0_5, %c0_6] : memref<48x64xf32, #tpu.memory_space<vmem>>, vector<48x64xf32>
    %7 = arith.addf %5, %6 : vector<48x64xf32>
    %8 = arith.addf %7, %4 : vector<48x64xf32>
    %cst_7 = arith.constant 0.000000e+00 : f32
    %9 = vector.broadcast %cst_7 : f32 to vector<48x64xf32>
    %10 = arith.cmpf oge, %8, %9 : vector<48x64xf32>
    %cst_8 = arith.constant 1.000000e-01 : f32
    %11 = vector.broadcast %cst_8 : f32 to vector<48x64xf32>
    %12 = arith.mulf %11, %8 : vector<48x64xf32>
    %13 = arith.select %10, %8, %12 : vector<48x64xi1>, vector<48x64xf32>
    %14 = arith.truncf %13 : vector<48x64xf32> to vector<48x64xbf16>
    %c0_9 = arith.constant 0 : index
    %c0_10 = arith.constant 0 : index
    %15 = vector.load %arg5[%c0_9, %c0_10] : memref<64x2xf32, #tpu.memory_space<vmem>>, vector<64x2xf32>
    %16 = arith.truncf %15 : vector<64x2xf32> to vector<64x2xbf16>
    %cst_11 = arith.constant dense<0.000000e+00> : vector<48x2xf32>
    %17 = tpu.matmul %14, %16, %cst_11 {dimension_numbers = #tpu.dot_dimension_numbers<[1], [0], [0], [1], [0, 0, 1, 1], [], []>} : vector<48x64xbf16>, vector<64x2xbf16>, vector<48x2xf32> -> vector<48x2xf32>
    %c0_12 = arith.constant 0 : index
    %c0_13 = arith.constant 0 : index
    %18 = vector.load %arg6[%c0_12, %c0_13] : memref<48x2xf32, #tpu.memory_space<vmem>>, vector<48x2xf32>
    tpu.vector_store %arg6[%c0_12, %c0_13], %17 {strides = array<i32>} : memref<48x2xf32, #tpu.memory_space<vmem>>, vector<48x2xf32>,
    return
  }
  func.func @transform_0(%arg0: i32) -> (i32, i32) {
    %c0_i32 = arith.constant 0 : i32
    %c0_i32_0 = arith.constant 0 : i32
    return %arg0, %c0_i32 : i32, i32
  }
  func.func @transform_1(%arg0: i32) -> (i32, i32) {
    %c0_i32 = arith.constant 0 : i32
    %c0_i32_0 = arith.constant 0 : i32
    return %arg0, %c0_i32 : i32, i32
  }
  func.func @transform_2(%arg0: i32) -> (i32, i32) {
    %c0_i32 = arith.constant 0 : i32
    %c0_i32_0 = arith.constant 0 : i32
    return %arg0, %c0_i32 : i32, i32
  }
  func.func @transform_3(%arg0: i32) -> (i32, i32) {
    %c0_i32 = arith.constant 0 : i32
    %c0_i32_0 = arith.constant 0 : i32
    %c0_i32_1 = arith.constant 0 : i32
    return %c0_i32, %c0_i32_0 : i32, i32
  }
  func.func @transform_4(%arg0: i32) -> (i32, i32) {
    %c0_i32 = arith.constant 0 : i32
    %c0_i32_0 = arith.constant 0 : i32
    %c0_i32_1 = arith.constant 0 : i32
    return %c0_i32, %c0_i32_0 : i32, i32
  }
  func.func @transform_5(%arg0: i32) -> (i32, i32) {
    %c0_i32 = arith.constant 0 : i32
    %c0_i32_0 = arith.constant 0 : i32
    return %arg0, %c0_i32 : i32, i32
  }
}

module attributes {stable_mosaic.version = 11 : i64} {
  func.func @_ln_res_kernel(%arg0: i32, %arg1: memref<16x64xf32, #tpu.memory_space<vmem>>, %arg2: memref<16x64xf32, #tpu.memory_space<vmem>>, %arg3: memref<1x64xf32, #tpu.memory_space<vmem>>, %arg4: memref<1x64xf32, #tpu.memory_space<vmem>>, %arg5: memref<16x64xf32, #tpu.memory_space<vmem>>) attributes {dimension_semantics = [#tpu.dimension_semantics<parallel>], iteration_bounds = array<i64: 1>, scalar_prefetch = 0 : i64, scratch_operands = 0 : i64, tpu.core_type = #tpu.core_type<tc>, window_params = [{transform_indices = @transform_0, window_bounds = array<i64: 16, 64>}, {transform_indices = @transform_1, window_bounds = array<i64: 16, 64>}, {pipeline_mode = #tpu.pipeline_mode<synchronous>, transform_indices = @transform_2, window_bounds = array<i64: 1, 64>}, {pipeline_mode = #tpu.pipeline_mode<synchronous>, transform_indices = @transform_3, window_bounds = array<i64: 1, 64>}, {transform_indices = @transform_4, window_bounds = array<i64: 16, 64>}]} {
    %c0 = arith.constant 0 : index
    %c0_0 = arith.constant 0 : index
    %0 = vector.load %arg1[%c0, %c0_0] : memref<16x64xf32, #tpu.memory_space<vmem>>, vector<16x64xf32>
    %c0_1 = arith.constant 0 : index
    %c0_2 = arith.constant 0 : index
    %1 = vector.load %arg2[%c0_1, %c0_2] : memref<16x64xf32, #tpu.memory_space<vmem>>, vector<16x64xf32>
    %2 = arith.addf %0, %1 : vector<16x64xf32>
    %c0_3 = arith.constant 0 : index
    %c0_4 = arith.constant 0 : index
    %3 = vector.load %arg3[%c0_3, %c0_4] : memref<1x64xf32, #tpu.memory_space<vmem>>, vector<1x64xf32>
    %c0_5 = arith.constant 0 : index
    %c0_6 = arith.constant 0 : index
    %4 = vector.load %arg4[%c0_5, %c0_6] : memref<1x64xf32, #tpu.memory_space<vmem>>, vector<1x64xf32>
    %cst = arith.constant dense<0.000000e+00> : vector<16xf32>
    %5 = vector.multi_reduction <add>, %2, %cst [1] : vector<16x64xf32> to vector<16xf32>
    %6 = vector.shape_cast %5 : vector<16xf32> to vector<16x1xf32>
    %cst_7 = arith.constant 6.400000e+01 : f32
    %7 = vector.broadcast %cst_7 : f32 to vector<16x1xf32>
    %8 = arith.divf %6, %7 : vector<16x1xf32>
    %9 = vector.broadcast %8 : vector<16x1xf32> to vector<16x64xf32>
    %10 = arith.subf %2, %9 : vector<16x64xf32>
    %11 = arith.mulf %10, %10 : vector<16x64xf32>
    %cst_8 = arith.constant dense<0.000000e+00> : vector<16xf32>
    %12 = vector.multi_reduction <add>, %11, %cst_8 [1] : vector<16x64xf32> to vector<16xf32>
    %13 = vector.shape_cast %12 : vector<16xf32> to vector<16x1xf32>
    %cst_9 = arith.constant 6.400000e+01 : f32
    %14 = vector.broadcast %cst_9 : f32 to vector<16x1xf32>
    %15 = arith.divf %13, %14 : vector<16x1xf32>
    %cst_10 = arith.constant 9.99999974E-6 : f32
    %16 = vector.broadcast %cst_10 : f32 to vector<16x1xf32>
    %17 = arith.addf %15, %16 : vector<16x1xf32>
    %18 = math.rsqrt %17 : vector<16x1xf32>
    %19 = vector.broadcast %18 : vector<16x1xf32> to vector<16x64xf32>
    %20 = arith.mulf %10, %19 : vector<16x64xf32>
    %21 = vector.broadcast %3 : vector<1x64xf32> to vector<16x64xf32>
    %22 = arith.mulf %20, %21 : vector<16x64xf32>
    %23 = vector.broadcast %4 : vector<1x64xf32> to vector<16x64xf32>
    %24 = arith.addf %22, %23 : vector<16x64xf32>
    %cst_11 = arith.constant 5.000000e-01 : f32
    %25 = vector.broadcast %cst_11 : f32 to vector<16x64xf32>
    %26 = arith.mulf %25, %24 : vector<16x64xf32>
    %cst_12 = arith.constant 0.707106769 : f32
    %27 = vector.broadcast %cst_12 : f32 to vector<16x64xf32>
    %28 = arith.mulf %24, %27 : vector<16x64xf32>
    %cst_13 = arith.constant 0.000000e+00 : f32
    %29 = vector.broadcast %cst_13 : f32 to vector<16x64xf32>
    %30 = arith.cmpf oge, %28, %29 : vector<16x64xf32>
    %cst_14 = arith.constant 1.000000e+00 : f32
    %cst_15 = arith.constant -1.000000e+00 : f32
    %31 = vector.broadcast %cst_14 : f32 to vector<16x64xf32>
    %32 = vector.broadcast %cst_15 : f32 to vector<16x64xf32>
    %33 = arith.select %30, %31, %32 : vector<16x64xi1>, vector<16x64xf32>
    %34 = math.absf %28 : vector<16x64xf32>
    %cst_16 = arith.constant 0.327591091 : f32
    %35 = vector.broadcast %cst_16 : f32 to vector<16x64xf32>
    %36 = arith.mulf %35, %34 : vector<16x64xf32>
    %cst_17 = arith.constant 1.000000e+00 : f32
    %37 = vector.broadcast %cst_17 : f32 to vector<16x64xf32>
    %38 = arith.addf %37, %36 : vector<16x64xf32>
    %cst_18 = arith.constant 1.000000e+00 : f32
    %39 = vector.broadcast %cst_18 : f32 to vector<16x64xf32>
    %40 = arith.divf %39, %38 : vector<16x64xf32>
    %cst_19 = arith.constant 1.06140542 : f32
    %41 = vector.broadcast %cst_19 : f32 to vector<16x64xf32>
    %42 = arith.mulf %41, %40 : vector<16x64xf32>
    %cst_20 = arith.constant -1.45315206 : f32
    %43 = vector.broadcast %cst_20 : f32 to vector<16x64xf32>
    %44 = arith.addf %42, %43 : vector<16x64xf32>
    %45 = arith.mulf %44, %40 : vector<16x64xf32>
    %cst_21 = arith.constant 1.42141378 : f32
    %46 = vector.broadcast %cst_21 : f32 to vector<16x64xf32>
    %47 = arith.addf %45, %46 : vector<16x64xf32>
    %48 = arith.mulf %47, %40 : vector<16x64xf32>
    %cst_22 = arith.constant -0.284496725 : f32
    %49 = vector.broadcast %cst_22 : f32 to vector<16x64xf32>
    %50 = arith.addf %48, %49 : vector<16x64xf32>
    %51 = arith.mulf %50, %40 : vector<16x64xf32>
    %cst_23 = arith.constant 0.254829586 : f32
    %52 = vector.broadcast %cst_23 : f32 to vector<16x64xf32>
    %53 = arith.addf %51, %52 : vector<16x64xf32>
    %54 = arith.mulf %53, %40 : vector<16x64xf32>
    %cst_24 = arith.constant 0.000000e+00 : f32
    %55 = vector.broadcast %cst_24 : f32 to vector<16x64xf32>
    %56 = arith.subf %55, %34 : vector<16x64xf32>
    %57 = arith.mulf %56, %34 : vector<16x64xf32>
    %58 = math.exp %57 : vector<16x64xf32>
    %59 = arith.mulf %54, %58 : vector<16x64xf32>
    %cst_25 = arith.constant 1.000000e+00 : f32
    %60 = vector.broadcast %cst_25 : f32 to vector<16x64xf32>
    %61 = arith.subf %60, %59 : vector<16x64xf32>
    %62 = arith.mulf %33, %61 : vector<16x64xf32>
    %cst_26 = arith.constant 1.000000e+00 : f32
    %63 = vector.broadcast %cst_26 : f32 to vector<16x64xf32>
    %64 = arith.addf %63, %62 : vector<16x64xf32>
    %65 = arith.mulf %26, %64 : vector<16x64xf32>
    %c0_27 = arith.constant 0 : index
    %c0_28 = arith.constant 0 : index
    %66 = vector.load %arg5[%c0_27, %c0_28] : memref<16x64xf32, #tpu.memory_space<vmem>>, vector<16x64xf32>
    tpu.vector_store %arg5[%c0_27, %c0_28], %65 {strides = array<i32>} : memref<16x64xf32, #tpu.memory_space<vmem>>, vector<16x64xf32>,
    return
  }
  func.func @transform_0(%arg0: i32) -> (i32, i32) {
    %c0_i32 = arith.constant 0 : i32
    %c0_i32_0 = arith.constant 0 : i32
    return %arg0, %c0_i32 : i32, i32
  }
  func.func @transform_1(%arg0: i32) -> (i32, i32) {
    %c0_i32 = arith.constant 0 : i32
    %c0_i32_0 = arith.constant 0 : i32
    return %arg0, %c0_i32 : i32, i32
  }
  func.func @transform_2(%arg0: i32) -> (i32, i32) {
    %c0_i32 = arith.constant 0 : i32
    %c0_i32_0 = arith.constant 0 : i32
    %c0_i32_1 = arith.constant 0 : i32
    return %c0_i32, %c0_i32_0 : i32, i32
  }
  func.func @transform_3(%arg0: i32) -> (i32, i32) {
    %c0_i32 = arith.constant 0 : i32
    %c0_i32_0 = arith.constant 0 : i32
    %c0_i32_1 = arith.constant 0 : i32
    return %c0_i32, %c0_i32_0 : i32, i32
  }
  func.func @transform_4(%arg0: i32) -> (i32, i32) {
    %c0_i32 = arith.constant 0 : i32
    %c0_i32_0 = arith.constant 0 : i32
    return %arg0, %c0_i32 : i32, i32
  }
}

module attributes {stable_mosaic.version = 11 : i64} {
  func.func @_nnconv_kernel(%arg0: i32, %arg1: memref<32x64xf32, #tpu.memory_space<vmem>>, %arg2: memref<32x64xf32, #tpu.memory_space<vmem>>, %arg3: memref<4096x64xbf16, #tpu.memory_space<vmem>>, %arg4: memref<64x64xbf16, #tpu.memory_space<vmem>>, %arg5: memref<32x64xf32, #tpu.memory_space<vmem>>, %arg6: memref<32x4096xbf16, #tpu.memory_space<vmem>>) attributes {dimension_semantics = [#tpu.dimension_semantics<parallel>], iteration_bounds = array<i64: 1>, scalar_prefetch = 0 : i64, scratch_operands = 1 : i64, tpu.core_type = #tpu.core_type<tc>, window_params = [{transform_indices = @transform_0, window_bounds = array<i64: 32, 64>}, {transform_indices = @transform_1, window_bounds = array<i64: 32, 64>}, {pipeline_mode = #tpu.pipeline_mode<synchronous>, transform_indices = @transform_2, window_bounds = array<i64: 4096, 64>}, {pipeline_mode = #tpu.pipeline_mode<synchronous>, transform_indices = @transform_3, window_bounds = array<i64: 64, 64>}, {transform_indices = @transform_4, window_bounds = array<i64: 32, 64>}]} {
    %c0 = arith.constant 0 : index
    %c0_0 = arith.constant 0 : index
    %0 = vector.load %arg2[%c0, %c0_0] : memref<32x64xf32, #tpu.memory_space<vmem>>, vector<32x64xf32>
    %c0_1 = arith.constant 0 : index
    %c0_2 = arith.constant 0 : index
    %1 = vector.load %arg1[%c0_1, %c0_2] : memref<32x64xf32, #tpu.memory_space<vmem>>, vector<32x1xf32>
    %2 = vector.broadcast %1 : vector<32x1xf32> to vector<32x64xf32>
    %3 = arith.mulf %2, %0 : vector<32x64xf32>
    %c0_3 = arith.constant 0 : index
    %c1 = arith.constant 1 : index
    %4 = vector.load %arg1[%c0_3, %c1] : memref<32x64xf32, #tpu.memory_space<vmem>>, vector<32x1xf32>
    %5 = vector.broadcast %4 : vector<32x1xf32> to vector<32x64xf32>
    %6 = arith.mulf %5, %0 : vector<32x64xf32>
    %7 = tpu.concatenate %3, %6 in 1 : vector<32x64xf32>, vector<32x64xf32> -> vector<32x128xf32>
    %8 = arith.truncf %7 : vector<32x128xf32> to vector<32x128xbf16>
    %c0_4 = arith.constant 0 : index
    %c0_5 = arith.constant 0 : index
    %9 = vector.load %arg6[%c0_4, %c0_5] : memref<32x4096xbf16, #tpu.memory_space<vmem>>, vector<32x128xbf16>
    tpu.vector_store %arg6[%c0_4, %c0_5], %8 {strides = array<i32>} : memref<32x4096xbf16, #tpu.memory_space<vmem>>, vector<32x128xbf16>,
    %c0_6 = arith.constant 0 : index
    %c2 = arith.constant 2 : index
    %10 = vector.load %arg1[%c0_6, %c2] : memref<32x64xf32, #tpu.memory_space<vmem>>, vector<32x1xf32>
    %11 = vector.broadcast %10 : vector<32x1xf32> to vector<32x64xf32>
    %12 = arith.mulf %11, %0 : vector<32x64xf32>
    %c0_7 = arith.constant 0 : index
    %c3 = arith.constant 3 : index
    %13 = vector.load %arg1[%c0_7, %c3] : memref<32x64xf32, #tpu.memory_space<vmem>>, vector<32x1xf32>
    %14 = vector.broadcast %13 : vector<32x1xf32> to vector<32x64xf32>
    %15 = arith.mulf %14, %0 : vector<32x64xf32>
    %16 = tpu.concatenate %12, %15 in 1 : vector<32x64xf32>, vector<32x64xf32> -> vector<32x128xf32>
    %17 = arith.truncf %16 : vector<32x128xf32> to vector<32x128xbf16>
    %c0_8 = arith.constant 0 : index
    %c128 = arith.constant 128 : index
    %18 = vector.load %arg6[%c0_8, %c128] : memref<32x4096xbf16, #tpu.memory_space<vmem>>, vector<32x128xbf16>
    tpu.vector_store %arg6[%c0_8, %c128], %17 {strides = array<i32>} : memref<32x4096xbf16, #tpu.memory_space<vmem>>, vector<32x128xbf16>,
    %c0_9 = arith.constant 0 : index
    %c4 = arith.constant 4 : index
    %19 = vector.load %arg1[%c0_9, %c4] : memref<32x64xf32, #tpu.memory_space<vmem>>, vector<32x1xf32>
    %20 = vector.broadcast %19 : vector<32x1xf32> to vector<32x64xf32>
    %21 = arith.mulf %20, %0 : vector<32x64xf32>
    %c0_10 = arith.constant 0 : index
    %c5 = arith.constant 5 : index
    %22 = vector.load %arg1[%c0_10, %c5] : memref<32x64xf32, #tpu.memory_space<vmem>>, vector<32x1xf32>
    %23 = vector.broadcast %22 : vector<32x1xf32> to vector<32x64xf32>
    %24 = arith.mulf %23, %0 : vector<32x64xf32>
    %25 = tpu.concatenate %21, %24 in 1 : vector<32x64xf32>, vector<32x64xf32> -> vector<32x128xf32>
    %26 = arith.truncf %25 : vector<32x128xf32> to vector<32x128xbf16>
    %c0_11 = arith.constant 0 : index
    %c256 = arith.constant 256 : index
    %27 = vector.load %arg6[%c0_11, %c256] : memref<32x4096xbf16, #tpu.memory_space<vmem>>, vector<32x128xbf16>
    tpu.vector_store %arg6[%c0_11, %c256], %26 {strides = array<i32>} : memref<32x4096xbf16, #tpu.memory_space<vmem>>, vector<32x128xbf16>,
    %c0_12 = arith.constant 0 : index
    %c6 = arith.constant 6 : index
    %28 = vector.load %arg1[%c0_12, %c6] : memref<32x64xf32, #tpu.memory_space<vmem>>, vector<32x1xf32>
    %29 = vector.broadcast %28 : vector<32x1xf32> to vector<32x64xf32>
    %30 = arith.mulf %29, %0 : vector<32x64xf32>
    %c0_13 = arith.constant 0 : index
    %c7 = arith.constant 7 : index
    %31 = vector.load %arg1[%c0_13, %c7] : memref<32x64xf32, #tpu.memory_space<vmem>>, vector<32x1xf32>
    %32 = vector.broadcast %31 : vector<32x1xf32> to vector<32x64xf32>
    %33 = arith.mulf %32, %0 : vector<32x64xf32>
    %34 = tpu.concatenate %30, %33 in 1 : vector<32x64xf32>, vector<32x64xf32> -> vector<32x128xf32>
    %35 = arith.truncf %34 : vector<32x128xf32> to vector<32x128xbf16>
    %c0_14 = arith.constant 0 : index
    %c384 = arith.constant 384 : index
    %36 = vector.load %arg6[%c0_14, %c384] : memref<32x4096xbf16, #tpu.memory_space<vmem>>, vector<32x128xbf16>
    tpu.vector_store %arg6[%c0_14, %c384], %35 {strides = array<i32>} : memref<32x4096xbf16, #tpu.memory_space<vmem>>, vector<32x128xbf16>,
    %c0_15 = arith.constant 0 : index
    %c8 = arith.constant 8 : index
    %37 = vector.load %arg1[%c0_15, %c8] : memref<32x64xf32, #tpu.memory_space<vmem>>, vector<32x1xf32>
    %38 = vector.broadcast %37 : vector<32x1xf32> to vector<32x64xf32>
    %39 = arith.mulf %38, %0 : vector<32x64xf32>
    %c0_16 = arith.constant 0 : index
    %c9 = arith.constant 9 : index
    %40 = vector.load %arg1[%c0_16, %c9] : memref<32x64xf32, #tpu.memory_space<vmem>>, vector<32x1xf32>
    %41 = vector.broadcast %40 : vector<32x1xf32> to vector<32x64xf32>
    %42 = arith.mulf %41, %0 : vector<32x64xf32>
    %43 = tpu.concatenate %39, %42 in 1 : vector<32x64xf32>, vector<32x64xf32> -> vector<32x128xf32>
    %44 = arith.truncf %43 : vector<32x128xf32> to vector<32x128xbf16>
    %c0_17 = arith.constant 0 : index
    %c512 = arith.constant 512 : index
    %45 = vector.load %arg6[%c0_17, %c512] : memref<32x4096xbf16, #tpu.memory_space<vmem>>, vector<32x128xbf16>
    tpu.vector_store %arg6[%c0_17, %c512], %44 {strides = array<i32>} : memref<32x4096xbf16, #tpu.memory_space<vmem>>, vector<32x128xbf16>,
    %c0_18 = arith.constant 0 : index
    %c10 = arith.constant 10 : index
    %46 = vector.load %arg1[%c0_18, %c10] : memref<32x64xf32, #tpu.memory_space<vmem>>, vector<32x1xf32>
    %47 = vector.broadcast %46 : vector<32x1xf32> to vector<32x64xf32>
    %48 = arith.mulf %47, %0 : vector<32x64xf32>
    %c0_19 = arith.constant 0 : index
    %c11 = arith.constant 11 : index
    %49 = vector.load %arg1[%c0_19, %c11] : memref<32x64xf32, #tpu.memory_space<vmem>>, vector<32x1xf32>
    %50 = vector.broadcast %49 : vector<32x1xf32> to vector<32x64xf32>
    %51 = arith.mulf %50, %0 : vector<32x64xf32>
    %52 = tpu.concatenate %48, %51 in 1 : vector<32x64xf32>, vector<32x64xf32> -> vector<32x128xf32>
    %53 = arith.truncf %52 : vector<32x128xf32> to vector<32x128xbf16>
    %c0_20 = arith.constant 0 : index
    %c640 = arith.constant 640 : index
    %54 = vector.load %arg6[%c0_20, %c640] : memref<32x4096xbf16, #tpu.memory_space<vmem>>, vector<32x128xbf16>
    tpu.vector_store %arg6[%c0_20, %c640], %53 {strides = array<i32>} : memref<32x4096xbf16, #tpu.memory_space<vmem>>, vector<32x128xbf16>,
    %c0_21 = arith.constant 0 : index
    %c12 = arith.constant 12 : index
    %55 = vector.load %arg1[%c0_21, %c12] : memref<32x64xf32, #tpu.memory_space<vmem>>, vector<32x1xf32>
    %56 = vector.broadcast %55 : vector<32x1xf32> to vector<32x64xf32>
    %57 = arith.mulf %56, %0 : vector<32x64xf32>
    %c0_22 = arith.constant 0 : index
    %c13 = arith.constant 13 : index
    %58 = vector.load %arg1[%c0_22, %c13] : memref<32x64xf32, #tpu.memory_space<vmem>>, vector<32x1xf32>
    %59 = vector.broadcast %58 : vector<32x1xf32> to vector<32x64xf32>
    %60 = arith.mulf %59, %0 : vector<32x64xf32>
    %61 = tpu.concatenate %57, %60 in 1 : vector<32x64xf32>, vector<32x64xf32> -> vector<32x128xf32>
    %62 = arith.truncf %61 : vector<32x128xf32> to vector<32x128xbf16>
    %c0_23 = arith.constant 0 : index
    %c768 = arith.constant 768 : index
    %63 = vector.load %arg6[%c0_23, %c768] : memref<32x4096xbf16, #tpu.memory_space<vmem>>, vector<32x128xbf16>
    tpu.vector_store %arg6[%c0_23, %c768], %62 {strides = array<i32>} : memref<32x4096xbf16, #tpu.memory_space<vmem>>, vector<32x128xbf16>,
    %c0_24 = arith.constant 0 : index
    %c14 = arith.constant 14 : index
    %64 = vector.load %arg1[%c0_24, %c14] : memref<32x64xf32, #tpu.memory_space<vmem>>, vector<32x1xf32>
    %65 = vector.broadcast %64 : vector<32x1xf32> to vector<32x64xf32>
    %66 = arith.mulf %65, %0 : vector<32x64xf32>
    %c0_25 = arith.constant 0 : index
    %c15 = arith.constant 15 : index
    %67 = vector.load %arg1[%c0_25, %c15] : memref<32x64xf32, #tpu.memory_space<vmem>>, vector<32x1xf32>
    %68 = vector.broadcast %67 : vector<32x1xf32> to vector<32x64xf32>
    %69 = arith.mulf %68, %0 : vector<32x64xf32>
    %70 = tpu.concatenate %66, %69 in 1 : vector<32x64xf32>, vector<32x64xf32> -> vector<32x128xf32>
    %71 = arith.truncf %70 : vector<32x128xf32> to vector<32x128xbf16>
    %c0_26 = arith.constant 0 : index
    %c896 = arith.constant 896 : index
    %72 = vector.load %arg6[%c0_26, %c896] : memref<32x4096xbf16, #tpu.memory_space<vmem>>, vector<32x128xbf16>
    tpu.vector_store %arg6[%c0_26, %c896], %71 {strides = array<i32>} : memref<32x4096xbf16, #tpu.memory_space<vmem>>, vector<32x128xbf16>,
    %c0_27 = arith.constant 0 : index
    %c16 = arith.constant 16 : index
    %73 = vector.load %arg1[%c0_27, %c16] : memref<32x64xf32, #tpu.memory_space<vmem>>, vector<32x1xf32>
    %74 = vector.broadcast %73 : vector<32x1xf32> to vector<32x64xf32>
    %75 = arith.mulf %74, %0 : vector<32x64xf32>
    %c0_28 = arith.constant 0 : index
    %c17 = arith.constant 17 : index
    %76 = vector.load %arg1[%c0_28, %c17] : memref<32x64xf32, #tpu.memory_space<vmem>>, vector<32x1xf32>
    %77 = vector.broadcast %76 : vector<32x1xf32> to vector<32x64xf32>
    %78 = arith.mulf %77, %0 : vector<32x64xf32>
    %79 = tpu.concatenate %75, %78 in 1 : vector<32x64xf32>, vector<32x64xf32> -> vector<32x128xf32>
    %80 = arith.truncf %79 : vector<32x128xf32> to vector<32x128xbf16>
    %c0_29 = arith.constant 0 : index
    %c1024 = arith.constant 1024 : index
    %81 = vector.load %arg6[%c0_29, %c1024] : memref<32x4096xbf16, #tpu.memory_space<vmem>>, vector<32x128xbf16>
    tpu.vector_store %arg6[%c0_29, %c1024], %80 {strides = array<i32>} : memref<32x4096xbf16, #tpu.memory_space<vmem>>, vector<32x128xbf16>,
    %c0_30 = arith.constant 0 : index
    %c18 = arith.constant 18 : index
    %82 = vector.load %arg1[%c0_30, %c18] : memref<32x64xf32, #tpu.memory_space<vmem>>, vector<32x1xf32>
    %83 = vector.broadcast %82 : vector<32x1xf32> to vector<32x64xf32>
    %84 = arith.mulf %83, %0 : vector<32x64xf32>
    %c0_31 = arith.constant 0 : index
    %c19 = arith.constant 19 : index
    %85 = vector.load %arg1[%c0_31, %c19] : memref<32x64xf32, #tpu.memory_space<vmem>>, vector<32x1xf32>
    %86 = vector.broadcast %85 : vector<32x1xf32> to vector<32x64xf32>
    %87 = arith.mulf %86, %0 : vector<32x64xf32>
    %88 = tpu.concatenate %84, %87 in 1 : vector<32x64xf32>, vector<32x64xf32> -> vector<32x128xf32>
    %89 = arith.truncf %88 : vector<32x128xf32> to vector<32x128xbf16>
    %c0_32 = arith.constant 0 : index
    %c1152 = arith.constant 1152 : index
    %90 = vector.load %arg6[%c0_32, %c1152] : memref<32x4096xbf16, #tpu.memory_space<vmem>>, vector<32x128xbf16>
    tpu.vector_store %arg6[%c0_32, %c1152], %89 {strides = array<i32>} : memref<32x4096xbf16, #tpu.memory_space<vmem>>, vector<32x128xbf16>,
    %c0_33 = arith.constant 0 : index
    %c20 = arith.constant 20 : index
    %91 = vector.load %arg1[%c0_33, %c20] : memref<32x64xf32, #tpu.memory_space<vmem>>, vector<32x1xf32>
    %92 = vector.broadcast %91 : vector<32x1xf32> to vector<32x64xf32>
    %93 = arith.mulf %92, %0 : vector<32x64xf32>
    %c0_34 = arith.constant 0 : index
    %c21 = arith.constant 21 : index
    %94 = vector.load %arg1[%c0_34, %c21] : memref<32x64xf32, #tpu.memory_space<vmem>>, vector<32x1xf32>
    %95 = vector.broadcast %94 : vector<32x1xf32> to vector<32x64xf32>
    %96 = arith.mulf %95, %0 : vector<32x64xf32>
    %97 = tpu.concatenate %93, %96 in 1 : vector<32x64xf32>, vector<32x64xf32> -> vector<32x128xf32>
    %98 = arith.truncf %97 : vector<32x128xf32> to vector<32x128xbf16>
    %c0_35 = arith.constant 0 : index
    %c1280 = arith.constant 1280 : index
    %99 = vector.load %arg6[%c0_35, %c1280] : memref<32x4096xbf16, #tpu.memory_space<vmem>>, vector<32x128xbf16>
    tpu.vector_store %arg6[%c0_35, %c1280], %98 {strides = array<i32>} : memref<32x4096xbf16, #tpu.memory_space<vmem>>, vector<32x128xbf16>,
    %c0_36 = arith.constant 0 : index
    %c22 = arith.constant 22 : index
    %100 = vector.load %arg1[%c0_36, %c22] : memref<32x64xf32, #tpu.memory_space<vmem>>, vector<32x1xf32>
    %101 = vector.broadcast %100 : vector<32x1xf32> to vector<32x64xf32>
    %102 = arith.mulf %101, %0 : vector<32x64xf32>
    %c0_37 = arith.constant 0 : index
    %c23 = arith.constant 23 : index
    %103 = vector.load %arg1[%c0_37, %c23] : memref<32x64xf32, #tpu.memory_space<vmem>>, vector<32x1xf32>
    %104 = vector.broadcast %103 : vector<32x1xf32> to vector<32x64xf32>
    %105 = arith.mulf %104, %0 : vector<32x64xf32>
    %106 = tpu.concatenate %102, %105 in 1 : vector<32x64xf32>, vector<32x64xf32> -> vector<32x128xf32>
    %107 = arith.truncf %106 : vector<32x128xf32> to vector<32x128xbf16>
    %c0_38 = arith.constant 0 : index
    %c1408 = arith.constant 1408 : index
    %108 = vector.load %arg6[%c0_38, %c1408] : memref<32x4096xbf16, #tpu.memory_space<vmem>>, vector<32x128xbf16>
    tpu.vector_store %arg6[%c0_38, %c1408], %107 {strides = array<i32>} : memref<32x4096xbf16, #tpu.memory_space<vmem>>, vector<32x128xbf16>,
    %c0_39 = arith.constant 0 : index
    %c24 = arith.constant 24 : index
    %109 = vector.load %arg1[%c0_39, %c24] : memref<32x64xf32, #tpu.memory_space<vmem>>, vector<32x1xf32>
    %110 = vector.broadcast %109 : vector<32x1xf32> to vector<32x64xf32>
    %111 = arith.mulf %110, %0 : vector<32x64xf32>
    %c0_40 = arith.constant 0 : index
    %c25 = arith.constant 25 : index
    %112 = vector.load %arg1[%c0_40, %c25] : memref<32x64xf32, #tpu.memory_space<vmem>>, vector<32x1xf32>
    %113 = vector.broadcast %112 : vector<32x1xf32> to vector<32x64xf32>
    %114 = arith.mulf %113, %0 : vector<32x64xf32>
    %115 = tpu.concatenate %111, %114 in 1 : vector<32x64xf32>, vector<32x64xf32> -> vector<32x128xf32>
    %116 = arith.truncf %115 : vector<32x128xf32> to vector<32x128xbf16>
    %c0_41 = arith.constant 0 : index
    %c1536 = arith.constant 1536 : index
    %117 = vector.load %arg6[%c0_41, %c1536] : memref<32x4096xbf16, #tpu.memory_space<vmem>>, vector<32x128xbf16>
    tpu.vector_store %arg6[%c0_41, %c1536], %116 {strides = array<i32>} : memref<32x4096xbf16, #tpu.memory_space<vmem>>, vector<32x128xbf16>,
    %c0_42 = arith.constant 0 : index
    %c26 = arith.constant 26 : index
    %118 = vector.load %arg1[%c0_42, %c26] : memref<32x64xf32, #tpu.memory_space<vmem>>, vector<32x1xf32>
    %119 = vector.broadcast %118 : vector<32x1xf32> to vector<32x64xf32>
    %120 = arith.mulf %119, %0 : vector<32x64xf32>
    %c0_43 = arith.constant 0 : index
    %c27 = arith.constant 27 : index
    %121 = vector.load %arg1[%c0_43, %c27] : memref<32x64xf32, #tpu.memory_space<vmem>>, vector<32x1xf32>
    %122 = vector.broadcast %121 : vector<32x1xf32> to vector<32x64xf32>
    %123 = arith.mulf %122, %0 : vector<32x64xf32>
    %124 = tpu.concatenate %120, %123 in 1 : vector<32x64xf32>, vector<32x64xf32> -> vector<32x128xf32>
    %125 = arith.truncf %124 : vector<32x128xf32> to vector<32x128xbf16>
    %c0_44 = arith.constant 0 : index
    %c1664 = arith.constant 1664 : index
    %126 = vector.load %arg6[%c0_44, %c1664] : memref<32x4096xbf16, #tpu.memory_space<vmem>>, vector<32x128xbf16>
    tpu.vector_store %arg6[%c0_44, %c1664], %125 {strides = array<i32>} : memref<32x4096xbf16, #tpu.memory_space<vmem>>, vector<32x128xbf16>,
    %c0_45 = arith.constant 0 : index
    %c28 = arith.constant 28 : index
    %127 = vector.load %arg1[%c0_45, %c28] : memref<32x64xf32, #tpu.memory_space<vmem>>, vector<32x1xf32>
    %128 = vector.broadcast %127 : vector<32x1xf32> to vector<32x64xf32>
    %129 = arith.mulf %128, %0 : vector<32x64xf32>
    %c0_46 = arith.constant 0 : index
    %c29 = arith.constant 29 : index
    %130 = vector.load %arg1[%c0_46, %c29] : memref<32x64xf32, #tpu.memory_space<vmem>>, vector<32x1xf32>
    %131 = vector.broadcast %130 : vector<32x1xf32> to vector<32x64xf32>
    %132 = arith.mulf %131, %0 : vector<32x64xf32>
    %133 = tpu.concatenate %129, %132 in 1 : vector<32x64xf32>, vector<32x64xf32> -> vector<32x128xf32>
    %134 = arith.truncf %133 : vector<32x128xf32> to vector<32x128xbf16>
    %c0_47 = arith.constant 0 : index
    %c1792 = arith.constant 1792 : index
    %135 = vector.load %arg6[%c0_47, %c1792] : memref<32x4096xbf16, #tpu.memory_space<vmem>>, vector<32x128xbf16>
    tpu.vector_store %arg6[%c0_47, %c1792], %134 {strides = array<i32>} : memref<32x4096xbf16, #tpu.memory_space<vmem>>, vector<32x128xbf16>,
    %c0_48 = arith.constant 0 : index
    %c30 = arith.constant 30 : index
    %136 = vector.load %arg1[%c0_48, %c30] : memref<32x64xf32, #tpu.memory_space<vmem>>, vector<32x1xf32>
    %137 = vector.broadcast %136 : vector<32x1xf32> to vector<32x64xf32>
    %138 = arith.mulf %137, %0 : vector<32x64xf32>
    %c0_49 = arith.constant 0 : index
    %c31 = arith.constant 31 : index
    %139 = vector.load %arg1[%c0_49, %c31] : memref<32x64xf32, #tpu.memory_space<vmem>>, vector<32x1xf32>
    %140 = vector.broadcast %139 : vector<32x1xf32> to vector<32x64xf32>
    %141 = arith.mulf %140, %0 : vector<32x64xf32>
    %142 = tpu.concatenate %138, %141 in 1 : vector<32x64xf32>, vector<32x64xf32> -> vector<32x128xf32>
    %143 = arith.truncf %142 : vector<32x128xf32> to vector<32x128xbf16>
    %c0_50 = arith.constant 0 : index
    %c1920 = arith.constant 1920 : index
    %144 = vector.load %arg6[%c0_50, %c1920] : memref<32x4096xbf16, #tpu.memory_space<vmem>>, vector<32x128xbf16>
    tpu.vector_store %arg6[%c0_50, %c1920], %143 {strides = array<i32>} : memref<32x4096xbf16, #tpu.memory_space<vmem>>, vector<32x128xbf16>,
    %c0_51 = arith.constant 0 : index
    %c32 = arith.constant 32 : index
    %145 = vector.load %arg1[%c0_51, %c32] : memref<32x64xf32, #tpu.memory_space<vmem>>, vector<32x1xf32>
    %146 = vector.broadcast %145 : vector<32x1xf32> to vector<32x64xf32>
    %147 = arith.mulf %146, %0 : vector<32x64xf32>
    %c0_52 = arith.constant 0 : index
    %c33 = arith.constant 33 : index
    %148 = vector.load %arg1[%c0_52, %c33] : memref<32x64xf32, #tpu.memory_space<vmem>>, vector<32x1xf32>
    %149 = vector.broadcast %148 : vector<32x1xf32> to vector<32x64xf32>
    %150 = arith.mulf %149, %0 : vector<32x64xf32>
    %151 = tpu.concatenate %147, %150 in 1 : vector<32x64xf32>, vector<32x64xf32> -> vector<32x128xf32>
    %152 = arith.truncf %151 : vector<32x128xf32> to vector<32x128xbf16>
    %c0_53 = arith.constant 0 : index
    %c2048 = arith.constant 2048 : index
    %153 = vector.load %arg6[%c0_53, %c2048] : memref<32x4096xbf16, #tpu.memory_space<vmem>>, vector<32x128xbf16>
    tpu.vector_store %arg6[%c0_53, %c2048], %152 {strides = array<i32>} : memref<32x4096xbf16, #tpu.memory_space<vmem>>, vector<32x128xbf16>,
    %c0_54 = arith.constant 0 : index
    %c34 = arith.constant 34 : index
    %154 = vector.load %arg1[%c0_54, %c34] : memref<32x64xf32, #tpu.memory_space<vmem>>, vector<32x1xf32>
    %155 = vector.broadcast %154 : vector<32x1xf32> to vector<32x64xf32>
    %156 = arith.mulf %155, %0 : vector<32x64xf32>
    %c0_55 = arith.constant 0 : index
    %c35 = arith.constant 35 : index
    %157 = vector.load %arg1[%c0_55, %c35] : memref<32x64xf32, #tpu.memory_space<vmem>>, vector<32x1xf32>
    %158 = vector.broadcast %157 : vector<32x1xf32> to vector<32x64xf32>
    %159 = arith.mulf %158, %0 : vector<32x64xf32>
    %160 = tpu.concatenate %156, %159 in 1 : vector<32x64xf32>, vector<32x64xf32> -> vector<32x128xf32>
    %161 = arith.truncf %160 : vector<32x128xf32> to vector<32x128xbf16>
    %c0_56 = arith.constant 0 : index
    %c2176 = arith.constant 2176 : index
    %162 = vector.load %arg6[%c0_56, %c2176] : memref<32x4096xbf16, #tpu.memory_space<vmem>>, vector<32x128xbf16>
    tpu.vector_store %arg6[%c0_56, %c2176], %161 {strides = array<i32>} : memref<32x4096xbf16, #tpu.memory_space<vmem>>, vector<32x128xbf16>,
    %c0_57 = arith.constant 0 : index
    %c36 = arith.constant 36 : index
    %163 = vector.load %arg1[%c0_57, %c36] : memref<32x64xf32, #tpu.memory_space<vmem>>, vector<32x1xf32>
    %164 = vector.broadcast %163 : vector<32x1xf32> to vector<32x64xf32>
    %165 = arith.mulf %164, %0 : vector<32x64xf32>
    %c0_58 = arith.constant 0 : index
    %c37 = arith.constant 37 : index
    %166 = vector.load %arg1[%c0_58, %c37] : memref<32x64xf32, #tpu.memory_space<vmem>>, vector<32x1xf32>
    %167 = vector.broadcast %166 : vector<32x1xf32> to vector<32x64xf32>
    %168 = arith.mulf %167, %0 : vector<32x64xf32>
    %169 = tpu.concatenate %165, %168 in 1 : vector<32x64xf32>, vector<32x64xf32> -> vector<32x128xf32>
    %170 = arith.truncf %169 : vector<32x128xf32> to vector<32x128xbf16>
    %c0_59 = arith.constant 0 : index
    %c2304 = arith.constant 2304 : index
    %171 = vector.load %arg6[%c0_59, %c2304] : memref<32x4096xbf16, #tpu.memory_space<vmem>>, vector<32x128xbf16>
    tpu.vector_store %arg6[%c0_59, %c2304], %170 {strides = array<i32>} : memref<32x4096xbf16, #tpu.memory_space<vmem>>, vector<32x128xbf16>,
    %c0_60 = arith.constant 0 : index
    %c38 = arith.constant 38 : index
    %172 = vector.load %arg1[%c0_60, %c38] : memref<32x64xf32, #tpu.memory_space<vmem>>, vector<32x1xf32>
    %173 = vector.broadcast %172 : vector<32x1xf32> to vector<32x64xf32>
    %174 = arith.mulf %173, %0 : vector<32x64xf32>
    %c0_61 = arith.constant 0 : index
    %c39 = arith.constant 39 : index
    %175 = vector.load %arg1[%c0_61, %c39] : memref<32x64xf32, #tpu.memory_space<vmem>>, vector<32x1xf32>
    %176 = vector.broadcast %175 : vector<32x1xf32> to vector<32x64xf32>
    %177 = arith.mulf %176, %0 : vector<32x64xf32>
    %178 = tpu.concatenate %174, %177 in 1 : vector<32x64xf32>, vector<32x64xf32> -> vector<32x128xf32>
    %179 = arith.truncf %178 : vector<32x128xf32> to vector<32x128xbf16>
    %c0_62 = arith.constant 0 : index
    %c2432 = arith.constant 2432 : index
    %180 = vector.load %arg6[%c0_62, %c2432] : memref<32x4096xbf16, #tpu.memory_space<vmem>>, vector<32x128xbf16>
    tpu.vector_store %arg6[%c0_62, %c2432], %179 {strides = array<i32>} : memref<32x4096xbf16, #tpu.memory_space<vmem>>, vector<32x128xbf16>,
    %c0_63 = arith.constant 0 : index
    %c40 = arith.constant 40 : index
    %181 = vector.load %arg1[%c0_63, %c40] : memref<32x64xf32, #tpu.memory_space<vmem>>, vector<32x1xf32>
    %182 = vector.broadcast %181 : vector<32x1xf32> to vector<32x64xf32>
    %183 = arith.mulf %182, %0 : vector<32x64xf32>
    %c0_64 = arith.constant 0 : index
    %c41 = arith.constant 41 : index
    %184 = vector.load %arg1[%c0_64, %c41] : memref<32x64xf32, #tpu.memory_space<vmem>>, vector<32x1xf32>
    %185 = vector.broadcast %184 : vector<32x1xf32> to vector<32x64xf32>
    %186 = arith.mulf %185, %0 : vector<32x64xf32>
    %187 = tpu.concatenate %183, %186 in 1 : vector<32x64xf32>, vector<32x64xf32> -> vector<32x128xf32>
    %188 = arith.truncf %187 : vector<32x128xf32> to vector<32x128xbf16>
    %c0_65 = arith.constant 0 : index
    %c2560 = arith.constant 2560 : index
    %189 = vector.load %arg6[%c0_65, %c2560] : memref<32x4096xbf16, #tpu.memory_space<vmem>>, vector<32x128xbf16>
    tpu.vector_store %arg6[%c0_65, %c2560], %188 {strides = array<i32>} : memref<32x4096xbf16, #tpu.memory_space<vmem>>, vector<32x128xbf16>,
    %c0_66 = arith.constant 0 : index
    %c42 = arith.constant 42 : index
    %190 = vector.load %arg1[%c0_66, %c42] : memref<32x64xf32, #tpu.memory_space<vmem>>, vector<32x1xf32>
    %191 = vector.broadcast %190 : vector<32x1xf32> to vector<32x64xf32>
    %192 = arith.mulf %191, %0 : vector<32x64xf32>
    %c0_67 = arith.constant 0 : index
    %c43 = arith.constant 43 : index
    %193 = vector.load %arg1[%c0_67, %c43] : memref<32x64xf32, #tpu.memory_space<vmem>>, vector<32x1xf32>
    %194 = vector.broadcast %193 : vector<32x1xf32> to vector<32x64xf32>
    %195 = arith.mulf %194, %0 : vector<32x64xf32>
    %196 = tpu.concatenate %192, %195 in 1 : vector<32x64xf32>, vector<32x64xf32> -> vector<32x128xf32>
    %197 = arith.truncf %196 : vector<32x128xf32> to vector<32x128xbf16>
    %c0_68 = arith.constant 0 : index
    %c2688 = arith.constant 2688 : index
    %198 = vector.load %arg6[%c0_68, %c2688] : memref<32x4096xbf16, #tpu.memory_space<vmem>>, vector<32x128xbf16>
    tpu.vector_store %arg6[%c0_68, %c2688], %197 {strides = array<i32>} : memref<32x4096xbf16, #tpu.memory_space<vmem>>, vector<32x128xbf16>,
    %c0_69 = arith.constant 0 : index
    %c44 = arith.constant 44 : index
    %199 = vector.load %arg1[%c0_69, %c44] : memref<32x64xf32, #tpu.memory_space<vmem>>, vector<32x1xf32>
    %200 = vector.broadcast %199 : vector<32x1xf32> to vector<32x64xf32>
    %201 = arith.mulf %200, %0 : vector<32x64xf32>
    %c0_70 = arith.constant 0 : index
    %c45 = arith.constant 45 : index
    %202 = vector.load %arg1[%c0_70, %c45] : memref<32x64xf32, #tpu.memory_space<vmem>>, vector<32x1xf32>
    %203 = vector.broadcast %202 : vector<32x1xf32> to vector<32x64xf32>
    %204 = arith.mulf %203, %0 : vector<32x64xf32>
    %205 = tpu.concatenate %201, %204 in 1 : vector<32x64xf32>, vector<32x64xf32> -> vector<32x128xf32>
    %206 = arith.truncf %205 : vector<32x128xf32> to vector<32x128xbf16>
    %c0_71 = arith.constant 0 : index
    %c2816 = arith.constant 2816 : index
    %207 = vector.load %arg6[%c0_71, %c2816] : memref<32x4096xbf16, #tpu.memory_space<vmem>>, vector<32x128xbf16>
    tpu.vector_store %arg6[%c0_71, %c2816], %206 {strides = array<i32>} : memref<32x4096xbf16, #tpu.memory_space<vmem>>, vector<32x128xbf16>,
    %c0_72 = arith.constant 0 : index
    %c46 = arith.constant 46 : index
    %208 = vector.load %arg1[%c0_72, %c46] : memref<32x64xf32, #tpu.memory_space<vmem>>, vector<32x1xf32>
    %209 = vector.broadcast %208 : vector<32x1xf32> to vector<32x64xf32>
    %210 = arith.mulf %209, %0 : vector<32x64xf32>
    %c0_73 = arith.constant 0 : index
    %c47 = arith.constant 47 : index
    %211 = vector.load %arg1[%c0_73, %c47] : memref<32x64xf32, #tpu.memory_space<vmem>>, vector<32x1xf32>
    %212 = vector.broadcast %211 : vector<32x1xf32> to vector<32x64xf32>
    %213 = arith.mulf %212, %0 : vector<32x64xf32>
    %214 = tpu.concatenate %210, %213 in 1 : vector<32x64xf32>, vector<32x64xf32> -> vector<32x128xf32>
    %215 = arith.truncf %214 : vector<32x128xf32> to vector<32x128xbf16>
    %c0_74 = arith.constant 0 : index
    %c2944 = arith.constant 2944 : index
    %216 = vector.load %arg6[%c0_74, %c2944] : memref<32x4096xbf16, #tpu.memory_space<vmem>>, vector<32x128xbf16>
    tpu.vector_store %arg6[%c0_74, %c2944], %215 {strides = array<i32>} : memref<32x4096xbf16, #tpu.memory_space<vmem>>, vector<32x128xbf16>,
    %c0_75 = arith.constant 0 : index
    %c48 = arith.constant 48 : index
    %217 = vector.load %arg1[%c0_75, %c48] : memref<32x64xf32, #tpu.memory_space<vmem>>, vector<32x1xf32>
    %218 = vector.broadcast %217 : vector<32x1xf32> to vector<32x64xf32>
    %219 = arith.mulf %218, %0 : vector<32x64xf32>
    %c0_76 = arith.constant 0 : index
    %c49 = arith.constant 49 : index
    %220 = vector.load %arg1[%c0_76, %c49] : memref<32x64xf32, #tpu.memory_space<vmem>>, vector<32x1xf32>
    %221 = vector.broadcast %220 : vector<32x1xf32> to vector<32x64xf32>
    %222 = arith.mulf %221, %0 : vector<32x64xf32>
    %223 = tpu.concatenate %219, %222 in 1 : vector<32x64xf32>, vector<32x64xf32> -> vector<32x128xf32>
    %224 = arith.truncf %223 : vector<32x128xf32> to vector<32x128xbf16>
    %c0_77 = arith.constant 0 : index
    %c3072 = arith.constant 3072 : index
    %225 = vector.load %arg6[%c0_77, %c3072] : memref<32x4096xbf16, #tpu.memory_space<vmem>>, vector<32x128xbf16>
    tpu.vector_store %arg6[%c0_77, %c3072], %224 {strides = array<i32>} : memref<32x4096xbf16, #tpu.memory_space<vmem>>, vector<32x128xbf16>,
    %c0_78 = arith.constant 0 : index
    %c50 = arith.constant 50 : index
    %226 = vector.load %arg1[%c0_78, %c50] : memref<32x64xf32, #tpu.memory_space<vmem>>, vector<32x1xf32>
    %227 = vector.broadcast %226 : vector<32x1xf32> to vector<32x64xf32>
    %228 = arith.mulf %227, %0 : vector<32x64xf32>
    %c0_79 = arith.constant 0 : index
    %c51 = arith.constant 51 : index
    %229 = vector.load %arg1[%c0_79, %c51] : memref<32x64xf32, #tpu.memory_space<vmem>>, vector<32x1xf32>
    %230 = vector.broadcast %229 : vector<32x1xf32> to vector<32x64xf32>
    %231 = arith.mulf %230, %0 : vector<32x64xf32>
    %232 = tpu.concatenate %228, %231 in 1 : vector<32x64xf32>, vector<32x64xf32> -> vector<32x128xf32>
    %233 = arith.truncf %232 : vector<32x128xf32> to vector<32x128xbf16>
    %c0_80 = arith.constant 0 : index
    %c3200 = arith.constant 3200 : index
    %234 = vector.load %arg6[%c0_80, %c3200] : memref<32x4096xbf16, #tpu.memory_space<vmem>>, vector<32x128xbf16>
    tpu.vector_store %arg6[%c0_80, %c3200], %233 {strides = array<i32>} : memref<32x4096xbf16, #tpu.memory_space<vmem>>, vector<32x128xbf16>,
    %c0_81 = arith.constant 0 : index
    %c52 = arith.constant 52 : index
    %235 = vector.load %arg1[%c0_81, %c52] : memref<32x64xf32, #tpu.memory_space<vmem>>, vector<32x1xf32>
    %236 = vector.broadcast %235 : vector<32x1xf32> to vector<32x64xf32>
    %237 = arith.mulf %236, %0 : vector<32x64xf32>
    %c0_82 = arith.constant 0 : index
    %c53 = arith.constant 53 : index
    %238 = vector.load %arg1[%c0_82, %c53] : memref<32x64xf32, #tpu.memory_space<vmem>>, vector<32x1xf32>
    %239 = vector.broadcast %238 : vector<32x1xf32> to vector<32x64xf32>
    %240 = arith.mulf %239, %0 : vector<32x64xf32>
    %241 = tpu.concatenate %237, %240 in 1 : vector<32x64xf32>, vector<32x64xf32> -> vector<32x128xf32>
    %242 = arith.truncf %241 : vector<32x128xf32> to vector<32x128xbf16>
    %c0_83 = arith.constant 0 : index
    %c3328 = arith.constant 3328 : index
    %243 = vector.load %arg6[%c0_83, %c3328] : memref<32x4096xbf16, #tpu.memory_space<vmem>>, vector<32x128xbf16>
    tpu.vector_store %arg6[%c0_83, %c3328], %242 {strides = array<i32>} : memref<32x4096xbf16, #tpu.memory_space<vmem>>, vector<32x128xbf16>,
    %c0_84 = arith.constant 0 : index
    %c54 = arith.constant 54 : index
    %244 = vector.load %arg1[%c0_84, %c54] : memref<32x64xf32, #tpu.memory_space<vmem>>, vector<32x1xf32>
    %245 = vector.broadcast %244 : vector<32x1xf32> to vector<32x64xf32>
    %246 = arith.mulf %245, %0 : vector<32x64xf32>
    %c0_85 = arith.constant 0 : index
    %c55 = arith.constant 55 : index
    %247 = vector.load %arg1[%c0_85, %c55] : memref<32x64xf32, #tpu.memory_space<vmem>>, vector<32x1xf32>
    %248 = vector.broadcast %247 : vector<32x1xf32> to vector<32x64xf32>
    %249 = arith.mulf %248, %0 : vector<32x64xf32>
    %250 = tpu.concatenate %246, %249 in 1 : vector<32x64xf32>, vector<32x64xf32> -> vector<32x128xf32>
    %251 = arith.truncf %250 : vector<32x128xf32> to vector<32x128xbf16>
    %c0_86 = arith.constant 0 : index
    %c3456 = arith.constant 3456 : index
    %252 = vector.load %arg6[%c0_86, %c3456] : memref<32x4096xbf16, #tpu.memory_space<vmem>>, vector<32x128xbf16>
    tpu.vector_store %arg6[%c0_86, %c3456], %251 {strides = array<i32>} : memref<32x4096xbf16, #tpu.memory_space<vmem>>, vector<32x128xbf16>,
    %c0_87 = arith.constant 0 : index
    %c56 = arith.constant 56 : index
    %253 = vector.load %arg1[%c0_87, %c56] : memref<32x64xf32, #tpu.memory_space<vmem>>, vector<32x1xf32>
    %254 = vector.broadcast %253 : vector<32x1xf32> to vector<32x64xf32>
    %255 = arith.mulf %254, %0 : vector<32x64xf32>
    %c0_88 = arith.constant 0 : index
    %c57 = arith.constant 57 : index
    %256 = vector.load %arg1[%c0_88, %c57] : memref<32x64xf32, #tpu.memory_space<vmem>>, vector<32x1xf32>
    %257 = vector.broadcast %256 : vector<32x1xf32> to vector<32x64xf32>
    %258 = arith.mulf %257, %0 : vector<32x64xf32>
    %259 = tpu.concatenate %255, %258 in 1 : vector<32x64xf32>, vector<32x64xf32> -> vector<32x128xf32>
    %260 = arith.truncf %259 : vector<32x128xf32> to vector<32x128xbf16>
    %c0_89 = arith.constant 0 : index
    %c3584 = arith.constant 3584 : index
    %261 = vector.load %arg6[%c0_89, %c3584] : memref<32x4096xbf16, #tpu.memory_space<vmem>>, vector<32x128xbf16>
    tpu.vector_store %arg6[%c0_89, %c3584], %260 {strides = array<i32>} : memref<32x4096xbf16, #tpu.memory_space<vmem>>, vector<32x128xbf16>,
    %c0_90 = arith.constant 0 : index
    %c58 = arith.constant 58 : index
    %262 = vector.load %arg1[%c0_90, %c58] : memref<32x64xf32, #tpu.memory_space<vmem>>, vector<32x1xf32>
    %263 = vector.broadcast %262 : vector<32x1xf32> to vector<32x64xf32>
    %264 = arith.mulf %263, %0 : vector<32x64xf32>
    %c0_91 = arith.constant 0 : index
    %c59 = arith.constant 59 : index
    %265 = vector.load %arg1[%c0_91, %c59] : memref<32x64xf32, #tpu.memory_space<vmem>>, vector<32x1xf32>
    %266 = vector.broadcast %265 : vector<32x1xf32> to vector<32x64xf32>
    %267 = arith.mulf %266, %0 : vector<32x64xf32>
    %268 = tpu.concatenate %264, %267 in 1 : vector<32x64xf32>, vector<32x64xf32> -> vector<32x128xf32>
    %269 = arith.truncf %268 : vector<32x128xf32> to vector<32x128xbf16>
    %c0_92 = arith.constant 0 : index
    %c3712 = arith.constant 3712 : index
    %270 = vector.load %arg6[%c0_92, %c3712] : memref<32x4096xbf16, #tpu.memory_space<vmem>>, vector<32x128xbf16>
    tpu.vector_store %arg6[%c0_92, %c3712], %269 {strides = array<i32>} : memref<32x4096xbf16, #tpu.memory_space<vmem>>, vector<32x128xbf16>,
    %c0_93 = arith.constant 0 : index
    %c60 = arith.constant 60 : index
    %271 = vector.load %arg1[%c0_93, %c60] : memref<32x64xf32, #tpu.memory_space<vmem>>, vector<32x1xf32>
    %272 = vector.broadcast %271 : vector<32x1xf32> to vector<32x64xf32>
    %273 = arith.mulf %272, %0 : vector<32x64xf32>
    %c0_94 = arith.constant 0 : index
    %c61 = arith.constant 61 : index
    %274 = vector.load %arg1[%c0_94, %c61] : memref<32x64xf32, #tpu.memory_space<vmem>>, vector<32x1xf32>
    %275 = vector.broadcast %274 : vector<32x1xf32> to vector<32x64xf32>
    %276 = arith.mulf %275, %0 : vector<32x64xf32>
    %277 = tpu.concatenate %273, %276 in 1 : vector<32x64xf32>, vector<32x64xf32> -> vector<32x128xf32>
    %278 = arith.truncf %277 : vector<32x128xf32> to vector<32x128xbf16>
    %c0_95 = arith.constant 0 : index
    %c3840 = arith.constant 3840 : index
    %279 = vector.load %arg6[%c0_95, %c3840] : memref<32x4096xbf16, #tpu.memory_space<vmem>>, vector<32x128xbf16>
    tpu.vector_store %arg6[%c0_95, %c3840], %278 {strides = array<i32>} : memref<32x4096xbf16, #tpu.memory_space<vmem>>, vector<32x128xbf16>,
    %c0_96 = arith.constant 0 : index
    %c62 = arith.constant 62 : index
    %280 = vector.load %arg1[%c0_96, %c62] : memref<32x64xf32, #tpu.memory_space<vmem>>, vector<32x1xf32>
    %281 = vector.broadcast %280 : vector<32x1xf32> to vector<32x64xf32>
    %282 = arith.mulf %281, %0 : vector<32x64xf32>
    %c0_97 = arith.constant 0 : index
    %c63 = arith.constant 63 : index
    %283 = vector.load %arg1[%c0_97, %c63] : memref<32x64xf32, #tpu.memory_space<vmem>>, vector<32x1xf32>
    %284 = vector.broadcast %283 : vector<32x1xf32> to vector<32x64xf32>
    %285 = arith.mulf %284, %0 : vector<32x64xf32>
    %286 = tpu.concatenate %282, %285 in 1 : vector<32x64xf32>, vector<32x64xf32> -> vector<32x128xf32>
    %287 = arith.truncf %286 : vector<32x128xf32> to vector<32x128xbf16>
    %c0_98 = arith.constant 0 : index
    %c3968 = arith.constant 3968 : index
    %288 = vector.load %arg6[%c0_98, %c3968] : memref<32x4096xbf16, #tpu.memory_space<vmem>>, vector<32x128xbf16>
    tpu.vector_store %arg6[%c0_98, %c3968], %287 {strides = array<i32>} : memref<32x4096xbf16, #tpu.memory_space<vmem>>, vector<32x128xbf16>,
    %c0_99 = arith.constant 0 : index
    %c0_100 = arith.constant 0 : index
    %289 = vector.load %arg6[%c0_99, %c0_100] : memref<32x4096xbf16, #tpu.memory_space<vmem>>, vector<32x4096xbf16>
    %c0_101 = arith.constant 0 : index
    %c0_102 = arith.constant 0 : index
    %290 = vector.load %arg3[%c0_101, %c0_102] : memref<4096x64xbf16, #tpu.memory_space<vmem>>, vector<4096x64xbf16>
    %cst = arith.constant dense<0.000000e+00> : vector<32x64xf32>
    %291 = tpu.matmul %289, %290, %cst {dimension_numbers = #tpu.dot_dimension_numbers<[1], [0], [0], [1], [0, 0, 1, 1], [], []>} : vector<32x4096xbf16>, vector<4096x64xbf16>, vector<32x64xf32> -> vector<32x64xf32>
    %292 = arith.truncf %0 : vector<32x64xf32> to vector<32x64xbf16>
    %c0_103 = arith.constant 0 : index
    %c0_104 = arith.constant 0 : index
    %293 = vector.load %arg4[%c0_103, %c0_104] : memref<64x64xbf16, #tpu.memory_space<vmem>>, vector<64x64xbf16>
    %cst_105 = arith.constant dense<0.000000e+00> : vector<32x64xf32>
    %294 = tpu.matmul %292, %293, %cst_105 {dimension_numbers = #tpu.dot_dimension_numbers<[1], [0], [0], [1], [0, 0, 1, 1], [], []>} : vector<32x64xbf16>, vector<64x64xbf16>, vector<32x64xf32> -> vector<32x64xf32>
    %295 = arith.addf %291, %294 : vector<32x64xf32>
    %c0_106 = arith.constant 0 : index
    %c0_107 = arith.constant 0 : index
    %296 = vector.load %arg5[%c0_106, %c0_107] : memref<32x64xf32, #tpu.memory_space<vmem>>, vector<32x64xf32>
    tpu.vector_store %arg5[%c0_106, %c0_107], %295 {strides = array<i32>} : memref<32x64xf32, #tpu.memory_space<vmem>>, vector<32x64xf32>,
    return
  }
  func.func @transform_0(%arg0: i32) -> (i32, i32) {
    %c0_i32 = arith.constant 0 : i32
    %c0_i32_0 = arith.constant 0 : i32
    return %arg0, %c0_i32 : i32, i32
  }
  func.func @transform_1(%arg0: i32) -> (i32, i32) {
    %c0_i32 = arith.constant 0 : i32
    %c0_i32_0 = arith.constant 0 : i32
    return %arg0, %c0_i32 : i32, i32
  }
  func.func @transform_2(%arg0: i32) -> (i32, i32) {
    %c0_i32 = arith.constant 0 : i32
    %c0_i32_0 = arith.constant 0 : i32
    %c0_i32_1 = arith.constant 0 : i32
    return %c0_i32, %c0_i32_0 : i32, i32
  }
  func.func @transform_3(%arg0: i32) -> (i32, i32) {
    %c0_i32 = arith.constant 0 : i32
    %c0_i32_0 = arith.constant 0 : i32
    %c0_i32_1 = arith.constant 0 : i32
    return %c0_i32, %c0_i32_0 : i32, i32
  }
  func.func @transform_4(%arg0: i32) -> (i32, i32) {
    %c0_i32 = arith.constant 0 : i32
    %c0_i32_0 = arith.constant 0 : i32
    return %arg0, %c0_i32 : i32, i32
  }
}

module attributes {stable_mosaic.version = 11 : i64} {
  func.func @_matmul_bias_kernel(%arg0: i32, %arg1: i32, %arg2: memref<16x64xf32, #tpu.memory_space<vmem>>, %arg3: memref<64x64xf32, #tpu.memory_space<vmem>>, %arg4: memref<1x64xf32, #tpu.memory_space<vmem>>, %arg5: memref<16x64xf32, #tpu.memory_space<vmem>>) attributes {dimension_semantics = [#tpu.dimension_semantics<parallel>, #tpu.dimension_semantics<parallel>], iteration_bounds = array<i64: 1, 1>, scalar_prefetch = 0 : i64, scratch_operands = 0 : i64, tpu.core_type = #tpu.core_type<tc>, window_params = [{transform_indices = @transform_0, window_bounds = array<i64: 16, 64>}, {transform_indices = @transform_1, window_bounds = array<i64: 64, 64>}, {transform_indices = @transform_2, window_bounds = array<i64: 1, 64>}, {transform_indices = @transform_3, window_bounds = array<i64: 16, 64>}]} {
    %c0 = arith.constant 0 : index
    %c0_0 = arith.constant 0 : index
    %0 = vector.load %arg2[%c0, %c0_0] : memref<16x64xf32, #tpu.memory_space<vmem>>, vector<16x64xf32>
    %1 = arith.truncf %0 : vector<16x64xf32> to vector<16x64xbf16>
    %c0_1 = arith.constant 0 : index
    %c0_2 = arith.constant 0 : index
    %2 = vector.load %arg3[%c0_1, %c0_2] : memref<64x64xf32, #tpu.memory_space<vmem>>, vector<64x64xf32>
    %3 = arith.truncf %2 : vector<64x64xf32> to vector<64x64xbf16>
    %cst = arith.constant dense<0.000000e+00> : vector<16x64xf32>
    %4 = tpu.matmul %1, %3, %cst {dimension_numbers = #tpu.dot_dimension_numbers<[1], [0], [0], [1], [0, 0, 1, 1], [], []>} : vector<16x64xbf16>, vector<64x64xbf16>, vector<16x64xf32> -> vector<16x64xf32>
    %c0_3 = arith.constant 0 : index
    %c0_4 = arith.constant 0 : index
    %5 = vector.load %arg4[%c0_3, %c0_4] : memref<1x64xf32, #tpu.memory_space<vmem>>, vector<1x64xf32>
    %6 = vector.broadcast %5 : vector<1x64xf32> to vector<16x64xf32>
    %7 = arith.addf %4, %6 : vector<16x64xf32>
    %c0_5 = arith.constant 0 : index
    %c0_6 = arith.constant 0 : index
    %8 = vector.load %arg5[%c0_5, %c0_6] : memref<16x64xf32, #tpu.memory_space<vmem>>, vector<16x64xf32>
    tpu.vector_store %arg5[%c0_5, %c0_6], %7 {strides = array<i32>} : memref<16x64xf32, #tpu.memory_space<vmem>>, vector<16x64xf32>,
    return
  }
  func.func @transform_0(%arg0: i32, %arg1: i32) -> (i32, i32) {
    %c0_i32 = arith.constant 0 : i32
    %c0_i32_0 = arith.constant 0 : i32
    return %arg0, %c0_i32 : i32, i32
  }
  func.func @transform_1(%arg0: i32, %arg1: i32) -> (i32, i32) {
    %c0_i32 = arith.constant 0 : i32
    %c0_i32_0 = arith.constant 0 : i32
    return %c0_i32, %arg1 : i32, i32
  }
  func.func @transform_2(%arg0: i32, %arg1: i32) -> (i32, i32) {
    %c0_i32 = arith.constant 0 : i32
    %c0_i32_0 = arith.constant 0 : i32
    return %c0_i32, %arg1 : i32, i32
  }
  func.func @transform_3(%arg0: i32, %arg1: i32) -> (i32, i32) {
    %c0_i32 = arith.constant 0 : i32
    return %arg0, %arg1 : i32, i32
  }
}

module attributes {stable_mosaic.version = 11 : i64} {
  func.func @_ln_kernel(%arg0: i32, %arg1: memref<16x64xf32, #tpu.memory_space<vmem>>, %arg2: memref<1x64xf32, #tpu.memory_space<vmem>>, %arg3: memref<1x64xf32, #tpu.memory_space<vmem>>, %arg4: memref<16x64xf32, #tpu.memory_space<vmem>>) attributes {dimension_semantics = [#tpu.dimension_semantics<parallel>], iteration_bounds = array<i64: 1>, scalar_prefetch = 0 : i64, scratch_operands = 0 : i64, tpu.core_type = #tpu.core_type<tc>, window_params = [{transform_indices = @transform_0, window_bounds = array<i64: 16, 64>}, {pipeline_mode = #tpu.pipeline_mode<synchronous>, transform_indices = @transform_1, window_bounds = array<i64: 1, 64>}, {pipeline_mode = #tpu.pipeline_mode<synchronous>, transform_indices = @transform_2, window_bounds = array<i64: 1, 64>}, {transform_indices = @transform_3, window_bounds = array<i64: 16, 64>}]} {
    %c0 = arith.constant 0 : index
    %c0_0 = arith.constant 0 : index
    %0 = vector.load %arg1[%c0, %c0_0] : memref<16x64xf32, #tpu.memory_space<vmem>>, vector<16x64xf32>
    %c0_1 = arith.constant 0 : index
    %c0_2 = arith.constant 0 : index
    %1 = vector.load %arg2[%c0_1, %c0_2] : memref<1x64xf32, #tpu.memory_space<vmem>>, vector<1x64xf32>
    %c0_3 = arith.constant 0 : index
    %c0_4 = arith.constant 0 : index
    %2 = vector.load %arg3[%c0_3, %c0_4] : memref<1x64xf32, #tpu.memory_space<vmem>>, vector<1x64xf32>
    %cst = arith.constant dense<0.000000e+00> : vector<16xf32>
    %3 = vector.multi_reduction <add>, %0, %cst [1] : vector<16x64xf32> to vector<16xf32>
    %4 = vector.shape_cast %3 : vector<16xf32> to vector<16x1xf32>
    %cst_5 = arith.constant 6.400000e+01 : f32
    %5 = vector.broadcast %cst_5 : f32 to vector<16x1xf32>
    %6 = arith.divf %4, %5 : vector<16x1xf32>
    %7 = vector.broadcast %6 : vector<16x1xf32> to vector<16x64xf32>
    %8 = arith.subf %0, %7 : vector<16x64xf32>
    %9 = arith.mulf %8, %8 : vector<16x64xf32>
    %cst_6 = arith.constant dense<0.000000e+00> : vector<16xf32>
    %10 = vector.multi_reduction <add>, %9, %cst_6 [1] : vector<16x64xf32> to vector<16xf32>
    %11 = vector.shape_cast %10 : vector<16xf32> to vector<16x1xf32>
    %cst_7 = arith.constant 6.400000e+01 : f32
    %12 = vector.broadcast %cst_7 : f32 to vector<16x1xf32>
    %13 = arith.divf %11, %12 : vector<16x1xf32>
    %cst_8 = arith.constant 9.99999974E-6 : f32
    %14 = vector.broadcast %cst_8 : f32 to vector<16x1xf32>
    %15 = arith.addf %13, %14 : vector<16x1xf32>
    %16 = math.rsqrt %15 : vector<16x1xf32>
    %17 = vector.broadcast %16 : vector<16x1xf32> to vector<16x64xf32>
    %18 = arith.mulf %8, %17 : vector<16x64xf32>
    %19 = vector.broadcast %1 : vector<1x64xf32> to vector<16x64xf32>
    %20 = arith.mulf %18, %19 : vector<16x64xf32>
    %21 = vector.broadcast %2 : vector<1x64xf32> to vector<16x64xf32>
    %22 = arith.addf %20, %21 : vector<16x64xf32>
    %cst_9 = arith.constant 5.000000e-01 : f32
    %23 = vector.broadcast %cst_9 : f32 to vector<16x64xf32>
    %24 = arith.mulf %23, %22 : vector<16x64xf32>
    %cst_10 = arith.constant 0.707106769 : f32
    %25 = vector.broadcast %cst_10 : f32 to vector<16x64xf32>
    %26 = arith.mulf %22, %25 : vector<16x64xf32>
    %cst_11 = arith.constant 0.000000e+00 : f32
    %27 = vector.broadcast %cst_11 : f32 to vector<16x64xf32>
    %28 = arith.cmpf oge, %26, %27 : vector<16x64xf32>
    %cst_12 = arith.constant 1.000000e+00 : f32
    %cst_13 = arith.constant -1.000000e+00 : f32
    %29 = vector.broadcast %cst_12 : f32 to vector<16x64xf32>
    %30 = vector.broadcast %cst_13 : f32 to vector<16x64xf32>
    %31 = arith.select %28, %29, %30 : vector<16x64xi1>, vector<16x64xf32>
    %32 = math.absf %26 : vector<16x64xf32>
    %cst_14 = arith.constant 0.327591091 : f32
    %33 = vector.broadcast %cst_14 : f32 to vector<16x64xf32>
    %34 = arith.mulf %33, %32 : vector<16x64xf32>
    %cst_15 = arith.constant 1.000000e+00 : f32
    %35 = vector.broadcast %cst_15 : f32 to vector<16x64xf32>
    %36 = arith.addf %35, %34 : vector<16x64xf32>
    %cst_16 = arith.constant 1.000000e+00 : f32
    %37 = vector.broadcast %cst_16 : f32 to vector<16x64xf32>
    %38 = arith.divf %37, %36 : vector<16x64xf32>
    %cst_17 = arith.constant 1.06140542 : f32
    %39 = vector.broadcast %cst_17 : f32 to vector<16x64xf32>
    %40 = arith.mulf %39, %38 : vector<16x64xf32>
    %cst_18 = arith.constant -1.45315206 : f32
    %41 = vector.broadcast %cst_18 : f32 to vector<16x64xf32>
    %42 = arith.addf %40, %41 : vector<16x64xf32>
    %43 = arith.mulf %42, %38 : vector<16x64xf32>
    %cst_19 = arith.constant 1.42141378 : f32
    %44 = vector.broadcast %cst_19 : f32 to vector<16x64xf32>
    %45 = arith.addf %43, %44 : vector<16x64xf32>
    %46 = arith.mulf %45, %38 : vector<16x64xf32>
    %cst_20 = arith.constant -0.284496725 : f32
    %47 = vector.broadcast %cst_20 : f32 to vector<16x64xf32>
    %48 = arith.addf %46, %47 : vector<16x64xf32>
    %49 = arith.mulf %48, %38 : vector<16x64xf32>
    %cst_21 = arith.constant 0.254829586 : f32
    %50 = vector.broadcast %cst_21 : f32 to vector<16x64xf32>
    %51 = arith.addf %49, %50 : vector<16x64xf32>
    %52 = arith.mulf %51, %38 : vector<16x64xf32>
    %cst_22 = arith.constant 0.000000e+00 : f32
    %53 = vector.broadcast %cst_22 : f32 to vector<16x64xf32>
    %54 = arith.subf %53, %32 : vector<16x64xf32>
    %55 = arith.mulf %54, %32 : vector<16x64xf32>
    %56 = math.exp %55 : vector<16x64xf32>
    %57 = arith.mulf %52, %56 : vector<16x64xf32>
    %cst_23 = arith.constant 1.000000e+00 : f32
    %58 = vector.broadcast %cst_23 : f32 to vector<16x64xf32>
    %59 = arith.subf %58, %57 : vector<16x64xf32>
    %60 = arith.mulf %31, %59 : vector<16x64xf32>
    %cst_24 = arith.constant 1.000000e+00 : f32
    %61 = vector.broadcast %cst_24 : f32 to vector<16x64xf32>
    %62 = arith.addf %61, %60 : vector<16x64xf32>
    %63 = arith.mulf %24, %62 : vector<16x64xf32>
    %c0_25 = arith.constant 0 : index
    %c0_26 = arith.constant 0 : index
    %64 = vector.load %arg4[%c0_25, %c0_26] : memref<16x64xf32, #tpu.memory_space<vmem>>, vector<16x64xf32>
    tpu.vector_store %arg4[%c0_25, %c0_26], %63 {strides = array<i32>} : memref<16x64xf32, #tpu.memory_space<vmem>>, vector<16x64xf32>,
    return
  }
  func.func @transform_0(%arg0: i32) -> (i32, i32) {
    %c0_i32 = arith.constant 0 : i32
    %c0_i32_0 = arith.constant 0 : i32
    return %arg0, %c0_i32 : i32, i32
  }
  func.func @transform_1(%arg0: i32) -> (i32, i32) {
    %c0_i32 = arith.constant 0 : i32
    %c0_i32_0 = arith.constant 0 : i32
    %c0_i32_1 = arith.constant 0 : i32
    return %c0_i32, %c0_i32_0 : i32, i32
  }
  func.func @transform_2(%arg0: i32) -> (i32, i32) {
    %c0_i32 = arith.constant 0 : i32
    %c0_i32_0 = arith.constant 0 : i32
    %c0_i32_1 = arith.constant 0 : i32
    return %c0_i32, %c0_i32_0 : i32, i32
  }
  func.func @transform_3(%arg0: i32) -> (i32, i32) {
    %c0_i32 = arith.constant 0 : i32
    %c0_i32_0 = arith.constant 0 : i32
    return %arg0, %c0_i32 : i32, i32
  }
}

module attributes {stable_mosaic.version = 11 : i64} {
  func.func @_ln_head_kernel(%arg0: i32, %arg1: memref<16x64xf32, #tpu.memory_space<vmem>>, %arg2: memref<1x64xf32, #tpu.memory_space<vmem>>, %arg3: memref<1x64xf32, #tpu.memory_space<vmem>>, %arg4: memref<64x128xf32, #tpu.memory_space<vmem>>, %arg5: memref<1x128xf32, #tpu.memory_space<vmem>>, %arg6: memref<16x128xf32, #tpu.memory_space<vmem>>) attributes {dimension_semantics = [#tpu.dimension_semantics<parallel>], iteration_bounds = array<i64: 1>, scalar_prefetch = 0 : i64, scratch_operands = 0 : i64, tpu.core_type = #tpu.core_type<tc>, window_params = [{transform_indices = @transform_0, window_bounds = array<i64: 16, 64>}, {pipeline_mode = #tpu.pipeline_mode<synchronous>, transform_indices = @transform_1, window_bounds = array<i64: 1, 64>}, {pipeline_mode = #tpu.pipeline_mode<synchronous>, transform_indices = @transform_2, window_bounds = array<i64: 1, 64>}, {pipeline_mode = #tpu.pipeline_mode<synchronous>, transform_indices = @transform_3, window_bounds = array<i64: 64, 128>}, {pipeline_mode = #tpu.pipeline_mode<synchronous>, transform_indices = @transform_4, window_bounds = array<i64: 1, 128>}, {transform_indices = @transform_5, window_bounds = array<i64: 16, 128>}]} {
    %c0 = arith.constant 0 : index
    %c0_0 = arith.constant 0 : index
    %0 = vector.load %arg1[%c0, %c0_0] : memref<16x64xf32, #tpu.memory_space<vmem>>, vector<16x64xf32>
    %c0_1 = arith.constant 0 : index
    %c0_2 = arith.constant 0 : index
    %1 = vector.load %arg2[%c0_1, %c0_2] : memref<1x64xf32, #tpu.memory_space<vmem>>, vector<1x64xf32>
    %c0_3 = arith.constant 0 : index
    %c0_4 = arith.constant 0 : index
    %2 = vector.load %arg3[%c0_3, %c0_4] : memref<1x64xf32, #tpu.memory_space<vmem>>, vector<1x64xf32>
    %cst = arith.constant dense<0.000000e+00> : vector<16xf32>
    %3 = vector.multi_reduction <add>, %0, %cst [1] : vector<16x64xf32> to vector<16xf32>
    %4 = vector.shape_cast %3 : vector<16xf32> to vector<16x1xf32>
    %cst_5 = arith.constant 6.400000e+01 : f32
    %5 = vector.broadcast %cst_5 : f32 to vector<16x1xf32>
    %6 = arith.divf %4, %5 : vector<16x1xf32>
    %7 = vector.broadcast %6 : vector<16x1xf32> to vector<16x64xf32>
    %8 = arith.subf %0, %7 : vector<16x64xf32>
    %9 = arith.mulf %8, %8 : vector<16x64xf32>
    %cst_6 = arith.constant dense<0.000000e+00> : vector<16xf32>
    %10 = vector.multi_reduction <add>, %9, %cst_6 [1] : vector<16x64xf32> to vector<16xf32>
    %11 = vector.shape_cast %10 : vector<16xf32> to vector<16x1xf32>
    %cst_7 = arith.constant 6.400000e+01 : f32
    %12 = vector.broadcast %cst_7 : f32 to vector<16x1xf32>
    %13 = arith.divf %11, %12 : vector<16x1xf32>
    %cst_8 = arith.constant 9.99999974E-6 : f32
    %14 = vector.broadcast %cst_8 : f32 to vector<16x1xf32>
    %15 = arith.addf %13, %14 : vector<16x1xf32>
    %16 = math.rsqrt %15 : vector<16x1xf32>
    %17 = vector.broadcast %16 : vector<16x1xf32> to vector<16x64xf32>
    %18 = arith.mulf %8, %17 : vector<16x64xf32>
    %19 = vector.broadcast %1 : vector<1x64xf32> to vector<16x64xf32>
    %20 = arith.mulf %18, %19 : vector<16x64xf32>
    %21 = vector.broadcast %2 : vector<1x64xf32> to vector<16x64xf32>
    %22 = arith.addf %20, %21 : vector<16x64xf32>
    %cst_9 = arith.constant 5.000000e-01 : f32
    %23 = vector.broadcast %cst_9 : f32 to vector<16x64xf32>
    %24 = arith.mulf %23, %22 : vector<16x64xf32>
    %cst_10 = arith.constant 0.707106769 : f32
    %25 = vector.broadcast %cst_10 : f32 to vector<16x64xf32>
    %26 = arith.mulf %22, %25 : vector<16x64xf32>
    %cst_11 = arith.constant 0.000000e+00 : f32
    %27 = vector.broadcast %cst_11 : f32 to vector<16x64xf32>
    %28 = arith.cmpf oge, %26, %27 : vector<16x64xf32>
    %cst_12 = arith.constant 1.000000e+00 : f32
    %cst_13 = arith.constant -1.000000e+00 : f32
    %29 = vector.broadcast %cst_12 : f32 to vector<16x64xf32>
    %30 = vector.broadcast %cst_13 : f32 to vector<16x64xf32>
    %31 = arith.select %28, %29, %30 : vector<16x64xi1>, vector<16x64xf32>
    %32 = math.absf %26 : vector<16x64xf32>
    %cst_14 = arith.constant 0.327591091 : f32
    %33 = vector.broadcast %cst_14 : f32 to vector<16x64xf32>
    %34 = arith.mulf %33, %32 : vector<16x64xf32>
    %cst_15 = arith.constant 1.000000e+00 : f32
    %35 = vector.broadcast %cst_15 : f32 to vector<16x64xf32>
    %36 = arith.addf %35, %34 : vector<16x64xf32>
    %cst_16 = arith.constant 1.000000e+00 : f32
    %37 = vector.broadcast %cst_16 : f32 to vector<16x64xf32>
    %38 = arith.divf %37, %36 : vector<16x64xf32>
    %cst_17 = arith.constant 1.06140542 : f32
    %39 = vector.broadcast %cst_17 : f32 to vector<16x64xf32>
    %40 = arith.mulf %39, %38 : vector<16x64xf32>
    %cst_18 = arith.constant -1.45315206 : f32
    %41 = vector.broadcast %cst_18 : f32 to vector<16x64xf32>
    %42 = arith.addf %40, %41 : vector<16x64xf32>
    %43 = arith.mulf %42, %38 : vector<16x64xf32>
    %cst_19 = arith.constant 1.42141378 : f32
    %44 = vector.broadcast %cst_19 : f32 to vector<16x64xf32>
    %45 = arith.addf %43, %44 : vector<16x64xf32>
    %46 = arith.mulf %45, %38 : vector<16x64xf32>
    %cst_20 = arith.constant -0.284496725 : f32
    %47 = vector.broadcast %cst_20 : f32 to vector<16x64xf32>
    %48 = arith.addf %46, %47 : vector<16x64xf32>
    %49 = arith.mulf %48, %38 : vector<16x64xf32>
    %cst_21 = arith.constant 0.254829586 : f32
    %50 = vector.broadcast %cst_21 : f32 to vector<16x64xf32>
    %51 = arith.addf %49, %50 : vector<16x64xf32>
    %52 = arith.mulf %51, %38 : vector<16x64xf32>
    %cst_22 = arith.constant 0.000000e+00 : f32
    %53 = vector.broadcast %cst_22 : f32 to vector<16x64xf32>
    %54 = arith.subf %53, %32 : vector<16x64xf32>
    %55 = arith.mulf %54, %32 : vector<16x64xf32>
    %56 = math.exp %55 : vector<16x64xf32>
    %57 = arith.mulf %52, %56 : vector<16x64xf32>
    %cst_23 = arith.constant 1.000000e+00 : f32
    %58 = vector.broadcast %cst_23 : f32 to vector<16x64xf32>
    %59 = arith.subf %58, %57 : vector<16x64xf32>
    %60 = arith.mulf %31, %59 : vector<16x64xf32>
    %cst_24 = arith.constant 1.000000e+00 : f32
    %61 = vector.broadcast %cst_24 : f32 to vector<16x64xf32>
    %62 = arith.addf %61, %60 : vector<16x64xf32>
    %63 = arith.mulf %24, %62 : vector<16x64xf32>
    %64 = arith.truncf %63 : vector<16x64xf32> to vector<16x64xbf16>
    %c0_25 = arith.constant 0 : index
    %c0_26 = arith.constant 0 : index
    %65 = vector.load %arg4[%c0_25, %c0_26] : memref<64x128xf32, #tpu.memory_space<vmem>>, vector<64x128xf32>
    %66 = arith.truncf %65 : vector<64x128xf32> to vector<64x128xbf16>
    %cst_27 = arith.constant dense<0.000000e+00> : vector<16x128xf32>
    %67 = tpu.matmul %64, %66, %cst_27 {dimension_numbers = #tpu.dot_dimension_numbers<[1], [0], [0], [1], [0, 0, 1, 1], [], []>} : vector<16x64xbf16>, vector<64x128xbf16>, vector<16x128xf32> -> vector<16x128xf32>
    %c0_28 = arith.constant 0 : index
    %c0_29 = arith.constant 0 : index
    %68 = vector.load %arg5[%c0_28, %c0_29] : memref<1x128xf32, #tpu.memory_space<vmem>>, vector<1x128xf32>
    %69 = vector.broadcast %68 : vector<1x128xf32> to vector<16x128xf32>
    %70 = arith.addf %67, %69 : vector<16x128xf32>
    %c0_30 = arith.constant 0 : index
    %c0_31 = arith.constant 0 : index
    %71 = vector.load %arg6[%c0_30, %c0_31] : memref<16x128xf32, #tpu.memory_space<vmem>>, vector<16x128xf32>
    tpu.vector_store %arg6[%c0_30, %c0_31], %70 {strides = array<i32>} : memref<16x128xf32, #tpu.memory_space<vmem>>, vector<16x128xf32>,
    return
  }
  func.func @transform_0(%arg0: i32) -> (i32, i32) {
    %c0_i32 = arith.constant 0 : i32
    %c0_i32_0 = arith.constant 0 : i32
    return %arg0, %c0_i32 : i32, i32
  }
  func.func @transform_1(%arg0: i32) -> (i32, i32) {
    %c0_i32 = arith.constant 0 : i32
    %c0_i32_0 = arith.constant 0 : i32
    %c0_i32_1 = arith.constant 0 : i32
    return %c0_i32, %c0_i32_0 : i32, i32
  }
  func.func @transform_2(%arg0: i32) -> (i32, i32) {
    %c0_i32 = arith.constant 0 : i32
    %c0_i32_0 = arith.constant 0 : i32
    %c0_i32_1 = arith.constant 0 : i32
    return %c0_i32, %c0_i32_0 : i32, i32
  }
  func.func @transform_3(%arg0: i32) -> (i32, i32) {
    %c0_i32 = arith.constant 0 : i32
    %c0_i32_0 = arith.constant 0 : i32
    %c0_i32_1 = arith.constant 0 : i32
    return %c0_i32, %c0_i32_0 : i32, i32
  }
  func.func @transform_4(%arg0: i32) -> (i32, i32) {
    %c0_i32 = arith.constant 0 : i32
    %c0_i32_0 = arith.constant 0 : i32
    %c0_i32_1 = arith.constant 0 : i32
    return %c0_i32, %c0_i32_0 : i32, i32
  }
  func.func @transform_5(%arg0: i32) -> (i32, i32) {
    %c0_i32 = arith.constant 0 : i32
    %c0_i32_0 = arith.constant 0 : i32
    return %arg0, %c0_i32 : i32, i32
  }
}

</mosaic_0001>

<bundles_post_ra>
// kernel: gnn_forward.18
= control target key start
LH: loop header
LB: loop body
LE: loop exit
PB: predicated region body
PF: predicated region fallthrough
CT: control target
= control target key end

     0   :  { %vm34_vm0 = vcmask 1041408   ;;  %vm27_vm1 = vcmask 31744   ;;  %vm57_vm2 = vcmask 523264   ;;  %s120_s1 = inlined_call_operand.vmem [shape: f32[4,64], index: 1, kind: input, shape index: {}]   ;;  %s121_s0 = inlined_call_operand.vmem [shape: f32[32,4], index: 0, kind: input, shape index: {}]   ;;  %s122_s2 = inlined_call_operand.vmem [shape: f32[1,64], index: 2, kind: input, shape index: {}]   ;;  %s123_s3 = inlined_call_operand.vmem [shape: f32[32,64], index: 3, kind: output, shape index: {}]  }
   0x1   :  { %v21_v0 = vld [vmem:[%s120_s1] sm:$0xf]  ;;  %v16_v2 = vld [vmem:[%s121_s0 + $0x8] sm:$0xff]  ;;  %v17_v4 = vld [vmem:[%s121_s0 + $0x10] sm:$0xff] }
   0x2   :  { %v15_v1 = vld [vmem:[%s121_s0] sm:$0xff]  ;;  %v22_v3 = vpack.c.bf16 %v21_v0, %v21_v0  ;;  %v18_v5 = vld [vmem:[%s121_s0 + $0x18] sm:$0xff] }
   0x3   :  { %v19_v7 = vpack.c.bf16 %v16_v2, %v15_v1  ;;  %v20_v8 = vpack.c.bf16 %v18_v5, %v17_v4  ;;  %v69_v9 = vld [vmem:[%s122_s2] ss:$0 sm:$0xff] }
   0x4   :  { %v36_v6 = vsel %vm34_vm0, %v22_v3, 0 }
   0x5   :  { %45 = vmatpush.bf16.msra.mxu0 %v36_v6  ;;  %68 = vmatpush.bf16.msra.mxu1 %v36_v6 }
   0x8   :  { %66 = vmatmul.msk.bf16.vlgmr.msra.gmra.mxu0 %vm27_vm1, %v19_v7  ;;  %67 = vmatmul.msk.bf16.vlgmr.msra.gmra.mxu1 %vm27_vm1, %v20_v8 }
  0x85   :  { %v47_v10 = vpop.f32.mrf.mxu0  ;;  %v52_v11 = vpop.f32.mrf.mxu1 }
  0x86   :  { %v48_v12 = vadd.f32 %v69_v9, %v47_v10  ;;  %v53_v13 = vadd.f32 %v69_v9, %v52_v11 }
  0x88   :  { %58 = vst.msk [vmem:[%s123_s3] sm:$0xff] %vm57_vm2, %v48_v12 }
  0x89   :  { %60 = vst.msk [vmem:[%s123_s3 + $0x10] sm:$0xff] %vm57_vm2, %v53_v13 }
  0x8d   :  { %v49_v14 = vpop.f32.mrf.mxu0  ;;  %v54_v15 = vpop.f32.mrf.mxu1 }
  0x8e   :  { %v50_v16 = vadd.f32 %v69_v9, %v49_v14  ;;  %v55_v17 = vadd.f32 %v69_v9, %v54_v15 }
  0x90   :  { %59 = vst.msk [vmem:[%s123_s3 + $0x8] sm:$0xff] %vm57_vm2, %v50_v16 }
  0x91   :  { %61 = vst.msk [vmem:[%s123_s3 + $0x18] sm:$0xff] %vm57_vm2, %v55_v17 }

// kernel: gnn_forward.17
= control target key start
LH: loop header
LB: loop body
LE: loop exit
PB: predicated region body
PF: predicated region fallthrough
CT: control target
= control target key end

     0   :  { %vm21_vm0 = vcmask 1042432   ;;  %vm17_vm1 = vcmask 48128   ;;  %vm39_vm2 = vcmask 523264   ;;  %s77_s1 = inlined_call_operand.vmem [shape: f32[6,64], index: 1, kind: input, shape index: {}]   ;;  %s78_s0 = inlined_call_operand.vmem [shape: f32[16,6], index: 0, kind: input, shape index: {}]   ;;  %s79_s2 = inlined_call_operand.vmem [shape: f32[16,64], index: 2, kind: output, shape index: {}]  }
   0x1   :  { %v15_v0 = vld [vmem:[%s77_s1] sm:$0x3f]  ;;  %v13_v2 = vld [vmem:[%s78_s0 + $0x8] sm:$0xff] }
   0x2   :  { %v12_v1 = vld [vmem:[%s78_s0] sm:$0xff]  ;;  %v16_v3 = vpack.c.bf16 %v15_v0, %v15_v0 }
   0x3   :  { %v14_v5 = vpack.c.bf16 %v13_v2, %v12_v1 }
   0x4   :  { %v23_v4 = vsel %vm21_vm0, %v16_v3, 0 }
   0x5   :  { %32 = vmatpush.bf16.msra.mxu0 %v23_v4 }
   0x8   :  { %46 = vmatmul.msk.bf16.vlgmr.msra.gmra.mxu0 %vm17_vm1, %v14_v5 }
  0x85   :  { %v34_v6 = vpop.f32.mrf.mxu0 }
  0x86   :  { %40 = vst.msk [vmem:[%s79_s2] sm:$0xff] %vm39_vm2, %v34_v6 }
  0x8d   :  { %v36_v7 = vpop.f32.mrf.mxu0 }
  0x8e   :  { %41 = vst.msk [vmem:[%s79_s2 + $0x8] sm:$0xff] %vm39_vm2, %v36_v7 }

// kernel: gnn_forward.19
= control target key start
LH: loop header
LB: loop body
LE: loop exit
PB: predicated region body
PF: predicated region fallthrough
CT: control target
= control target key end

     0   :  { %vm34_vm0 = vcmask 523264   ;;  %s119_s1 = inlined_call_operand.vmem [shape: f32[64,128], index: 1, kind: input, shape index: {}]   ;;  %s120_s2 = inlined_call_operand.vmem [shape: f32[1,128], index: 2, kind: input, shape index: {}]   ;;  %s121_s0 = inlined_call_operand.vmem [shape: f32[16,64], index: 0, kind: input, shape index: {}]   ;;  %s122_s3 = inlined_call_operand.vmem [shape: f32[16,128], index: 3, kind: output, shape index: {}]  }
   0x1   :  { %v24_v0 = vld [vmem:[%s119_s1 + $0x30] sm:$0xff]  ;;  %v25_v1 = vld [vmem:[%s119_s1 + $0x38] sm:$0xff]  ;;  %v22_v2 = vld [vmem:[%s119_s1 + $0x20] sm:$0xff] }
   0x2   :  { %v29_v3 = vpack.c.bf16 %v25_v1, %v24_v0  ;;  %v23_v4 = vld [vmem:[%s119_s1 + $0x28] sm:$0xff]  ;;  %v20_v6 = vld [vmem:[%s119_s1 + $0x10] sm:$0xff]  ;;  %v21_v7 = vld [vmem:[%s119_s1 + $0x18] sm:$0xff] }
   0x3   :  { %v28_v5 = vpack.c.bf16 %v23_v4, %v22_v2  ;;  %v27_v8 = vpack.c.bf16 %v21_v7, %v20_v6  ;;  %v18_v9 = vld [vmem:[%s119_s1] sm:$0xff]  ;;  %v19_v10 = vld [vmem:[%s119_s1 + $0x8] sm:$0xff] }
   0x4   :  { %42 = vmatpush.bf16.msra.mxu0 %v29_v3  ;;  %v26_v11 = vpack.c.bf16 %v19_v10, %v18_v9  ;;  %v15_v12 = vld [vmem:[%s121_s0] sm:$0xff]  ;;  %v16_v13 = vld [vmem:[%s121_s0 + $0x8] sm:$0xff] }
   0x5   :  { %v17_v14 = vpack.c.bf16 %v16_v13, %v15_v12  ;;  %v59_v15 = vld [vmem:[%s120_s2] ss:$0 sm:$0xff] }
   0x8   :  { %43 = vmatpush.bf16.msra.mxu0 %v28_v5 }
   0xc   :  { %44 = vmatpush.bf16.msra.mxu0 %v27_v8 }
  0x10   :  { %45 = vmatpush.bf16.msra.mxu0 %v26_v11 }
  0x13   :  { %58 = vmatmul.msk.bf16.vlgmr.msra.gmra.mxu0 %vm34_vm0, %v17_v14 }
  0x90   :  { %v47_v16 = vpop.f32.mrf.mxu0 }
  0x91   :  { %v48_v17 = vadd.f32 %v59_v15, %v47_v16 }
  0x93   :  { %52 = vst [vmem:[%s122_s3] sm:$0xff] %v48_v17 }
  0x98   :  { %v49_v18 = vpop.f32.mrf.mxu0 }
  0x99   :  { %v50_v19 = vadd.f32 %v59_v15, %v49_v18 }
  0x9b   :  { %53 = vst [vmem:[%s122_s3 + $0x8] sm:$0xff] %v50_v19 }

// kernel: gnn_forward.20
= control target key start
LH: loop header
LB: loop body
LE: loop exit
PB: predicated region body
PF: predicated region fallthrough
CT: control target
= control target key end

     0   :  { %vm42_vm0 = vcmask 523264   ;;  %vm166_vm7 = vcmask 15360   ;;  %s347_s3 = inlined_call_operand.vmem [shape: f32[64,64], index: 3, kind: input, shape index: {}]   ;;  %s348_s2 = inlined_call_operand.vmem [shape: f32[48,64], index: 2, kind: input, shape index: {}]   ;;  %s349_s4 = inlined_call_operand.vmem [shape: f32[64,2], index: 4, kind: input, shape index: {}]   ;;  %s350_s0 = inlined_call_operand.vmem [shape: f32[48,64], index: 0, kind: input, shape index: {}]   ;;  %s351_s1 = inlined_call_operand.vmem [shape: f32[48,64], index: 1, kind: input, shape index: {}]   ;;  %s352_s5 = inlined_call_operand.vmem [shape: f32[48,2], index: 5, kind: output, shape index: {}]  }
   0x1   :  { %v36_v0 = vld [vmem:[%s347_s3 + $0x30] sm:$0xff]  ;;  %v37_v1 = vld [vmem:[%s347_s3 + $0x38] sm:$0xff]  ;;  %v34_v2 = vld [vmem:[%s347_s3 + $0x20] sm:$0xff] }
   0x2   :  { %v41_v3 = vpack.c.bf16 %v37_v1, %v36_v0  ;;  %v35_v4 = vld [vmem:[%s347_s3 + $0x28] sm:$0xff]  ;;  %v32_v6 = vld [vmem:[%s347_s3 + $0x10] sm:$0xff]  ;;  %v33_v7 = vld [vmem:[%s347_s3 + $0x18] sm:$0xff] }
   0x3   :  { %v40_v5 = vpack.c.bf16 %v35_v4, %v34_v2  ;;  %v39_v8 = vpack.c.bf16 %v33_v7, %v32_v6  ;;  %v30_v9 = vld [vmem:[%s347_s3] sm:$0xff]  ;;  %v31_v10 = vld [vmem:[%s347_s3 + $0x8] sm:$0xff]  ;;  %v23_v11 = vld [vmem:[%s348_s2 + $0x10] sm:$0xff] }
   0x4   :  { %183 = vmatpush.bf16.msra.mxu2 %v41_v3  ;;  %56 = vmatpush.bf16.msra.mxu0 %v41_v3  ;;  %v38_v12 = vpack.c.bf16 %v31_v10, %v30_v9  ;;  %v24_v13 = vld [vmem:[%s348_s2 + $0x18] sm:$0xff]  ;;  %v21_v14 = vld [vmem:[%s348_s2] sm:$0xff]  ;;  %v22_v15 = vld [vmem:[%s348_s2 + $0x8] sm:$0xff] }
   0x5   :  { %v28_v16 = vpack.c.bf16 %v24_v13, %v23_v11  ;;  %v27_v17 = vpack.c.bf16 %v22_v15, %v21_v14  ;;  %v25_v18 = vld [vmem:[%s348_s2 + $0x20] sm:$0xff]  ;;  %v26_v19 = vld [vmem:[%s348_s2 + $0x28] sm:$0xff]  ;;  %v127_v21 = vld [vmem:[%s349_s4 + $0x30] sm:$0xff] }
   0x6   :  { %v29_v20 = vpack.c.bf16 %v26_v19, %v25_v18  ;;  %v128_v22 = vld [vmem:[%s349_s4 + $0x38] sm:$0xff]  ;;  %v125_v24 = vld [vmem:[%s349_s4 + $0x20] sm:$0xff]  ;;  %v126_v25 = vld [vmem:[%s349_s4 + $0x28] sm:$0xff] }
   0x7   :  { %v132_v23 = vpack.c.bf16 %v128_v22, %v127_v21  ;;  %v131_v26 = vpack.c.bf16 %v126_v25, %v125_v24  ;;  %v123_v27 = vld [vmem:[%s349_s4 + $0x10] sm:$0xff]  ;;  %v124_v28 = vld [vmem:[%s349_s4 + $0x18] sm:$0xff]  ;;  %v121_v30 = vld [vmem:[%s349_s4] sm:$0xff] }
   0x8   :  { %184 = vmatpush.bf16.msra.mxu2 %v40_v5  ;;  %57 = vmatpush.bf16.msra.mxu0 %v40_v5  ;;  %v130_v29 = vpack.c.bf16 %v124_v28, %v123_v27  ;;  %v122_v31 = vld [vmem:[%s349_s4 + $0x8] sm:$0xff]  ;;  %v76_v33 = vld [vmem:[%s350_s0] sm:$0xff]  ;;  %v78_v40 = vld [vmem:[%s350_s0 + $0x10] sm:$0xff] }
   0x9   :  { %187 = vmatpush.bf16.msra.mxu3 %v132_v23  ;;  %146 = vmatpush.bf16.msra.mxu1 %v132_v23  ;;  %v129_v32 = vpack.c.bf16 %v122_v31, %v121_v30  ;;  %v82_v34 = vld [vmem:[%s351_s1] sm:$0xff]  ;;  %v77_v37 = vld [vmem:[%s350_s0 + $0x8] sm:$0xff]  ;;  %v84_v41 = vld [vmem:[%s351_s1 + $0x10] sm:$0xff] }
   0xa   :  { %v88_v35 = vadd.f32 %v82_v34, %v76_v33  ;;  %v83_v38 = vld [vmem:[%s351_s1 + $0x8] sm:$0xff]  ;;  %v90_v44 = vadd.f32 %v84_v41, %v78_v40  ;;  %v79_v46 = vld [vmem:[%s350_s0 + $0x18] sm:$0xff]  ;;  %v80_v62 = vld [vmem:[%s350_s0 + $0x20] sm:$0xff] }
   0xb   :  { %v89_v42 = vadd.f32 %v83_v38, %v77_v37  ;;  %v85_v47 = vld [vmem:[%s351_s1 + $0x18] sm:$0xff]  ;;  %v86_v63 = vld [vmem:[%s351_s1 + $0x20] sm:$0xff]  ;;  %v81_v3 = vld [vmem:[%s350_s0 + $0x28] sm:$0xff] }
   0xc   :  { %185 = vmatpush.bf16.msra.mxu2 %v39_v8  ;;  %58 = vmatpush.bf16.msra.mxu0 %v39_v8  ;;  %v91_v50 = vadd.f32 %v85_v47, %v79_v46  ;;  %v92_v2 = vadd.f32 %v86_v63, %v80_v62  ;;  %v87_v4 = vld [vmem:[%s351_s1 + $0x28] sm:$0xff] }
   0xd   :  { %188 = vmatpush.bf16.msra.mxu3 %v131_v26  ;;  %147 = vmatpush.bf16.msra.mxu1 %v131_v26  ;;  %v93_v6 = vadd.f32 %v87_v4, %v81_v3 }
  0x10   :  { %186 = vmatpush.bf16.msra.mxu2 %v38_v12  ;;  %59 = vmatpush.bf16.msra.mxu0 %v38_v12 }
  0x11   :  { %189 = vmatpush.bf16.msra.mxu3 %v130_v29  ;;  %148 = vmatpush.bf16.msra.mxu1 %v130_v29 }
  0x13   :  { %178 = vmatmul.msk.bf16.vlgmr.msra.gmra.mxu2 %vm42_vm0, %v28_v16  ;;  %177 = vmatmul.msk.bf16.vlgmr.msra.gmra.mxu0 %vm42_vm0, %v27_v17 }
  0x15   :  { %190 = vmatpush.bf16.msra.mxu3 %v129_v32  ;;  %149 = vmatpush.bf16.msra.mxu1 %v129_v32 }
  0x23   :  { %179 = vmatmul.msk.bf16.gmra.mxu2 %vm42_vm0, %v29_v20 }
  0x90   :  { %v61_v36 = vpop.f32.mrf.mxu0 }
  0x91   :  { %v94_v39 = vadd.f32 %v88_v35, %v61_v36 }
  0x93   :  { %v106_v45 = vmul.f32 0.1, %v94_v39  ;;  %vm100_vm1 = vcmp.ge.f32.partialorder %v94_v39, 0.0 }
  0x95   :  { %v112_v53 = vsel %vm100_vm1, %v94_v39, %v106_v45 }
  0x96   :  { %v66_v43 = vpop.f32.mrf.mxu2 }
  0x97   :  { %v96_v51 = vadd.f32 %v90_v44, %v66_v43 }
  0x98   :  { %v63_v48 = vpop.f32.mrf.mxu0 }
  0x99   :  { %v95_v49 = vadd.f32 %v89_v42, %v63_v48  ;;  %v108_v57 = vmul.f32 0.1, %v96_v51  ;;  %vm102_vm3 = vcmp.ge.f32.partialorder %v96_v51, 0.0 }
  0x9b   :  { %vm101_vm2 = vcmp.ge.f32.partialorder %v95_v49, 0.0  ;;  %v107_v52 = vmul.f32 0.1, %v95_v49  ;;  %v114_v60 = vsel %vm102_vm3, %v96_v51, %v108_v57 }
  0x9d   :  { %v113_v54 = vsel %vm101_vm2, %v95_v49, %v107_v52 }
  0x9e   :  { %v68_v55 = vpop.f32.mrf.mxu2  ;;  %v118_v56 = vpack.c.bf16 %v113_v54, %v112_v53 }
  0x9f   :  { %v97_v58 = vadd.f32 %v91_v50, %v68_v55 }
  0xa0   :  { %180 = vmatmul.msk.bf16.vlgmr.msra.gmra.mxu1 %vm42_vm0, %v118_v56 }
  0xa1   :  { %vm103_vm4 = vcmp.ge.f32.partialorder %v97_v58, 0.0  ;;  %v109_v59 = vmul.f32 0.1, %v97_v58 }
  0xa3   :  { %v115_v61 = vsel %vm103_vm4, %v97_v58, %v109_v59 }
  0xa4   :  { %v119_v0 = vpack.c.bf16 %v115_v61, %v114_v60 }
  0xa6   :  { %v71_v1 = vpop.f32.mrf.mxu2  ;;  %181 = vmatmul.msk.bf16.vlgmr.msra.gmra.mxu3 %vm42_vm0, %v119_v0 }
  0xa7   :  { %v98_v5 = vadd.f32 %v92_v2, %v71_v1 }
  0xa9   :  { %v110_v8 = vmul.f32 0.1, %v98_v5  ;;  %vm104_vm5 = vcmp.ge.f32.partialorder %v98_v5, 0.0 }
  0xab   :  { %v116_v11 = vsel %vm104_vm5, %v98_v5, %v110_v8 }
  0xae   :  { %v73_v7 = vpop.f32.mrf.mxu2 }
  0xaf   :  { %v99_v9 = vadd.f32 %v93_v6, %v73_v7 }
  0xb1   :  { %vm105_vm6 = vcmp.ge.f32.partialorder %v99_v9, 0.0  ;;  %v111_v10 = vmul.f32 0.1, %v99_v9 }
  0xb3   :  { %v117_v12 = vsel %vm105_vm6, %v99_v9, %v111_v10 }
  0xb4   :  { %v120_v13 = vpack.c.bf16 %v117_v12, %v116_v11 }
  0xb6   :  { %182 = vmatmul.msk.bf16.gmra.mxu3 %vm42_vm0, %v120_v13 }
 0x11d   :  { %v151_v14 = vpop.f32.mrf.mxu1 }
 0x11e   :  { %167 = vst.msk [vmem:[%s352_s5] sm:$0xff] %vm166_vm7, %v151_v14 }
 0x125   :  { %v153_v15 = vpop.f32.mrf.mxu1 }
 0x126   :  { %168 = vst.msk [vmem:[%s352_s5 + $0x8] sm:$0xff] %vm166_vm7, %v153_v15 }
 0x129   :  { %v156_v16 = vpop.f32.mrf.mxu3 }
 0x12a   :  { %169 = vst.msk [vmem:[%s352_s5 + $0x10] sm:$0xff] %vm166_vm7, %v156_v16 }
 0x131   :  { %v158_v17 = vpop.f32.mrf.mxu3 }
 0x132   :  { %170 = vst.msk [vmem:[%s352_s5 + $0x18] sm:$0xff] %vm166_vm7, %v158_v17 }
 0x139   :  { %v161_v18 = vpop.f32.mrf.mxu3 }
 0x13a   :  { %171 = vst.msk [vmem:[%s352_s5 + $0x20] sm:$0xff] %vm166_vm7, %v161_v18 }
 0x141   :  { %v163_v19 = vpop.f32.mrf.mxu3 }
 0x142   :  { %172 = vst.msk [vmem:[%s352_s5 + $0x28] sm:$0xff] %vm166_vm7, %v163_v19 }

// kernel: gnn_forward.21
= control target key start
LH: loop header
LB: loop body
LE: loop exit
PB: predicated region body
PF: predicated region fallthrough
CT: control target
= control target key end

     0   :  { %vm25_vm0 = vcmask 523264   ;;  %v191_v8 = vmov 64.0   ;;  %s264_s0 = inlined_call_operand.vmem [shape: f32[16,64], index: 0, kind: input, shape index: {}]   ;;  %s265_s1 = inlined_call_operand.vmem [shape: f32[16,64], index: 1, kind: input, shape index: {}]   ;;  %s266_s2 = inlined_call_operand.vmem [shape: f32[1,64], index: 2, kind: input, shape index: {}]   ;;  %s267_s3 = inlined_call_operand.vmem [shape: f32[1,64], index: 3, kind: input, shape index: {}]   ;;  %s268_s4 = inlined_call_operand.vmem [shape: f32[16,64], index: 4, kind: output, shape index: {}]  }
   0x1   :  { %v17_v0 = vld [vmem:[%s264_s0] sm:$0xff]  ;;  %v18_v3 = vld [vmem:[%s264_s0 + $0x8] sm:$0xff]  ;;  %177 = vrcp.f32 %v191_v8 }
   0x2   :  { %v19_v1 = vld [vmem:[%s265_s1] sm:$0xff]  ;;  %v20_v4 = vld [vmem:[%s265_s1 + $0x8] sm:$0xff] }
   0x3   :  { %v21_v2 = vadd.f32 %v19_v1, %v17_v0  ;;  %v22_v6 = vadd.f32 %v20_v4, %v18_v3  ;;  %v175_v39 = vld [vmem:[%s266_s2] ss:$0 sm:$0xff] }
   0x4   :  { %v176_v42 = vld [vmem:[%s267_s3] ss:$0 sm:$0xff] }
   0x5   :  { %v26_v5 = vsel %vm25_vm0, %v21_v2, 0.0  ;;  %v29_v7 = vsel %vm25_vm0, %v22_v6, 0.0 }
   0x6   :  { %27 = vadd.xlane.f32.xlu0 %v26_v5 }
   0x7   :  { %v178_v9 = vpop.eup %177 }
   0x8   :  { %v33_v10 = vmul.f32 64.0, %v178_v9  ;;  %vm37_vm1 = vweird.f32 %v178_v9 }
   0xa   :  { %v34_v11 = vsub.f32 1.0, %v33_v10 }
   0xc   :  { %v35_v12 = vmul.f32 %v178_v9, %v34_v11 }
   0xe   :  { %30 = vadd.xlane.f32.xlu0 %v29_v7  ;;  %v36_v13 = vadd.f32 %v178_v9, %v35_v12 }
  0x10   :  { %v38_v14 = vsel %vm37_vm1, %v178_v9, %v36_v13 }
  0x79   :  { %v28_v15 = vpop.xlane.xlu0 %27 }
  0x7a   :  { %v39_v16 = vmul.f32 %v38_v14, %v28_v15 }
  0x7c   :  { %v41_v17 = vsub.f32 %v21_v2, %v39_v16 }
  0x7e   :  { %v43_v18 = vmul.f32 %v41_v17, %v41_v17 }
  0x80   :  { %v45_v19 = vsel %vm25_vm0, %v43_v18, 0.0 }
  0x81   :  { %46 = vadd.xlane.f32.xlu1 %v45_v19  ;;  %v31_v20 = vpop.xlane.xlu0 %30 }
  0x82   :  { %v40_v21 = vmul.f32 %v38_v14, %v31_v20 }
  0x84   :  { %v42_v22 = vsub.f32 %v22_v6, %v40_v21 }
  0x86   :  { %v44_v23 = vmul.f32 %v42_v22, %v42_v22 }
  0x88   :  { %v48_v24 = vsel %vm25_vm0, %v44_v23, 0.0 }
  0x89   :  { %49 = vadd.xlane.f32.xlu1 %v48_v24 }
  0xf4   :  { %v47_v25 = vpop.xlane.xlu1 %46 }
  0xf5   :  { %v51_v26 = vmul.f32 %v47_v25, %v38_v14 }
  0xf7   :  { %v53_v27 = vadd.f32 1e-05, %v51_v26 }
  0xf9   :  { %179 = vrsqrt.f32 %v53_v27  ;;  %vm61_vm3 = vweird.f32 %v53_v27 }
  0xfc   :  { %v50_v28 = vpop.xlane.xlu1 %49 }
  0xfd   :  { %v52_v29 = vmul.f32 %v50_v28, %v38_v14 }
  0xff   :  { %v180_v30 = vpop.eup %179  ;;  %v54_v31 = vadd.f32 1e-05, %v52_v29 }
 0x100   :  { %v56_v32 = vmul.f32 %v180_v30, %v53_v27  ;;  %vm62_vm2 = vweird.f32 %v180_v30 }
 0x101   :  { %181 = vrsqrt.f32 %v54_v31  ;;  %vm63_vm4 = vmor %vm61_vm3, %vm62_vm2  ;;  %vm71_vm6 = vweird.f32 %v54_v31 }
 0x102   :  { %v57_v33 = vmul.f32 %v180_v30, %v56_v32 }
 0x104   :  { %v58_v34 = vmul.f32 0.5, %v57_v33 }
 0x106   :  { %v59_v35 = vsub.f32 1.5, %v58_v34 }
 0x107   :  { %v182_v36 = vpop.eup %181 }
 0x108   :  { %v60_v37 = vmul.f32 %v180_v30, %v59_v35  ;;  %v66_v38 = vmul.f32 %v182_v36, %v54_v31  ;;  %vm72_vm5 = vweird.f32 %v182_v36 }
 0x109   :  { %vm73_vm7 = vmor %vm71_vm6, %vm72_vm5 }
 0x10a   :  { %v64_v40 = vsel %vm63_vm4, %v180_v30, %v60_v37  ;;  %v67_v41 = vmul.f32 %v182_v36, %v66_v38 }
 0x10b   :  { %v75_v43 = vmul.f32 %v64_v40, %v41_v17 }
 0x10c   :  { %v68_v44 = vmul.f32 0.5, %v67_v41  ;;  %v192_v41 = vmov -1.0  }
 0x10d   :  { %v80_v45 = vmul.f32 %v175_v39, %v75_v43 }
 0x10e   :  { %v69_v46 = vsub.f32 1.5, %v68_v44 }
 0x10f   :  { %v240_v47 = vadd.f32 %v176_v42, %v80_v45 }
 0x110   :  { %v70_v48 = vmul.f32 %v182_v36, %v69_v46 }
 0x111   :  { %v243_v49 = vmul.f32 0.70710677, %v240_v47  ;;  %v87_v46 = vmul.f32 0.5, %v240_v47 }
 0x112   :  { %v74_v50 = vsel %vm73_vm7, %v182_v36, %v70_v48 }
 0x113   :  { %v95_v51 = vand.u32 2147483647, %v243_v49  ;;  %v76_v52 = vmul.f32 %v74_v50, %v42_v22  ;;  %vm91_vm1 = vcmp.ge.f32.partialorder %v243_v49, 0.0 }
 0x115   :  { %v97_v53 = vmul.f32 0.3275911, %v95_v51  ;;  %v81_v54 = vmul.f32 %v175_v39, %v76_v52  ;;  %v149_v8 = vsub.f32 0.0, %v95_v51 }
 0x117   :  { %v99_v55 = vadd.f32 1.0, %v97_v53  ;;  %v246_v56 = vadd.f32 %v176_v42, %v81_v54  ;;  %v151_v14 = vmul.f32 %v149_v8, %v95_v51  ;;  %v93_v42 = vsel %vm91_vm1, 1.0, %v192_v41 }
 0x119   :  { %183 = vrcp.f32 %v99_v55  ;;  %v249_v57 = vmul.f32 0.70710677, %v246_v56  ;;  %v112_v0 = vand.u32 2147483648, %v99_v55  ;;  %v110_v2 = vand.u32 2147483647, %v99_v55 }
 0x11a   :  { %vm106_vm9 = vweird.f32 %v99_v55  ;;  %v153_v21 = vmul.f32 1.442695, %v151_v14 }
 0x11b   :  { %v96_v58 = vand.u32 2147483647, %v249_v57  ;;  %v113_v4 = vor.u32 1.1754944e-38, %v112_v0  ;;  %vm111_vm11 = vcmp.eq.f32.partialorder %v110_v2, 8.507059e+37  ;;  %vm92_vm2 = vcmp.ge.f32.partialorder %v249_v57, 0.0 }
 0x11c   :  { %v94_v54 = vsel %vm92_vm2, 1.0, %v192_v41 }
 0x11d   :  { %v98_v59 = vmul.f32 0.3275911, %v96_v58  ;;  %v150_v25 = vsub.f32 0.0, %v96_v58 }
 0x11f   :  { %v184_v60 = vpop.eup %183  ;;  %v100_v62 = vadd.f32 1.0, %v98_v59  ;;  %v152_v30 = vmul.f32 %v150_v25, %v96_v58  ;;  %v88_v58 = vmul.f32 0.5, %v246_v56 }
 0x120   :  { %v102_v61 = vmul.f32 %v184_v60, %v99_v55  ;;  %vm107_vm8 = vweird.f32 %v184_v60 }
 0x121   :  { %185 = vrcp.f32 %v100_v62  ;;  %vm108_vm10 = vmor %vm106_vm9, %vm107_vm8  ;;  %v127_v13 = vand.u32 2147483648, %v100_v62  ;;  %v125_v16 = vand.u32 2147483647, %v100_v62  ;;  %vm121_vm13 = vweird.f32 %v100_v62 }
 0x122   :  { %v103_v63 = vsub.f32 1.0, %v102_v61  ;;  %187 = vpow2.f32 %v153_v21  ;;  %v155_v35 = vmul.f32 1.442695, %v152_v30 }
 0x123   :  { %v128_v20 = vor.u32 1.1754944e-38, %v127_v13  ;;  %vm126_vm15 = vcmp.eq.f32.partialorder %v125_v16, 8.507059e+37 }
 0x124   :  { %v104_v1 = vmul.f32 %v184_v60, %v103_v63  ;;  %189 = vpow2.f32 %v155_v35 }
 0x126   :  { %v105_v3 = vadd.f32 %v184_v60, %v104_v1 }
 0x127   :  { %v186_v5 = vpop.eup %185 }
 0x128   :  { %v109_v6 = vsel %vm108_vm10, %v184_v60, %v105_v3  ;;  %v117_v9 = vmul.f32 %v186_v5, %v100_v62  ;;  %vm122_vm12 = vweird.f32 %v186_v5  ;;  %v188_v36 = vpop.eup %187 }
 0x129   :  { %v114_v7 = vsel %vm111_vm11, %v113_v4, %v109_v6  ;;  %vm123_vm14 = vmor %vm121_vm13, %vm122_vm12 }
 0x12a   :  { %v131_v10 = vmul.f32 1.0614054, %v114_v7  ;;  %v118_v11 = vsub.f32 1.0, %v117_v9  ;;  %v190_v51 = vpop.eup %189 }
 0x12c   :  { %v133_v12 = vadd.f32 -1.4531521, %v131_v10  ;;  %v119_v15 = vmul.f32 %v186_v5, %v118_v11 }
 0x12e   :  { %v135_v17 = vmul.f32 %v133_v12, %v114_v7  ;;  %v120_v18 = vadd.f32 %v186_v5, %v119_v15 }
 0x130   :  { %v137_v19 = vadd.f32 1.4214138, %v135_v17  ;;  %v124_v22 = vsel %vm123_vm14, %v186_v5, %v120_v18 }
 0x131   :  { %v129_v24 = vsel %vm126_vm15, %v128_v20, %v124_v22 }
 0x132   :  { %v139_v23 = vmul.f32 %v137_v19, %v114_v7  ;;  %v132_v26 = vmul.f32 1.0614054, %v129_v24 }
 0x134   :  { %v141_v27 = vadd.f32 -0.28449672, %v139_v23  ;;  %v134_v28 = vadd.f32 -1.4531521, %v132_v26 }
 0x136   :  { %v143_v29 = vmul.f32 %v141_v27, %v114_v7  ;;  %v136_v31 = vmul.f32 %v134_v28, %v129_v24 }
 0x138   :  { %v145_v32 = vadd.f32 0.2548296, %v143_v29  ;;  %v138_v33 = vadd.f32 1.4214138, %v136_v31 }
 0x13a   :  { %v147_v34 = vmul.f32 %v145_v32, %v114_v7  ;;  %v140_v37 = vmul.f32 %v138_v33, %v129_v24 }
 0x13c   :  { %v157_v38 = vmul.f32 %v188_v36, %v147_v34  ;;  %v142_v39 = vadd.f32 -0.28449672, %v140_v37 }
 0x13e   :  { %v159_v40 = vsub.f32 1.0, %v157_v38  ;;  %v144_v43 = vmul.f32 %v142_v39, %v129_v24 }
 0x140   :  { %v161_v44 = vmul.f32 %v159_v40, %v93_v42  ;;  %v146_v45 = vadd.f32 0.2548296, %v144_v43 }
 0x142   :  { %v163_v48 = vadd.f32 1.0, %v161_v44  ;;  %v148_v50 = vmul.f32 %v146_v45, %v129_v24 }
 0x144   :  { %v165_v52 = vmul.f32 %v163_v48, %v87_v46  ;;  %v158_v53 = vmul.f32 %v190_v51, %v148_v50 }
 0x146   :  { %167 = vst.msk [vmem:[%s268_s4] sm:$0xff] %vm25_vm0, %v165_v52  ;;  %v160_v49 = vsub.f32 1.0, %v158_v53 }
 0x148   :  { %v162_v55 = vmul.f32 %v160_v49, %v94_v54 }
 0x14a   :  { %v164_v59 = vadd.f32 1.0, %v162_v55 }
 0x14c   :  { %v166_v60 = vmul.f32 %v164_v59, %v88_v58 }
 0x14e   :  { %168 = vst.msk [vmem:[%s268_s4 + $0x8] sm:$0xff] %vm25_vm0, %v166_v60 }

// kernel: gnn_forward.26
= control target key start
LH: loop header
LB: loop body
LE: loop exit
PB: predicated region body
PF: predicated region fallthrough
CT: control target
= control target key end

     0   :  { %vm34_vm0 = vcmask 523264   ;;  %s119_s1 = inlined_call_operand.vmem [shape: f32[64,64], index: 1, kind: input, shape index: {}]   ;;  %s120_s2 = inlined_call_operand.vmem [shape: f32[1,64], index: 2, kind: input, shape index: {}]   ;;  %s121_s0 = inlined_call_operand.vmem [shape: f32[16,64], index: 0, kind: input, shape index: {}]   ;;  %s122_s3 = inlined_call_operand.vmem [shape: f32[16,64], index: 3, kind: output, shape index: {}]  }
   0x1   :  { %v24_v0 = vld [vmem:[%s119_s1 + $0x30] sm:$0xff]  ;;  %v25_v1 = vld [vmem:[%s119_s1 + $0x38] sm:$0xff]  ;;  %v22_v2 = vld [vmem:[%s119_s1 + $0x20] sm:$0xff] }
   0x2   :  { %v29_v3 = vpack.c.bf16 %v25_v1, %v24_v0  ;;  %v23_v4 = vld [vmem:[%s119_s1 + $0x28] sm:$0xff]  ;;  %v20_v6 = vld [vmem:[%s119_s1 + $0x10] sm:$0xff]  ;;  %v21_v7 = vld [vmem:[%s119_s1 + $0x18] sm:$0xff] }
   0x3   :  { %v28_v5 = vpack.c.bf16 %v23_v4, %v22_v2  ;;  %v27_v8 = vpack.c.bf16 %v21_v7, %v20_v6  ;;  %v18_v9 = vld [vmem:[%s119_s1] sm:$0xff]  ;;  %v19_v10 = vld [vmem:[%s119_s1 + $0x8] sm:$0xff] }
   0x4   :  { %42 = vmatpush.bf16.msra.mxu0 %v29_v3  ;;  %v26_v11 = vpack.c.bf16 %v19_v10, %v18_v9  ;;  %v15_v12 = vld [vmem:[%s121_s0] sm:$0xff]  ;;  %v16_v13 = vld [vmem:[%s121_s0 + $0x8] sm:$0xff] }
   0x5   :  { %v17_v14 = vpack.c.bf16 %v16_v13, %v15_v12  ;;  %v59_v15 = vld [vmem:[%s120_s2] ss:$0 sm:$0xff] }
   0x8   :  { %43 = vmatpush.bf16.msra.mxu0 %v28_v5 }
   0xc   :  { %44 = vmatpush.bf16.msra.mxu0 %v27_v8 }
  0x10   :  { %45 = vmatpush.bf16.msra.mxu0 %v26_v11 }
  0x13   :  { %58 = vmatmul.msk.bf16.vlgmr.msra.gmra.mxu0 %vm34_vm0, %v17_v14 }
  0x90   :  { %v47_v16 = vpop.f32.mrf.mxu0 }
  0x91   :  { %v48_v17 = vadd.f32 %v59_v15, %v47_v16 }
  0x93   :  { %52 = vst.msk [vmem:[%s122_s3] sm:$0xff] %vm34_vm0, %v48_v17 }
  0x98   :  { %v49_v18 = vpop.f32.mrf.mxu0 }
  0x99   :  { %v50_v19 = vadd.f32 %v59_v15, %v49_v18 }
  0x9b   :  { %53 = vst.msk [vmem:[%s122_s3 + $0x8] sm:$0xff] %vm34_vm0, %v50_v19 }

// kernel: gnn_forward.27
= control target key start
LH: loop header
LB: loop body
LE: loop exit
PB: predicated region body
PF: predicated region fallthrough
CT: control target
= control target key end

     0   :  { %vm18_vm0 = vcmask 523264   ;;  %v184_v4 = vmov 64.0   ;;  %s246_s0 = inlined_call_operand.vmem [shape: f32[16,64], index: 0, kind: input, shape index: {}]   ;;  %s247_s1 = inlined_call_operand.vmem [shape: f32[1,64], index: 1, kind: input, shape index: {}]   ;;  %s248_s2 = inlined_call_operand.vmem [shape: f32[1,64], index: 2, kind: input, shape index: {}]   ;;  %s249_s3 = inlined_call_operand.vmem [shape: f32[16,64], index: 3, kind: output, shape index: {}]  }
   0x1   :  { %v14_v0 = vld [vmem:[%s246_s0] sm:$0xff]  ;;  %v15_v2 = vld [vmem:[%s246_s0 + $0x8] sm:$0xff]  ;;  %170 = vrcp.f32 %v184_v4 }
   0x2   :  { %v19_v1 = vsel %vm18_vm0, %v14_v0, 0.0  ;;  %v22_v3 = vsel %vm18_vm0, %v15_v2, 0.0  ;;  %v168_v35 = vld [vmem:[%s247_s1] ss:$0 sm:$0xff] }
   0x3   :  { %20 = vadd.xlane.f32.xlu0 %v19_v1  ;;  %v169_v38 = vld [vmem:[%s248_s2] ss:$0 sm:$0xff] }
   0x7   :  { %v171_v5 = vpop.eup %170 }
   0x8   :  { %v26_v6 = vmul.f32 64.0, %v171_v5  ;;  %vm30_vm1 = vweird.f32 %v171_v5 }
   0xa   :  { %v27_v7 = vsub.f32 1.0, %v26_v6 }
   0xb   :  { %23 = vadd.xlane.f32.xlu0 %v22_v3 }
   0xc   :  { %v28_v8 = vmul.f32 %v171_v5, %v27_v7 }
   0xe   :  { %v29_v9 = vadd.f32 %v171_v5, %v28_v8 }
  0x10   :  { %v31_v10 = vsel %vm30_vm1, %v171_v5, %v29_v9 }
  0x76   :  { %v21_v11 = vpop.xlane.xlu0 %20 }
  0x77   :  { %v32_v12 = vmul.f32 %v31_v10, %v21_v11 }
  0x79   :  { %v34_v13 = vsub.f32 %v14_v0, %v32_v12 }
  0x7b   :  { %v36_v14 = vmul.f32 %v34_v13, %v34_v13 }
  0x7d   :  { %v38_v15 = vsel %vm18_vm0, %v36_v14, 0.0 }
  0x7e   :  { %39 = vadd.xlane.f32.xlu1 %v38_v15  ;;  %v24_v16 = vpop.xlane.xlu0 %23 }
  0x7f   :  { %v33_v17 = vmul.f32 %v31_v10, %v24_v16 }
  0x81   :  { %v35_v18 = vsub.f32 %v15_v2, %v33_v17 }
  0x83   :  { %v37_v19 = vmul.f32 %v35_v18, %v35_v18 }
  0x85   :  { %v41_v20 = vsel %vm18_vm0, %v37_v19, 0.0 }
  0x86   :  { %42 = vadd.xlane.f32.xlu1 %v41_v20 }
  0xf1   :  { %v40_v21 = vpop.xlane.xlu1 %39 }
  0xf2   :  { %v44_v22 = vmul.f32 %v40_v21, %v31_v10 }
  0xf4   :  { %v46_v23 = vadd.f32 1e-05, %v44_v22 }
  0xf6   :  { %172 = vrsqrt.f32 %v46_v23  ;;  %vm54_vm3 = vweird.f32 %v46_v23 }
  0xf9   :  { %v43_v24 = vpop.xlane.xlu1 %42 }
  0xfa   :  { %v45_v25 = vmul.f32 %v43_v24, %v31_v10 }
  0xfc   :  { %v173_v26 = vpop.eup %172  ;;  %v47_v27 = vadd.f32 1e-05, %v45_v25 }
  0xfd   :  { %v49_v28 = vmul.f32 %v173_v26, %v46_v23  ;;  %vm55_vm2 = vweird.f32 %v173_v26 }
  0xfe   :  { %174 = vrsqrt.f32 %v47_v27  ;;  %vm56_vm4 = vmor %vm54_vm3, %vm55_vm2  ;;  %vm64_vm6 = vweird.f32 %v47_v27 }
  0xff   :  { %v50_v29 = vmul.f32 %v173_v26, %v49_v28 }
 0x101   :  { %v51_v30 = vmul.f32 0.5, %v50_v29 }
 0x103   :  { %v52_v31 = vsub.f32 1.5, %v51_v30 }
 0x104   :  { %v175_v32 = vpop.eup %174 }
 0x105   :  { %v53_v33 = vmul.f32 %v173_v26, %v52_v31  ;;  %v59_v34 = vmul.f32 %v175_v32, %v47_v27  ;;  %vm65_vm5 = vweird.f32 %v175_v32 }
 0x106   :  { %vm66_vm7 = vmor %vm64_vm6, %vm65_vm5 }
 0x107   :  { %v57_v36 = vsel %vm56_vm4, %v173_v26, %v53_v33  ;;  %v60_v37 = vmul.f32 %v175_v32, %v59_v34 }
 0x108   :  { %v68_v39 = vmul.f32 %v57_v36, %v34_v13 }
 0x109   :  { %v61_v40 = vmul.f32 0.5, %v60_v37  ;;  %v185_v37 = vmov -1.0  }
 0x10a   :  { %v73_v41 = vmul.f32 %v168_v35, %v68_v39 }
 0x10b   :  { %v62_v42 = vsub.f32 1.5, %v61_v40 }
 0x10c   :  { %v222_v43 = vadd.f32 %v169_v38, %v73_v41 }
 0x10d   :  { %v63_v44 = vmul.f32 %v175_v32, %v62_v42 }
 0x10e   :  { %v225_v45 = vmul.f32 0.70710677, %v222_v43  ;;  %v80_v42 = vmul.f32 0.5, %v222_v43 }
 0x10f   :  { %v67_v46 = vsel %vm66_vm7, %v175_v32, %v63_v44 }
 0x110   :  { %v88_v47 = vand.u32 2147483647, %v225_v45  ;;  %v69_v48 = vmul.f32 %v67_v46, %v35_v18  ;;  %vm84_vm1 = vcmp.ge.f32.partialorder %v225_v45, 0.0 }
 0x112   :  { %v90_v49 = vmul.f32 0.3275911, %v88_v47  ;;  %v74_v50 = vmul.f32 %v168_v35, %v69_v48  ;;  %v142_v4 = vsub.f32 0.0, %v88_v47 }
 0x114   :  { %v92_v51 = vadd.f32 1.0, %v90_v49  ;;  %v228_v52 = vadd.f32 %v169_v38, %v74_v50  ;;  %v144_v10 = vmul.f32 %v142_v4, %v88_v47  ;;  %v86_v38 = vsel %vm84_vm1, 1.0, %v185_v37 }
 0x116   :  { %176 = vrcp.f32 %v92_v51  ;;  %v231_v53 = vmul.f32 0.70710677, %v228_v52  ;;  %v105_v60 = vand.u32 2147483648, %v92_v51  ;;  %v103_v62 = vand.u32 2147483647, %v92_v51 }
 0x117   :  { %vm99_vm9 = vweird.f32 %v92_v51  ;;  %v146_v17 = vmul.f32 1.442695, %v144_v10 }
 0x118   :  { %v89_v54 = vand.u32 2147483647, %v231_v53  ;;  %v106_v0 = vor.u32 1.1754944e-38, %v105_v60  ;;  %vm104_vm11 = vcmp.eq.f32.partialorder %v103_v62, 8.507059e+37  ;;  %vm85_vm2 = vcmp.ge.f32.partialorder %v231_v53, 0.0 }
 0x119   :  { %v87_v50 = vsel %vm85_vm2, 1.0, %v185_v37 }
 0x11a   :  { %v91_v55 = vmul.f32 0.3275911, %v89_v54  ;;  %v143_v21 = vsub.f32 0.0, %v89_v54 }
 0x11c   :  { %v177_v56 = vpop.eup %176  ;;  %v93_v58 = vadd.f32 1.0, %v91_v55  ;;  %v145_v26 = vmul.f32 %v143_v21, %v89_v54  ;;  %v81_v54 = vmul.f32 0.5, %v228_v52 }
 0x11d   :  { %v95_v57 = vmul.f32 %v177_v56, %v92_v51  ;;  %vm100_vm8 = vweird.f32 %v177_v56 }
 0x11e   :  { %178 = vrcp.f32 %v93_v58  ;;  %vm101_vm10 = vmor %vm99_vm9, %vm100_vm8  ;;  %v120_v9 = vand.u32 2147483648, %v93_v58  ;;  %v118_v12 = vand.u32 2147483647, %v93_v58  ;;  %vm114_vm13 = vweird.f32 %v93_v58 }
 0x11f   :  { %v96_v59 = vsub.f32 1.0, %v95_v57  ;;  %180 = vpow2.f32 %v146_v17  ;;  %v148_v31 = vmul.f32 1.442695, %v145_v26 }
 0x120   :  { %v121_v16 = vor.u32 1.1754944e-38, %v120_v9  ;;  %vm119_vm15 = vcmp.eq.f32.partialorder %v118_v12, 8.507059e+37 }
 0x121   :  { %v97_v61 = vmul.f32 %v177_v56, %v96_v59  ;;  %182 = vpow2.f32 %v148_v31 }
 0x123   :  { %v98_v63 = vadd.f32 %v177_v56, %v97_v61 }
 0x124   :  { %v179_v1 = vpop.eup %178 }
 0x125   :  { %v102_v2 = vsel %vm101_vm10, %v177_v56, %v98_v63  ;;  %v110_v5 = vmul.f32 %v179_v1, %v93_v58  ;;  %vm115_vm12 = vweird.f32 %v179_v1  ;;  %v181_v32 = vpop.eup %180 }
 0x126   :  { %v107_v3 = vsel %vm104_vm11, %v106_v0, %v102_v2  ;;  %vm116_vm14 = vmor %vm114_vm13, %vm115_vm12 }
 0x127   :  { %v124_v6 = vmul.f32 1.0614054, %v107_v3  ;;  %v111_v7 = vsub.f32 1.0, %v110_v5  ;;  %v183_v47 = vpop.eup %182 }
 0x129   :  { %v126_v8 = vadd.f32 -1.4531521, %v124_v6  ;;  %v112_v11 = vmul.f32 %v179_v1, %v111_v7 }
 0x12b   :  { %v128_v13 = vmul.f32 %v126_v8, %v107_v3  ;;  %v113_v14 = vadd.f32 %v179_v1, %v112_v11 }
 0x12d   :  { %v130_v15 = vadd.f32 1.4214138, %v128_v13  ;;  %v117_v18 = vsel %vm116_vm14, %v179_v1, %v113_v14 }
 0x12e   :  { %v122_v20 = vsel %vm119_vm15, %v121_v16, %v117_v18 }
 0x12f   :  { %v132_v19 = vmul.f32 %v130_v15, %v107_v3  ;;  %v125_v22 = vmul.f32 1.0614054, %v122_v20 }
 0x131   :  { %v134_v23 = vadd.f32 -0.28449672, %v132_v19  ;;  %v127_v24 = vadd.f32 -1.4531521, %v125_v22 }
 0x133   :  { %v136_v25 = vmul.f32 %v134_v23, %v107_v3  ;;  %v129_v27 = vmul.f32 %v127_v24, %v122_v20 }
 0x135   :  { %v138_v28 = vadd.f32 0.2548296, %v136_v25  ;;  %v131_v29 = vadd.f32 1.4214138, %v129_v27 }
 0x137   :  { %v140_v30 = vmul.f32 %v138_v28, %v107_v3  ;;  %v133_v33 = vmul.f32 %v131_v29, %v122_v20 }
 0x139   :  { %v150_v34 = vmul.f32 %v181_v32, %v140_v30  ;;  %v135_v35 = vadd.f32 -0.28449672, %v133_v33 }
 0x13b   :  { %v152_v36 = vsub.f32 1.0, %v150_v34  ;;  %v137_v39 = vmul.f32 %v135_v35, %v122_v20 }
 0x13d   :  { %v154_v40 = vmul.f32 %v152_v36, %v86_v38  ;;  %v139_v41 = vadd.f32 0.2548296, %v137_v39 }
 0x13f   :  { %v156_v44 = vadd.f32 1.0, %v154_v40  ;;  %v141_v46 = vmul.f32 %v139_v41, %v122_v20 }
 0x141   :  { %v158_v48 = vmul.f32 %v156_v44, %v80_v42  ;;  %v151_v49 = vmul.f32 %v183_v47, %v141_v46 }
 0x143   :  { %160 = vst.msk [vmem:[%s249_s3] sm:$0xff] %vm18_vm0, %v158_v48  ;;  %v153_v45 = vsub.f32 1.0, %v151_v49 }
 0x145   :  { %v155_v51 = vmul.f32 %v153_v45, %v87_v50 }
 0x147   :  { %v157_v55 = vadd.f32 1.0, %v155_v51 }
 0x149   :  { %v159_v56 = vmul.f32 %v157_v55, %v81_v54 }
 0x14b   :  { %161 = vst.msk [vmem:[%s249_s3 + $0x8] sm:$0xff] %vm18_vm0, %v159_v56 }

// kernel: gnn_forward.33
= control target key start
LH: loop header
LB: loop body
LE: loop exit
PB: predicated region body
PF: predicated region fallthrough
CT: control target
= control target key end

     0   :  { %vm25_vm0 = vcmask 523264   ;;  %v227_v4 = vmov 64.0   ;;  %s325_s0 = inlined_call_operand.vmem [shape: f32[16,64], index: 0, kind: input, shape index: {}]   ;;  %s326_s1 = inlined_call_operand.vmem [shape: f32[1,64], index: 1, kind: input, shape index: {}]   ;;  %s327_s2 = inlined_call_operand.vmem [shape: f32[1,64], index: 2, kind: input, shape index: {}]   ;;  %s328_s4 = inlined_call_operand.vmem [shape: f32[1,128], index: 4, kind: input, shape index: {}]   ;;  %s329_s3 = inlined_call_operand.vmem [shape: f32[64,128], index: 3, kind: input, shape index: {}]   ;;  %s330_s5 = inlined_call_operand.vmem [shape: f32[16,128], index: 5, kind: output, shape index: {}]  }
   0x1   :  { %v21_v0 = vld [vmem:[%s325_s0] sm:$0xff]  ;;  %v22_v2 = vld [vmem:[%s325_s0 + $0x8] sm:$0xff]  ;;  %213 = vrcp.f32 %v227_v4  ;;  %v174_v23 = vld [vmem:[%s329_s3 + $0x30] sm:$0xff] }
   0x2   :  { %v26_v1 = vsel %vm25_vm0, %v21_v0, 0.0  ;;  %v29_v3 = vsel %vm25_vm0, %v22_v2, 0.0  ;;  %v175_v24 = vld [vmem:[%s329_s3 + $0x38] sm:$0xff]  ;;  %v172_v25 = vld [vmem:[%s329_s3 + $0x20] sm:$0xff]  ;;  %v173_v27 = vld [vmem:[%s329_s3 + $0x28] sm:$0xff] }
   0x3   :  { %27 = vadd.xlane.f32.xlu0 %v26_v1  ;;  %v179_v26 = vpack.c.bf16 %v175_v24, %v174_v23  ;;  %v178_v29 = vpack.c.bf16 %v173_v27, %v172_v25  ;;  %v170_v30 = vld [vmem:[%s329_s3 + $0x10] sm:$0xff]  ;;  %v171_v31 = vld [vmem:[%s329_s3 + $0x18] sm:$0xff]  ;;  %v168_v35 = vld [vmem:[%s329_s3] sm:$0xff] }
   0x4   :  { %v177_v33 = vpack.c.bf16 %v171_v31, %v170_v30  ;;  %v169_v36 = vld [vmem:[%s329_s3 + $0x8] sm:$0xff]  ;;  %v210_v47 = vld [vmem:[%s326_s1] ss:$0 sm:$0xff] }
   0x5   :  { %191 = vmatpush.bf16.msra.mxu0 %v179_v26  ;;  %v176_v40 = vpack.c.bf16 %v169_v36, %v168_v35  ;;  %v211_v51 = vld [vmem:[%s327_s2] ss:$0 sm:$0xff] }
   0x7   :  { %v214_v5 = vpop.eup %213 }
   0x8   :  { %v33_v6 = vmul.f32 64.0, %v214_v5  ;;  %vm37_vm1 = vweird.f32 %v214_v5 }
   0x9   :  { %192 = vmatpush.bf16.msra.mxu0 %v178_v29 }
   0xa   :  { %v34_v7 = vsub.f32 1.0, %v33_v6 }
   0xb   :  { %30 = vadd.xlane.f32.xlu0 %v29_v3 }
   0xc   :  { %v35_v8 = vmul.f32 %v214_v5, %v34_v7 }
   0xd   :  { %193 = vmatpush.bf16.msra.mxu0 %v177_v33 }
   0xe   :  { %v36_v9 = vadd.f32 %v214_v5, %v35_v8 }
  0x10   :  { %v38_v10 = vsel %vm37_vm1, %v214_v5, %v36_v9 }
  0x11   :  { %194 = vmatpush.bf16.msra.mxu0 %v176_v40 }
  0x76   :  { %v28_v11 = vpop.xlane.xlu0 %27 }
  0x77   :  { %v39_v12 = vmul.f32 %v38_v10, %v28_v11 }
  0x79   :  { %v41_v13 = vsub.f32 %v21_v0, %v39_v12 }
  0x7b   :  { %v43_v14 = vmul.f32 %v41_v13, %v41_v13 }
  0x7d   :  { %v45_v15 = vsel %vm25_vm0, %v43_v14, 0.0 }
  0x7e   :  { %46 = vadd.xlane.f32.xlu1 %v45_v15  ;;  %v31_v16 = vpop.xlane.xlu0 %30 }
  0x7f   :  { %v40_v17 = vmul.f32 %v38_v10, %v31_v16 }
  0x81   :  { %v42_v18 = vsub.f32 %v22_v2, %v40_v17 }
  0x83   :  { %v44_v19 = vmul.f32 %v42_v18, %v42_v18 }
  0x85   :  { %v48_v20 = vsel %vm25_vm0, %v44_v19, 0.0 }
  0x86   :  { %49 = vadd.xlane.f32.xlu1 %v48_v20 }
  0xf1   :  { %v47_v21 = vpop.xlane.xlu1 %46 }
  0xf2   :  { %v51_v22 = vmul.f32 %v47_v21, %v38_v10 }
  0xf4   :  { %v53_v28 = vadd.f32 1e-05, %v51_v22 }
  0xf6   :  { %215 = vrsqrt.f32 %v53_v28  ;;  %vm61_vm3 = vweird.f32 %v53_v28 }
  0xf9   :  { %v50_v32 = vpop.xlane.xlu1 %49 }
  0xfa   :  { %v52_v34 = vmul.f32 %v50_v32, %v38_v10 }
  0xfc   :  { %v216_v37 = vpop.eup %215  ;;  %v54_v38 = vadd.f32 1e-05, %v52_v34 }
  0xfd   :  { %v56_v39 = vmul.f32 %v216_v37, %v53_v28  ;;  %vm62_vm2 = vweird.f32 %v216_v37 }
  0xfe   :  { %217 = vrsqrt.f32 %v54_v38  ;;  %vm63_vm4 = vmor %vm61_vm3, %vm62_vm2  ;;  %vm71_vm6 = vweird.f32 %v54_v38 }
  0xff   :  { %v57_v41 = vmul.f32 %v216_v37, %v56_v39 }
 0x101   :  { %v58_v42 = vmul.f32 0.5, %v57_v41 }
 0x103   :  { %v59_v43 = vsub.f32 1.5, %v58_v42 }
 0x104   :  { %v218_v44 = vpop.eup %217 }
 0x105   :  { %v60_v45 = vmul.f32 %v216_v37, %v59_v43  ;;  %v66_v46 = vmul.f32 %v218_v44, %v54_v38  ;;  %vm72_vm5 = vweird.f32 %v218_v44 }
 0x106   :  { %vm73_vm7 = vmor %vm71_vm6, %vm72_vm5 }
 0x107   :  { %v64_v48 = vsel %vm63_vm4, %v216_v37, %v60_v45  ;;  %v67_v49 = vmul.f32 %v218_v44, %v66_v46 }
 0x108   :  { %v75_v50 = vmul.f32 %v64_v48, %v41_v13 }
 0x109   :  { %v68_v52 = vmul.f32 0.5, %v67_v49 }
 0x10a   :  { %v80_v53 = vmul.f32 %v210_v47, %v75_v50 }
 0x10b   :  { %v69_v54 = vsub.f32 1.5, %v68_v52 }
 0x10c   :  { %v299_v55 = vadd.f32 %v211_v51, %v80_v53  ;;  %v228_v53 = vmov -1.0  }
 0x10d   :  { %v70_v56 = vmul.f32 %v218_v44, %v69_v54 }
 0x10e   :  { %v302_v57 = vmul.f32 0.70710677, %v299_v55 }
 0x10f   :  { %v74_v58 = vsel %vm73_vm7, %v218_v44, %v70_v56 }
 0x110   :  { %v76_v59 = vmul.f32 %v74_v58, %v42_v18  ;;  %v95_v60 = vand.u32 2147483647, %v302_v57  ;;  %vm91_vm1 = vcmp.ge.f32.partialorder %v302_v57, 0.0 }
 0x111   :  { %v93_v54 = vsel %vm91_vm1, 1.0, %v228_v53 }
 0x112   :  { %v81_v61 = vmul.f32 %v210_v47, %v76_v59  ;;  %v97_v62 = vmul.f32 0.3275911, %v95_v60  ;;  %v149_v17 = vsub.f32 0.0, %v95_v60 }
 0x114   :  { %v305_v63 = vadd.f32 %v211_v51, %v81_v61  ;;  %v99_v0 = vadd.f32 1.0, %v97_v62  ;;  %v151_v24 = vmul.f32 %v149_v17, %v95_v60 }
 0x116   :  { %v308_v1 = vmul.f32 0.70710677, %v305_v63  ;;  %219 = vrcp.f32 %v99_v0  ;;  %v112_v8 = vand.u32 2147483648, %v99_v0  ;;  %v110_v10 = vand.u32 2147483647, %v99_v0 }
 0x117   :  { %vm106_vm9 = vweird.f32 %v99_v0  ;;  %v153_v32 = vmul.f32 1.442695, %v151_v24 }
 0x118   :  { %v96_v2 = vand.u32 2147483647, %v308_v1  ;;  %v113_v13 = vor.u32 1.1754944e-38, %v112_v8  ;;  %vm111_vm11 = vcmp.eq.f32.partialorder %v110_v10, 8.507059e+37  ;;  %vm92_vm2 = vcmp.ge.f32.partialorder %v308_v1, 0.0 }
 0x119   :  { %v94_v60 = vsel %vm92_vm2, 1.0, %v228_v53  ;;  %v212_v1 = vld [vmem:[%s328_s4] ss:$0 sm:$0xff] }
 0x11a   :  { %v98_v3 = vmul.f32 0.3275911, %v96_v2  ;;  %v150_v31 = vsub.f32 0.0, %v96_v2 }
 0x11c   :  { %v220_v4 = vpop.eup %219  ;;  %v100_v5 = vadd.f32 1.0, %v98_v3  ;;  %v152_v37 = vmul.f32 %v150_v31, %v96_v2  ;;  %v88_v2 = vmul.f32 0.5, %v305_v63 }
 0x11d   :  { %v102_v6 = vmul.f32 %v220_v4, %v99_v0  ;;  %vm107_vm8 = vweird.f32 %v220_v4  ;;  %v87_v0 = vmul.f32 0.5, %v299_v55 }
 0x11e   :  { %221 = vrcp.f32 %v100_v5  ;;  %vm108_vm10 = vmor %vm106_vm9, %vm107_vm8  ;;  %v127_v20 = vand.u32 2147483648, %v100_v5  ;;  %v125_v22 = vand.u32 2147483647, %v100_v5  ;;  %vm121_vm13 = vweird.f32 %v100_v5 }
 0x11f   :  { %v103_v7 = vsub.f32 1.0, %v102_v6  ;;  %223 = vpow2.f32 %v153_v32  ;;  %v155_v42 = vmul.f32 1.442695, %v152_v37 }
 0x120   :  { %v128_v27 = vor.u32 1.1754944e-38, %v127_v20  ;;  %vm126_vm15 = vcmp.eq.f32.partialorder %v125_v22, 8.507059e+37 }
 0x121   :  { %v104_v9 = vmul.f32 %v220_v4, %v103_v7  ;;  %225 = vpow2.f32 %v155_v42 }
 0x123   :  { %v105_v11 = vadd.f32 %v220_v4, %v104_v9 }
 0x124   :  { %v222_v12 = vpop.eup %221 }
 0x125   :  { %v109_v14 = vsel %vm108_vm10, %v220_v4, %v105_v11  ;;  %v117_v15 = vmul.f32 %v222_v12, %v100_v5  ;;  %vm122_vm12 = vweird.f32 %v222_v12  ;;  %v224_v45 = vpop.eup %223 }
 0x126   :  { %v114_v16 = vsel %vm111_vm11, %v113_v13, %v109_v14  ;;  %vm123_vm14 = vmor %vm121_vm13, %vm122_vm12 }
 0x127   :  { %v118_v18 = vsub.f32 1.0, %v117_v15  ;;  %v131_v19 = vmul.f32 1.0614054, %v114_v16  ;;  %v226_v52 = vpop.eup %225 }
 0x129   :  { %v119_v21 = vmul.f32 %v222_v12, %v118_v18  ;;  %v133_v23 = vadd.f32 -1.4531521, %v131_v19 }
 0x12b   :  { %v120_v25 = vadd.f32 %v222_v12, %v119_v21  ;;  %v135_v26 = vmul.f32 %v133_v23, %v114_v16 }
 0x12d   :  { %v124_v28 = vsel %vm123_vm14, %v222_v12, %v120_v25  ;;  %v137_v29 = vadd.f32 1.4214138, %v135_v26 }
 0x12e   :  { %v129_v30 = vsel %vm126_vm15, %v128_v27, %v124_v28 }
 0x12f   :  { %v132_v33 = vmul.f32 1.0614054, %v129_v30  ;;  %v139_v34 = vmul.f32 %v137_v29, %v114_v16 }
 0x131   :  { %v134_v35 = vadd.f32 -1.4531521, %v132_v33  ;;  %v141_v36 = vadd.f32 -0.28449672, %v139_v34 }
 0x133   :  { %v136_v38 = vmul.f32 %v134_v35, %v129_v30  ;;  %v143_v39 = vmul.f32 %v141_v36, %v114_v16 }
 0x135   :  { %v138_v40 = vadd.f32 1.4214138, %v136_v38  ;;  %v145_v41 = vadd.f32 0.2548296, %v143_v39 }
 0x137   :  { %v140_v43 = vmul.f32 %v138_v40, %v129_v30  ;;  %v147_v44 = vmul.f32 %v145_v41, %v114_v16 }
 0x139   :  { %v142_v46 = vadd.f32 -0.28449672, %v140_v43  ;;  %v157_v47 = vmul.f32 %v224_v45, %v147_v44 }
 0x13b   :  { %v144_v48 = vmul.f32 %v142_v46, %v129_v30  ;;  %v159_v50 = vsub.f32 1.0, %v157_v47 }
 0x13d   :  { %v146_v49 = vadd.f32 0.2548296, %v144_v48  ;;  %v161_v58 = vmul.f32 %v159_v50, %v93_v54 }
 0x13f   :  { %v148_v51 = vmul.f32 %v146_v49, %v129_v30  ;;  %v163_v62 = vadd.f32 1.0, %v161_v58 }
 0x141   :  { %v158_v56 = vmul.f32 %v226_v52, %v148_v51  ;;  %v165_v57 = vmul.f32 %v163_v62, %v87_v0 }
 0x143   :  { %v160_v59 = vsub.f32 1.0, %v158_v56 }
 0x145   :  { %v162_v61 = vmul.f32 %v160_v59, %v94_v60 }
 0x147   :  { %v164_v3 = vadd.f32 1.0, %v162_v61 }
 0x149   :  { %v166_v4 = vmul.f32 %v164_v3, %v88_v2 }
 0x14b   :  { %v167_v5 = vpack.c.bf16 %v166_v4, %v165_v57 }
 0x14d   :  { %207 = vmatmul.msk.bf16.vlgmr.msra.gmra.mxu0 %vm25_vm0, %v167_v5 }
 0x1ca   :  { %v196_v6 = vpop.f32.mrf.mxu0 }
 0x1cb   :  { %v197_v7 = vadd.f32 %v212_v1, %v196_v6 }
 0x1cd   :  { %201 = vst [vmem:[%s330_s5] sm:$0xff] %v197_v7 }
 0x1d2   :  { %v198_v8 = vpop.f32.mrf.mxu0 }
 0x1d3   :  { %v199_v55 = vadd.f32 %v212_v1, %v198_v8 }
 0x1d5   :  { %202 = vst [vmem:[%s330_s5 + $0x8] sm:$0xff] %v199_v55 }

// kernel: gnn_forward.25
= control target key start
LH: loop header
LB: loop body
LE: loop exit
PB: predicated region body
PF: predicated region fallthrough
CT: control target
= control target key end

     0   :  { %v7787_v0 = vmov 1   ;;  %v7788_v1 = vmov 0   ;;  %v7789_v6 = vmov 2   ;;  %v7790_v7 = vmov 3   ;;  %s7795_s27 = smov 64   ;;  %s10202_s0 = inlined_call_operand.vmem [shape: f32[32,64], index: 0, kind: input, shape index: {}]   ;;  %s10203_s1 = inlined_call_operand.vmem [shape: f32[32,64], index: 1, kind: input, shape index: {}]   ;;  %s10204_s2 = inlined_call_operand.vmem [shape: bf16[4096,64], index: 2, kind: input, shape index: {}]   ;;  %s10205_s3 = inlined_call_operand.vmem [shape: bf16[64,64], index: 3, kind: input, shape index: {}]   ;;  %s10206_s4 = inlined_call_operand.vmem [shape: f32[32,64], index: 4, kind: output, shape index: {}]  }
   0x1   :  { %7251 = vset.pattern.permute.xlu2 %v7787_v0  ;;  %7250 = vset.pattern.permute.xlu1 %v7788_v1  ;;  %v7880_v2 = vld [vmem:[%s10202_s0 + $0x10] sm:$0xff]  ;;  %v7885_v3 = vld [vmem:[%s10202_s0] sm:$0xff]  ;;  %v7893_v4 = vld [vmem:[%s10202_s0 + $0x18] sm:$0xff]  ;;  %v7791_v8 = vmov 4   ;;  %v7792_v9 = vmov 5   ;;  %v7793_v10 = vmov 6  }
   0x2   :  { %7249 = vset.pattern.permute.xlu0 %v7788_v1  ;;  %38 = vperm.xlu1 %7250, %v7880_v2   ;;  %v7898_v5 = vld [vmem:[%s10202_s0 + $0x8] sm:$0xff]  ;;  %v7794_v11 = vmov 7   ;;  %v7931_v13 = vld [vmem:[%s10203_s1] sm:$0xff]  ;;  %v7957_v26 = vld [vmem:[%s10203_s1 + $0x18] sm:$0xff]  ;;  %vm86_vm0 = vcmask 523264  }
   0x3   :  { %51 = vperm.xlu2 %7251, %v7885_v3   ;;  %28 = vperm.xlu0 %7249, %v7885_v3   ;;  %v7937_v14 = vld [vmem:[%s10203_s1 + $0x8] sm:$0xff]  ;;  %v7962_v28 = vld [vmem:[%s10203_s1 + $0x10] sm:$0xff]  ;;  %v6931_v37 = vld [vmem:[%s10204_s2 + $0x38] sm:$0xff] }
   0x4   :  { %4946 = vmatpush.bf16.msra.mxu1 %v6931_v37  ;;  %v6930_v39 = vld [vmem:[%s10204_s2 + $0x30] sm:$0xff]  ;;  %v6929_v44 = vld [vmem:[%s10204_s2 + $0x28] sm:$0xff]  ;;  %v6928_v47 = vld [vmem:[%s10204_s2 + $0x20] sm:$0xff]  ;;  %v3031_v1 = vpack.c.bf16 %v7937_v14, %v7931_v13 }
   0x5   :  { %v7183_v51 = vld [vmem:[%s10205_s3 + $0x18] sm:$0xff]  ;;  %v7182_v55 = vld [vmem:[%s10205_s3 + $0x10] sm:$0xff]  ;;  %v7181_v58 = vld [vmem:[%s10205_s3 + $0x8] sm:$0xff] }
   0x6   :  { %v6927_v52 = vld [vmem:[%s10204_s2 + $0x18] sm:$0xff]  ;;  %3075 = vmatpush.bf16.msra.mxu0 %v7183_v51  ;;  %v6926_v56 = vld [vmem:[%s10204_s2 + $0x10] sm:$0xff]  ;;  %v6925_v59 = vld [vmem:[%s10204_s2 + $0x8] sm:$0xff] }
   0x7   :  { %v7180_v60 = vld [vmem:[%s10205_s3] sm:$0xff] }
   0x8   :  { %4947 = vmatpush.bf16.msra.mxu1 %v6930_v39  ;;  %v6924_v61 = vld [vmem:[%s10204_s2] sm:$0xff] }
   0xa   :  { %43 = vperm.xlu1 %7250, %v7893_v4   ;;  %3076 = vmatpush.bf16.msra.mxu0 %v7182_v55 }
   0xb   :  { %55 = vperm.xlu2 %7251, %v7898_v5   ;;  %33 = vperm.xlu0 %7249, %v7898_v5  }
   0xc   :  { %4948 = vmatpush.bf16.msra.mxu1 %v6929_v44 }
   0xe   :  { %3077 = vmatpush.bf16.msra.mxu0 %v7181_v58  ;;  %v6935_v58 = vld [vmem:[%s10204_s2 + $0x58] sm:$0xff] }
  0x10   :  { %4949 = vmatpush.bf16.msra.mxu1 %v6928_v47 }
  0x12   :  { %7253 = vset.pattern.permute.xlu1 %v7787_v0  ;;  %3078 = vmatpush.bf16.msra.mxu0 %v7180_v60  ;;  %v6933_v60 = vld [vmem:[%s10204_s2 + $0x48] sm:$0xff] }
  0x13   :  { %7252 = vset.pattern.permute.xlu0 %v7787_v0  ;;  %63 = vperm.xlu1 %7253, %v7893_v4  }
  0x14   :  { %59 = vperm.xlu0 %7252, %v7880_v2   ;;  %7254 = vset.pattern.permute.xlu2 %v7789_v6 }
  0x15   :  { %105 = vperm.xlu2 %7254, %v7885_v3   ;;  %4950 = vmatpush.bf16.msra.mxu1 %v6927_v52 }
  0x16   :  { %5578 = vmatmul.msk.bf16.vlgmr.msra.gmra.mxu0 %vm86_vm0, %v3031_v1  ;;  %v6945_v1 = vld [vmem:[%s10204_s2 + $0xa8] sm:$0xff] }
  0x19   :  { %4951 = vmatpush.bf16.msra.mxu1 %v6926_v56 }
  0x1b   :  { %7256 = vset.pattern.permute.xlu1 %v7789_v6 }
  0x1c   :  { %115 = vperm.xlu1 %7256, %v7880_v2   ;;  %7255 = vset.pattern.permute.xlu0 %v7789_v6 }
  0x1d   :  { %120 = vperm.xlu2 %7254, %v7893_v4   ;;  %110 = vperm.xlu0 %7255, %v7898_v5  }
  0x1e   :  { %4952 = vmatpush.bf16.msra.mxu1 %v6925_v59  ;;  %v6934_v59 = vld [vmem:[%s10204_s2 + $0x50] sm:$0xff] }
  0x22   :  { %4953 = vmatpush.bf16.msra.mxu1 %v6924_v61  ;;  %v6947_v61 = vld [vmem:[%s10204_s2 + $0xb8] sm:$0xff] }
  0x23   :  { %4984 = vmatpush.bf16.msra.mxu3 %v6947_v61 }
  0x24   :  { %7257 = vset.pattern.permute.xlu1 %v7790_v7 }
  0x25   :  { %128 = vperm.xlu1 %7257, %v7885_v3   ;;  %7258 = vset.pattern.permute.xlu2 %v7790_v7 }
  0x26   :  { %7259 = vset.pattern.permute.xlu0 %v7790_v7  ;;  %132 = vperm.xlu2 %7258, %v7898_v5  }
  0x27   :  { %136 = vperm.xlu0 %7259, %v7880_v2  }
  0x2d   :  { %140 = vperm.xlu1 %7257, %v7893_v4  }
  0x2e   :  { %7260 = vset.pattern.permute.xlu2 %v7791_v8 }
  0x2f   :  { %181 = vperm.xlu2 %7260, %v7885_v3   ;;  %7261 = vset.pattern.permute.xlu0 %v7791_v8 }
  0x30   :  { %186 = vperm.xlu0 %7261, %v7898_v5  }
  0x35   :  { %7262 = vset.pattern.permute.xlu1 %v7791_v8 }
  0x36   :  { %191 = vperm.xlu1 %7262, %v7880_v2  }
  0x37   :  { %196 = vperm.xlu2 %7260, %v7893_v4  }
  0x38   :  { %7265 = vset.pattern.permute.xlu0 %v7792_v9 }
  0x39   :  { %212 = vperm.xlu0 %7265, %v7880_v2  }
  0x3e   :  { %7263 = vset.pattern.permute.xlu1 %v7792_v9 }
  0x3f   :  { %204 = vperm.xlu1 %7263, %v7885_v3   ;;  %7264 = vset.pattern.permute.xlu2 %v7792_v9 }
  0x40   :  { %208 = vperm.xlu2 %7264, %v7898_v5  }
  0x41   :  { %7267 = vset.pattern.permute.xlu0 %v7793_v10 }
  0x42   :  { %262 = vperm.xlu0 %7267, %v7898_v5  }
  0x47   :  { %216 = vperm.xlu1 %7263, %v7893_v4  }
  0x48   :  { %7266 = vset.pattern.permute.xlu2 %v7793_v10 }
  0x49   :  { %257 = vperm.xlu2 %7266, %v7885_v3  }
  0x4a   :  { %7271 = vset.pattern.permute.xlu0 %v7794_v11 }
  0x4b   :  { %288 = vperm.xlu0 %7271, %v7880_v2  }
  0x4f   :  { %7268 = vset.pattern.permute.xlu1 %v7793_v10 }
  0x50   :  { %267 = vperm.xlu1 %7268, %v7880_v2  }
  0x51   :  { %272 = vperm.xlu2 %7266, %v7893_v4  }
  0x58   :  { %7269 = vset.pattern.permute.xlu1 %v7794_v11 }
  0x59   :  { %280 = vperm.xlu1 %7269, %v7885_v3   ;;  %7270 = vset.pattern.permute.xlu2 %v7794_v11  ;;  %v7796_v11 = vmov 8  }
  0x5a   :  { %284 = vperm.xlu2 %7270, %v7898_v5   ;;  %7313 = vset.pattern.permute.xlu0 %v7796_v11 }
  0x5b   :  { %338 = vperm.xlu0 %7313, %v7898_v5  }
  0x5d   :  { %v52_v12 = vpop.permute.xlu2 %51 }
  0x5e   :  { %v66_v15 = vmul.f32 %v52_v12, %v7931_v13 }
  0x61   :  { %292 = vperm.xlu1 %7269, %v7893_v4  }
  0x62   :  { %7312 = vset.pattern.permute.xlu2 %v7796_v11 }
  0x65   :  { %v56_v16 = vpop.permute.xlu2 %55 }
  0x66   :  { %v67_v17 = vmul.f32 %v56_v16, %v7937_v14 }
  0x68   :  { %v7272_v18 = vpack.i.bf16 %v67_v17, %v66_v15  ;;  %v6939_v17 = vld [vmem:[%s10204_s2 + $0x78] sm:$0xff] }
  0x69   :  { %7314 = vset.pattern.permute.xlu1 %v7796_v11  ;;  %4965 = vmatpush.bf16.msra.mxu2 %v6939_v17 }
  0x6a   :  { %7273 = vrot.lane.b32.xlu2 %v7272_v18, %s7795_s27 }
  0x6f   :  { %v7942_v19 = vpop.permute.xlu2 %105 }
  0x74   :  { %v7944_v20 = vpop.permute.xlu1 %38 }
  0x75   :  { %v7946_v21 = vpop.permute.xlu0 %28 }
  0x77   :  { %v7948_v22 = vpop.permute.xlu2 %120 }
  0x7c   :  { %v7950_v23 = vpop.permute.xlu1 %43 }
  0x7d   :  { %v7952_v24 = vpop.permute.xlu0 %33 }
  0x80   :  { %v133_v25 = vpop.permute.xlu2 %132 }
  0x81   :  { %v144_v38 = vmul.f32 %v133_v25, %v7937_v14  ;;  %v7797_v25 = vmov 9  }
  0x82   :  { %7317 = vset.pattern.permute.xlu0 %v7797_v25 }
  0x83   :  { %364 = vperm.xlu0 %7317, %v7880_v2  }
  0x85   :  { %v64_v27 = vpop.permute.xlu1 %63 }
  0x86   :  { %v69_v29 = vmul.f32 %v64_v27, %v7957_v26  ;;  %v60_v30 = vpop.permute.xlu0 %59 }
  0x87   :  { %v68_v31 = vmul.f32 %v60_v30, %v7962_v28  ;;  %v47_v30 = vmul.f32 %v7952_v24, %v7937_v14  ;;  %v6937_v24 = vld [vmem:[%s10204_s2 + $0x68] sm:$0xff] }
  0x89   :  { %v7277_v32 = vpack.i.bf16 %v69_v29, %v68_v31  ;;  %v7966_v33 = vpop.permute.xlu2 %181  ;;  %v46_v29 = vmul.f32 %v7946_v21, %v7931_v13 }
  0x8b   :  { %7278 = vrot.lane.b32.xlu1 %v7277_v32, %s7795_s27 }
  0x8e   :  { %v7969_v34 = vpop.permute.xlu1 %115 }
  0x8f   :  { %v7971_v35 = vpop.permute.xlu0 %110 }
  0x91   :  { %v7973_v36 = vpop.permute.xlu2 %196 }
  0x97   :  { %v129_v40 = vpop.permute.xlu1 %128 }
  0x98   :  { %v143_v41 = vmul.f32 %v129_v40, %v7931_v13 }
  0x99   :  { %v137_v43 = vpop.permute.xlu0 %136 }
  0x9a   :  { %v7282_v42 = vpack.i.bf16 %v144_v38, %v143_v41  ;;  %v209_v45 = vpop.permute.xlu2 %208  ;;  %v145_v46 = vmul.f32 %v137_v43, %v7962_v28 }
  0x9b   :  { %v220_v62 = vmul.f32 %v209_v45, %v7937_v14 }
  0x9c   :  { %7283 = vrot.lane.b32.xlu2 %v7282_v42, %s7795_s27  ;;  %v6938_v42 = vld [vmem:[%s10204_s2 + $0x70] sm:$0xff] }
  0x9d   :  { %4966 = vmatpush.bf16.msra.mxu2 %v6938_v42 }
  0x9f   :  { %v141_v48 = vpop.permute.xlu1 %140 }
  0xa0   :  { %v146_v49 = vmul.f32 %v141_v48, %v7957_v26  ;;  %v6936_v48 = vld [vmem:[%s10204_s2 + $0x60] sm:$0xff] }
  0xa1   :  { %4967 = vmatpush.bf16.msra.mxu2 %v6937_v24 }
  0xa2   :  { %v7287_v50 = vpack.i.bf16 %v146_v49, %v145_v46  ;;  %v8009_v57 = vpop.permute.xlu0 %186 }
  0xa3   :  { %v7999_v53 = vpop.permute.xlu2 %257 }
  0xa4   :  { %7288 = vrot.lane.b32.xlu1 %v7287_v50, %s7795_s27 }
  0xa5   :  { %4968 = vmatpush.bf16.msra.mxu2 %v6936_v48 }
  0xa8   :  { %v8001_v54 = vpop.permute.xlu1 %191 }
  0xa9   :  { %4969 = vmatpush.bf16.msra.mxu2 %v6935_v58 }
  0xab   :  { %v8024_v63 = vpop.permute.xlu2 %272  ;;  %v213_v8 = vpop.permute.xlu0 %212 }
  0xac   :  { %v221_v9 = vmul.f32 %v213_v8, %v7962_v28  ;;  %v6943_v8 = vld [vmem:[%s10204_s2 + $0x98] sm:$0xff] }
  0xad   :  { %4970 = vmatpush.bf16.msra.mxu2 %v6934_v59 }
  0xb1   :  { %v205_v0 = vpop.permute.xlu1 %204  ;;  %4971 = vmatpush.bf16.msra.mxu2 %v6933_v60 }
  0xb2   :  { %v219_v6 = vmul.f32 %v205_v0, %v7931_v13  ;;  %v6946_v0 = vld [vmem:[%s10204_s2 + $0xb0] sm:$0xff] }
  0xb3   :  { %4985 = vmatpush.bf16.msra.mxu3 %v6946_v0 }
  0xb4   :  { %v7292_v7 = vpack.i.bf16 %v220_v62, %v219_v6  ;;  %v285_v15 = vpop.permute.xlu2 %284  ;;  %v8045_v37 = vpop.permute.xlu0 %262  ;;  %v6932_v62 = vld [vmem:[%s10204_s2 + $0x40] sm:$0xff]  ;;  %v3032_v6 = vpack.c.bf16 %v7957_v26, %v7962_v28 }
  0xb5   :  { %v296_v43 = vmul.f32 %v285_v15, %v7937_v14  ;;  %4972 = vmatpush.bf16.msra.mxu2 %v6932_v62  ;;  %v6949_v62 = vld [vmem:[%s10204_s2 + $0xc8] sm:$0xff] }
  0xb6   :  { %7293 = vrot.lane.b32.xlu2 %v7292_v7, %s7795_s27  ;;  %5579 = vmatmul.msk.bf16.gmra.mxu0 %vm86_vm0, %v3032_v6  ;;  %v6944_v7 = vld [vmem:[%s10204_s2 + $0xa0] sm:$0xff] }
  0xb7   :  { %4986 = vmatpush.bf16.msra.mxu3 %v6945_v1  ;;  %v126_v1 = vmul.f32 %v7948_v22, %v7957_v26 }
  0xb9   :  { %v217_v10 = vpop.permute.xlu1 %216 }
  0xba   :  { %v222_v12 = vmul.f32 %v217_v10, %v7957_v26  ;;  %v6942_v10 = vld [vmem:[%s10204_s2 + $0x90] sm:$0xff] }
  0xbb   :  { %4987 = vmatpush.bf16.msra.mxu3 %v6944_v7 }
  0xbc   :  { %v7297_v16 = vpack.i.bf16 %v222_v12, %v221_v9  ;;  %v123_v9 = vmul.f32 %v7942_v19, %v7931_v13  ;;  %v124_v12 = vmul.f32 %v7971_v35, %v7937_v14 }
  0xbd   :  { %v289_v46 = vpop.permute.xlu0 %288 }
  0xbe   :  { %7298 = vrot.lane.b32.xlu1 %v7297_v16, %s7795_s27  ;;  %v297_v50 = vmul.f32 %v289_v46, %v7962_v28 }
  0xbf   :  { %4988 = vmatpush.bf16.msra.mxu3 %v6943_v8 }
  0xc2   :  { %v8038_v18 = vpop.permute.xlu1 %267 }
  0xc3   :  { %4989 = vmatpush.bf16.msra.mxu3 %v6942_v10 }
  0xc4   :  { %v7274_v27 = vpop.permute.xlu2 %7273 }
  0xc5   :  { %v7276_v31 = vunpack.i.h.bf16 %v7274_v27  ;;  %v7275_v32 = vunpack.i.l.bf16 %v7274_v27  ;;  %v6941_v27 = vld [vmem:[%s10204_s2 + $0x88] sm:$0xff] }
  0xc7   :  { %v87_v38 = vsel %vm86_vm0, %v46_v29, %v7275_v32  ;;  %v88_v39 = vsel %vm86_vm0, %v47_v30, %v7276_v31  ;;  %4990 = vmatpush.bf16.msra.mxu3 %v6941_v27  ;;  %v6955_v30 = vld [vmem:[%s10204_s2 + $0xf8] sm:$0xff]  ;;  %v6940_v31 = vld [vmem:[%s10204_s2 + $0x80] sm:$0xff]  ;;  %v6954_v32 = vld [vmem:[%s10204_s2 + $0xf0] sm:$0xff] }
  0xc8   :  { %v91_v40 = vpack.c.bf16 %v87_v38, %v87_v38  ;;  %v92_v41 = vpack.c.bf16 %v88_v39, %v88_v39  ;;  %5003 = vmatpush.bf16.msrb.mxu0 %v6955_v30  ;;  %v48_v38 = vmul.f32 %v7944_v20, %v7962_v28  ;;  %v49_v39 = vmul.f32 %v7950_v23, %v7957_v26  ;;  %v6952_v23 = vld [vmem:[%s10204_s2 + $0xe0] sm:$0xff] }
  0xc9   :  { %v276_v30 = vmul.f32 %v8045_v37, %v7937_v14 }
  0xca   :  { %95 = vst [vmem:[#allocation2] sm:$0xf] %v91_v40 }
  0xcb   :  { %96 = vst [vmem:[#allocation2 + $0x80] sm:$0xf] %v92_v41  ;;  %v281_v21 = vpop.permute.xlu1 %280  ;;  %4991 = vmatpush.bf16.msra.mxu3 %v6940_v31 }
  0xcc   :  { %v295_v44 = vmul.f32 %v281_v21, %v7931_v13  ;;  %5004 = vmatpush.bf16.msrb.mxu0 %v6954_v32 }
  0xce   :  { %v7302_v45 = vpack.i.bf16 %v296_v43, %v295_v44  ;;  %v6953_v44 = vld [vmem:[%s10204_s2 + $0xe8] sm:$0xff] }
  0xd0   :  { %7303 = vrot.lane.b32.xlu2 %v7302_v45, %s7795_s27  ;;  %5005 = vmatpush.bf16.msrb.mxu0 %v6953_v44 }
  0xd1   :  { %v5582_v47 = vld [vmem:[#allocation2] sm:$0xf] }
  0xd2   :  { %v6876_v49 = vld [vmem:[#allocation2 + $0x7c] sm:$0xf0] }
  0xd3   :  { %v293_v51 = vpop.permute.xlu1 %292  ;;  %v5583_v52 = vor.u32 %v6876_v49, %v5582_v47  ;;  %v6951_v49 = vld [vmem:[%s10204_s2 + $0xd8] sm:$0xff] }
  0xd4   :  { %v298_v55 = vmul.f32 %v293_v51, %v7957_v26  ;;  %5006 = vmatpush.bf16.msrb.mxu0 %v6952_v23  ;;  %v199_v51 = vmul.f32 %v7966_v33, %v7931_v13 }
  0xd5   :  { %4954 = vmatmul.bf16.vlgmr.msra.gmra.mxu1 %v5583_v52  ;;  %v6950_v52 = vld [vmem:[%s10204_s2 + $0xd0] sm:$0xff] }
  0xd6   :  { %v7307_v56 = vpack.i.bf16 %v298_v55, %v297_v50 }
  0xd8   :  { %7308 = vrot.lane.b32.xlu1 %v7307_v56, %s7795_s27  ;;  %333 = vperm.xlu2 %7312, %v7885_v3   ;;  %v200_v56 = vmul.f32 %v8009_v57, %v7937_v14  ;;  %v125_v57 = vmul.f32 %v7969_v34, %v7962_v28 }
  0xd9   :  { %5007 = vmatpush.bf16.msrb.mxu0 %v6951_v49  ;;  %v278_v49 = vmul.f32 %v8024_v63, %v7957_v26 }
  0xdd   :  { %5008 = vmatpush.bf16.msrb.mxu0 %v6950_v52  ;;  %v277_v52 = vmul.f32 %v8038_v18, %v7962_v28  ;;  %v339_v18 = vpop.permute.xlu0 %338 }
  0xe0   :  { %343 = vperm.xlu1 %7314, %v7880_v2   ;;  %348 = vperm.xlu2 %7312, %v7893_v4  }
  0xe1   :  { %5009 = vmatpush.bf16.msrb.mxu0 %v6949_v62  ;;  %v3080_v62 = vpop.f32.mrf.mxu0 }
  0xe8   :  { %7315 = vset.pattern.permute.xlu1 %v7797_v25  ;;  %7316 = vset.pattern.permute.xlu2 %v7797_v25 }
  0xe9   :  { %356 = vperm.xlu1 %7315, %v7885_v3   ;;  %360 = vperm.xlu2 %7316, %v7898_v5  }
  0xf1   :  { %368 = vperm.xlu1 %7315, %v7893_v4  }
  0xf6   :  { %v7284_v11 = vpop.permute.xlu2 %7283 }
  0xf7   :  { %v7286_v15 = vunpack.i.h.bf16 %v7284_v11  ;;  %v7285_v16 = vunpack.i.l.bf16 %v7284_v11 }
  0xf9   :  { %v163_v17 = vsel %vm86_vm0, %v123_v9, %v7285_v16  ;;  %v164_v25 = vsel %vm86_vm0, %v124_v12, %v7286_v15  ;;  %v6948_v9 = vld [vmem:[%s10204_s2 + $0xc0] sm:$0xff] }
  0xfa   :  { %v167_v19 = vpack.c.bf16 %v163_v17, %v163_v17  ;;  %v168_v29 = vpack.c.bf16 %v164_v25, %v164_v25  ;;  %5010 = vmatpush.bf16.msrb.mxu0 %v6948_v9 }
  0xfc   :  { %171 = vst [vmem:[#allocation2 + $0x4] sm:$0xf] %v167_v19  ;;  %v275_v19 = vmul.f32 %v7999_v53, %v7931_v13  ;;  %v201_v53 = vmul.f32 %v8001_v54, %v7962_v28 }
  0xfd   :  { %172 = vst [vmem:[#allocation2 + $0x84] sm:$0xf] %v168_v29  ;;  %v7279_v35 = vpop.permute.xlu1 %7278 }
  0xfe   :  { %v7281_v40 = vunpack.i.h.bf16 %v7279_v35  ;;  %v7280_v41 = vunpack.i.l.bf16 %v7279_v35 }
 0x100   :  { %v90_v42 = vsel %vm86_vm0, %v49_v39, %v7281_v40  ;;  %v89_v43 = vsel %vm86_vm0, %v48_v38, %v7280_v41  ;;  %v202_v41 = vmul.f32 %v7973_v36, %v7957_v26 }
 0x101   :  { %v94_v21 = vpack.c.bf16 %v90_v42, %v90_v42  ;;  %v93_v24 = vpack.c.bf16 %v89_v43, %v89_v43 }
 0x103   :  { %98 = vst [vmem:[#allocation2 + $0x180] sm:$0xf] %v94_v21  ;;  %v6860_v45 = vld [vmem:[#allocation2 + $0x4] sm:$0xf] }
 0x104   :  { %97 = vst [vmem:[#allocation2 + $0x100] sm:$0xf] %v93_v24  ;;  %v5584_v20 = vld [vmem:[#allocation2 + $0x80] sm:$0xf0] }
 0x105   :  { %v5587_v46 = vor.u32 %v6860_v45, %v5584_v20 }
 0x107   :  { %4973 = vmatmul.bf16.vlgmr.msra.gmra.mxu2 %v5587_v46 }
 0x10a   :  { %v6908_v47 = vld [vmem:[#allocation2 + $0x17c] sm:$0xf0] }
 0x10b   :  { %v5710_v48 = vld [vmem:[#allocation2 + $0x100] sm:$0xf] }
 0x10c   :  { %v5711_v50 = vor.u32 %v6908_v47, %v5710_v48 }
 0x10e   :  { %4959 = vmatmul.bf16.gmra.mxu1 %v5711_v50  ;;  %v7798_v50 = vmov 10  }
 0x10f   :  { %7330 = vset.pattern.permute.xlu1 %v7798_v50  ;;  %7329 = vset.pattern.permute.xlu0 %v7798_v50 }
 0x110   :  { %v7294_v55 = vpop.permute.xlu2 %7293  ;;  %414 = vperm.xlu0 %7329, %v7898_v5   ;;  %7328 = vset.pattern.permute.xlu2 %v7798_v50 }
 0x111   :  { %v7296_v58 = vunpack.i.h.bf16 %v7294_v55  ;;  %v7295_v59 = vunpack.i.l.bf16 %v7294_v55 }
 0x113   :  { %v239_v60 = vsel %vm86_vm0, %v199_v51, %v7295_v59  ;;  %v240_v61 = vsel %vm86_vm0, %v200_v56, %v7296_v58 }
 0x114   :  { %v243_v33 = vpack.c.bf16 %v239_v60, %v239_v60  ;;  %v244_v0 = vpack.c.bf16 %v240_v61, %v240_v61 }
 0x116   :  { %247 = vst [vmem:[#allocation2 + $0x8] sm:$0xf] %v243_v33  ;;  %v7289_v6 = vpop.permute.xlu1 %7288 }
 0x117   :  { %248 = vst [vmem:[#allocation2 + $0x88] sm:$0xf] %v244_v0  ;;  %v7291_v7 = vunpack.i.h.bf16 %v7289_v6  ;;  %v7290_v8 = vunpack.i.l.bf16 %v7289_v6 }
 0x119   :  { %v166_v10 = vsel %vm86_vm0, %v126_v1, %v7291_v7  ;;  %v165_v11 = vsel %vm86_vm0, %v125_v57, %v7290_v8  ;;  %v7799_v1 = vmov 11  }
 0x11a   :  { %v170_v12 = vpack.c.bf16 %v166_v10, %v166_v10  ;;  %v169_v22 = vpack.c.bf16 %v165_v11, %v165_v11  ;;  %7333 = vset.pattern.permute.xlu0 %v7799_v1 }
 0x11b   :  { %440 = vperm.xlu0 %7333, %v7880_v2  }
 0x11c   :  { %174 = vst [vmem:[#allocation2 + $0x184] sm:$0xf] %v170_v12 }
 0x11d   :  { %173 = vst [vmem:[#allocation2 + $0x104] sm:$0xf] %v169_v22  ;;  %v5590_v15 = vld [vmem:[#allocation2 + $0x8] sm:$0xf] }
 0x11e   :  { %v6877_v16 = vld [vmem:[#allocation2 + $0x84] sm:$0xf0] }
 0x11f   :  { %v5591_v17 = vor.u32 %v6877_v16, %v5590_v15  ;;  %v365_v15 = vpop.permute.xlu0 %364 }
 0x120   :  { %v373_v16 = vmul.f32 %v365_v15, %v7962_v28 }
 0x121   :  { %4992 = vmatmul.bf16.vlgmr.msra.gmra.mxu3 %v5591_v17 }
 0x123   :  { %v5712_v34 = vld [vmem:[#allocation2 + $0x180] sm:$0xf0] }
 0x124   :  { %v6892_v25 = vld [vmem:[#allocation2 + $0x104] sm:$0xf] }
 0x125   :  { %v5715_v27 = vor.u32 %v6892_v25, %v5712_v34 }
 0x127   :  { %4978 = vmatmul.bf16.gmra.mxu2 %v5715_v27  ;;  %v8194_v27 = vpop.f32.mrf.mxu0 }
 0x12a   :  { %v7304_v29 = vpop.permute.xlu2 %7303 }
 0x12b   :  { %v7306_v35 = vunpack.i.h.bf16 %v7304_v29  ;;  %v7305_v31 = vunpack.i.l.bf16 %v7304_v29 }
 0x12d   :  { %v315_v32 = vsel %vm86_vm0, %v275_v19, %v7305_v31  ;;  %v316_v38 = vsel %vm86_vm0, %v276_v30, %v7306_v35 }
 0x12e   :  { %v319_v39 = vpack.c.bf16 %v315_v32, %v315_v32  ;;  %v320_v40 = vpack.c.bf16 %v316_v38, %v316_v38  ;;  %v6959_v38 = vld [vmem:[%s10204_s2 + $0x118] sm:$0xff] }
 0x130   :  { %323 = vst [vmem:[#allocation2 + $0xc] sm:$0xf] %v319_v39  ;;  %v7299_v42 = vpop.permute.xlu1 %7298  ;;  %v6958_v39 = vld [vmem:[%s10204_s2 + $0x110] sm:$0xff] }
 0x131   :  { %324 = vst [vmem:[#allocation2 + $0x8c] sm:$0xf] %v320_v40  ;;  %v7301_v43 = vunpack.i.h.bf16 %v7299_v42  ;;  %v7300_v21 = vunpack.i.l.bf16 %v7299_v42 }
 0x132   :  { %v8169_v54 = vpop.permute.xlu2 %333 }
 0x133   :  { %v242_v37 = vsel %vm86_vm0, %v202_v41, %v7301_v43  ;;  %v241_v24 = vsel %vm86_vm0, %v201_v53, %v7300_v21  ;;  %v3085_v29 = vpop.f32.mrf.mxu0  ;;  %v6957_v41 = vld [vmem:[%s10204_s2 + $0x108] sm:$0xff]  ;;  %v6956_v43 = vld [vmem:[%s10204_s2 + $0x100] sm:$0xff] }
 0x134   :  { %v246_v44 = vpack.c.bf16 %v242_v37, %v242_v37  ;;  %v245_v45 = vpack.c.bf16 %v241_v24, %v241_v24 }
 0x136   :  { %250 = vst [vmem:[#allocation2 + $0x188] sm:$0xf] %v246_v44 }
 0x137   :  { %249 = vst [vmem:[#allocation2 + $0x108] sm:$0xf] %v245_v45  ;;  %v6861_v20 = vld [vmem:[#allocation2 + $0xc] sm:$0xf]  ;;  %v351_v45 = vmul.f32 %v8169_v54, %v7931_v13 }
 0x138   :  { %v5592_v46 = vld [vmem:[#allocation2 + $0x88] sm:$0xf0] }
 0x139   :  { %v5595_v23 = vor.u32 %v6861_v20, %v5592_v46 }
 0x13a   :  { %v8178_v60 = vpop.permute.xlu2 %348 }
 0x13b   :  { %5011 = vmatmul.bf16.vlgmr.msrb.gmra.mxu0 %v5595_v23  ;;  %v8225_v24 = vpop.f32.mrf.mxu0  ;;  %v352_v23 = vmul.f32 %v339_v18, %v7937_v14 }
 0x13d   :  { %v6909_v36 = vld [vmem:[#allocation2 + $0x184] sm:$0xf0] }
 0x13e   :  { %v5718_v47 = vld [vmem:[#allocation2 + $0x108] sm:$0xf] }
 0x13f   :  { %v5719_v48 = vor.u32 %v6909_v36, %v5718_v47 }
 0x141   :  { %4997 = vmatmul.bf16.gmra.mxu3 %v5719_v48 }
 0x143   :  { %v361_v7 = vpop.permute.xlu2 %360 }
 0x144   :  { %v372_v10 = vmul.f32 %v361_v7, %v7937_v14 }
 0x14a   :  { %v7309_v51 = vpop.permute.xlu1 %7308 }
 0x14b   :  { %v7311_v55 = vunpack.i.h.bf16 %v7309_v51  ;;  %v7310_v56 = vunpack.i.l.bf16 %v7309_v51 }
 0x14d   :  { %v318_v58 = vsel %vm86_vm0, %v278_v49, %v7311_v55  ;;  %v317_v59 = vsel %vm86_vm0, %v277_v52, %v7310_v56 }
 0x14e   :  { %v322_v61 = vpack.c.bf16 %v318_v58, %v318_v58  ;;  %v321_v63 = vpack.c.bf16 %v317_v59, %v317_v59 }
 0x150   :  { %326 = vst [vmem:[#allocation2 + $0x18c] sm:$0xf] %v322_v61 }
 0x151   :  { %325 = vst [vmem:[#allocation2 + $0x10c] sm:$0xf] %v321_v63 }
 0x152   :  { %v4955_v33 = vpop.f32.mrf.mxu1  ;;  %v8180_v0 = vpop.permute.xlu1 %343 }
 0x153   :  { %v4956_v6 = vadd.f32 %v4955_v33, %v3080_v62  ;;  %v354_v33 = vmul.f32 %v8178_v60, %v7957_v26 }
 0x157   :  { %v5720_v57 = vld [vmem:[#allocation2 + $0x188] sm:$0xf0] }
 0x158   :  { %v6893_v8 = vld [vmem:[#allocation2 + $0x10c] sm:$0xf] }
 0x159   :  { %v5723_v9 = vor.u32 %v6893_v8, %v5720_v57  ;;  %v353_v57 = vmul.f32 %v8180_v0, %v7962_v28 }
 0x15a   :  { %v8197_v19 = vpop.f32.mrf.mxu1 }
 0x15b   :  { %5016 = vmatmul.bf16.gmra.mxu0 %v5723_v9  ;;  %v357_v11 = vpop.permute.xlu1 %356 }
 0x15c   :  { %v371_v12 = vmul.f32 %v357_v11, %v7931_v13 }
 0x15e   :  { %v7318_v22 = vpack.i.bf16 %v372_v10, %v371_v12 }
 0x160   :  { %7319 = vrot.lane.b32.xlu2 %v7318_v22, %s7795_s27  ;;  %v8253_v22 = vld [vmem:[%s10202_s0 + $0x8] sm:$0xff] }
 0x163   :  { %v369_v17 = vpop.permute.xlu1 %368 }
 0x164   :  { %v374_v34 = vmul.f32 %v369_v17, %v7957_v26 }
 0x166   :  { %v7323_v25 = vpack.i.bf16 %v374_v34, %v373_v16 }
 0x168   :  { %7324 = vrot.lane.b32.xlu1 %v7323_v25, %s7795_s27  ;;  %409 = vperm.xlu2 %7328, %v7885_v3  }
 0x170   :  { %419 = vperm.xlu1 %7330, %v7880_v2   ;;  %424 = vperm.xlu2 %7328, %v7893_v4   ;;  %v6963_v2 = vld [vmem:[%s10204_s2 + $0x138] sm:$0xff] }
 0x171   :  { %5022 = vmatpush.bf16.msrb.mxu1 %v6963_v2 }
 0x178   :  { %7331 = vset.pattern.permute.xlu1 %v7799_v1  ;;  %7332 = vset.pattern.permute.xlu2 %v7799_v1 }
 0x179   :  { %432 = vperm.xlu1 %7331, %v7885_v3   ;;  %436 = vperm.xlu2 %7332, %v7898_v5   ;;  %v6962_v3 = vld [vmem:[%s10204_s2 + $0x130] sm:$0xff]  ;;  %v6960_v5 = vld [vmem:[%s10204_s2 + $0x120] sm:$0xff] }
 0x17a   :  { %5023 = vmatpush.bf16.msrb.mxu1 %v6962_v3 }
 0x181   :  { %444 = vperm.xlu1 %7331, %v7893_v4   ;;  %v6961_v4 = vld [vmem:[%s10204_s2 + $0x128] sm:$0xff] }
 0x182   :  { %5024 = vmatpush.bf16.msrb.mxu1 %v6961_v4  ;;  %v415_v15 = vpop.permute.xlu0 %414  ;;  %v6971_v4 = vld [vmem:[%s10204_s2 + $0x178] sm:$0xff] }
 0x183   :  { %5041 = vmatpush.bf16.msrb.mxu2 %v6971_v4 }
 0x186   :  { %5025 = vmatpush.bf16.msrb.mxu1 %v6960_v5 }
 0x18a   :  { %v4974_v30 = vpop.f32.mrf.mxu2  ;;  %5026 = vmatpush.bf16.msrb.mxu1 %v6959_v38 }
 0x18b   :  { %v4960_v35 = vpop.f32.mrf.mxu1  ;;  %v4975_v31 = vadd.f32 %v4974_v30, %v4956_v6  ;;  %v7800_v6 = vmov 12   ;;  %v7801_v30 = vmov 13  }
 0x18c   :  { %v4961_v32 = vadd.f32 %v4960_v35, %v3085_v29  ;;  %7346 = vset.pattern.permute.xlu1 %v7800_v6  ;;  %7345 = vset.pattern.permute.xlu0 %v7800_v6  ;;  %v8261_v29 = vld [vmem:[%s10202_s0 + $0x10] sm:$0xff] }
 0x18d   :  { %7344 = vset.pattern.permute.xlu2 %v7800_v6  ;;  %490 = vperm.xlu0 %7345, %v8253_v22   ;;  %v441_v3 = vpop.permute.xlu0 %440 }
 0x18e   :  { %5027 = vmatpush.bf16.msrb.mxu1 %v6958_v39  ;;  %v449_v5 = vmul.f32 %v441_v3, %v7962_v28  ;;  %v6970_v39 = vld [vmem:[%s10204_s2 + $0x170] sm:$0xff] }
 0x18f   :  { %5042 = vmatpush.bf16.msrb.mxu2 %v6970_v39 }
 0x192   :  { %v8217_v40 = vpop.f32.mrf.mxu2  ;;  %5028 = vmatpush.bf16.msrb.mxu1 %v6957_v41 }
 0x195   :  { %7349 = vset.pattern.permute.xlu0 %v7801_v30 }
 0x196   :  { %5029 = vmatpush.bf16.msrb.mxu1 %v6956_v43  ;;  %516 = vperm.xlu0 %7349, %v8261_v29   ;;  %v6969_v43 = vld [vmem:[%s10204_s2 + $0x168] sm:$0xff] }
 0x197   :  { %5043 = vmatpush.bf16.msrb.mxu2 %v6969_v43 }
 0x1a4   :  { %v4993_v42 = vpop.f32.mrf.mxu3 }
 0x1a5   :  { %v4994_v53 = vadd.f32 %v4993_v42, %v4975_v31 }
 0x1aa   :  { %v4979_v21 = vpop.f32.mrf.mxu2 }
 0x1ab   :  { %v4980_v37 = vadd.f32 %v4979_v21, %v4961_v32  ;;  %v8288_v21 = vld [vmem:[%s10202_s0 + $0x18] sm:$0xff] }
 0x1ac   :  { %v8232_v48 = vpop.f32.mrf.mxu3 }
 0x1b8   :  { %v5012_v44 = vpop.f32.mrf.mxu0 }
 0x1b9   :  { %v8229_v20 = vadd.f32 %v5012_v44, %v4994_v53  ;;  %v8278_v53 = vld [vmem:[%s10202_s0] sm:$0xff]  ;;  %v6967_v44 = vld [vmem:[%s10204_s2 + $0x158] sm:$0xff] }
 0x1ba   :  { %v7320_v46 = vpop.permute.xlu2 %7319 }
 0x1bb   :  { %v7322_v36 = vunpack.i.h.bf16 %v7320_v46  ;;  %v7321_v47 = vunpack.i.l.bf16 %v7320_v46  ;;  %v6965_v46 = vld [vmem:[%s10204_s2 + $0x148] sm:$0xff] }
 0x1bd   :  { %v391_v49 = vsel %vm86_vm0, %v351_v45, %v7321_v47  ;;  %v392_v50 = vsel %vm86_vm0, %v352_v23, %v7322_v36  ;;  %v6966_v45 = vld [vmem:[%s10204_s2 + $0x150] sm:$0xff]  ;;  %v6964_v23 = vld [vmem:[%s10204_s2 + $0x140] sm:$0xff]  ;;  %v8310_v36 = vpop.f32.mrf.mxu1 }
 0x1be   :  { %v395_v51 = vpack.c.bf16 %v391_v49, %v391_v49  ;;  %v396_v52 = vpack.c.bf16 %v392_v50, %v392_v50 }
 0x1c0   :  { %399 = vst [vmem:[#allocation2 + $0x10] sm:$0xf] %v395_v51  ;;  %v8236_v61 = vpop.f32.mrf.mxu0 }
 0x1c1   :  { %400 = vst [vmem:[#allocation2 + $0x90] sm:$0xf] %v396_v52  ;;  %v428_v52 = vmul.f32 %v415_v15, %v7937_v14 }
 0x1c2   :  { %v8238_v63 = vpop.permute.xlu2 %409 }
 0x1c3   :  { %v427_v49 = vmul.f32 %v8238_v63, %v7931_v13 }
 0x1c4   :  { %v4998_v55 = vpop.f32.mrf.mxu3 }
 0x1c5   :  { %v4999_v56 = vadd.f32 %v4998_v55, %v4980_v37  ;;  %v6968_v37 = vld [vmem:[%s10204_s2 + $0x160] sm:$0xff] }
 0x1c6   :  { %5044 = vmatpush.bf16.msrb.mxu2 %v6968_v37 }
 0x1c7   :  { %v5598_v54 = vld [vmem:[#allocation2 + $0x10] sm:$0xf] }
 0x1c8   :  { %v6878_v58 = vld [vmem:[#allocation2 + $0x8c] sm:$0xf0] }
 0x1c9   :  { %v5599_v59 = vor.u32 %v6878_v58, %v5598_v54 }
 0x1ca   :  { %v8248_v11 = vpop.permute.xlu2 %424  ;;  %5045 = vmatpush.bf16.msrb.mxu2 %v6967_v44 }
 0x1cb   :  { %5030 = vmatmul.bf16.vlgmr.msrb.gmra.mxu1 %v5599_v59 }
 0x1ce   :  { %5046 = vmatpush.bf16.msrb.mxu2 %v6966_v45  ;;  %v6974_v45 = vld [vmem:[%s10204_s2 + $0x190] sm:$0xff] }
 0x1d2   :  { %5047 = vmatpush.bf16.msrb.mxu2 %v6965_v46  ;;  %v6973_v46 = vld [vmem:[%s10204_s2 + $0x188] sm:$0xff] }
 0x1d3   :  { %v437_v17 = vpop.permute.xlu2 %436 }
 0x1d4   :  { %v448_v35 = vmul.f32 %v437_v17, %v7937_v14 }
 0x1d6   :  { %5048 = vmatpush.bf16.msrb.mxu2 %v6964_v23  ;;  %v6972_v23 = vld [vmem:[%s10204_s2 + $0x180] sm:$0xff] }
 0x1d8   :  { %v5017_v62 = vpop.f32.mrf.mxu0 }
 0x1d9   :  { %v8242_v1 = vadd.f32 %v5017_v62, %v4999_v56 }
 0x1da   :  { %v7325_v18 = vpop.permute.xlu1 %7324 }
 0x1db   :  { %v7327_v7 = vunpack.i.h.bf16 %v7325_v18  ;;  %v7326_v8 = vunpack.i.l.bf16 %v7325_v18 }
 0x1dd   :  { %v394_v9 = vsel %vm86_vm0, %v354_v33, %v7327_v7  ;;  %v393_v10 = vsel %vm86_vm0, %v353_v57, %v7326_v8  ;;  %v430_v7 = vmul.f32 %v8248_v11, %v7957_v26 }
 0x1de   :  { %v398_v12 = vpack.c.bf16 %v394_v9, %v394_v9  ;;  %v397_v60 = vpack.c.bf16 %v393_v10, %v393_v10  ;;  %v7802_v9 = vmov 14  }
 0x1df   :  { %7361 = vset.pattern.permute.xlu0 %v7802_v9 }
 0x1e0   :  { %402 = vst [vmem:[#allocation2 + $0x190] sm:$0xf] %v398_v12  ;;  %566 = vperm.xlu0 %7361, %v8253_v22  }
 0x1e1   :  { %401 = vst [vmem:[#allocation2 + $0x110] sm:$0xf] %v397_v60 }
 0x1e2   :  { %v8256_v0 = vpop.permute.xlu1 %419 }
 0x1e3   :  { %v429_v12 = vmul.f32 %v8256_v0, %v7962_v28 }
 0x1e7   :  { %v6910_v16 = vld [vmem:[#allocation2 + $0x18c] sm:$0xf0] }
 0x1e8   :  { %v5726_v34 = vld [vmem:[#allocation2 + $0x110] sm:$0xf] }
 0x1e9   :  { %v5727_v25 = vor.u32 %v6910_v16, %v5726_v34 }
 0x1eb   :  { %5035 = vmatmul.bf16.gmra.mxu1 %v5727_v25  ;;  %v433_v31 = vpop.permute.xlu1 %432 }
 0x1ec   :  { %v447_v2 = vmul.f32 %v433_v31, %v7931_v13 }
 0x1ee   :  { %v7334_v32 = vpack.i.bf16 %v448_v35, %v447_v2 }
 0x1f0   :  { %7335 = vrot.lane.b32.xlu2 %v7334_v32, %s7795_s27 }
 0x1f3   :  { %v445_v38 = vpop.permute.xlu1 %444 }
 0x1f4   :  { %v450_v41 = vmul.f32 %v445_v38, %v7957_v26 }
 0x1f6   :  { %v7339_v42 = vpack.i.bf16 %v450_v41, %v449_v5  ;;  %v6979_v41 = vld [vmem:[%s10204_s2 + $0x1b8] sm:$0xff] }
 0x1f7   :  { %5060 = vmatpush.bf16.msrb.mxu3 %v6979_v41 }
 0x1f8   :  { %7340 = vrot.lane.b32.xlu1 %v7339_v42, %s7795_s27  ;;  %485 = vperm.xlu2 %7344, %v8278_v53  }
 0x1ff   :  { %v491_v35 = vpop.permute.xlu0 %490 }
 0x200   :  { %495 = vperm.xlu1 %7346, %v8261_v29   ;;  %500 = vperm.xlu2 %7344, %v8288_v21  }
 0x208   :  { %7347 = vset.pattern.permute.xlu1 %v7801_v30  ;;  %7348 = vset.pattern.permute.xlu2 %v7801_v30  ;;  %v7803_v30 = vmov 15   ;;  %v517_v39 = vpop.permute.xlu0 %516 }
 0x209   :  { %508 = vperm.xlu1 %7347, %v8278_v53   ;;  %512 = vperm.xlu2 %7348, %v8253_v22   ;;  %v525_v42 = vmul.f32 %v517_v39, %v7962_v28  ;;  %v6976_v28 = vld [vmem:[%s10204_s2 + $0x1a0] sm:$0xff] }
 0x20a   :  { %7365 = vset.pattern.permute.xlu0 %v7803_v30 }
 0x20b   :  { %592 = vperm.xlu0 %7365, %v8261_v29  }
 0x211   :  { %520 = vperm.xlu1 %7347, %v8288_v21   ;;  %7360 = vset.pattern.permute.xlu2 %v7802_v9 }
 0x219   :  { %7362 = vset.pattern.permute.xlu1 %v7802_v9 }
 0x248   :  { %v5031_v47 = vpop.f32.mrf.mxu1 }
 0x249   :  { %v8315_v50 = vadd.f32 %v5031_v47, %v8229_v20  ;;  %v8375_v47 = vpop.f32.mrf.mxu2 }
 0x24a   :  { %v7336_v51 = vpop.permute.xlu2 %7335 }
 0x24b   :  { %v7338_v55 = vunpack.i.h.bf16 %v7336_v51  ;;  %v7337_v56 = vunpack.i.l.bf16 %v7336_v51 }
 0x24d   :  { %v467_v54 = vsel %vm86_vm0, %v427_v49, %v7337_v56  ;;  %v468_v58 = vsel %vm86_vm0, %v428_v52, %v7338_v55  ;;  %v8380_v49 = vld [vmem:[%s10203_s1] sm:$0xff]  ;;  %v8387_v55 = vld [vmem:[%s10203_s1 + $0x8] sm:$0xff] }
 0x24e   :  { %v471_v59 = vpack.c.bf16 %v467_v54, %v467_v54  ;;  %v472_v62 = vpack.c.bf16 %v468_v58, %v468_v58  ;;  %v504_v56 = vmul.f32 %v8387_v55, %v491_v35 }
 0x250   :  { %475 = vst [vmem:[#allocation2 + $0x14] sm:$0xf] %v471_v59  ;;  %v8320_v63 = vpop.f32.mrf.mxu1 }
 0x251   :  { %476 = vst [vmem:[#allocation2 + $0x94] sm:$0xf] %v472_v62 }
 0x252   :  { %v8322_v20 = vpop.permute.xlu2 %485 }
 0x253   :  { %v503_v51 = vmul.f32 %v8380_v49, %v8322_v20 }
 0x257   :  { %v6862_v33 = vld [vmem:[#allocation2 + $0x14] sm:$0xf] }
 0x258   :  { %v5600_v6 = vld [vmem:[#allocation2 + $0x90] sm:$0xf0] }
 0x259   :  { %v5603_v18 = vor.u32 %v6862_v33, %v5600_v6 }
 0x25a   :  { %v8334_v11 = vpop.permute.xlu2 %500 }
 0x25b   :  { %5049 = vmatmul.bf16.vlgmr.msrb.gmra.mxu2 %v5603_v18 }
 0x263   :  { %v513_v31 = vpop.permute.xlu2 %512 }
 0x264   :  { %v524_v3 = vmul.f32 %v513_v31, %v7937_v14  ;;  %v6978_v14 = vld [vmem:[%s10204_s2 + $0x1b0] sm:$0xff] }
 0x265   :  { %5061 = vmatpush.bf16.msrb.mxu3 %v6978_v14 }
 0x268   :  { %v5036_v57 = vpop.f32.mrf.mxu1 }
 0x269   :  { %v8327_v8 = vadd.f32 %v5036_v57, %v8242_v1 }
 0x26a   :  { %v7341_v10 = vpop.permute.xlu1 %7340 }
 0x26b   :  { %v7343_v60 = vunpack.i.h.bf16 %v7341_v10  ;;  %v7342_v15 = vunpack.i.l.bf16 %v7341_v10 }
 0x26d   :  { %v470_v16 = vsel %vm86_vm0, %v430_v7, %v7343_v60  ;;  %v469_v17 = vsel %vm86_vm0, %v429_v12, %v7342_v15  ;;  %v8402_v60 = vld [vmem:[%s10203_s1 + $0x18] sm:$0xff] }
 0x26e   :  { %v474_v1 = vpack.c.bf16 %v470_v16, %v470_v16  ;;  %v473_v34 = vpack.c.bf16 %v469_v17, %v469_v17  ;;  %v506_v15 = vmul.f32 %v8402_v60, %v8334_v11  ;;  %v8410_v17 = vld [vmem:[%s10203_s1 + $0x10] sm:$0xff] }
 0x270   :  { %478 = vst [vmem:[#allocation2 + $0x194] sm:$0xf] %v474_v1 }
 0x271   :  { %477 = vst [vmem:[#allocation2 + $0x114] sm:$0xf] %v473_v34 }
 0x272   :  { %v8336_v25 = vpop.permute.xlu1 %495 }
 0x273   :  { %v505_v1 = vmul.f32 %v8410_v17, %v8336_v25  ;;  %v567_v25 = vpop.permute.xlu0 %566 }
 0x277   :  { %v5728_v0 = vld [vmem:[#allocation2 + $0x190] sm:$0xf0] }
 0x278   :  { %v6894_v2 = vld [vmem:[#allocation2 + $0x114] sm:$0xf] }
 0x279   :  { %v5731_v32 = vor.u32 %v6894_v2, %v5728_v0 }
 0x27b   :  { %5054 = vmatmul.bf16.gmra.mxu2 %v5731_v32  ;;  %v509_v4 = vpop.permute.xlu1 %508 }
 0x27c   :  { %v523_v5 = vmul.f32 %v509_v4, %v7931_v13  ;;  %v6977_v13 = vld [vmem:[%s10204_s2 + $0x1a8] sm:$0xff] }
 0x27d   :  { %5062 = vmatpush.bf16.msrb.mxu3 %v6977_v13  ;;  %v6987_v13 = vld [vmem:[%s10204_s2 + $0x1f8] sm:$0xff] }
 0x27e   :  { %v7350_v38 = vpack.i.bf16 %v524_v3, %v523_v5  ;;  %v7805_v5 = vmov 17   ;;  %5079 = vmatpush.bf16.msra.mxu0 %v6987_v13 }
 0x280   :  { %7351 = vrot.lane.b32.xlu2 %v7350_v38, %s7795_s27 }
 0x281   :  { %5063 = vmatpush.bf16.msrb.mxu3 %v6976_v28 }
 0x283   :  { %v521_v43 = vpop.permute.xlu1 %520 }
 0x284   :  { %v526_v37 = vmul.f32 %v521_v43, %v7957_v26  ;;  %v6975_v26 = vld [vmem:[%s10204_s2 + $0x198] sm:$0xff] }
 0x285   :  { %5064 = vmatpush.bf16.msrb.mxu3 %v6975_v26 }
 0x286   :  { %v7355_v44 = vpack.i.bf16 %v526_v37, %v525_v42 }
 0x288   :  { %7356 = vrot.lane.b32.xlu1 %v7355_v44, %s7795_s27  ;;  %561 = vperm.xlu2 %7360, %v8278_v53   ;;  %v593_v44 = vpop.permute.xlu0 %592 }
 0x289   :  { %5065 = vmatpush.bf16.msrb.mxu3 %v6974_v45  ;;  %v601_v28 = vmul.f32 %v8410_v17, %v593_v44  ;;  %v6986_v45 = vld [vmem:[%s10204_s2 + $0x1f0] sm:$0xff]  ;;  %v7807_v44 = vmov 19  }
 0x28a   :  { %5080 = vmatpush.bf16.msra.mxu0 %v6986_v45 }
 0x28d   :  { %5066 = vmatpush.bf16.msrb.mxu3 %v6973_v46 }
 0x290   :  { %571 = vperm.xlu1 %7362, %v8261_v29   ;;  %576 = vperm.xlu2 %7360, %v8288_v21  }
 0x291   :  { %5067 = vmatpush.bf16.msrb.mxu3 %v6972_v23 }
 0x298   :  { %7363 = vset.pattern.permute.xlu1 %v7803_v30  ;;  %7364 = vset.pattern.permute.xlu2 %v7803_v30 }
 0x299   :  { %584 = vperm.xlu1 %7363, %v8278_v53   ;;  %588 = vperm.xlu2 %7364, %v8253_v22  }
 0x2a1   :  { %596 = vperm.xlu1 %7363, %v8288_v21  }
 0x2da   :  { %v7352_v52 = vpop.permute.xlu2 %7351 }
 0x2db   :  { %v7354_v54 = vunpack.i.h.bf16 %v7352_v52  ;;  %v7353_v58 = vunpack.i.l.bf16 %v7352_v52  ;;  %v6984_v52 = vld [vmem:[%s10204_s2 + $0x1e0] sm:$0xff] }
 0x2dd   :  { %v543_v59 = vsel %vm86_vm0, %v503_v51, %v7353_v58  ;;  %v544_v62 = vsel %vm86_vm0, %v504_v56, %v7354_v54  ;;  %v6985_v51 = vld [vmem:[%s10204_s2 + $0x1e8] sm:$0xff]  ;;  %v6983_v56 = vld [vmem:[%s10204_s2 + $0x1d8] sm:$0xff]  ;;  %v6982_v54 = vld [vmem:[%s10204_s2 + $0x1d0] sm:$0xff] }
 0x2de   :  { %v547_v33 = vpack.c.bf16 %v543_v59, %v543_v59  ;;  %v548_v6 = vpack.c.bf16 %v544_v62, %v544_v62  ;;  %v5050_v18 = vpop.f32.mrf.mxu2  ;;  %5081 = vmatpush.bf16.msra.mxu0 %v6985_v51  ;;  %v6981_v58 = vld [vmem:[%s10204_s2 + $0x1c8] sm:$0xff]  ;;  %v6980_v59 = vld [vmem:[%s10204_s2 + $0x1c0] sm:$0xff]  ;;  %v8460_v62 = vpop.f32.mrf.mxu3 }
 0x2df   :  { %v8393_v57 = vadd.f32 %v5050_v18, %v8315_v50  ;;  %v7804_v50 = vmov 16   ;;  %v580_v18 = vmul.f32 %v8387_v55, %v567_v25 }
 0x2e0   :  { %551 = vst [vmem:[#allocation2 + $0x18] sm:$0xf] %v547_v33  ;;  %7378 = vset.pattern.permute.xlu1 %v7804_v50  ;;  %7377 = vset.pattern.permute.xlu0 %v7804_v50 }
 0x2e1   :  { %552 = vst [vmem:[#allocation2 + $0x98] sm:$0xf] %v548_v6  ;;  %642 = vperm.xlu0 %7377, %v8253_v22   ;;  %7376 = vset.pattern.permute.xlu2 %v7804_v50 }
 0x2e2   :  { %v8395_v10 = vpop.permute.xlu2 %561  ;;  %5082 = vmatpush.bf16.msra.mxu0 %v6984_v52 }
 0x2e3   :  { %v579_v33 = vmul.f32 %v8380_v49, %v8395_v10 }
 0x2e6   :  { %v8397_v12 = vpop.f32.mrf.mxu2  ;;  %5083 = vmatpush.bf16.msra.mxu0 %v6983_v56  ;;  %v6995_v56 = vld [vmem:[%s10204_s2 + $0x238] sm:$0xff] }
 0x2e7   :  { %v5606_v20 = vld [vmem:[#allocation2 + $0x18] sm:$0xf]  ;;  %5098 = vmatpush.bf16.msra.mxu1 %v6995_v56  ;;  %v7809_v56 = vmov 21  }
 0x2e8   :  { %v6879_v7 = vld [vmem:[#allocation2 + $0x94] sm:$0xf0] }
 0x2e9   :  { %v5607_v9 = vor.u32 %v6879_v7, %v5606_v20  ;;  %7381 = vset.pattern.permute.xlu0 %v7805_v5 }
 0x2ea   :  { %v8416_v0 = vpop.permute.xlu2 %576  ;;  %668 = vperm.xlu0 %7381, %v8261_v29   ;;  %5084 = vmatpush.bf16.msra.mxu0 %v6982_v54 }
 0x2eb   :  { %5068 = vmatmul.bf16.vlgmr.msrb.gmra.mxu3 %v5607_v9 }
 0x2ee   :  { %5085 = vmatpush.bf16.msra.mxu0 %v6981_v58 }
 0x2f2   :  { %5086 = vmatpush.bf16.msra.mxu0 %v6980_v59  ;;  %v6994_v59 = vld [vmem:[%s10204_s2 + $0x230] sm:$0xff] }
 0x2f3   :  { %v589_v39 = vpop.permute.xlu2 %588  ;;  %5099 = vmatpush.bf16.msra.mxu1 %v6994_v59 }
 0x2f4   :  { %v600_v43 = vmul.f32 %v8387_v55, %v589_v39 }
 0x2fa   :  { %v7357_v16 = vpop.permute.xlu1 %7356 }
 0x2fb   :  { %v7359_v34 = vunpack.i.h.bf16 %v7357_v16  ;;  %v7358_v30 = vunpack.i.l.bf16 %v7357_v16 }
 0x2fd   :  { %v546_v35 = vsel %vm86_vm0, %v506_v15, %v7359_v34  ;;  %v545_v11 = vsel %vm86_vm0, %v505_v1, %v7358_v30 }
 0x2fe   :  { %v550_v31 = vpack.c.bf16 %v546_v35, %v546_v35  ;;  %v549_v2 = vpack.c.bf16 %v545_v11, %v545_v11  ;;  %v5055_v32 = vpop.f32.mrf.mxu2 }
 0x2ff   :  { %v8419_v3 = vadd.f32 %v5055_v32, %v8327_v8  ;;  %v7806_v32 = vmov 18  }
 0x300   :  { %554 = vst [vmem:[#allocation2 + $0x198] sm:$0xf] %v550_v31  ;;  %7393 = vset.pattern.permute.xlu0 %v7806_v32 }
 0x301   :  { %553 = vst [vmem:[#allocation2 + $0x118] sm:$0xf] %v549_v2  ;;  %v582_v2 = vmul.f32 %v8402_v60, %v8416_v0  ;;  %718 = vperm.xlu0 %7393, %v8253_v22  }
 0x302   :  { %v8421_v4 = vpop.permute.xlu1 %571 }
 0x307   :  { %v6911_v38 = vld [vmem:[#allocation2 + $0x194] sm:$0xf0] }
 0x308   :  { %v5734_v41 = vld [vmem:[#allocation2 + $0x118] sm:$0xf] }
 0x309   :  { %v5735_v42 = vor.u32 %v6911_v38, %v5734_v41  ;;  %7397 = vset.pattern.permute.xlu0 %v7807_v44 }
 0x30a   :  { %744 = vperm.xlu0 %7397, %v8261_v29  }
 0x30b   :  { %5073 = vmatmul.bf16.gmra.mxu3 %v5735_v42  ;;  %v585_v14 = vpop.permute.xlu1 %584 }
 0x30c   :  { %v599_v8 = vmul.f32 %v8380_v49, %v585_v14 }
 0x30e   :  { %v7366_v37 = vpack.i.bf16 %v600_v43, %v599_v8 }
 0x310   :  { %7367 = vrot.lane.b32.xlu2 %v7366_v37, %s7795_s27 }
 0x313   :  { %v597_v26 = vpop.permute.xlu1 %596 }
 0x314   :  { %v602_v46 = vmul.f32 %v8402_v60, %v597_v26 }
 0x316   :  { %v7371_v23 = vpack.i.bf16 %v602_v46, %v601_v28 }
 0x318   :  { %7372 = vrot.lane.b32.xlu1 %v7371_v23, %s7795_s27  ;;  %637 = vperm.xlu2 %7376, %v8278_v53  }
 0x320   :  { %647 = vperm.xlu1 %7378, %v8261_v29   ;;  %652 = vperm.xlu2 %7376, %v8288_v21  }
 0x328   :  { %7379 = vset.pattern.permute.xlu1 %v7805_v5  ;;  %7380 = vset.pattern.permute.xlu2 %v7805_v5 }
 0x329   :  { %660 = vperm.xlu1 %7379, %v8278_v53   ;;  %664 = vperm.xlu2 %7380, %v8253_v22  }
 0x331   :  { %672 = vperm.xlu1 %7379, %v8288_v21   ;;  %7392 = vset.pattern.permute.xlu2 %v7806_v32 }
 0x339   :  { %7394 = vset.pattern.permute.xlu1 %v7806_v32 }
 0x36a   :  { %v7368_v6 = vpop.permute.xlu2 %7367 }
 0x36b   :  { %v7370_v20 = vunpack.i.h.bf16 %v7368_v6  ;;  %v7369_v7 = vunpack.i.l.bf16 %v7368_v6 }
 0x36d   :  { %v619_v9 = vsel %vm86_vm0, %v579_v33, %v7369_v7  ;;  %v620_v15 = vsel %vm86_vm0, %v580_v18, %v7370_v20  ;;  %v6993_v18 = vld [vmem:[%s10204_s2 + $0x228] sm:$0xff]  ;;  %v6992_v20 = vld [vmem:[%s10204_s2 + $0x220] sm:$0xff]  ;;  %v6991_v7 = vld [vmem:[%s10204_s2 + $0x218] sm:$0xff] }
 0x36e   :  { %v623_v50 = vpack.c.bf16 %v619_v9, %v619_v9  ;;  %v624_v16 = vpack.c.bf16 %v620_v15, %v620_v15  ;;  %v5069_v1 = vpop.f32.mrf.mxu3  ;;  %5100 = vmatpush.bf16.msra.mxu1 %v6993_v18  ;;  %v6990_v9 = vld [vmem:[%s10204_s2 + $0x210] sm:$0xff]  ;;  %v6989_v15 = vld [vmem:[%s10204_s2 + $0x208] sm:$0xff] }
 0x36f   :  { %v8468_v34 = vadd.f32 %v5069_v1, %v8393_v57  ;;  %v581_v57 = vmul.f32 %v8410_v17, %v8421_v4  ;;  %v643_v4 = vpop.permute.xlu0 %642 }
 0x370   :  { %627 = vst [vmem:[#allocation2 + $0x1c] sm:$0xf] %v623_v50  ;;  %v6988_v50 = vld [vmem:[%s10204_s2 + $0x200] sm:$0xff] }
 0x371   :  { %628 = vst [vmem:[#allocation2 + $0x9c] sm:$0xf] %v624_v16  ;;  %v8525_v16 = vpop.f32.mrf.mxu0 }
 0x372   :  { %v8470_v11 = vpop.permute.xlu2 %637  ;;  %5101 = vmatpush.bf16.msra.mxu1 %v6992_v20 }
 0x376   :  { %v8472_v31 = vpop.f32.mrf.mxu3  ;;  %5102 = vmatpush.bf16.msra.mxu1 %v6991_v7 }
 0x377   :  { %v6863_v30 = vld [vmem:[#allocation2 + $0x1c] sm:$0xf]  ;;  %v669_v52 = vpop.permute.xlu0 %668 }
 0x378   :  { %v5608_v35 = vld [vmem:[#allocation2 + $0x98] sm:$0xf0]  ;;  %v677_v54 = vmul.f32 %v8410_v17, %v669_v52 }
 0x379   :  { %v5611_v10 = vor.u32 %v6863_v30, %v5608_v35  ;;  %v655_v30 = vmul.f32 %v8380_v49, %v8470_v11 }
 0x37a   :  { %v8481_v42 = vpop.permute.xlu2 %652  ;;  %5103 = vmatpush.bf16.msra.mxu1 %v6990_v9 }
 0x37b   :  { %5087 = vmatmul.bf16.vlgmr.msra.gmra.mxu0 %v5611_v10 }
 0x37e   :  { %5104 = vmatpush.bf16.msra.mxu1 %v6989_v15  ;;  %v7003_v15 = vld [vmem:[%s10204_s2 + $0x278] sm:$0xff] }
 0x37f   :  { %5117 = vmatpush.bf16.msra.mxu2 %v7003_v15 }
 0x382   :  { %5105 = vmatpush.bf16.msra.mxu1 %v6988_v50 }
 0x383   :  { %v665_v28 = vpop.permute.xlu2 %664 }
 0x384   :  { %v676_v46 = vmul.f32 %v8387_v55, %v665_v28 }
 0x38a   :  { %v7373_v5 = vpop.permute.xlu1 %7372 }
 0x38b   :  { %v7375_v25 = vunpack.i.h.bf16 %v7373_v5  ;;  %v7374_v38 = vunpack.i.l.bf16 %v7373_v5 }
 0x38d   :  { %v622_v39 = vsel %vm86_vm0, %v582_v2, %v7375_v25  ;;  %v621_v41 = vsel %vm86_vm0, %v581_v57, %v7374_v38  ;;  %v656_v2 = vmul.f32 %v8387_v55, %v643_v4 }
 0x38e   :  { %v626_v43 = vpack.c.bf16 %v622_v39, %v622_v39  ;;  %v625_v0 = vpack.c.bf16 %v621_v41, %v621_v41  ;;  %v5074_v14 = vpop.f32.mrf.mxu3 }
 0x38f   :  { %v8484_v8 = vadd.f32 %v5074_v14, %v8419_v3 }
 0x390   :  { %630 = vst [vmem:[#allocation2 + $0x19c] sm:$0xf] %v626_v43 }
 0x391   :  { %629 = vst [vmem:[#allocation2 + $0x11c] sm:$0xf] %v625_v0 }
 0x392   :  { %v8486_v37 = vpop.permute.xlu1 %647 }
 0x397   :  { %v5736_v13 = vld [vmem:[#allocation2 + $0x198] sm:$0xf0] }
 0x398   :  { %v6895_v26 = vld [vmem:[#allocation2 + $0x11c] sm:$0xf] }
 0x399   :  { %v5739_v45 = vor.u32 %v6895_v26, %v5736_v13  ;;  %v7808_v13 = vmov 20   ;;  %v657_v26 = vmul.f32 %v8410_v17, %v8486_v37 }
 0x39a   :  { %7409 = vset.pattern.permute.xlu0 %v7808_v13 }
 0x39b   :  { %5092 = vmatmul.bf16.gmra.mxu0 %v5739_v45  ;;  %v661_v23 = vpop.permute.xlu1 %660  ;;  %794 = vperm.xlu0 %7409, %v8253_v22  }
 0x39c   :  { %v675_v3 = vmul.f32 %v8380_v49, %v661_v23 }
 0x39e   :  { %v7382_v51 = vpack.i.bf16 %v676_v46, %v675_v3 }
 0x3a0   :  { %7383 = vrot.lane.b32.xlu2 %v7382_v51, %s7795_s27 }
 0x3a3   :  { %v673_v58 = vpop.permute.xlu1 %672  ;;  %7413 = vset.pattern.permute.xlu0 %v7809_v56 }
 0x3a4   :  { %v678_v33 = vmul.f32 %v8402_v60, %v673_v58  ;;  %820 = vperm.xlu0 %7413, %v8261_v29  }
 0x3a6   :  { %v7387_v6 = vpack.i.bf16 %v678_v33, %v677_v54  ;;  %v719_v54 = vpop.permute.xlu0 %718 }
 0x3a8   :  { %7388 = vrot.lane.b32.xlu1 %v7387_v6, %s7795_s27  ;;  %713 = vperm.xlu2 %7392, %v8278_v53  }
 0x3ae   :  { %v745_v9 = vpop.permute.xlu0 %744 }
 0x3af   :  { %v753_v50 = vmul.f32 %v8410_v17, %v745_v9 }
 0x3b0   :  { %723 = vperm.xlu1 %7394, %v8261_v29   ;;  %728 = vperm.xlu2 %7392, %v8288_v21  }
 0x3b8   :  { %7395 = vset.pattern.permute.xlu1 %v7807_v44  ;;  %7396 = vset.pattern.permute.xlu2 %v7807_v44  ;;  %v658_v44 = vmul.f32 %v8402_v60, %v8481_v42 }
 0x3b9   :  { %736 = vperm.xlu1 %7395, %v8278_v53   ;;  %740 = vperm.xlu2 %7396, %v8253_v22  }
 0x3c1   :  { %748 = vperm.xlu1 %7395, %v8288_v21   ;;  %7408 = vset.pattern.permute.xlu2 %v7808_v13 }
 0x3c9   :  { %7410 = vset.pattern.permute.xlu1 %v7808_v13 }
 0x3f8   :  { %v5088_v1 = vpop.f32.mrf.mxu0 }
 0x3f9   :  { %v8530_v35 = vadd.f32 %v5088_v1, %v8468_v34 }
 0x3fa   :  { %v7384_v10 = vpop.permute.xlu2 %7383 }
 0x3fb   :  { %v7386_v32 = vunpack.i.h.bf16 %v7384_v10  ;;  %v7385_v5 = vunpack.i.l.bf16 %v7384_v10 }
 0x3fd   :  { %v695_v57 = vsel %vm86_vm0, %v655_v30, %v7385_v5  ;;  %v696_v25 = vsel %vm86_vm0, %v656_v2, %v7386_v32  ;;  %v7002_v30 = vld [vmem:[%s10204_s2 + $0x270] sm:$0xff]  ;;  %v7001_v32 = vld [vmem:[%s10204_s2 + $0x268] sm:$0xff]  ;;  %v7000_v5 = vld [vmem:[%s10204_s2 + $0x260] sm:$0xff] }
 0x3fe   :  { %v699_v38 = vpack.c.bf16 %v695_v57, %v695_v57  ;;  %v700_v39 = vpack.c.bf16 %v696_v25, %v696_v25  ;;  %5118 = vmatpush.bf16.msra.mxu2 %v7002_v30  ;;  %v6999_v57 = vld [vmem:[%s10204_s2 + $0x258] sm:$0xff]  ;;  %v8626_v30 = vld [vmem:[%s10202_s0 + $0x10] sm:$0xff] }
 0x400   :  { %703 = vst [vmem:[#allocation2 + $0x20] sm:$0xf] %v699_v38  ;;  %v8535_v11 = vpop.f32.mrf.mxu0 }
 0x401   :  { %704 = vst [vmem:[#allocation2 + $0xa0] sm:$0xf] %v700_v39 }
 0x402   :  { %v8537_v34 = vpop.permute.xlu2 %713  ;;  %5119 = vmatpush.bf16.msra.mxu2 %v7001_v32 }
 0x403   :  { %v731_v38 = vmul.f32 %v8380_v49, %v8537_v34 }
 0x406   :  { %5120 = vmatpush.bf16.msra.mxu2 %v7000_v5 }
 0x407   :  { %v5614_v41 = vld [vmem:[#allocation2 + $0x20] sm:$0xf] }
 0x408   :  { %v6880_v43 = vld [vmem:[#allocation2 + $0x9c] sm:$0xf0] }
 0x409   :  { %v5615_v0 = vor.u32 %v6880_v43, %v5614_v41  ;;  %v732_v43 = vmul.f32 %v8387_v55, %v719_v54 }
 0x40a   :  { %v8549_v42 = vpop.permute.xlu2 %728  ;;  %5121 = vmatpush.bf16.msra.mxu2 %v6999_v57 }
 0x40b   :  { %5106 = vmatmul.bf16.vlgmr.msra.gmra.mxu1 %v5615_v0 }
 0x413   :  { %v741_v58 = vpop.permute.xlu2 %740 }
 0x414   :  { %v752_v6 = vmul.f32 %v8387_v55, %v741_v58 }
 0x418   :  { %v5093_v14 = vpop.f32.mrf.mxu0 }
 0x419   :  { %v8542_v4 = vadd.f32 %v5093_v14, %v8484_v8 }
 0x41a   :  { %v7389_v28 = vpop.permute.xlu1 %7388 }
 0x41b   :  { %v7391_v45 = vunpack.i.h.bf16 %v7389_v28  ;;  %v7390_v46 = vunpack.i.l.bf16 %v7389_v28 }
 0x41d   :  { %v698_v23 = vsel %vm86_vm0, %v658_v44, %v7391_v45  ;;  %v697_v3 = vsel %vm86_vm0, %v657_v26, %v7390_v46 }
 0x41e   :  { %v702_v8 = vpack.c.bf16 %v698_v23, %v698_v23  ;;  %v701_v51 = vpack.c.bf16 %v697_v3, %v697_v3 }
 0x420   :  { %706 = vst [vmem:[#allocation2 + $0x1a0] sm:$0xf] %v702_v8  ;;  %v734_v8 = vmul.f32 %v8402_v60, %v8549_v42 }
 0x421   :  { %705 = vst [vmem:[#allocation2 + $0x120] sm:$0xf] %v701_v51 }
 0x422   :  { %v8551_v52 = vpop.permute.xlu1 %723 }
 0x427   :  { %v6912_v37 = vld [vmem:[#allocation2 + $0x19c] sm:$0xf0] }
 0x428   :  { %v5742_v59 = vld [vmem:[#allocation2 + $0x120] sm:$0xf] }
 0x429   :  { %v5743_v33 = vor.u32 %v6912_v37, %v5742_v59  ;;  %v733_v37 = vmul.f32 %v8410_v17, %v8551_v52 }
 0x42b   :  { %5111 = vmatmul.bf16.gmra.mxu1 %v5743_v33  ;;  %v737_v18 = vpop.permute.xlu1 %736 }
 0x42c   :  { %v751_v20 = vmul.f32 %v8380_v49, %v737_v18 }
 0x42e   :  { %v7398_v7 = vpack.i.bf16 %v752_v6, %v751_v20 }
 0x430   :  { %7399 = vrot.lane.b32.xlu2 %v7398_v7, %s7795_s27  ;;  %v795_v7 = vpop.permute.xlu0 %794 }
 0x433   :  { %v749_v1 = vpop.permute.xlu1 %748 }
 0x434   :  { %v754_v10 = vmul.f32 %v8402_v60, %v749_v1 }
 0x436   :  { %v7403_v2 = vpack.i.bf16 %v754_v10, %v753_v50  ;;  %v7811_v10 = vmov 23  }
 0x438   :  { %7404 = vrot.lane.b32.xlu1 %v7403_v2, %s7795_s27  ;;  %789 = vperm.xlu2 %7408, %v8278_v53  }
 0x440   :  { %799 = vperm.xlu1 %7410, %v8261_v29   ;;  %804 = vperm.xlu2 %7408, %v8288_v21   ;;  %v6998_v29 = vld [vmem:[%s10204_s2 + $0x250] sm:$0xff] }
 0x441   :  { %5122 = vmatpush.bf16.msra.mxu2 %v6998_v29  ;;  %v821_v29 = vpop.permute.xlu0 %820 }
 0x448   :  { %7411 = vset.pattern.permute.xlu1 %v7809_v56  ;;  %7412 = vset.pattern.permute.xlu2 %v7809_v56  ;;  %v7810_v56 = vmov 22  }
 0x449   :  { %812 = vperm.xlu1 %7411, %v8278_v53   ;;  %816 = vperm.xlu2 %7412, %v8253_v22   ;;  %v6997_v22 = vld [vmem:[%s10204_s2 + $0x248] sm:$0xff]  ;;  %v6996_v53 = vld [vmem:[%s10204_s2 + $0x240] sm:$0xff] }
 0x44a   :  { %5123 = vmatpush.bf16.msra.mxu2 %v6997_v22  ;;  %7425 = vset.pattern.permute.xlu0 %v7810_v56  ;;  %v7011_v22 = vld [vmem:[%s10204_s2 + $0x2b8] sm:$0xff] }
 0x44b   :  { %5136 = vmatpush.bf16.msra.mxu3 %v7011_v22 }
 0x44e   :  { %5124 = vmatpush.bf16.msra.mxu2 %v6996_v53  ;;  %v829_v53 = vmul.f32 %v8410_v17, %v821_v29 }
 0x451   :  { %824 = vperm.xlu1 %7411, %v8288_v21   ;;  %v8590_v21 = vpop.f32.mrf.mxu1  ;;  %7424 = vset.pattern.permute.xlu2 %v7810_v56 }
 0x459   :  { %7426 = vset.pattern.permute.xlu1 %v7810_v56 }
 0x488   :  { %v5107_v25 = vpop.f32.mrf.mxu1 }
 0x489   :  { %v8595_v39 = vadd.f32 %v5107_v25, %v8530_v35 }
 0x48a   :  { %v7400_v41 = vpop.permute.xlu2 %7399 }
 0x48b   :  { %v7402_v0 = vunpack.i.h.bf16 %v7400_v41  ;;  %v7401_v14 = vunpack.i.l.bf16 %v7400_v41 }
 0x48d   :  { %v771_v44 = vsel %vm86_vm0, %v731_v38, %v7401_v14  ;;  %v772_v13 = vsel %vm86_vm0, %v732_v43, %v7402_v0  ;;  %v7010_v38 = vld [vmem:[%s10204_s2 + $0x2b0] sm:$0xff]  ;;  %v8643_v0 = vld [vmem:[%s10202_s0] sm:$0xff]  ;;  %v7009_v14 = vld [vmem:[%s10204_s2 + $0x2a8] sm:$0xff] }
 0x48e   :  { %v775_v28 = vpack.c.bf16 %v771_v44, %v771_v44  ;;  %v776_v26 = vpack.c.bf16 %v772_v13, %v772_v13  ;;  %5137 = vmatpush.bf16.msra.mxu3 %v7010_v38  ;;  %v7008_v44 = vld [vmem:[%s10204_s2 + $0x2a0] sm:$0xff]  ;;  %v8656_v13 = vld [vmem:[%s10202_s0 + $0x18] sm:$0xff] }
 0x490   :  { %779 = vst [vmem:[#allocation2 + $0x24] sm:$0xf] %v775_v28  ;;  %v8600_v34 = vpop.f32.mrf.mxu1  ;;  %v7007_v28 = vld [vmem:[%s10204_s2 + $0x298] sm:$0xff] }
 0x491   :  { %780 = vst [vmem:[#allocation2 + $0xa4] sm:$0xf] %v776_v26  ;;  %v7006_v26 = vld [vmem:[%s10204_s2 + $0x290] sm:$0xff] }
 0x492   :  { %v8602_v35 = vpop.permute.xlu2 %789  ;;  %5138 = vmatpush.bf16.msra.mxu3 %v7009_v14 }
 0x496   :  { %5139 = vmatpush.bf16.msra.mxu3 %v7008_v44 }
 0x497   :  { %v6864_v45 = vld [vmem:[#allocation2 + $0x24] sm:$0xf] }
 0x498   :  { %v5616_v46 = vld [vmem:[#allocation2 + $0xa0] sm:$0xf0] }
 0x499   :  { %v5619_v23 = vor.u32 %v6864_v45, %v5616_v46  ;;  %v7005_v45 = vld [vmem:[%s10204_s2 + $0x288] sm:$0xff]  ;;  %v7004_v46 = vld [vmem:[%s10204_s2 + $0x280] sm:$0xff] }
 0x49a   :  { %v8613_v18 = vpop.permute.xlu2 %804  ;;  %5140 = vmatpush.bf16.msra.mxu3 %v7007_v28 }
 0x49b   :  { %5125 = vmatmul.bf16.vlgmr.msra.gmra.mxu2 %v5619_v23  ;;  %v4958_v23 = vadd.f32 %v8197_v19, %v8194_v27 }
 0x49e   :  { %5141 = vmatpush.bf16.msra.mxu3 %v7006_v26 }
 0x4a2   :  { %5142 = vmatpush.bf16.msra.mxu3 %v7005_v45 }
 0x4a3   :  { %v817_v15 = vpop.permute.xlu2 %816 }
 0x4a4   :  { %v828_v2 = vmul.f32 %v8387_v55, %v817_v15 }
 0x4a6   :  { %5143 = vmatpush.bf16.msra.mxu3 %v7004_v46 }
 0x4a8   :  { %v5112_v3 = vpop.f32.mrf.mxu1 }
 0x4a9   :  { %v8607_v51 = vadd.f32 %v5112_v3, %v8542_v4  ;;  %v8618_v4 = vld [vmem:[%s10202_s0 + $0x8] sm:$0xff]  ;;  %v8677_v3 = vpop.f32.mrf.mxu2 }
 0x4aa   :  { %v7405_v54 = vpop.permute.xlu1 %7404  ;;  %870 = vperm.xlu0 %7425, %v8618_v4  }
 0x4ab   :  { %v7407_v58 = vunpack.i.h.bf16 %v7405_v54  ;;  %v7406_v59 = vunpack.i.l.bf16 %v7405_v54  ;;  %v807_v54 = vmul.f32 %v8380_v49, %v8602_v35 }
 0x4ad   :  { %v774_v33 = vsel %vm86_vm0, %v734_v8, %v7407_v58  ;;  %v773_v6 = vsel %vm86_vm0, %v733_v37, %v7406_v59  ;;  %v4977_v8 = vadd.f32 %v8217_v40, %v4958_v23  ;;  %v808_v59 = vmul.f32 %v8387_v55, %v795_v7 }
 0x4ae   :  { %v778_v42 = vpack.c.bf16 %v774_v33, %v774_v33  ;;  %v777_v20 = vpack.c.bf16 %v773_v6, %v773_v6 }
 0x4af   :  { %v4996_v56 = vadd.f32 %v8232_v48, %v4977_v8 }
 0x4b0   :  { %782 = vst [vmem:[#allocation2 + $0x1a4] sm:$0xf] %v778_v42 }
 0x4b1   :  { %781 = vst [vmem:[#allocation2 + $0x124] sm:$0xf] %v777_v20  ;;  %v5015_v58 = vadd.f32 %v8236_v61, %v4996_v56  ;;  %v7019_v56 = vld [vmem:[%s10204_s2 + $0x2f8] sm:$0xff] }
 0x4b2   :  { %v8621_v52 = vpop.permute.xlu1 %799  ;;  %7429 = vset.pattern.permute.xlu0 %v7811_v10  ;;  %5155 = vmatpush.bf16.msrb.mxu0 %v7019_v56 }
 0x4b3   :  { %896 = vperm.xlu0 %7429, %v8626_v30   ;;  %v5034_v42 = vadd.f32 %v8320_v63, %v5015_v58  ;;  %v7018_v58 = vld [vmem:[%s10204_s2 + $0x2f0] sm:$0xff] }
 0x4b5   :  { %v5053_v48 = vadd.f32 %v8397_v12, %v5034_v42  ;;  %v810_v12 = vmul.f32 %v8402_v60, %v8613_v18  ;;  %v7016_v42 = vld [vmem:[%s10204_s2 + $0x2e0] sm:$0xff] }
 0x4b6   :  { %5156 = vmatpush.bf16.msrb.mxu0 %v7018_v58 }
 0x4b7   :  { %v5744_v9 = vld [vmem:[#allocation2 + $0x1a0] sm:$0xf0]  ;;  %v5072_v61 = vadd.f32 %v8472_v31, %v5053_v48 }
 0x4b8   :  { %v6896_v50 = vld [vmem:[#allocation2 + $0x124] sm:$0xf] }
 0x4b9   :  { %v5747_v1 = vor.u32 %v6896_v50, %v5744_v9  ;;  %v5091_v7 = vadd.f32 %v8535_v11, %v5072_v61  ;;  %v809_v11 = vmul.f32 %v8410_v17, %v8621_v52 }
 0x4bb   :  { %5130 = vmatmul.bf16.gmra.mxu2 %v5747_v1  ;;  %v813_v32 = vpop.permute.xlu1 %812  ;;  %v5110_v63 = vadd.f32 %v8600_v34, %v5091_v7 }
 0x4bc   :  { %v827_v5 = vmul.f32 %v8380_v49, %v813_v32 }
 0x4be   :  { %v7414_v57 = vpack.i.bf16 %v828_v2, %v827_v5 }
 0x4c0   :  { %7415 = vrot.lane.b32.xlu2 %v7414_v57, %s7795_s27 }
 0x4c3   :  { %v825_v25 = vpop.permute.xlu1 %824 }
 0x4c4   :  { %v830_v41 = vmul.f32 %v8402_v60, %v825_v25 }
 0x4c6   :  { %v7419_v43 = vpack.i.bf16 %v830_v41, %v829_v53 }
 0x4c8   :  { %7420 = vrot.lane.b32.xlu1 %v7419_v43, %s7795_s27  ;;  %865 = vperm.xlu2 %7424, %v8643_v0   ;;  %v7813_v43 = vmov 25  }
 0x4d0   :  { %875 = vperm.xlu1 %7426, %v8626_v30   ;;  %880 = vperm.xlu2 %7424, %v8656_v13  }
 0x4d8   :  { %7427 = vset.pattern.permute.xlu1 %v7811_v10  ;;  %7428 = vset.pattern.permute.xlu2 %v7811_v10 }
 0x4d9   :  { %888 = vperm.xlu1 %7427, %v8643_v0   ;;  %892 = vperm.xlu2 %7428, %v8618_v4  }
 0x4e1   :  { %900 = vperm.xlu1 %7427, %v8656_v13  }
 0x51a   :  { %v7416_v37 = vpop.permute.xlu2 %7415 }
 0x51b   :  { %v7418_v33 = vunpack.i.h.bf16 %v7416_v37  ;;  %v7417_v6 = vunpack.i.l.bf16 %v7416_v37 }
 0x51c   :  { %v871_v52 = vpop.permute.xlu0 %870 }
 0x51d   :  { %v847_v27 = vsel %vm86_vm0, %v807_v54, %v7417_v6  ;;  %v848_v19 = vsel %vm86_vm0, %v808_v59, %v7418_v33  ;;  %v7017_v6 = vld [vmem:[%s10204_s2 + $0x2e8] sm:$0xff]  ;;  %v884_v7 = vmul.f32 %v8387_v55, %v871_v52 }
 0x51e   :  { %v851_v20 = vpack.c.bf16 %v847_v27, %v847_v27  ;;  %v852_v40 = vpack.c.bf16 %v848_v19, %v848_v19  ;;  %v5126_v9 = vpop.f32.mrf.mxu2  ;;  %5157 = vmatpush.bf16.msrb.mxu0 %v7017_v6  ;;  %v7015_v27 = vld [vmem:[%s10204_s2 + $0x2d8] sm:$0xff]  ;;  %v7014_v19 = vld [vmem:[%s10204_s2 + $0x2d0] sm:$0xff] }
 0x51f   :  { %v8690_v35 = vadd.f32 %v5126_v9, %v8595_v39  ;;  %v7812_v39 = vmov 24   ;;  %v8750_v9 = vpop.f32.mrf.mxu3  ;;  %v7027_v6 = vld [vmem:[%s10204_s2 + $0x338] sm:$0xff] }
 0x520   :  { %855 = vst [vmem:[#allocation2 + $0x28] sm:$0xf] %v851_v20  ;;  %7442 = vset.pattern.permute.xlu1 %v7812_v39  ;;  %7441 = vset.pattern.permute.xlu0 %v7812_v39  ;;  %v7013_v20 = vld [vmem:[%s10204_s2 + $0x2c8] sm:$0xff] }
 0x521   :  { %856 = vst [vmem:[#allocation2 + $0xa8] sm:$0xf] %v852_v40  ;;  %946 = vperm.xlu0 %7441, %v8618_v4   ;;  %7440 = vset.pattern.permute.xlu2 %v7812_v39  ;;  %v7012_v40 = vld [vmem:[%s10204_s2 + $0x2c0] sm:$0xff] }
 0x522   :  { %v8697_v32 = vpop.permute.xlu2 %865  ;;  %5158 = vmatpush.bf16.msrb.mxu0 %v7016_v42  ;;  %5174 = vmatpush.bf16.msrb.mxu1 %v7027_v6 }
 0x523   :  { %v883_v48 = vmul.f32 %v8380_v49, %v8697_v32 }
 0x525   :  { %v897_v8 = vpop.permute.xlu0 %896 }
 0x526   :  { %v5128_v15 = vpop.f32.mrf.mxu2  ;;  %v905_v54 = vmul.f32 %v8410_v17, %v897_v8  ;;  %5159 = vmatpush.bf16.msrb.mxu0 %v7015_v27 }
 0x527   :  { %v8695_v50 = vadd.f32 %v5128_v15, %v5110_v63  ;;  %v5622_v1 = vld [vmem:[#allocation2 + $0x28] sm:$0xf] }
 0x528   :  { %v6881_v10 = vld [vmem:[#allocation2 + $0xa4] sm:$0xf0] }
 0x529   :  { %v5623_v2 = vor.u32 %v6881_v10, %v5622_v1  ;;  %7445 = vset.pattern.permute.xlu0 %v7813_v43 }
 0x52a   :  { %v8706_v22 = vpop.permute.xlu2 %880  ;;  %972 = vperm.xlu0 %7445, %v8626_v30   ;;  %5160 = vmatpush.bf16.msrb.mxu0 %v7014_v19 }
 0x52b   :  { %5144 = vmatmul.bf16.vlgmr.msra.gmra.mxu3 %v5623_v2 }
 0x52e   :  { %5161 = vmatpush.bf16.msrb.mxu0 %v7013_v20 }
 0x532   :  { %5162 = vmatpush.bf16.msrb.mxu0 %v7012_v40  ;;  %v7022_v40 = vld [vmem:[%s10204_s2 + $0x310] sm:$0xff] }
 0x533   :  { %v893_v44 = vpop.permute.xlu2 %892 }
 0x534   :  { %v904_v45 = vmul.f32 %v8387_v55, %v893_v44 }
 0x53a   :  { %v7421_v31 = vpop.permute.xlu1 %7420 }
 0x53b   :  { %v7423_v34 = vunpack.i.h.bf16 %v7421_v31  ;;  %v7422_v5 = vunpack.i.l.bf16 %v7421_v31 }
 0x53d   :  { %v850_v57 = vsel %vm86_vm0, %v810_v12, %v7423_v34  ;;  %v849_v29 = vsel %vm86_vm0, %v809_v11, %v7422_v5 }
 0x53e   :  { %v854_v53 = vpack.c.bf16 %v850_v57, %v850_v57  ;;  %v853_v18 = vpack.c.bf16 %v849_v29, %v849_v29  ;;  %v5131_v25 = vpop.f32.mrf.mxu2 }
 0x53f   :  { %v8709_v38 = vadd.f32 %v5131_v25, %v8607_v51 }
 0x540   :  { %858 = vst [vmem:[#allocation2 + $0x1a8] sm:$0xf] %v854_v53  ;;  %v886_v53 = vmul.f32 %v8402_v60, %v8706_v22 }
 0x541   :  { %857 = vst [vmem:[#allocation2 + $0x128] sm:$0xf] %v853_v18  ;;  %v7814_v18 = vmov 26  }
 0x542   :  { %v8711_v41 = vpop.permute.xlu1 %875  ;;  %7457 = vset.pattern.permute.xlu0 %v7814_v18 }
 0x543   :  { %1022 = vperm.xlu0 %7457, %v8618_v4  }
 0x547   :  { %v6913_v14 = vld [vmem:[#allocation2 + $0x1a4] sm:$0xf0] }
 0x548   :  { %v5750_v28 = vld [vmem:[#allocation2 + $0x128] sm:$0xf] }
 0x549   :  { %v5751_v26 = vor.u32 %v6913_v14, %v5750_v28 }
 0x54b   :  { %5149 = vmatmul.bf16.gmra.mxu3 %v5751_v26  ;;  %v889_v46 = vpop.permute.xlu1 %888 }
 0x54c   :  { %v903_v51 = vmul.f32 %v8380_v49, %v889_v46 }
 0x54e   :  { %v7430_v23 = vpack.i.bf16 %v904_v45, %v903_v51  ;;  %v7815_v51 = vmov 27  }
 0x54f   :  { %7461 = vset.pattern.permute.xlu0 %v7815_v51 }
 0x550   :  { %7431 = vrot.lane.b32.xlu2 %v7430_v23, %s7795_s27  ;;  %1048 = vperm.xlu0 %7461, %v8626_v30  }
 0x553   :  { %v901_v37 = vpop.permute.xlu1 %900 }
 0x554   :  { %v906_v59 = vmul.f32 %v8402_v60, %v901_v37 }
 0x556   :  { %v7435_v33 = vpack.i.bf16 %v906_v59, %v905_v54 }
 0x558   :  { %7436 = vrot.lane.b32.xlu1 %v7435_v33, %s7795_s27  ;;  %941 = vperm.xlu2 %7440, %v8643_v0  }
 0x560   :  { %951 = vperm.xlu1 %7442, %v8626_v30   ;;  %956 = vperm.xlu2 %7440, %v8656_v13  }
 0x568   :  { %7443 = vset.pattern.permute.xlu1 %v7813_v43  ;;  %7444 = vset.pattern.permute.xlu2 %v7813_v43 }
 0x569   :  { %964 = vperm.xlu1 %7443, %v8643_v0   ;;  %968 = vperm.xlu2 %7444, %v8618_v4  }
 0x571   :  { %976 = vperm.xlu1 %7443, %v8656_v13   ;;  %7456 = vset.pattern.permute.xlu2 %v7814_v18 }
 0x579   :  { %7458 = vset.pattern.permute.xlu1 %v7814_v18 }
 0x5aa   :  { %v7432_v61 = vpop.permute.xlu2 %7431 }
 0x5ab   :  { %v7434_v63 = vunpack.i.h.bf16 %v7432_v61  ;;  %v7433_v15 = vunpack.i.l.bf16 %v7432_v61  ;;  %v7020_v61 = vld [vmem:[%s10204_s2 + $0x300] sm:$0xff] }
 0x5ad   :  { %v923_v1 = vsel %vm86_vm0, %v883_v48, %v7433_v15  ;;  %v924_v10 = vsel %vm86_vm0, %v884_v7, %v7434_v63  ;;  %v7021_v48 = vld [vmem:[%s10204_s2 + $0x308] sm:$0xff]  ;;  %v8816_v7 = vpop.f32.mrf.mxu0  ;;  %v8821_v15 = vld [vmem:[%s10203_s1] sm:$0xff] }
 0x5ae   :  { %v927_v2 = vpack.c.bf16 %v923_v1, %v923_v1  ;;  %v928_v12 = vpack.c.bf16 %v924_v10, %v924_v10  ;;  %v5145_v39 = vpop.f32.mrf.mxu3 }
 0x5af   :  { %v8758_v31 = vadd.f32 %v5145_v39, %v8690_v35 }
 0x5b0   :  { %931 = vst [vmem:[#allocation2 + $0x2c] sm:$0xf] %v927_v2 }
 0x5b1   :  { %932 = vst [vmem:[#allocation2 + $0xac] sm:$0xf] %v928_v12  ;;  %v8831_v12 = vld [vmem:[%s10203_s1 + $0x8] sm:$0xff] }
 0x5b2   :  { %v8763_v29 = vpop.permute.xlu2 %941 }
 0x5b3   :  { %v959_v1 = vmul.f32 %v8821_v15, %v8763_v29 }
 0x5b6   :  { %v5147_v11 = vpop.f32.mrf.mxu3 }
 0x5b7   :  { %v8761_v32 = vadd.f32 %v5147_v11, %v8695_v50  ;;  %v6865_v34 = vld [vmem:[#allocation2 + $0x2c] sm:$0xf]  ;;  %v885_v50 = vmul.f32 %v8410_v17, %v8711_v41  ;;  %v947_v41 = vpop.permute.xlu0 %946 }
 0x5b8   :  { %v5624_v5 = vld [vmem:[#allocation2 + $0xa8] sm:$0xf0]  ;;  %v960_v39 = vmul.f32 %v8831_v12, %v947_v41 }
 0x5b9   :  { %v5627_v57 = vor.u32 %v6865_v34, %v5624_v5 }
 0x5ba   :  { %v8772_v44 = vpop.permute.xlu2 %956 }
 0x5bb   :  { %5163 = vmatmul.bf16.vlgmr.msrb.gmra.mxu0 %v5627_v57 }
 0x5bf   :  { %v973_v33 = vpop.permute.xlu0 %972 }
 0x5c0   :  { %v981_v42 = vmul.f32 %v8410_v17, %v973_v33  ;;  %v7023_v17 = vld [vmem:[%s10204_s2 + $0x318] sm:$0xff] }
 0x5c3   :  { %v969_v8 = vpop.permute.xlu2 %968 }
 0x5c4   :  { %v980_v37 = vmul.f32 %v8387_v55, %v969_v8  ;;  %v7026_v55 = vld [vmem:[%s10204_s2 + $0x330] sm:$0xff] }
 0x5c5   :  { %5175 = vmatpush.bf16.msrb.mxu1 %v7026_v55 }
 0x5ca   :  { %v7437_v35 = vpop.permute.xlu1 %7436 }
 0x5cb   :  { %v7439_v25 = vunpack.i.h.bf16 %v7437_v35  ;;  %v7438_v43 = vunpack.i.l.bf16 %v7437_v35 }
 0x5cd   :  { %v926_v52 = vsel %vm86_vm0, %v886_v53, %v7439_v25  ;;  %v925_v14 = vsel %vm86_vm0, %v885_v50, %v7438_v43 }
 0x5ce   :  { %v930_v28 = vpack.c.bf16 %v926_v52, %v926_v52  ;;  %v929_v22 = vpack.c.bf16 %v925_v14, %v925_v14  ;;  %v5150_v26 = vpop.f32.mrf.mxu3  ;;  %v8844_v14 = vld [vmem:[%s10203_s1 + $0x18] sm:$0xff] }
 0x5cf   :  { %v8775_v45 = vadd.f32 %v5150_v26, %v8709_v38 }
 0x5d0   :  { %934 = vst [vmem:[#allocation2 + $0x1ac] sm:$0xf] %v930_v28  ;;  %v962_v28 = vmul.f32 %v8844_v14, %v8772_v44 }
 0x5d1   :  { %933 = vst [vmem:[#allocation2 + $0x12c] sm:$0xf] %v929_v22 }
 0x5d2   :  { %v8777_v46 = vpop.permute.xlu1 %951 }
 0x5d7   :  { %v5752_v23 = vld [vmem:[#allocation2 + $0x1a8] sm:$0xf0] }
 0x5d8   :  { %v6897_v56 = vld [vmem:[#allocation2 + $0x12c] sm:$0xf] }
 0x5d9   :  { %v5755_v54 = vor.u32 %v6897_v56, %v5752_v23 }
 0x5db   :  { %5168 = vmatmul.bf16.gmra.mxu0 %v5755_v54  ;;  %v965_v58 = vpop.permute.xlu1 %964 }
 0x5dc   :  { %v979_v38 = vmul.f32 %v8380_v49, %v965_v58  ;;  %v7025_v49 = vld [vmem:[%s10204_s2 + $0x328] sm:$0xff] }
 0x5dd   :  { %5176 = vmatpush.bf16.msrb.mxu1 %v7025_v49 }
 0x5de   :  { %v7446_v59 = vpack.i.bf16 %v980_v37, %v979_v38  ;;  %v7817_v38 = vmov 29  }
 0x5e0   :  { %7447 = vrot.lane.b32.xlu2 %v7446_v59, %s7795_s27  ;;  %v1023_v59 = vpop.permute.xlu0 %1022 }
 0x5e3   :  { %v977_v27 = vpop.permute.xlu1 %976 }
 0x5e4   :  { %v982_v19 = vmul.f32 %v8402_v60, %v977_v27  ;;  %v7024_v60 = vld [vmem:[%s10204_s2 + $0x320] sm:$0xff] }
 0x5e5   :  { %5177 = vmatpush.bf16.msrb.mxu1 %v7024_v60  ;;  %v7035_v60 = vld [vmem:[%s10204_s2 + $0x378] sm:$0xff] }
 0x5e6   :  { %v7451_v20 = vpack.i.bf16 %v982_v19, %v981_v42  ;;  %5193 = vmatpush.bf16.msrb.mxu2 %v7035_v60 }
 0x5e8   :  { %7452 = vrot.lane.b32.xlu1 %v7451_v20, %s7795_s27  ;;  %1017 = vperm.xlu2 %7456, %v8643_v0   ;;  %v1049_v49 = vpop.permute.xlu0 %1048 }
 0x5e9   :  { %5178 = vmatpush.bf16.msrb.mxu1 %v7023_v17 }
 0x5ed   :  { %5179 = vmatpush.bf16.msrb.mxu1 %v7022_v40 }
 0x5f0   :  { %1027 = vperm.xlu1 %7458, %v8626_v30   ;;  %1032 = vperm.xlu2 %7456, %v8656_v13  }
 0x5f1   :  { %5180 = vmatpush.bf16.msrb.mxu1 %v7021_v48  ;;  %v7034_v48 = vld [vmem:[%s10204_s2 + $0x370] sm:$0xff] }
 0x5f2   :  { %5194 = vmatpush.bf16.msrb.mxu2 %v7034_v48 }
 0x5f5   :  { %5181 = vmatpush.bf16.msrb.mxu1 %v7020_v61 }
 0x5f8   :  { %7459 = vset.pattern.permute.xlu1 %v7815_v51  ;;  %7460 = vset.pattern.permute.xlu2 %v7815_v51  ;;  %v8855_v51 = vld [vmem:[%s10203_s1 + $0x10] sm:$0xff] }
 0x5f9   :  { %1040 = vperm.xlu1 %7459, %v8643_v0   ;;  %1044 = vperm.xlu2 %7460, %v8618_v4   ;;  %v961_v41 = vmul.f32 %v8855_v51, %v8777_v46  ;;  %v1057_v17 = vmul.f32 %v8855_v51, %v1049_v49 }
 0x601   :  { %1052 = vperm.xlu1 %7459, %v8656_v13  }
 0x638   :  { %v5164_v63 = vpop.f32.mrf.mxu0 }
 0x639   :  { %v8826_v10 = vadd.f32 %v5164_v63, %v8758_v31 }
 0x63a   :  { %v7448_v2 = vpop.permute.xlu2 %7447 }
 0x63b   :  { %v7450_v11 = vunpack.i.h.bf16 %v7448_v2  ;;  %v7449_v34 = vunpack.i.l.bf16 %v7448_v2  ;;  %v7032_v2 = vld [vmem:[%s10204_s2 + $0x360] sm:$0xff] }
 0x63d   :  { %v999_v5 = vsel %vm86_vm0, %v959_v1, %v7449_v34  ;;  %v1000_v57 = vsel %vm86_vm0, %v960_v39, %v7450_v11  ;;  %v7033_v1 = vld [vmem:[%s10204_s2 + $0x368] sm:$0xff]  ;;  %v7031_v39 = vld [vmem:[%s10204_s2 + $0x358] sm:$0xff]  ;;  %v7030_v11 = vld [vmem:[%s10204_s2 + $0x350] sm:$0xff] }
 0x63e   :  { %v1003_v53 = vpack.c.bf16 %v999_v5, %v999_v5  ;;  %v1004_v18 = vpack.c.bf16 %v1000_v57, %v1000_v57  ;;  %5195 = vmatpush.bf16.msrb.mxu2 %v7033_v1  ;;  %v7029_v34 = vld [vmem:[%s10204_s2 + $0x348] sm:$0xff]  ;;  %v7028_v5 = vld [vmem:[%s10204_s2 + $0x340] sm:$0xff]  ;;  %v8902_v57 = vpop.f32.mrf.mxu1 }
 0x640   :  { %1007 = vst [vmem:[#allocation2 + $0x30] sm:$0xf] %v1003_v53  ;;  %v5166_v29 = vpop.f32.mrf.mxu0 }
 0x641   :  { %1008 = vst [vmem:[#allocation2 + $0xb0] sm:$0xf] %v1004_v18  ;;  %v8837_v31 = vadd.f32 %v5166_v29, %v8761_v32  ;;  %v7816_v32 = vmov 28  }
 0x642   :  { %v8839_v43 = vpop.permute.xlu2 %1017  ;;  %7474 = vset.pattern.permute.xlu1 %v7816_v32  ;;  %7473 = vset.pattern.permute.xlu0 %v7816_v32 }
 0x643   :  { %1098 = vperm.xlu0 %7473, %v8618_v4   ;;  %7472 = vset.pattern.permute.xlu2 %v7816_v32  ;;  %v1035_v18 = vmul.f32 %v8821_v15, %v8839_v43 }
 0x644   :  { %5196 = vmatpush.bf16.msrb.mxu2 %v7032_v2 }
 0x647   :  { %v5630_v35 = vld [vmem:[#allocation2 + $0x30] sm:$0xf] }
 0x648   :  { %v6882_v50 = vld [vmem:[#allocation2 + $0xac] sm:$0xf0]  ;;  %5197 = vmatpush.bf16.msrb.mxu2 %v7031_v39  ;;  %v7043_v39 = vld [vmem:[%s10204_s2 + $0x3b8] sm:$0xff] }
 0x649   :  { %v5631_v25 = vor.u32 %v6882_v50, %v5630_v35  ;;  %v1036_v50 = vmul.f32 %v8831_v12, %v1023_v59  ;;  %v7818_v59 = vmov 30   ;;  %5212 = vmatpush.bf16.msrb.mxu3 %v7043_v39 }
 0x64a   :  { %v8861_v56 = vpop.permute.xlu2 %1032 }
 0x64b   :  { %5182 = vmatmul.bf16.vlgmr.msrb.gmra.mxu1 %v5631_v25  ;;  %7477 = vset.pattern.permute.xlu0 %v7817_v38 }
 0x64c   :  { %1124 = vperm.xlu0 %7477, %v8626_v30   ;;  %5198 = vmatpush.bf16.msrb.mxu2 %v7030_v11 }
 0x650   :  { %5199 = vmatpush.bf16.msrb.mxu2 %v7029_v34 }
 0x653   :  { %v1045_v33 = vpop.permute.xlu2 %1044 }
 0x654   :  { %v1056_v27 = vmul.f32 %v8831_v12, %v1045_v33  ;;  %5200 = vmatpush.bf16.msrb.mxu2 %v7028_v5  ;;  %7489 = vset.pattern.permute.xlu0 %v7818_v59  ;;  %v7042_v5 = vld [vmem:[%s10204_s2 + $0x3b0] sm:$0xff] }
 0x655   :  { %1174 = vperm.xlu0 %7489, %v8618_v4   ;;  %5213 = vmatpush.bf16.msrb.mxu3 %v7042_v5 }
 0x658   :  { %v5169_v52 = vpop.f32.mrf.mxu0 }
 0x659   :  { %v8849_v22 = vadd.f32 %v5169_v52, %v8775_v45 }
 0x65a   :  { %v7453_v26 = vpop.permute.xlu1 %7452 }
 0x65b   :  { %v7455_v23 = vunpack.i.h.bf16 %v7453_v26  ;;  %v7454_v44 = vunpack.i.l.bf16 %v7453_v26 }
 0x65d   :  { %v1002_v45 = vsel %vm86_vm0, %v962_v28, %v7455_v23  ;;  %v1001_v8 = vsel %vm86_vm0, %v961_v41, %v7454_v44 }
 0x65e   :  { %v1006_v54 = vpack.c.bf16 %v1002_v45, %v1002_v45  ;;  %v1005_v37 = vpack.c.bf16 %v1001_v8, %v1001_v8 }
 0x660   :  { %1010 = vst [vmem:[#allocation2 + $0x1b0] sm:$0xf] %v1006_v54 }
 0x661   :  { %1009 = vst [vmem:[#allocation2 + $0x130] sm:$0xf] %v1005_v37  ;;  %v1038_v37 = vmul.f32 %v8844_v14, %v8861_v56 }
 0x662   :  { %v8863_v58 = vpop.permute.xlu1 %1027 }
 0x667   :  { %v6914_v46 = vld [vmem:[#allocation2 + $0x1ac] sm:$0xf0] }
 0x668   :  { %v5758_v6 = vld [vmem:[#allocation2 + $0x130] sm:$0xf] }
 0x669   :  { %v5759_v42 = vor.u32 %v6914_v46, %v5758_v6 }
 0x66b   :  { %5187 = vmatmul.bf16.gmra.mxu1 %v5759_v42  ;;  %v1041_v55 = vpop.permute.xlu1 %1040 }
 0x66c   :  { %v1055_v19 = vmul.f32 %v8821_v15, %v1041_v55 }
 0x66e   :  { %v7462_v20 = vpack.i.bf16 %v1056_v27, %v1055_v19 }
 0x670   :  { %7463 = vrot.lane.b32.xlu2 %v7462_v20, %s7795_s27  ;;  %v7819_v20 = vmov 31  }
 0x671   :  { %7493 = vset.pattern.permute.xlu0 %v7819_v20 }
 0x672   :  { %1200 = vperm.xlu0 %7493, %v8626_v30  }
 0x673   :  { %v1053_v40 = vpop.permute.xlu1 %1052 }
 0x674   :  { %v1058_v61 = vmul.f32 %v8844_v14, %v1053_v40 }
 0x676   :  { %v7467_v63 = vpack.i.bf16 %v1058_v61, %v1057_v17 }
 0x678   :  { %7468 = vrot.lane.b32.xlu1 %v7467_v63, %s7795_s27  ;;  %1093 = vperm.xlu2 %7472, %v8643_v0  }
 0x680   :  { %1103 = vperm.xlu1 %7474, %v8626_v30   ;;  %1108 = vperm.xlu2 %7472, %v8656_v13  }
 0x688   :  { %7475 = vset.pattern.permute.xlu1 %v7817_v38  ;;  %7476 = vset.pattern.permute.xlu2 %v7817_v38 }
 0x689   :  { %1116 = vperm.xlu1 %7475, %v8643_v0   ;;  %1120 = vperm.xlu2 %7476, %v8618_v4  }
 0x691   :  { %1128 = vperm.xlu1 %7475, %v8656_v13   ;;  %7488 = vset.pattern.permute.xlu2 %v7818_v59 }
 0x699   :  { %7490 = vset.pattern.permute.xlu1 %v7818_v59 }
 0x6b5   :  { %v1099_v49 = vpop.permute.xlu0 %1098 }
 0x6be   :  { %v1125_v2 = vpop.permute.xlu0 %1124 }
 0x6bf   :  { %v1133_v11 = vmul.f32 %v8855_v51, %v1125_v2 }
 0x6c8   :  { %v5183_v53 = vpop.f32.mrf.mxu1 }
 0x6c9   :  { %v8907_v29 = vadd.f32 %v5183_v53, %v8826_v10 }
 0x6ca   :  { %v7464_v35 = vpop.permute.xlu2 %7463 }
 0x6cb   :  { %v7466_v25 = vunpack.i.h.bf16 %v7464_v35  ;;  %v7465_v52 = vunpack.i.l.bf16 %v7464_v35  ;;  %v7041_v35 = vld [vmem:[%s10204_s2 + $0x3a8] sm:$0xff] }
 0x6cc   :  { %5214 = vmatpush.bf16.msrb.mxu3 %v7041_v35 }
 0x6cd   :  { %v1075_v28 = vsel %vm86_vm0, %v1035_v18, %v7465_v52  ;;  %v1076_v32 = vsel %vm86_vm0, %v1036_v50, %v7466_v25  ;;  %v7040_v50 = vld [vmem:[%s10204_s2 + $0x3a0] sm:$0xff]  ;;  %v7039_v25 = vld [vmem:[%s10204_s2 + $0x398] sm:$0xff]  ;;  %v7038_v52 = vld [vmem:[%s10204_s2 + $0x390] sm:$0xff] }
 0x6ce   :  { %v1079_v26 = vpack.c.bf16 %v1075_v28, %v1075_v28  ;;  %v1080_v41 = vpack.c.bf16 %v1076_v32, %v1076_v32  ;;  %v1112_v32 = vmul.f32 %v8831_v12, %v1099_v49 }
 0x6d0   :  { %1083 = vst [vmem:[#allocation2 + $0x34] sm:$0xf] %v1079_v26  ;;  %v5185_v23 = vpop.f32.mrf.mxu1  ;;  %5215 = vmatpush.bf16.msrb.mxu3 %v7040_v50  ;;  %v7051_v50 = vld [vmem:[%s10204_s2 + $0x3f8] sm:$0xff] }
 0x6d1   :  { %1084 = vst [vmem:[#allocation2 + $0xb4] sm:$0xf] %v1080_v41  ;;  %v8913_v44 = vadd.f32 %v5185_v23, %v8837_v31  ;;  %v1037_v31 = vmul.f32 %v8855_v51, %v8863_v58  ;;  %5231 = vmatpush.bf16.msra.mxu0 %v7051_v50 }
 0x6d2   :  { %v8915_v8 = vpop.permute.xlu2 %1093 }
 0x6d4   :  { %5216 = vmatpush.bf16.msrb.mxu3 %v7039_v25 }
 0x6d7   :  { %v6866_v43 = vld [vmem:[#allocation2 + $0x34] sm:$0xf] }
 0x6d8   :  { %v5632_v10 = vld [vmem:[#allocation2 + $0xb0] sm:$0xf0]  ;;  %5217 = vmatpush.bf16.msrb.mxu3 %v7038_v52 }
 0x6d9   :  { %v5635_v45 = vor.u32 %v6866_v43, %v5632_v10 }
 0x6da   :  { %v8927_v56 = vpop.permute.xlu2 %1108 }
 0x6db   :  { %5201 = vmatmul.bf16.vlgmr.msrb.gmra.mxu2 %v5635_v45 }
 0x6e3   :  { %v1121_v60 = vpop.permute.xlu2 %1120 }
 0x6e4   :  { %v1132_v48 = vmul.f32 %v8831_v12, %v1121_v60 }
 0x6e8   :  { %v5188_v54 = vpop.f32.mrf.mxu1 }
 0x6e9   :  { %v8920_v38 = vadd.f32 %v5188_v54, %v8849_v22 }
 0x6ea   :  { %v7469_v46 = vpop.permute.xlu1 %7468 }
 0x6eb   :  { %v7471_v33 = vunpack.i.h.bf16 %v7469_v46  ;;  %v7470_v6 = vunpack.i.l.bf16 %v7469_v46 }
 0x6ed   :  { %v1078_v42 = vsel %vm86_vm0, %v1038_v37, %v7471_v33  ;;  %v1077_v27 = vsel %vm86_vm0, %v1037_v31, %v7470_v6 }
 0x6ee   :  { %v1082_v22 = vpack.c.bf16 %v1078_v42, %v1078_v42  ;;  %v1081_v55 = vpack.c.bf16 %v1077_v27, %v1077_v27  ;;  %v1114_v42 = vmul.f32 %v8844_v14, %v8927_v56  ;;  %v7820_v27 = vmov 32  }
 0x6ef   :  { %7505 = vset.pattern.permute.xlu0 %v7820_v27 }
 0x6f0   :  { %1086 = vst [vmem:[#allocation2 + $0x1b4] sm:$0xf] %v1082_v22 }
 0x6f1   :  { %1085 = vst [vmem:[#allocation2 + $0x134] sm:$0xf] %v1081_v55 }
 0x6f2   :  { %v8929_v19 = vpop.permute.xlu1 %1103 }
 0x6f3   :  { %v1113_v22 = vmul.f32 %v8855_v51, %v8929_v19 }
 0x6f7   :  { %v5760_v58 = vld [vmem:[#allocation2 + $0x1b0] sm:$0xf0] }
 0x6f8   :  { %v6898_v17 = vld [vmem:[#allocation2 + $0x134] sm:$0xf] }
 0x6f9   :  { %v5763_v40 = vor.u32 %v6898_v17, %v5760_v58 }
 0x6fb   :  { %5206 = vmatmul.bf16.gmra.mxu2 %v5763_v40  ;;  %v1117_v61 = vpop.permute.xlu1 %1116 }
 0x6fc   :  { %v1131_v63 = vmul.f32 %v8821_v15, %v1117_v61  ;;  %v1175_v61 = vpop.permute.xlu0 %1174 }
 0x6fe   :  { %v7478_v1 = vpack.i.bf16 %v1132_v48, %v1131_v63  ;;  %v8997_v48 = vld [vmem:[%s10202_s0 + $0x8] sm:$0xff] }
 0x6ff   :  { %1250 = vperm.xlu0 %7505, %v8997_v48  }
 0x700   :  { %7479 = vrot.lane.b32.xlu2 %v7478_v1, %s7795_s27 }
 0x703   :  { %v1129_v34 = vpop.permute.xlu1 %1128 }
 0x704   :  { %v1134_v53 = vmul.f32 %v8844_v14, %v1129_v34  ;;  %v1201_v35 = vpop.permute.xlu0 %1200 }
 0x705   :  { %v1209_v25 = vmul.f32 %v8855_v51, %v1201_v35 }
 0x706   :  { %v7483_v18 = vpack.i.bf16 %v1134_v53, %v1133_v11  ;;  %v7821_v11 = vmov 33  }
 0x707   :  { %7509 = vset.pattern.permute.xlu0 %v7821_v11 }
 0x708   :  { %7484 = vrot.lane.b32.xlu1 %v7483_v18, %s7795_s27  ;;  %1169 = vperm.xlu2 %7488, %v8643_v0  }
 0x710   :  { %1179 = vperm.xlu1 %7490, %v8626_v30   ;;  %1184 = vperm.xlu2 %7488, %v8656_v13   ;;  %v7037_v30 = vld [vmem:[%s10204_s2 + $0x388] sm:$0xff] }
 0x711   :  { %5218 = vmatpush.bf16.msrb.mxu3 %v7037_v30  ;;  %v7050_v30 = vld [vmem:[%s10204_s2 + $0x3f0] sm:$0xff] }
 0x712   :  { %5232 = vmatpush.bf16.msra.mxu0 %v7050_v30 }
 0x718   :  { %7491 = vset.pattern.permute.xlu1 %v7819_v20  ;;  %7492 = vset.pattern.permute.xlu2 %v7819_v20 }
 0x719   :  { %1192 = vperm.xlu1 %7491, %v8643_v0   ;;  %1196 = vperm.xlu2 %7492, %v8618_v4   ;;  %v7036_v4 = vld [vmem:[%s10204_s2 + $0x380] sm:$0xff]  ;;  %v8968_v0 = vpop.f32.mrf.mxu2 }
 0x71a   :  { %5219 = vmatpush.bf16.msrb.mxu3 %v7036_v4 }
 0x721   :  { %1204 = vperm.xlu1 %7491, %v8656_v13   ;;  %v1111_v13 = vmul.f32 %v8821_v15, %v8915_v8  ;;  %7504 = vset.pattern.permute.xlu2 %v7820_v27 }
 0x729   :  { %7506 = vset.pattern.permute.xlu1 %v7820_v27 }
 0x75a   :  { %v7480_v28 = vpop.permute.xlu2 %7479 }
 0x75b   :  { %v7482_v26 = vunpack.i.h.bf16 %v7480_v28  ;;  %v7481_v41 = vunpack.i.l.bf16 %v7480_v28  ;;  %v9022_v28 = vld [vmem:[%s10202_s0] sm:$0xff] }
 0x75d   :  { %v1151_v23 = vsel %vm86_vm0, %v1111_v13, %v7481_v41  ;;  %v1152_v43 = vsel %vm86_vm0, %v1112_v32, %v7482_v26  ;;  %v7049_v32 = vld [vmem:[%s10204_s2 + $0x3e8] sm:$0xff]  ;;  %v7048_v26 = vld [vmem:[%s10204_s2 + $0x3e0] sm:$0xff]  ;;  %v9035_v41 = vld [vmem:[%s10202_s0 + $0x18] sm:$0xff] }
 0x75e   :  { %v1155_v10 = vpack.c.bf16 %v1151_v23, %v1151_v23  ;;  %v1156_v45 = vpack.c.bf16 %v1152_v43, %v1152_v43  ;;  %v5202_v54 = vpop.f32.mrf.mxu2  ;;  %5233 = vmatpush.bf16.msra.mxu0 %v7049_v32  ;;  %v7047_v23 = vld [vmem:[%s10204_s2 + $0x3d8] sm:$0xff]  ;;  %v7046_v43 = vld [vmem:[%s10204_s2 + $0x3d0] sm:$0xff] }
 0x75f   :  { %v8976_v37 = vadd.f32 %v5202_v54, %v8907_v29  ;;  %v9054_v54 = vpop.f32.mrf.mxu3 }
 0x760   :  { %1159 = vst [vmem:[#allocation2 + $0x38] sm:$0xf] %v1155_v10  ;;  %v7045_v10 = vld [vmem:[%s10204_s2 + $0x3c8] sm:$0xff] }
 0x761   :  { %1160 = vst [vmem:[#allocation2 + $0xb8] sm:$0xf] %v1156_v45  ;;  %v7044_v45 = vld [vmem:[%s10204_s2 + $0x3c0] sm:$0xff] }
 0x762   :  { %v8981_v6 = vpop.permute.xlu2 %1169  ;;  %5234 = vmatpush.bf16.msra.mxu0 %v7048_v26 }
 0x766   :  { %v5204_v59 = vpop.f32.mrf.mxu2  ;;  %5235 = vmatpush.bf16.msra.mxu0 %v7047_v23 }
 0x767   :  { %v8979_v8 = vadd.f32 %v5204_v59, %v8913_v44  ;;  %v5638_v46 = vld [vmem:[#allocation2 + $0x38] sm:$0xf]  ;;  %v1187_v59 = vmul.f32 %v8821_v15, %v8981_v6 }
 0x768   :  { %v6883_v31 = vld [vmem:[#allocation2 + $0xb4] sm:$0xf0] }
 0x769   :  { %v5639_v33 = vor.u32 %v6883_v31, %v5638_v46  ;;  %v1188_v31 = vmul.f32 %v8831_v12, %v1175_v61 }
 0x76a   :  { %v8989_v58 = vpop.permute.xlu2 %1184  ;;  %5236 = vmatpush.bf16.msra.mxu0 %v7046_v43 }
 0x76b   :  { %5220 = vmatmul.bf16.vlgmr.msrb.gmra.mxu3 %v5639_v33 }
 0x76e   :  { %5237 = vmatpush.bf16.msra.mxu0 %v7045_v10  ;;  %v7059_v10 = vld [vmem:[%s10204_s2 + $0x438] sm:$0xff] }
 0x76f   :  { %5250 = vmatpush.bf16.msra.mxu1 %v7059_v10 }
 0x772   :  { %5238 = vmatpush.bf16.msra.mxu0 %v7044_v45 }
 0x773   :  { %v1197_v1 = vpop.permute.xlu2 %1196 }
 0x774   :  { %v1208_v34 = vmul.f32 %v8831_v12, %v1197_v1  ;;  %v7822_v1 = vmov 34  }
 0x77a   :  { %v7485_v29 = vpop.permute.xlu1 %7484 }
 0x77b   :  { %v7487_v55 = vunpack.i.h.bf16 %v7485_v29  ;;  %v7486_v44 = vunpack.i.l.bf16 %v7485_v29 }
 0x77d   :  { %v1154_v20 = vsel %vm86_vm0, %v1114_v42, %v7487_v55  ;;  %v1153_v49 = vsel %vm86_vm0, %v1113_v22, %v7486_v44 }
 0x77e   :  { %v1158_v60 = vpack.c.bf16 %v1154_v20, %v1154_v20  ;;  %v1157_v17 = vpack.c.bf16 %v1153_v49, %v1153_v49  ;;  %v5207_v40 = vpop.f32.mrf.mxu2 }
 0x77f   :  { %v8992_v56 = vadd.f32 %v5207_v40, %v8920_v38  ;;  %v9005_v38 = vld [vmem:[%s10202_s0 + $0x10] sm:$0xff] }
 0x780   :  { %1162 = vst [vmem:[#allocation2 + $0x1b8] sm:$0xf] %v1158_v60  ;;  %1276 = vperm.xlu0 %7509, %v9005_v38  }
 0x781   :  { %1161 = vst [vmem:[#allocation2 + $0x138] sm:$0xf] %v1157_v17 }
 0x782   :  { %v9000_v19 = vpop.permute.xlu1 %1179 }
 0x787   :  { %v6915_v63 = vld [vmem:[#allocation2 + $0x1b4] sm:$0xf0] }
 0x788   :  { %v5766_v2 = vld [vmem:[#allocation2 + $0x138] sm:$0xf]  ;;  %7521 = vset.pattern.permute.xlu0 %v7822_v1 }
 0x789   :  { %v5767_v39 = vor.u32 %v6915_v63, %v5766_v2  ;;  %v1190_v63 = vmul.f32 %v8844_v14, %v8989_v58  ;;  %1326 = vperm.xlu0 %7521, %v8997_v48  }
 0x78b   :  { %5225 = vmatmul.bf16.gmra.mxu3 %v5767_v39  ;;  %v1193_v5 = vpop.permute.xlu1 %1192 }
 0x78c   :  { %v1207_v53 = vmul.f32 %v8821_v15, %v1193_v5 }
 0x78e   :  { %v7494_v18 = vpack.i.bf16 %v1208_v34, %v1207_v53 }
 0x790   :  { %7495 = vrot.lane.b32.xlu2 %v7494_v18, %s7795_s27 }
 0x793   :  { %v1205_v52 = vpop.permute.xlu1 %1204 }
 0x794   :  { %v1210_v4 = vmul.f32 %v8844_v14, %v1205_v52 }
 0x796   :  { %v7499_v13 = vpack.i.bf16 %v1210_v4, %v1209_v25  ;;  %v7823_v25 = vmov 35  }
 0x797   :  { %7525 = vset.pattern.permute.xlu0 %v7823_v25 }
 0x798   :  { %7500 = vrot.lane.b32.xlu1 %v7499_v13, %s7795_s27  ;;  %1245 = vperm.xlu2 %7504, %v9022_v28  }
 0x799   :  { %1352 = vperm.xlu0 %7525, %v9005_v38  }
 0x7a0   :  { %1255 = vperm.xlu1 %7506, %v9005_v38   ;;  %1260 = vperm.xlu2 %7504, %v9035_v41  }
 0x7a8   :  { %7507 = vset.pattern.permute.xlu1 %v7821_v11  ;;  %7508 = vset.pattern.permute.xlu2 %v7821_v11 }
 0x7a9   :  { %1268 = vperm.xlu1 %7507, %v9022_v28   ;;  %1272 = vperm.xlu2 %7508, %v8997_v48  }
 0x7b1   :  { %1280 = vperm.xlu1 %7507, %v9035_v41   ;;  %7520 = vset.pattern.permute.xlu2 %v7822_v1 }
 0x7b9   :  { %7522 = vset.pattern.permute.xlu1 %v7822_v1 }
 0x7ea   :  { %v7496_v46 = vpop.permute.xlu2 %7495 }
 0x7eb   :  { %v7498_v33 = vunpack.i.h.bf16 %v7496_v46  ;;  %v7497_v42 = vunpack.i.l.bf16 %v7496_v46  ;;  %v7058_v46 = vld [vmem:[%s10204_s2 + $0x430] sm:$0xff] }
 0x7ec   :  { %5251 = vmatpush.bf16.msra.mxu1 %v7058_v46 }
 0x7ed   :  { %v1227_v27 = vsel %vm86_vm0, %v1187_v59, %v7497_v42  ;;  %v1228_v29 = vsel %vm86_vm0, %v1188_v31, %v7498_v33  ;;  %v7057_v42 = vld [vmem:[%s10204_s2 + $0x428] sm:$0xff] }
 0x7ee   :  { %v1231_v22 = vpack.c.bf16 %v1227_v27, %v1227_v27  ;;  %v1232_v55 = vpack.c.bf16 %v1228_v29, %v1228_v29  ;;  %v5221_v44 = vpop.f32.mrf.mxu3  ;;  %v7056_v27 = vld [vmem:[%s10204_s2 + $0x420] sm:$0xff]  ;;  %v7055_v29 = vld [vmem:[%s10204_s2 + $0x418] sm:$0xff] }
 0x7ef   :  { %v9062_v20 = vadd.f32 %v5221_v44, %v8976_v37  ;;  %v7052_v44 = vld [vmem:[%s10204_s2 + $0x400] sm:$0xff] }
 0x7f0   :  { %1235 = vst [vmem:[#allocation2 + $0x3c] sm:$0xf] %v1231_v22  ;;  %5252 = vmatpush.bf16.msra.mxu1 %v7057_v42  ;;  %v7054_v22 = vld [vmem:[%s10204_s2 + $0x410] sm:$0xff] }
 0x7f1   :  { %1236 = vst [vmem:[#allocation2 + $0xbc] sm:$0xf] %v1232_v55  ;;  %v7053_v55 = vld [vmem:[%s10204_s2 + $0x408] sm:$0xff] }
 0x7f2   :  { %v9067_v61 = vpop.permute.xlu2 %1245 }
 0x7f4   :  { %5253 = vmatpush.bf16.msra.mxu1 %v7056_v27 }
 0x7f6   :  { %v5223_v49 = vpop.f32.mrf.mxu3 }
 0x7f7   :  { %v9065_v6 = vadd.f32 %v5223_v49, %v8979_v8  ;;  %v6867_v60 = vld [vmem:[#allocation2 + $0x3c] sm:$0xf]  ;;  %v1189_v8 = vmul.f32 %v8855_v51, %v9000_v19  ;;  %v1251_v19 = vpop.permute.xlu0 %1250  ;;  %v9120_v49 = vpop.f32.mrf.mxu0 }
 0x7f8   :  { %v5640_v17 = vld [vmem:[#allocation2 + $0xb8] sm:$0xf0]  ;;  %5254 = vmatpush.bf16.msra.mxu1 %v7055_v29  ;;  %v1264_v1 = vmul.f32 %v8831_v12, %v1251_v19 }
 0x7f9   :  { %v5643_v40 = vor.u32 %v6867_v60, %v5640_v17  ;;  %v1263_v17 = vmul.f32 %v8821_v15, %v9067_v61 }
 0x7fa   :  { %v9076_v5 = vpop.permute.xlu2 %1260 }
 0x7fb   :  { %5239 = vmatmul.bf16.vlgmr.msra.gmra.mxu0 %v5643_v40 }
 0x7fc   :  { %5255 = vmatpush.bf16.msra.mxu1 %v7054_v22 }
 0x7ff   :  { %v1277_v43 = vpop.permute.xlu0 %1276 }
 0x800   :  { %v1285_v45 = vmul.f32 %v8855_v51, %v1277_v43  ;;  %5256 = vmatpush.bf16.msra.mxu1 %v7053_v55 }
 0x803   :  { %v1273_v30 = vpop.permute.xlu2 %1272 }
 0x804   :  { %v1284_v32 = vmul.f32 %v8831_v12, %v1273_v30  ;;  %5257 = vmatpush.bf16.msra.mxu1 %v7052_v44  ;;  %v7067_v44 = vld [vmem:[%s10204_s2 + $0x478] sm:$0xff] }
 0x805   :  { %5269 = vmatpush.bf16.msra.mxu2 %v7067_v44 }
 0x80a   :  { %v7501_v37 = vpop.permute.xlu1 %7500 }
 0x80b   :  { %v7503_v2 = vunpack.i.h.bf16 %v7501_v37  ;;  %v7502_v39 = vunpack.i.l.bf16 %v7501_v37 }
 0x80d   :  { %v1230_v11 = vsel %vm86_vm0, %v1190_v63, %v7503_v2  ;;  %v1229_v34 = vsel %vm86_vm0, %v1189_v8, %v7502_v39 }
 0x80e   :  { %v1234_v53 = vpack.c.bf16 %v1230_v11, %v1230_v11  ;;  %v1233_v58 = vpack.c.bf16 %v1229_v34, %v1229_v34  ;;  %v5226_v18 = vpop.f32.mrf.mxu3 }
 0x80f   :  { %v9079_v35 = vadd.f32 %v5226_v18, %v8992_v56 }
 0x810   :  { %1238 = vst [vmem:[#allocation2 + $0x1bc] sm:$0xf] %v1234_v53 }
 0x811   :  { %1237 = vst [vmem:[#allocation2 + $0x13c] sm:$0xf] %v1233_v58 }
 0x812   :  { %v9081_v50 = vpop.permute.xlu1 %1255 }
 0x817   :  { %v5768_v52 = vld [vmem:[#allocation2 + $0x1b8] sm:$0xf0] }
 0x818   :  { %v6899_v4 = vld [vmem:[#allocation2 + $0x13c] sm:$0xf] }
 0x819   :  { %v5771_v13 = vor.u32 %v6899_v4, %v5768_v52  ;;  %v1266_v52 = vmul.f32 %v8844_v14, %v9076_v5  ;;  %v7824_v4 = vmov 36  }
 0x81a   :  { %7537 = vset.pattern.permute.xlu0 %v7824_v4 }
 0x81b   :  { %5244 = vmatmul.bf16.gmra.mxu0 %v5771_v13  ;;  %v1269_v26 = vpop.permute.xlu1 %1268  ;;  %1402 = vperm.xlu0 %7537, %v8997_v48  }
 0x81c   :  { %v1283_v56 = vmul.f32 %v8821_v15, %v1269_v26 }
 0x81e   :  { %v7510_v23 = vpack.i.bf16 %v1284_v32, %v1283_v56 }
 0x820   :  { %7511 = vrot.lane.b32.xlu2 %v7510_v23, %s7795_s27 }
 0x823   :  { %v1281_v59 = vpop.permute.xlu1 %1280 }
 0x824   :  { %v1286_v31 = vmul.f32 %v8844_v14, %v1281_v59  ;;  %v1327_v59 = vpop.permute.xlu0 %1326 }
 0x826   :  { %v7515_v33 = vpack.i.bf16 %v1286_v31, %v1285_v45  ;;  %v7825_v45 = vmov 37  }
 0x827   :  { %7541 = vset.pattern.permute.xlu0 %v7825_v45 }
 0x828   :  { %7516 = vrot.lane.b32.xlu1 %v7515_v33, %s7795_s27  ;;  %1321 = vperm.xlu2 %7520, %v9022_v28  }
 0x829   :  { %1428 = vperm.xlu0 %7541, %v9005_v38  }
 0x82c   :  { %v1353_v55 = vpop.permute.xlu0 %1352 }
 0x830   :  { %1331 = vperm.xlu1 %7522, %v9005_v38   ;;  %1336 = vperm.xlu2 %7520, %v9035_v41  }
 0x838   :  { %7523 = vset.pattern.permute.xlu1 %v7823_v25  ;;  %7524 = vset.pattern.permute.xlu2 %v7823_v25 }
 0x839   :  { %1344 = vperm.xlu1 %7523, %v9022_v28   ;;  %1348 = vperm.xlu2 %7524, %v8997_v48  }
 0x841   :  { %1356 = vperm.xlu1 %7523, %v9035_v41   ;;  %7536 = vset.pattern.permute.xlu2 %v7824_v4 }
 0x849   :  { %7538 = vset.pattern.permute.xlu1 %v7824_v4  ;;  %v1340_v4 = vmul.f32 %v8831_v12, %v1327_v59 }
 0x878   :  { %v5240_v60 = vpop.f32.mrf.mxu0 }
 0x879   :  { %v9125_v40 = vadd.f32 %v5240_v60, %v9062_v20  ;;  %v1361_v60 = vmul.f32 %v8855_v51, %v1353_v55 }
 0x87a   :  { %v7512_v63 = vpop.permute.xlu2 %7511 }
 0x87b   :  { %v7514_v37 = vunpack.i.h.bf16 %v7512_v63  ;;  %v7513_v8 = vunpack.i.l.bf16 %v7512_v63  ;;  %v7066_v63 = vld [vmem:[%s10204_s2 + $0x470] sm:$0xff] }
 0x87c   :  { %5270 = vmatpush.bf16.msra.mxu2 %v7066_v63 }
 0x87d   :  { %v1303_v2 = vsel %vm86_vm0, %v1263_v17, %v7513_v8  ;;  %v1304_v39 = vsel %vm86_vm0, %v1264_v1, %v7514_v37  ;;  %v7065_v8 = vld [vmem:[%s10204_s2 + $0x468] sm:$0xff] }
 0x87e   :  { %v1307_v11 = vpack.c.bf16 %v1303_v2, %v1303_v2  ;;  %v1308_v34 = vpack.c.bf16 %v1304_v39, %v1304_v39  ;;  %v7064_v2 = vld [vmem:[%s10204_s2 + $0x460] sm:$0xff]  ;;  %v7063_v39 = vld [vmem:[%s10204_s2 + $0x458] sm:$0xff] }
 0x880   :  { %1311 = vst [vmem:[#allocation2 + $0x40] sm:$0xf] %v1307_v11  ;;  %v5242_v53 = vpop.f32.mrf.mxu0  ;;  %5271 = vmatpush.bf16.msra.mxu2 %v7065_v8  ;;  %v7062_v11 = vld [vmem:[%s10204_s2 + $0x450] sm:$0xff] }
 0x881   :  { %1312 = vst [vmem:[#allocation2 + $0xc0] sm:$0xf] %v1308_v34  ;;  %v9131_v58 = vadd.f32 %v5242_v53, %v9065_v6  ;;  %v1265_v6 = vmul.f32 %v8855_v51, %v9081_v50  ;;  %v7061_v34 = vld [vmem:[%s10204_s2 + $0x448] sm:$0xff]  ;;  %v7060_v53 = vld [vmem:[%s10204_s2 + $0x440] sm:$0xff] }
 0x882   :  { %v9133_v25 = vpop.permute.xlu2 %1321 }
 0x884   :  { %5272 = vmatpush.bf16.msra.mxu2 %v7064_v2 }
 0x887   :  { %v5646_v61 = vld [vmem:[#allocation2 + $0x40] sm:$0xf] }
 0x888   :  { %v6884_v20 = vld [vmem:[#allocation2 + $0xbc] sm:$0xf0]  ;;  %5273 = vmatpush.bf16.msra.mxu2 %v7063_v39 }
 0x889   :  { %v5647_v18 = vor.u32 %v6884_v20, %v5646_v61  ;;  %v9186_v61 = vpop.f32.mrf.mxu1 }
 0x88a   :  { %v9145_v5 = vpop.permute.xlu2 %1336 }
 0x88b   :  { %5258 = vmatmul.bf16.vlgmr.msra.gmra.mxu1 %v5647_v18  ;;  %v1339_v18 = vmul.f32 %v8821_v15, %v9133_v25 }
 0x88c   :  { %5274 = vmatpush.bf16.msra.mxu2 %v7062_v11 }
 0x88d   :  { %v1403_v63 = vpop.permute.xlu0 %1402 }
 0x890   :  { %5275 = vmatpush.bf16.msra.mxu2 %v7061_v34 }
 0x893   :  { %v1349_v46 = vpop.permute.xlu2 %1348 }
 0x894   :  { %v1360_v42 = vmul.f32 %v8831_v12, %v1349_v46  ;;  %5276 = vmatpush.bf16.msra.mxu2 %v7060_v53  ;;  %v1342_v46 = vmul.f32 %v8844_v14, %v9145_v5 }
 0x898   :  { %v5245_v19 = vpop.f32.mrf.mxu0 }
 0x899   :  { %v9138_v30 = vadd.f32 %v5245_v19, %v9079_v35 }
 0x89a   :  { %v7517_v13 = vpop.permute.xlu1 %7516 }
 0x89b   :  { %v7519_v32 = vunpack.i.h.bf16 %v7517_v13  ;;  %v7518_v26 = vunpack.i.l.bf16 %v7517_v13  ;;  %v1429_v53 = vpop.permute.xlu0 %1428 }
 0x89d   :  { %v1306_v56 = vsel %vm86_vm0, %v1266_v52, %v7519_v32  ;;  %v1305_v23 = vsel %vm86_vm0, %v1265_v6, %v7518_v26 }
 0x89e   :  { %v1310_v35 = vpack.c.bf16 %v1306_v56, %v1306_v56  ;;  %v1309_v43 = vpack.c.bf16 %v1305_v23, %v1305_v23 }
 0x8a0   :  { %1314 = vst [vmem:[#allocation2 + $0x1c0] sm:$0xf] %v1310_v35 }
 0x8a1   :  { %1313 = vst [vmem:[#allocation2 + $0x140] sm:$0xf] %v1309_v43 }
 0x8a2   :  { %v9147_v10 = vpop.permute.xlu1 %1331 }
 0x8a7   :  { %v6916_v50 = vld [vmem:[#allocation2 + $0x1bc] sm:$0xf0] }
 0x8a8   :  { %v5774_v31 = vld [vmem:[#allocation2 + $0x140] sm:$0xf] }
 0x8a9   :  { %v5775_v33 = vor.u32 %v6916_v50, %v5774_v31 }
 0x8ab   :  { %5263 = vmatmul.bf16.gmra.mxu1 %v5775_v33  ;;  %v1345_v27 = vpop.permute.xlu1 %1344  ;;  %v7826_v33 = vmov 38  }
 0x8ac   :  { %v1359_v29 = vmul.f32 %v8821_v15, %v1345_v27  ;;  %7553 = vset.pattern.permute.xlu0 %v7826_v33 }
 0x8ad   :  { %1478 = vperm.xlu0 %7553, %v8997_v48  }
 0x8ae   :  { %v7526_v22 = vpack.i.bf16 %v1360_v42, %v1359_v29 }
 0x8b0   :  { %7527 = vrot.lane.b32.xlu2 %v7526_v22, %s7795_s27 }
 0x8b3   :  { %v1357_v17 = vpop.permute.xlu1 %1356 }
 0x8b4   :  { %v1362_v1 = vmul.f32 %v8844_v14, %v1357_v17  ;;  %v7827_v17 = vmov 39  }
 0x8b5   :  { %7557 = vset.pattern.permute.xlu0 %v7827_v17 }
 0x8b6   :  { %v7531_v37 = vpack.i.bf16 %v1362_v1, %v1361_v60  ;;  %1504 = vperm.xlu0 %7557, %v9005_v38  }
 0x8b8   :  { %7532 = vrot.lane.b32.xlu1 %v7531_v37, %s7795_s27  ;;  %1397 = vperm.xlu2 %7536, %v9022_v28  }
 0x8c0   :  { %1407 = vperm.xlu1 %7538, %v9005_v38   ;;  %1412 = vperm.xlu2 %7536, %v9035_v41  }
 0x8c8   :  { %7539 = vset.pattern.permute.xlu1 %v7825_v45  ;;  %7540 = vset.pattern.permute.xlu2 %v7825_v45 }
 0x8c9   :  { %1420 = vperm.xlu1 %7539, %v9022_v28   ;;  %1424 = vperm.xlu2 %7540, %v8997_v48  }
 0x8d1   :  { %1432 = vperm.xlu1 %7539, %v9035_v41   ;;  %7552 = vset.pattern.permute.xlu2 %v7826_v33 }
 0x8d9   :  { %7554 = vset.pattern.permute.xlu1 %v7826_v33 }
 0x908   :  { %v5259_v20 = vpop.f32.mrf.mxu1 }
 0x909   :  { %v9191_v19 = vadd.f32 %v5259_v20, %v9125_v40  ;;  %v7075_v20 = vld [vmem:[%s10204_s2 + $0x4b8] sm:$0xff] }
 0x90a   :  { %v7528_v52 = vpop.permute.xlu2 %7527  ;;  %5288 = vmatpush.bf16.msra.mxu3 %v7075_v20 }
 0x90b   :  { %v7530_v13 = vunpack.i.h.bf16 %v7528_v52  ;;  %v7529_v6 = vunpack.i.l.bf16 %v7528_v52 }
 0x90d   :  { %v1379_v32 = vsel %vm86_vm0, %v1339_v18, %v7529_v6  ;;  %v1380_v26 = vsel %vm86_vm0, %v1340_v4, %v7530_v13  ;;  %v1437_v18 = vmul.f32 %v8855_v51, %v1429_v53  ;;  %v7070_v6 = vld [vmem:[%s10204_s2 + $0x490] sm:$0xff] }
 0x90e   :  { %v1383_v56 = vpack.c.bf16 %v1379_v32, %v1379_v32  ;;  %v1384_v23 = vpack.c.bf16 %v1380_v26, %v1380_v26  ;;  %v7069_v32 = vld [vmem:[%s10204_s2 + $0x488] sm:$0xff]  ;;  %v7068_v26 = vld [vmem:[%s10204_s2 + $0x480] sm:$0xff] }
 0x910   :  { %1387 = vst [vmem:[#allocation2 + $0x44] sm:$0xf] %v1383_v56  ;;  %v5261_v35 = vpop.f32.mrf.mxu1  ;;  %v9252_v56 = vpop.f32.mrf.mxu2 }
 0x911   :  { %1388 = vst [vmem:[#allocation2 + $0xc4] sm:$0xf] %v1384_v23  ;;  %v9197_v43 = vadd.f32 %v5261_v35, %v9131_v58  ;;  %v1341_v58 = vmul.f32 %v8855_v51, %v9147_v10  ;;  %v7072_v51 = vld [vmem:[%s10204_s2 + $0x4a0] sm:$0xff] }
 0x912   :  { %v9199_v50 = vpop.permute.xlu2 %1397  ;;  %v9257_v23 = vld [vmem:[%s10203_s1] sm:$0xff] }
 0x913   :  { %v1415_v35 = vmul.f32 %v9257_v23, %v9199_v50 }
 0x917   :  { %v6868_v25 = vld [vmem:[#allocation2 + $0x44] sm:$0xf] }
 0x918   :  { %v5648_v40 = vld [vmem:[#allocation2 + $0xc0] sm:$0xf0] }
 0x919   :  { %v5651_v45 = vor.u32 %v6868_v25, %v5648_v40  ;;  %v9264_v40 = vld [vmem:[%s10203_s1 + $0x8] sm:$0xff] }
 0x91a   :  { %v9211_v5 = vpop.permute.xlu2 %1412 }
 0x91b   :  { %5277 = vmatmul.bf16.vlgmr.msra.gmra.mxu2 %v5651_v45  ;;  %v1416_v45 = vmul.f32 %v9264_v40, %v1403_v63 }
 0x923   :  { %v1425_v1 = vpop.permute.xlu2 %1424 }
 0x924   :  { %v1436_v2 = vmul.f32 %v8831_v12, %v1425_v1  ;;  %v7074_v12 = vld [vmem:[%s10204_s2 + $0x4b0] sm:$0xff]  ;;  %v7828_v1 = vmov 40  }
 0x925   :  { %5289 = vmatpush.bf16.msra.mxu3 %v7074_v12  ;;  %7569 = vset.pattern.permute.xlu0 %v7828_v1 }
 0x926   :  { %1554 = vperm.xlu0 %7569, %v8997_v48  }
 0x928   :  { %v5264_v59 = vpop.f32.mrf.mxu1 }
 0x929   :  { %v9204_v31 = vadd.f32 %v5264_v59, %v9138_v30 }
 0x92a   :  { %v7533_v42 = vpop.permute.xlu1 %7532 }
 0x92b   :  { %v7535_v27 = vunpack.i.h.bf16 %v7533_v42  ;;  %v7534_v29 = vunpack.i.l.bf16 %v7533_v42 }
 0x92d   :  { %v1382_v22 = vsel %vm86_vm0, %v1342_v46, %v7535_v27  ;;  %v1381_v55 = vsel %vm86_vm0, %v1341_v58, %v7534_v29 }
 0x92e   :  { %v1386_v30 = vpack.c.bf16 %v1382_v22, %v1382_v22  ;;  %v1385_v44 = vpack.c.bf16 %v1381_v55, %v1381_v55 }
 0x930   :  { %1390 = vst [vmem:[#allocation2 + $0x1c4] sm:$0xf] %v1386_v30 }
 0x931   :  { %1389 = vst [vmem:[#allocation2 + $0x144] sm:$0xf] %v1385_v44 }
 0x932   :  { %v9213_v60 = vpop.permute.xlu1 %1407 }
 0x937   :  { %v5776_v10 = vld [vmem:[#allocation2 + $0x1c0] sm:$0xf0] }
 0x938   :  { %v6900_v37 = vld [vmem:[#allocation2 + $0x144] sm:$0xf] }
 0x939   :  { %v5779_v8 = vor.u32 %v6900_v37, %v5776_v10  ;;  %v9280_v10 = vld [vmem:[%s10203_s1 + $0x18] sm:$0xff] }
 0x93b   :  { %5282 = vmatmul.bf16.gmra.mxu2 %v5779_v8  ;;  %v1421_v39 = vpop.permute.xlu1 %1420 }
 0x93c   :  { %v1435_v11 = vmul.f32 %v8821_v15, %v1421_v39  ;;  %v7073_v15 = vld [vmem:[%s10204_s2 + $0x4a8] sm:$0xff] }
 0x93d   :  { %5290 = vmatpush.bf16.msra.mxu3 %v7073_v15 }
 0x93e   :  { %v7542_v34 = vpack.i.bf16 %v1436_v2, %v1435_v11 }
 0x940   :  { %7543 = vrot.lane.b32.xlu2 %v7542_v34, %s7795_s27 }
 0x941   :  { %5291 = vmatpush.bf16.msra.mxu3 %v7072_v51 }
 0x943   :  { %v1433_v52 = vpop.permute.xlu1 %1432 }
 0x944   :  { %v1438_v4 = vmul.f32 %v8844_v14, %v1433_v52  ;;  %v7071_v14 = vld [vmem:[%s10204_s2 + $0x498] sm:$0xff] }
 0x945   :  { %5292 = vmatpush.bf16.msra.mxu3 %v7071_v14 }
 0x946   :  { %v7547_v13 = vpack.i.bf16 %v1438_v4, %v1437_v18  ;;  %v7829_v4 = vmov 41  }
 0x947   :  { %7573 = vset.pattern.permute.xlu0 %v7829_v4 }
 0x948   :  { %7548 = vrot.lane.b32.xlu1 %v7547_v13, %s7795_s27  ;;  %1473 = vperm.xlu2 %7552, %v9022_v28  }
 0x949   :  { %5293 = vmatpush.bf16.msra.mxu3 %v7070_v6  ;;  %1580 = vperm.xlu0 %7573, %v9005_v38  }
 0x94d   :  { %5294 = vmatpush.bf16.msra.mxu3 %v7069_v32 }
 0x950   :  { %1483 = vperm.xlu1 %7554, %v9005_v38   ;;  %1488 = vperm.xlu2 %7552, %v9035_v41  }
 0x951   :  { %5295 = vmatpush.bf16.msra.mxu3 %v7068_v26 }
 0x958   :  { %7555 = vset.pattern.permute.xlu1 %v7827_v17  ;;  %7556 = vset.pattern.permute.xlu2 %v7827_v17 }
 0x959   :  { %1496 = vperm.xlu1 %7555, %v9022_v28   ;;  %1500 = vperm.xlu2 %7556, %v8997_v48  }
 0x961   :  { %1508 = vperm.xlu1 %7555, %v9035_v41   ;;  %7568 = vset.pattern.permute.xlu2 %v7828_v1 }
 0x969   :  { %7570 = vset.pattern.permute.xlu1 %v7828_v1 }
 0x99a   :  { %v7544_v25 = vpop.permute.xlu2 %7543 }
 0x99b   :  { %v7546_v59 = vunpack.i.h.bf16 %v7544_v25  ;;  %v7545_v46 = vunpack.i.l.bf16 %v7544_v25  ;;  %v7083_v25 = vld [vmem:[%s10204_s2 + $0x4f8] sm:$0xff] }
 0x99c   :  { %5307 = vmatpush.bf16.msrb.mxu0 %v7083_v25  ;;  %v9367_v25 = vld [vmem:[%s10202_s0 + $0x8] sm:$0xff] }
 0x99d   :  { %v1455_v33 = vsel %vm86_vm0, %v1415_v35, %v7545_v46  ;;  %v1456_v42 = vsel %vm86_vm0, %v1416_v45, %v7546_v59  ;;  %v7082_v46 = vld [vmem:[%s10204_s2 + $0x4f0] sm:$0xff] }
 0x99e   :  { %v1459_v58 = vpack.c.bf16 %v1455_v33, %v1455_v33  ;;  %v1460_v27 = vpack.c.bf16 %v1456_v42, %v1456_v42  ;;  %v5278_v29 = vpop.f32.mrf.mxu2 }
 0x99f   :  { %v9270_v22 = vadd.f32 %v5278_v29, %v9191_v19  ;;  %v1418_v19 = vmul.f32 %v9280_v10, %v9211_v5  ;;  %v7079_v29 = vld [vmem:[%s10204_s2 + $0x4d8] sm:$0xff] }
 0x9a0   :  { %1463 = vst [vmem:[#allocation2 + $0x48] sm:$0xf] %v1459_v58  ;;  %5308 = vmatpush.bf16.msrb.mxu0 %v7082_v46  ;;  %v7081_v58 = vld [vmem:[%s10204_s2 + $0x4e8] sm:$0xff] }
 0x9a1   :  { %1464 = vst [vmem:[#allocation2 + $0xc8] sm:$0xf] %v1460_v27  ;;  %v7080_v27 = vld [vmem:[%s10204_s2 + $0x4e0] sm:$0xff] }
 0x9a2   :  { %v9275_v63 = vpop.permute.xlu2 %1473 }
 0x9a4   :  { %5309 = vmatpush.bf16.msrb.mxu0 %v7081_v58  ;;  %v7831_v58 = vmov 43  }
 0x9a6   :  { %v5280_v50 = vpop.f32.mrf.mxu2 }
 0x9a7   :  { %v9273_v55 = vadd.f32 %v5280_v50, %v9197_v43  ;;  %v5654_v30 = vld [vmem:[#allocation2 + $0x48] sm:$0xf]  ;;  %v9288_v43 = vld [vmem:[%s10203_s1 + $0x10] sm:$0xff] }
 0x9a8   :  { %v6885_v44 = vld [vmem:[#allocation2 + $0xc4] sm:$0xf0]  ;;  %v1417_v8 = vmul.f32 %v9288_v43, %v9213_v60  ;;  %v1479_v60 = vpop.permute.xlu0 %1478  ;;  %5310 = vmatpush.bf16.msrb.mxu0 %v7080_v27  ;;  %v7078_v50 = vld [vmem:[%s10204_s2 + $0x4d0] sm:$0xff] }
 0x9a9   :  { %v5655_v17 = vor.u32 %v6885_v44, %v5654_v30  ;;  %v1492_v44 = vmul.f32 %v9264_v40, %v1479_v60 }
 0x9aa   :  { %v9294_v34 = vpop.permute.xlu2 %1488 }
 0x9ab   :  { %5296 = vmatmul.bf16.vlgmr.msra.gmra.mxu3 %v5655_v17  ;;  %v1494_v60 = vmul.f32 %v9280_v10, %v9294_v34 }
 0x9ac   :  { %5311 = vmatpush.bf16.msrb.mxu0 %v7079_v29 }
 0x9b0   :  { %v1505_v35 = vpop.permute.xlu0 %1504  ;;  %5312 = vmatpush.bf16.msrb.mxu0 %v7078_v50 }
 0x9b1   :  { %v1513_v45 = vmul.f32 %v9288_v43, %v1505_v35 }
 0x9b3   :  { %v1501_v15 = vpop.permute.xlu2 %1500 }
 0x9b4   :  { %v1512_v6 = vmul.f32 %v9264_v40, %v1501_v15 }
 0x9ba   :  { %v7549_v37 = vpop.permute.xlu1 %7548 }
 0x9bb   :  { %v7551_v2 = vunpack.i.h.bf16 %v7549_v37  ;;  %v7550_v39 = vunpack.i.l.bf16 %v7549_v37 }
 0x9bd   :  { %v1458_v11 = vsel %vm86_vm0, %v1418_v19, %v7551_v2  ;;  %v1457_v5 = vsel %vm86_vm0, %v1417_v8, %v7550_v39 }
 0x9be   :  { %v1462_v53 = vpack.c.bf16 %v1458_v11, %v1458_v11  ;;  %v1461_v20 = vpack.c.bf16 %v1457_v5, %v1457_v5  ;;  %v5283_v18 = vpop.f32.mrf.mxu2 }
 0x9bf   :  { %v9297_v52 = vadd.f32 %v5283_v18, %v9204_v31 }
 0x9c0   :  { %1466 = vst [vmem:[#allocation2 + $0x1c8] sm:$0xf] %v1462_v53 }
 0x9c1   :  { %1465 = vst [vmem:[#allocation2 + $0x148] sm:$0xf] %v1461_v20 }
 0x9c2   :  { %v9299_v12 = vpop.permute.xlu1 %1483 }
 0x9c3   :  { %v1493_v15 = vmul.f32 %v9288_v43, %v9299_v12 }
 0x9c7   :  { %v6917_v13 = vld [vmem:[#allocation2 + $0x1c4] sm:$0xf0] }
 0x9c8   :  { %v5782_v51 = vld [vmem:[#allocation2 + $0x148] sm:$0xf] }
 0x9c9   :  { %v5783_v14 = vor.u32 %v6917_v13, %v5782_v51  ;;  %v7830_v13 = vmov 42  }
 0x9ca   :  { %7585 = vset.pattern.permute.xlu0 %v7830_v13 }
 0x9cb   :  { %5301 = vmatmul.bf16.gmra.mxu3 %v5783_v14  ;;  %v1497_v32 = vpop.permute.xlu1 %1496  ;;  %1630 = vperm.xlu0 %7585, %v9367_v25  }
 0x9cc   :  { %v1511_v31 = vmul.f32 %v9257_v23, %v1497_v32 }
 0x9ce   :  { %v7558_v26 = vpack.i.bf16 %v1512_v6, %v1511_v31 }
 0x9d0   :  { %7559 = vrot.lane.b32.xlu2 %v7558_v26, %s7795_s27 }
 0x9d3   :  { %v1509_v59 = vpop.permute.xlu1 %1508  ;;  %7589 = vset.pattern.permute.xlu0 %v7831_v58 }
 0x9d4   :  { %v1514_v33 = vmul.f32 %v9280_v10, %v1509_v59 }
 0x9d6   :  { %v7563_v42 = vpack.i.bf16 %v1514_v33, %v1513_v45  ;;  %v1555_v45 = vpop.permute.xlu0 %1554 }
 0x9d8   :  { %7564 = vrot.lane.b32.xlu1 %v7563_v42, %s7795_s27  ;;  %1549 = vperm.xlu2 %7568, %v9022_v28  }
 0x9e0   :  { %1559 = vperm.xlu1 %7570, %v9005_v38   ;;  %1564 = vperm.xlu2 %7568, %v9035_v41   ;;  %v7077_v38 = vld [vmem:[%s10204_s2 + $0x4c8] sm:$0xff] }
 0x9e1   :  { %5313 = vmatpush.bf16.msrb.mxu0 %v7077_v38 }
 0x9e8   :  { %7571 = vset.pattern.permute.xlu1 %v7829_v4  ;;  %7572 = vset.pattern.permute.xlu2 %v7829_v4 }
 0x9e9   :  { %1572 = vperm.xlu1 %7571, %v9022_v28   ;;  %1576 = vperm.xlu2 %7572, %v8997_v48   ;;  %v7076_v48 = vld [vmem:[%s10204_s2 + $0x4c0] sm:$0xff]  ;;  %v9338_v28 = vpop.f32.mrf.mxu3 }
 0x9ea   :  { %5314 = vmatpush.bf16.msrb.mxu0 %v7076_v48  ;;  %v1581_v48 = vpop.permute.xlu0 %1580 }
 0x9f1   :  { %1584 = vperm.xlu1 %7571, %v9035_v41   ;;  %v1491_v41 = vmul.f32 %v9257_v23, %v9275_v63  ;;  %7584 = vset.pattern.permute.xlu2 %v7830_v13 }
 0x9f9   :  { %7586 = vset.pattern.permute.xlu1 %v7830_v13 }
 0xa2a   :  { %v7560_v30 = vpop.permute.xlu2 %7559 }
 0xa2b   :  { %v7562_v17 = vunpack.i.h.bf16 %v7560_v30  ;;  %v7561_v19 = vunpack.i.l.bf16 %v7560_v30  ;;  %v1589_v30 = vmul.f32 %v9288_v43, %v1581_v48 }
 0xa2d   :  { %v1531_v1 = vsel %vm86_vm0, %v1491_v41, %v7561_v19  ;;  %v1532_v37 = vsel %vm86_vm0, %v1492_v44, %v7562_v17  ;;  %v7091_v41 = vld [vmem:[%s10204_s2 + $0x538] sm:$0xff]  ;;  %v7090_v17 = vld [vmem:[%s10204_s2 + $0x530] sm:$0xff] }
 0xa2e   :  { %v1535_v8 = vpack.c.bf16 %v1531_v1, %v1531_v1  ;;  %v1536_v2 = vpack.c.bf16 %v1532_v37, %v1532_v37  ;;  %v5297_v39 = vpop.f32.mrf.mxu3  ;;  %5326 = vmatpush.bf16.msrb.mxu1 %v7091_v41  ;;  %v9392_v37 = vld [vmem:[%s10202_s0] sm:$0xff] }
 0xa2f   :  { %v9346_v11 = vadd.f32 %v5297_v39, %v9270_v22  ;;  %v7088_v39 = vld [vmem:[%s10204_s2 + $0x520] sm:$0xff] }
 0xa30   :  { %1539 = vst [vmem:[#allocation2 + $0x4c] sm:$0xf] %v1535_v8  ;;  %v7089_v8 = vld [vmem:[%s10204_s2 + $0x528] sm:$0xff] }
 0xa31   :  { %1540 = vst [vmem:[#allocation2 + $0xcc] sm:$0xf] %v1536_v2  ;;  %v9402_v2 = vld [vmem:[%s10202_s0 + $0x18] sm:$0xff] }
 0xa32   :  { %v9351_v4 = vpop.permute.xlu2 %1549  ;;  %5327 = vmatpush.bf16.msrb.mxu1 %v7090_v17 }
 0xa36   :  { %v5299_v5 = vpop.f32.mrf.mxu3  ;;  %5328 = vmatpush.bf16.msrb.mxu1 %v7089_v8 }
 0xa37   :  { %v9349_v63 = vadd.f32 %v5299_v5, %v9273_v55  ;;  %v6869_v53 = vld [vmem:[#allocation2 + $0x4c] sm:$0xf]  ;;  %v7087_v5 = vld [vmem:[%s10204_s2 + $0x518] sm:$0xff] }
 0xa38   :  { %v5656_v20 = vld [vmem:[#allocation2 + $0xc8] sm:$0xf0] }
 0xa39   :  { %v5659_v18 = vor.u32 %v6869_v53, %v5656_v20  ;;  %v7086_v53 = vld [vmem:[%s10204_s2 + $0x510] sm:$0xff]  ;;  %v7085_v20 = vld [vmem:[%s10204_s2 + $0x508] sm:$0xff] }
 0xa3a   :  { %v9359_v32 = vpop.permute.xlu2 %1564  ;;  %5329 = vmatpush.bf16.msrb.mxu1 %v7088_v39 }
 0xa3b   :  { %5315 = vmatmul.bf16.vlgmr.msrb.gmra.mxu0 %v5659_v18  ;;  %v7084_v18 = vld [vmem:[%s10204_s2 + $0x500] sm:$0xff] }
 0xa3d   :  { %v1631_v8 = vpop.permute.xlu0 %1630 }
 0xa3e   :  { %5330 = vmatpush.bf16.msrb.mxu1 %v7087_v5 }
 0xa42   :  { %5331 = vmatpush.bf16.msrb.mxu1 %v7086_v53 }
 0xa43   :  { %v1577_v46 = vpop.permute.xlu2 %1576 }
 0xa44   :  { %v1588_v27 = vmul.f32 %v9264_v40, %v1577_v46 }
 0xa46   :  { %5332 = vmatpush.bf16.msrb.mxu1 %v7085_v20 }
 0xa4a   :  { %v7565_v22 = vpop.permute.xlu1 %7564  ;;  %5333 = vmatpush.bf16.msrb.mxu1 %v7084_v18 }
 0xa4b   :  { %v7567_v51 = vunpack.i.h.bf16 %v7565_v22  ;;  %v7566_v55 = vunpack.i.l.bf16 %v7565_v22  ;;  %v1567_v22 = vmul.f32 %v9257_v23, %v9351_v4 }
 0xa4d   :  { %v1534_v14 = vsel %vm86_vm0, %v1494_v60, %v7567_v51  ;;  %v1533_v6 = vsel %vm86_vm0, %v1493_v15, %v7566_v55  ;;  %v9424_v60 = vpop.f32.mrf.mxu0  ;;  %v1568_v55 = vmul.f32 %v9264_v40, %v1555_v45 }
 0xa4e   :  { %v1538_v31 = vpack.c.bf16 %v1534_v14, %v1534_v14  ;;  %v1537_v26 = vpack.c.bf16 %v1533_v6, %v1533_v6  ;;  %v5302_v35 = vpop.f32.mrf.mxu3 }
 0xa4f   :  { %v9362_v34 = vadd.f32 %v5302_v35, %v9297_v52  ;;  %v9375_v52 = vld [vmem:[%s10202_s0 + $0x10] sm:$0xff] }
 0xa50   :  { %1542 = vst [vmem:[#allocation2 + $0x1cc] sm:$0xf] %v1538_v31  ;;  %1656 = vperm.xlu0 %7589, %v9375_v52  }
 0xa51   :  { %1541 = vst [vmem:[#allocation2 + $0x14c] sm:$0xf] %v1537_v26 }
 0xa52   :  { %v9370_v12 = vpop.permute.xlu1 %1559 }
 0xa57   :  { %v5784_v59 = vld [vmem:[#allocation2 + $0x1c8] sm:$0xf0] }
 0xa58   :  { %v6901_v33 = vld [vmem:[#allocation2 + $0x14c] sm:$0xf] }
 0xa59   :  { %v5787_v42 = vor.u32 %v6901_v33, %v5784_v59 }
 0xa5b   :  { %5320 = vmatmul.bf16.gmra.mxu0 %v5787_v42  ;;  %v1573_v29 = vpop.permute.xlu1 %1572 }
 0xa5c   :  { %v1587_v50 = vmul.f32 %v9257_v23, %v1573_v29 }
 0xa5e   :  { %v7574_v38 = vpack.i.bf16 %v1588_v27, %v1587_v50  ;;  %v1570_v27 = vmul.f32 %v9280_v10, %v9359_v32  ;;  %v7832_v50 = vmov 44  }
 0xa5f   :  { %7601 = vset.pattern.permute.xlu0 %v7832_v50 }
 0xa60   :  { %7575 = vrot.lane.b32.xlu2 %v7574_v38, %s7795_s27  ;;  %1706 = vperm.xlu0 %7601, %v9367_v25  }
 0xa63   :  { %v1585_v44 = vpop.permute.xlu1 %1584 }
 0xa64   :  { %v1590_v19 = vmul.f32 %v9280_v10, %v1585_v44 }
 0xa66   :  { %v7579_v1 = vpack.i.bf16 %v1590_v19, %v1589_v30 }
 0xa68   :  { %7580 = vrot.lane.b32.xlu1 %v7579_v1, %s7795_s27  ;;  %1625 = vperm.xlu2 %7584, %v9392_v37   ;;  %v7833_v1 = vmov 45  }
 0xa69   :  { %7605 = vset.pattern.permute.xlu0 %v7833_v1 }
 0xa6a   :  { %1732 = vperm.xlu0 %7605, %v9375_v52  }
 0xa70   :  { %1635 = vperm.xlu1 %7586, %v9375_v52   ;;  %1640 = vperm.xlu2 %7584, %v9402_v2  }
 0xa78   :  { %7587 = vset.pattern.permute.xlu1 %v7831_v58  ;;  %7588 = vset.pattern.permute.xlu2 %v7831_v58 }
 0xa79   :  { %1648 = vperm.xlu1 %7587, %v9392_v37   ;;  %1652 = vperm.xlu2 %7588, %v9367_v25  }
 0xa81   :  { %1660 = vperm.xlu1 %7587, %v9402_v2   ;;  %7600 = vset.pattern.permute.xlu2 %v7832_v50 }
 0xa89   :  { %7602 = vset.pattern.permute.xlu1 %v7832_v50 }
 0xab8   :  { %v5316_v13 = vpop.f32.mrf.mxu0 }
 0xab9   :  { %v9429_v15 = vadd.f32 %v5316_v13, %v9346_v11 }
 0xaba   :  { %v7576_v51 = vpop.permute.xlu2 %7575 }
 0xabb   :  { %v7578_v14 = vunpack.i.h.bf16 %v7576_v51  ;;  %v7577_v6 = vunpack.i.l.bf16 %v7576_v51 }
 0xabd   :  { %v1607_v31 = vsel %vm86_vm0, %v1567_v22, %v7577_v6  ;;  %v1608_v26 = vsel %vm86_vm0, %v1568_v55, %v7578_v14  ;;  %v7099_v55 = vld [vmem:[%s10204_s2 + $0x578] sm:$0xff] }
 0xabe   :  { %v1611_v35 = vpack.c.bf16 %v1607_v31, %v1607_v31  ;;  %v1612_v59 = vpack.c.bf16 %v1608_v26, %v1608_v26  ;;  %5345 = vmatpush.bf16.msrb.mxu2 %v7099_v55  ;;  %v7098_v31 = vld [vmem:[%s10204_s2 + $0x570] sm:$0xff] }
 0xac0   :  { %1615 = vst [vmem:[#allocation2 + $0x50] sm:$0xf] %v1611_v35  ;;  %v5318_v46 = vpop.f32.mrf.mxu0 }
 0xac1   :  { %1616 = vst [vmem:[#allocation2 + $0xd0] sm:$0xf] %v1612_v59  ;;  %v9435_v33 = vadd.f32 %v5318_v46, %v9349_v63  ;;  %v1569_v63 = vmul.f32 %v9288_v43, %v9370_v12  ;;  %v7097_v59 = vld [vmem:[%s10204_s2 + $0x568] sm:$0xff]  ;;  %v7096_v46 = vld [vmem:[%s10204_s2 + $0x560] sm:$0xff] }
 0xac2   :  { %v9437_v58 = vpop.permute.xlu2 %1625  ;;  %v1657_v51 = vpop.permute.xlu0 %1656  ;;  %5346 = vmatpush.bf16.msrb.mxu2 %v7098_v31 }
 0xac3   :  { %v1665_v14 = vmul.f32 %v9288_v43, %v1657_v51 }
 0xac6   :  { %5347 = vmatpush.bf16.msrb.mxu2 %v7097_v59  ;;  %v7835_v59 = vmov 47  }
 0xac7   :  { %v5662_v4 = vld [vmem:[#allocation2 + $0x50] sm:$0xf] }
 0xac8   :  { %v6886_v11 = vld [vmem:[#allocation2 + $0xcc] sm:$0xf0] }
 0xac9   :  { %v5663_v42 = vor.u32 %v6886_v11, %v5662_v4  ;;  %v7095_v4 = vld [vmem:[%s10204_s2 + $0x558] sm:$0xff]  ;;  %v7094_v11 = vld [vmem:[%s10204_s2 + $0x550] sm:$0xff] }
 0xaca   :  { %v9449_v32 = vpop.permute.xlu2 %1640  ;;  %5348 = vmatpush.bf16.msrb.mxu2 %v7096_v46 }
 0xacb   :  { %5334 = vmatmul.bf16.vlgmr.msrb.gmra.mxu1 %v5663_v42  ;;  %v7093_v42 = vld [vmem:[%s10204_s2 + $0x548] sm:$0xff] }
 0xace   :  { %5349 = vmatpush.bf16.msrb.mxu2 %v7095_v4 }
 0xad2   :  { %5350 = vmatpush.bf16.msrb.mxu2 %v7094_v11  ;;  %v1707_v46 = vpop.permute.xlu0 %1706 }
 0xad3   :  { %v1653_v39 = vpop.permute.xlu2 %1652 }
 0xad4   :  { %v1664_v20 = vmul.f32 %v9264_v40, %v1653_v39 }
 0xad6   :  { %5351 = vmatpush.bf16.msrb.mxu2 %v7093_v42 }
 0xad8   :  { %v5321_v45 = vpop.f32.mrf.mxu0 }
 0xad9   :  { %v9442_v29 = vadd.f32 %v5321_v45, %v9362_v34  ;;  %v7092_v45 = vld [vmem:[%s10204_s2 + $0x540] sm:$0xff] }
 0xada   :  { %v7581_v38 = vpop.permute.xlu1 %7580  ;;  %5352 = vmatpush.bf16.msrb.mxu2 %v7092_v45 }
 0xadb   :  { %v7583_v48 = vunpack.i.h.bf16 %v7581_v38  ;;  %v7582_v41 = vunpack.i.l.bf16 %v7581_v38  ;;  %v1644_v38 = vmul.f32 %v9264_v40, %v1631_v8 }
 0xadd   :  { %v1610_v30 = vsel %vm86_vm0, %v1570_v27, %v7583_v48  ;;  %v1609_v44 = vsel %vm86_vm0, %v1569_v63, %v7582_v41  ;;  %v1643_v27 = vmul.f32 %v9257_v23, %v9437_v58 }
 0xade   :  { %v1614_v34 = vpack.c.bf16 %v1610_v30, %v1610_v30  ;;  %v1613_v17 = vpack.c.bf16 %v1609_v44, %v1609_v44  ;;  %v9495_v44 = vpop.f32.mrf.mxu1 }
 0xae0   :  { %1618 = vst [vmem:[#allocation2 + $0x1d0] sm:$0xf] %v1614_v34 }
 0xae1   :  { %1617 = vst [vmem:[#allocation2 + $0x150] sm:$0xf] %v1613_v17 }
 0xae2   :  { %v9451_v19 = vpop.permute.xlu1 %1635 }
 0xae3   :  { %v1645_v51 = vmul.f32 %v9288_v43, %v9451_v19 }
 0xae7   :  { %v6918_v12 = vld [vmem:[#allocation2 + $0x1cc] sm:$0xf0] }
 0xae8   :  { %v5790_v5 = vld [vmem:[#allocation2 + $0x150] sm:$0xf] }
 0xae9   :  { %v5791_v53 = vor.u32 %v6918_v12, %v5790_v5 }
 0xaeb   :  { %5339 = vmatmul.bf16.gmra.mxu1 %v5791_v53  ;;  %v1649_v18 = vpop.permute.xlu1 %1648 }
 0xaec   :  { %v1663_v13 = vmul.f32 %v9257_v23, %v1649_v18 }
 0xaee   :  { %v7590_v22 = vpack.i.bf16 %v1664_v20, %v1663_v13  ;;  %v1646_v20 = vmul.f32 %v9280_v10, %v9449_v32  ;;  %v7834_v13 = vmov 46  }
 0xaef   :  { %7617 = vset.pattern.permute.xlu0 %v7834_v13 }
 0xaf0   :  { %7591 = vrot.lane.b32.xlu2 %v7590_v22, %s7795_s27  ;;  %1782 = vperm.xlu0 %7617, %v9367_v25  }
 0xaf3   :  { %v1661_v6 = vpop.permute.xlu1 %1660 }
 0xaf4   :  { %v1666_v26 = vmul.f32 %v9280_v10, %v1661_v6 }
 0xaf6   :  { %v7595_v35 = vpack.i.bf16 %v1666_v26, %v1665_v14 }
 0xaf8   :  { %7596 = vrot.lane.b32.xlu1 %v7595_v35, %s7795_s27  ;;  %1701 = vperm.xlu2 %7600, %v9392_v37  }
 0xaf9   :  { %7621 = vset.pattern.permute.xlu0 %v7835_v59 }
 0xafa   :  { %1808 = vperm.xlu0 %7621, %v9375_v52  }
 0xb00   :  { %1711 = vperm.xlu1 %7602, %v9375_v52   ;;  %1716 = vperm.xlu2 %7600, %v9402_v2  }
 0xb08   :  { %7603 = vset.pattern.permute.xlu1 %v7833_v1  ;;  %7604 = vset.pattern.permute.xlu2 %v7833_v1 }
 0xb09   :  { %1724 = vperm.xlu1 %7603, %v9392_v37   ;;  %1728 = vperm.xlu2 %7604, %v9367_v25  }
 0xb11   :  { %1736 = vperm.xlu1 %7603, %v9402_v2   ;;  %7616 = vset.pattern.permute.xlu2 %v7834_v13 }
 0xb19   :  { %7618 = vset.pattern.permute.xlu1 %v7834_v13  ;;  %v7101_v13 = vld [vmem:[%s10204_s2 + $0x588] sm:$0xff] }
 0xb48   :  { %v9497_v1 = vpop.f32.mrf.mxu1 }
 0xb4a   :  { %v7592_v50 = vpop.permute.xlu2 %7591 }
 0xb4b   :  { %v7594_v63 = vunpack.i.h.bf16 %v7592_v50  ;;  %v7593_v48 = vunpack.i.l.bf16 %v7592_v50 }
 0xb4d   :  { %v1683_v41 = vsel %vm86_vm0, %v1643_v27, %v7593_v48  ;;  %v1684_v30 = vsel %vm86_vm0, %v1644_v38, %v7594_v63  ;;  %v1733_v63 = vpop.permute.xlu0 %1732  ;;  %v7107_v48 = vld [vmem:[%s10204_s2 + $0x5b8] sm:$0xff] }
 0xb4e   :  { %v1687_v34 = vpack.c.bf16 %v1683_v41, %v1683_v41  ;;  %v1688_v17 = vpack.c.bf16 %v1684_v30, %v1684_v30  ;;  %v1741_v41 = vmul.f32 %v9288_v43, %v1733_v63  ;;  %5364 = vmatpush.bf16.msrb.mxu3 %v7107_v48 }
 0xb50   :  { %1691 = vst [vmem:[#allocation2 + $0x54] sm:$0xf] %v1687_v34  ;;  %v9499_v5 = vpop.f32.mrf.mxu1  ;;  %v7106_v34 = vld [vmem:[%s10204_s2 + $0x5b0] sm:$0xff] }
 0xb51   :  { %1692 = vst [vmem:[#allocation2 + $0xd4] sm:$0xf] %v1688_v17 }
 0xb52   :  { %v9501_v8 = vpop.permute.xlu2 %1701  ;;  %5365 = vmatpush.bf16.msrb.mxu3 %v7106_v34 }
 0xb57   :  { %v6870_v12 = vld [vmem:[#allocation2 + $0x54] sm:$0xf] }
 0xb58   :  { %v5664_v39 = vld [vmem:[#allocation2 + $0xd0] sm:$0xf0] }
 0xb59   :  { %v5667_v58 = vor.u32 %v6870_v12, %v5664_v39  ;;  %v7105_v39 = vld [vmem:[%s10204_s2 + $0x5a8] sm:$0xff] }
 0xb5a   :  { %v9513_v32 = vpop.permute.xlu2 %1716  ;;  %5366 = vmatpush.bf16.msrb.mxu3 %v7105_v39 }
 0xb5b   :  { %5353 = vmatmul.bf16.vlgmr.msrb.gmra.mxu2 %v5667_v58  ;;  %v7104_v58 = vld [vmem:[%s10204_s2 + $0x5a0] sm:$0xff]  ;;  %v1722_v48 = vmul.f32 %v9280_v10, %v9513_v32 }
 0xb5e   :  { %5367 = vmatpush.bf16.msrb.mxu3 %v7104_v58 }
 0xb62   :  { %v1783_v32 = vpop.permute.xlu0 %1782 }
 0xb63   :  { %v1729_v4 = vpop.permute.xlu2 %1728 }
 0xb64   :  { %v1740_v45 = vmul.f32 %v9264_v40, %v1729_v4  ;;  %v9559_v4 = vpop.f32.mrf.mxu2 }
 0xb68   :  { %v5340_v53 = vpop.f32.mrf.mxu1 }
 0xb69   :  { %v9506_v18 = vadd.f32 %v5340_v53, %v9442_v29  ;;  %v7103_v53 = vld [vmem:[%s10204_s2 + $0x598] sm:$0xff] }
 0xb6a   :  { %v7597_v22 = vpop.permute.xlu1 %7596  ;;  %5368 = vmatpush.bf16.msrb.mxu3 %v7103_v53 }
 0xb6b   :  { %v7599_v55 = vunpack.i.h.bf16 %v7597_v22  ;;  %v7598_v14 = vunpack.i.l.bf16 %v7597_v22  ;;  %v7100_v22 = vld [vmem:[%s10204_s2 + $0x580] sm:$0xff] }
 0xb6d   :  { %v1686_v6 = vsel %vm86_vm0, %v1646_v20, %v7599_v55  ;;  %v1685_v31 = vsel %vm86_vm0, %v1645_v51, %v7598_v14  ;;  %v7102_v20 = vld [vmem:[%s10204_s2 + $0x590] sm:$0xff]  ;;  %v1719_v51 = vmul.f32 %v9257_v23, %v9501_v8  ;;  %v1720_v14 = vmul.f32 %v9264_v40, %v1707_v46 }
 0xb6e   :  { %v1690_v29 = vpack.c.bf16 %v1686_v6, %v1686_v6  ;;  %v1689_v26 = vpack.c.bf16 %v1685_v31, %v1685_v31  ;;  %5369 = vmatpush.bf16.msrb.mxu3 %v7102_v20 }
 0xb70   :  { %1694 = vst [vmem:[#allocation2 + $0x1d4] sm:$0xf] %v1690_v29 }
 0xb71   :  { %1693 = vst [vmem:[#allocation2 + $0x154] sm:$0xf] %v1689_v26 }
 0xb72   :  { %v9515_v35 = vpop.permute.xlu1 %1711  ;;  %5370 = vmatpush.bf16.msrb.mxu3 %v7101_v13  ;;  %v7837_v13 = vmov 49  }
 0xb73   :  { %v1721_v63 = vmul.f32 %v9288_v43, %v9515_v35 }
 0xb76   :  { %5371 = vmatpush.bf16.msrb.mxu3 %v7100_v22 }
 0xb77   :  { %v5792_v19 = vld [vmem:[#allocation2 + $0x1d0] sm:$0xf0] }
 0xb78   :  { %v6902_v11 = vld [vmem:[#allocation2 + $0x154] sm:$0xf] }
 0xb79   :  { %v5795_v42 = vor.u32 %v6902_v11, %v5792_v19 }
 0xb7b   :  { %5358 = vmatmul.bf16.gmra.mxu2 %v5795_v42  ;;  %v1725_v27 = vpop.permute.xlu1 %1724 }
 0xb7c   :  { %v1739_v50 = vmul.f32 %v9257_v23, %v1725_v27 }
 0xb7e   :  { %v7606_v38 = vpack.i.bf16 %v1740_v45, %v1739_v50  ;;  %v7836_v50 = vmov 48  }
 0xb7f   :  { %7633 = vset.pattern.permute.xlu0 %v7836_v50 }
 0xb80   :  { %7607 = vrot.lane.b32.xlu2 %v7606_v38, %s7795_s27  ;;  %1858 = vperm.xlu0 %7633, %v9367_v25  }
 0xb83   :  { %v1737_v30 = vpop.permute.xlu1 %1736 }
 0xb84   :  { %v1742_v17 = vmul.f32 %v9280_v10, %v1737_v30 }
 0xb86   :  { %v7611_v12 = vpack.i.bf16 %v1742_v17, %v1741_v41 }
 0xb88   :  { %7612 = vrot.lane.b32.xlu1 %v7611_v12, %s7795_s27  ;;  %1777 = vperm.xlu2 %7616, %v9392_v37  }
 0xb89   :  { %7637 = vset.pattern.permute.xlu0 %v7837_v13 }
 0xb8a   :  { %1884 = vperm.xlu0 %7637, %v9375_v52  }
 0xb90   :  { %1787 = vperm.xlu1 %7618, %v9375_v52   ;;  %1792 = vperm.xlu2 %7616, %v9402_v2  }
 0xb98   :  { %7619 = vset.pattern.permute.xlu1 %v7835_v59  ;;  %7620 = vset.pattern.permute.xlu2 %v7835_v59 }
 0xb99   :  { %1800 = vperm.xlu1 %7619, %v9392_v37   ;;  %1804 = vperm.xlu2 %7620, %v9367_v25  }
 0xba1   :  { %1812 = vperm.xlu1 %7619, %v9402_v2   ;;  %7632 = vset.pattern.permute.xlu2 %v7836_v50 }
 0xba9   :  { %7634 = vset.pattern.permute.xlu1 %v7836_v50 }
 0xbda   :  { %v7608_v55 = vpop.permute.xlu2 %7607 }
 0xbdb   :  { %v7610_v6 = vunpack.i.h.bf16 %v7608_v55  ;;  %v7609_v31 = vunpack.i.l.bf16 %v7608_v55 }
 0xbdd   :  { %v1759_v29 = vsel %vm86_vm0, %v1719_v51, %v7609_v31  ;;  %v1760_v26 = vsel %vm86_vm0, %v1720_v14, %v7610_v6 }
 0xbde   :  { %v1763_v59 = vpack.c.bf16 %v1759_v29, %v1759_v29  ;;  %v1764_v19 = vpack.c.bf16 %v1760_v26, %v1760_v26  ;;  %v9561_v8 = vpop.f32.mrf.mxu2  ;;  %v1809_v26 = vpop.permute.xlu0 %1808 }
 0xbe0   :  { %1767 = vst [vmem:[#allocation2 + $0x58] sm:$0xf] %v1763_v59  ;;  %v7115_v59 = vld [vmem:[%s10204_s2 + $0x5f8] sm:$0xff] }
 0xbe1   :  { %1768 = vst [vmem:[#allocation2 + $0xd8] sm:$0xf] %v1764_v19  ;;  %v1817_v19 = vmul.f32 %v9288_v43, %v1809_v26  ;;  %5383 = vmatpush.bf16.msra.mxu0 %v7115_v59  ;;  %v7838_v59 = vmov 50  }
 0xbe2   :  { %v9563_v27 = vpop.permute.xlu2 %1777  ;;  %7649 = vset.pattern.permute.xlu0 %v7838_v59 }
 0xbe3   :  { %1934 = vperm.xlu0 %7649, %v9367_v25  }
 0xbe6   :  { %v9565_v46 = vpop.f32.mrf.mxu2 }
 0xbe7   :  { %v5670_v11 = vld [vmem:[#allocation2 + $0x58] sm:$0xf] }
 0xbe8   :  { %v6887_v42 = vld [vmem:[#allocation2 + $0xd4] sm:$0xf0] }
 0xbe9   :  { %v5671_v45 = vor.u32 %v6887_v42, %v5670_v11  ;;  %v7114_v42 = vld [vmem:[%s10204_s2 + $0x5f0] sm:$0xff] }
 0xbea   :  { %v9574_v12 = vpop.permute.xlu2 %1792  ;;  %5384 = vmatpush.bf16.msra.mxu0 %v7114_v42 }
 0xbeb   :  { %5372 = vmatmul.bf16.vlgmr.msrb.gmra.mxu3 %v5671_v45  ;;  %v1798_v42 = vmul.f32 %v9280_v10, %v9574_v12 }
 0xbf2   :  { %v1859_v12 = vpop.permute.xlu0 %1858 }
 0xbf3   :  { %v1805_v51 = vpop.permute.xlu2 %1804 }
 0xbf4   :  { %v1816_v6 = vmul.f32 %v9264_v40, %v1805_v51 }
 0xbfa   :  { %v7613_v38 = vpop.permute.xlu1 %7612 }
 0xbfb   :  { %v7615_v41 = vunpack.i.h.bf16 %v7613_v38  ;;  %v7614_v30 = vunpack.i.l.bf16 %v7613_v38  ;;  %v7113_v38 = vld [vmem:[%s10204_s2 + $0x5e8] sm:$0xff] }
 0xbfc   :  { %5385 = vmatpush.bf16.msra.mxu0 %v7113_v38 }
 0xbfd   :  { %v1762_v34 = vsel %vm86_vm0, %v1722_v48, %v7615_v41  ;;  %v1761_v17 = vsel %vm86_vm0, %v1721_v63, %v7614_v30  ;;  %v7112_v63 = vld [vmem:[%s10204_s2 + $0x5e0] sm:$0xff]  ;;  %v7111_v48 = vld [vmem:[%s10204_s2 + $0x5d8] sm:$0xff]  ;;  %v7110_v41 = vld [vmem:[%s10204_s2 + $0x5d0] sm:$0xff] }
 0xbfe   :  { %v1766_v39 = vpack.c.bf16 %v1762_v34, %v1762_v34  ;;  %v1765_v58 = vpack.c.bf16 %v1761_v17, %v1761_v17  ;;  %v5359_v53 = vpop.f32.mrf.mxu2  ;;  %v7109_v30 = vld [vmem:[%s10204_s2 + $0x5c8] sm:$0xff]  ;;  %v7108_v34 = vld [vmem:[%s10204_s2 + $0x5c0] sm:$0xff] }
 0xbff   :  { %v9577_v20 = vadd.f32 %v5359_v53, %v9506_v18 }
 0xc00   :  { %1770 = vst [vmem:[#allocation2 + $0x1d8] sm:$0xf] %v1766_v39  ;;  %5386 = vmatpush.bf16.msra.mxu0 %v7112_v63  ;;  %v1795_v39 = vmul.f32 %v9257_v23, %v9563_v27 }
 0xc01   :  { %1769 = vst [vmem:[#allocation2 + $0x158] sm:$0xf] %v1765_v58  ;;  %v1796_v58 = vmul.f32 %v9264_v40, %v1783_v32 }
 0xc02   :  { %v9579_v35 = vpop.permute.xlu1 %1787 }
 0xc04   :  { %5387 = vmatpush.bf16.msra.mxu0 %v7111_v48 }
 0xc07   :  { %v6919_v22 = vld [vmem:[#allocation2 + $0x1d4] sm:$0xf0] }
 0xc08   :  { %v5798_v55 = vld [vmem:[#allocation2 + $0x158] sm:$0xf]  ;;  %5388 = vmatpush.bf16.msra.mxu0 %v7110_v41 }
 0xc09   :  { %v5799_v14 = vor.u32 %v6919_v22, %v5798_v55 }
 0xc0b   :  { %5377 = vmatmul.bf16.gmra.mxu3 %v5799_v14  ;;  %v1801_v31 = vpop.permute.xlu1 %1800 }
 0xc0c   :  { %v1815_v18 = vmul.f32 %v9257_v23, %v1801_v31  ;;  %5389 = vmatpush.bf16.msra.mxu0 %v7109_v30 }
 0xc0e   :  { %v7622_v29 = vpack.i.bf16 %v1816_v6, %v1815_v18  ;;  %v9623_v6 = vpop.f32.mrf.mxu3 }
 0xc10   :  { %7623 = vrot.lane.b32.xlu2 %v7622_v29, %s7795_s27  ;;  %5390 = vmatpush.bf16.msra.mxu0 %v7108_v34 }
 0xc13   :  { %v1813_v11 = vpop.permute.xlu1 %1812 }
 0xc14   :  { %v1818_v45 = vmul.f32 %v9280_v10, %v1813_v11  ;;  %v1797_v11 = vmul.f32 %v9288_v43, %v9579_v35 }
 0xc16   :  { %v7627_v50 = vpack.i.bf16 %v1818_v45, %v1817_v19 }
 0xc18   :  { %7628 = vrot.lane.b32.xlu1 %v7627_v50, %s7795_s27  ;;  %1853 = vperm.xlu2 %7632, %v9392_v37  }
 0xc20   :  { %1863 = vperm.xlu1 %7634, %v9375_v52   ;;  %1868 = vperm.xlu2 %7632, %v9402_v2  }
 0xc28   :  { %7635 = vset.pattern.permute.xlu1 %v7837_v13  ;;  %7636 = vset.pattern.permute.xlu2 %v7837_v13 }
 0xc29   :  { %1876 = vperm.xlu1 %7635, %v9392_v37   ;;  %1880 = vperm.xlu2 %7636, %v9367_v25  }
 0xc31   :  { %1888 = vperm.xlu1 %7635, %v9402_v2   ;;  %7648 = vset.pattern.permute.xlu2 %v7838_v59 }
 0xc39   :  { %7650 = vset.pattern.permute.xlu1 %v7838_v59 }
 0xc6a   :  { %v7624_v17 = vpop.permute.xlu2 %7623 }
 0xc6b   :  { %v7626_v53 = vunpack.i.h.bf16 %v7624_v17  ;;  %v7625_v13 = vunpack.i.l.bf16 %v7624_v17 }
 0xc6d   :  { %v1835_v22 = vsel %vm86_vm0, %v1795_v39, %v7625_v13  ;;  %v1836_v51 = vsel %vm86_vm0, %v1796_v58, %v7626_v53  ;;  %v7839_v39 = vmov 51  }
 0xc6e   :  { %v1839_v55 = vpack.c.bf16 %v1835_v22, %v1835_v22  ;;  %v1840_v14 = vpack.c.bf16 %v1836_v51, %v1836_v51  ;;  %v9625_v26 = vpop.f32.mrf.mxu3  ;;  %7653 = vset.pattern.permute.xlu0 %v7839_v39 }
 0xc6f   :  { %1960 = vperm.xlu0 %7653, %v9375_v52  }
 0xc70   :  { %1843 = vst [vmem:[#allocation2 + $0x5c] sm:$0xf] %v1839_v55 }
 0xc71   :  { %1844 = vst [vmem:[#allocation2 + $0xdc] sm:$0xf] %v1840_v14 }
 0xc72   :  { %v9627_v27 = vpop.permute.xlu2 %1853 }
 0xc76   :  { %v9629_v32 = vpop.f32.mrf.mxu3 }
 0xc77   :  { %v6871_v31 = vld [vmem:[#allocation2 + $0x5c] sm:$0xf] }
 0xc78   :  { %v5672_v18 = vld [vmem:[#allocation2 + $0xd8] sm:$0xf0] }
 0xc79   :  { %v5675_v29 = vor.u32 %v6871_v31, %v5672_v18  ;;  %v1885_v31 = vpop.permute.xlu0 %1884  ;;  %v7123_v18 = vld [vmem:[%s10204_s2 + $0x638] sm:$0xff] }
 0xc7a   :  { %v9638_v48 = vpop.permute.xlu2 %1868  ;;  %5402 = vmatpush.bf16.msra.mxu1 %v7123_v18 }
 0xc7b   :  { %5391 = vmatmul.bf16.vlgmr.msra.gmra.mxu0 %v5675_v29  ;;  %v1893_v29 = vmul.f32 %v9288_v43, %v1885_v31 }
 0xc83   :  { %v1881_v53 = vpop.permute.xlu2 %1880 }
 0xc84   :  { %v1892_v51 = vmul.f32 %v9264_v40, %v1881_v53 }
 0xc8a   :  { %v7629_v19 = vpop.permute.xlu1 %7628 }
 0xc8b   :  { %v7631_v45 = vunpack.i.h.bf16 %v7629_v19  ;;  %v7630_v50 = vunpack.i.l.bf16 %v7629_v19  ;;  %v7122_v19 = vld [vmem:[%s10204_s2 + $0x630] sm:$0xff] }
 0xc8c   :  { %5403 = vmatpush.bf16.msra.mxu1 %v7122_v19 }
 0xc8d   :  { %v1838_v38 = vsel %vm86_vm0, %v1798_v42, %v7631_v45  ;;  %v1837_v63 = vsel %vm86_vm0, %v1797_v11, %v7630_v50  ;;  %v7121_v45 = vld [vmem:[%s10204_s2 + $0x628] sm:$0xff]  ;;  %v7119_v50 = vld [vmem:[%s10204_s2 + $0x618] sm:$0xff] }
 0xc8e   :  { %v1842_v41 = vpack.c.bf16 %v1838_v38, %v1838_v38  ;;  %v1841_v30 = vpack.c.bf16 %v1837_v63, %v1837_v63  ;;  %v5378_v34 = vpop.f32.mrf.mxu3  ;;  %v1871_v38 = vmul.f32 %v9257_v23, %v9627_v27  ;;  %v1872_v63 = vmul.f32 %v9264_v40, %v1859_v12 }
 0xc8f   :  { %v9641_v17 = vadd.f32 %v5378_v34, %v9577_v20 }
 0xc90   :  { %1846 = vst [vmem:[#allocation2 + $0x1dc] sm:$0xf] %v1842_v41  ;;  %5404 = vmatpush.bf16.msra.mxu1 %v7121_v45 }
 0xc91   :  { %1845 = vst [vmem:[#allocation2 + $0x15c] sm:$0xf] %v1841_v30 }
 0xc92   :  { %v9643_v35 = vpop.permute.xlu1 %1863 }
 0xc93   :  { %v1873_v18 = vmul.f32 %v9288_v43, %v9643_v35  ;;  %v9714_v43 = vld [vmem:[%s10202_s0 + $0x8] sm:$0xff]  ;;  %v1935_v35 = vpop.permute.xlu0 %1934 }
 0xc97   :  { %v5800_v58 = vld [vmem:[#allocation2 + $0x1d8] sm:$0xf0] }
 0xc98   :  { %v6903_v13 = vld [vmem:[#allocation2 + $0x15c] sm:$0xf] }
 0xc99   :  { %v5803_v22 = vor.u32 %v6903_v13, %v5800_v58  ;;  %v9687_v58 = vpop.f32.mrf.mxu0 }
 0xc9b   :  { %5396 = vmatmul.bf16.gmra.mxu0 %v5803_v22  ;;  %v1877_v55 = vpop.permute.xlu1 %1876 }
 0xc9c   :  { %v1891_v20 = vmul.f32 %v9257_v23, %v1877_v55 }
 0xc9e   :  { %v7638_v14 = vpack.i.bf16 %v1892_v51, %v1891_v20 }
 0xca0   :  { %7639 = vrot.lane.b32.xlu2 %v7638_v14, %s7795_s27  ;;  %v7840_v14 = vmov 52  }
 0xca1   :  { %7665 = vset.pattern.permute.xlu0 %v7840_v14 }
 0xca2   :  { %2010 = vperm.xlu0 %7665, %v9714_v43  }
 0xca3   :  { %v1889_v59 = vpop.permute.xlu1 %1888 }
 0xca4   :  { %v1894_v11 = vmul.f32 %v9280_v10, %v1889_v59  ;;  %v7120_v10 = vld [vmem:[%s10204_s2 + $0x620] sm:$0xff] }
 0xca5   :  { %5405 = vmatpush.bf16.msra.mxu1 %v7120_v10 }
 0xca6   :  { %v7643_v42 = vpack.i.bf16 %v1894_v11, %v1893_v29  ;;  %v9703_v29 = vld [vmem:[%s10203_s1 + $0x18] sm:$0xff] }
 0xca7   :  { %v1874_v59 = vmul.f32 %v9703_v29, %v9638_v48 }
 0xca8   :  { %7644 = vrot.lane.b32.xlu1 %v7643_v42, %s7795_s27  ;;  %1929 = vperm.xlu2 %7648, %v9392_v37  }
 0xca9   :  { %5406 = vmatpush.bf16.msra.mxu1 %v7119_v50 }
 0xcb0   :  { %1939 = vperm.xlu1 %7650, %v9375_v52   ;;  %1944 = vperm.xlu2 %7648, %v9402_v2   ;;  %v7118_v52 = vld [vmem:[%s10204_s2 + $0x610] sm:$0xff] }
 0xcb1   :  { %5407 = vmatpush.bf16.msra.mxu1 %v7118_v52 }
 0xcb8   :  { %7651 = vset.pattern.permute.xlu1 %v7839_v39  ;;  %7652 = vset.pattern.permute.xlu2 %v7839_v39 }
 0xcb9   :  { %1952 = vperm.xlu1 %7651, %v9392_v37   ;;  %1956 = vperm.xlu2 %7652, %v9367_v25   ;;  %v7117_v25 = vld [vmem:[%s10204_s2 + $0x608] sm:$0xff]  ;;  %v7116_v37 = vld [vmem:[%s10204_s2 + $0x600] sm:$0xff] }
 0xcba   :  { %5408 = vmatpush.bf16.msra.mxu1 %v7117_v25 }
 0xcbe   :  { %5409 = vmatpush.bf16.msra.mxu1 %v7116_v37 }
 0xcc1   :  { %1964 = vperm.xlu1 %7651, %v9402_v2   ;;  %7664 = vset.pattern.permute.xlu2 %v7840_v14 }
 0xcc9   :  { %7666 = vset.pattern.permute.xlu1 %v7840_v14 }
 0xcf8   :  { %v9689_v22 = vpop.f32.mrf.mxu0 }
 0xcfa   :  { %v7640_v2 = vpop.permute.xlu2 %7639 }
 0xcfb   :  { %v7642_v41 = vunpack.i.h.bf16 %v7640_v2  ;;  %v7641_v30 = vunpack.i.l.bf16 %v7640_v2 }
 0xcfd   :  { %v1911_v34 = vsel %vm86_vm0, %v1871_v38, %v7641_v30  ;;  %v1912_v39 = vsel %vm86_vm0, %v1872_v63, %v7642_v41  ;;  %v9722_v38 = vld [vmem:[%s10202_s0 + $0x10] sm:$0xff]  ;;  %v7841_v63 = vmov 53   ;;  %v9727_v41 = vld [vmem:[%s10203_s1 + $0x8] sm:$0xff] }
 0xcfe   :  { %v1915_v53 = vpack.c.bf16 %v1911_v34, %v1911_v34  ;;  %v1916_v13 = vpack.c.bf16 %v1912_v39, %v1912_v39  ;;  %7669 = vset.pattern.permute.xlu0 %v7841_v63  ;;  %v9734_v39 = vld [vmem:[%s10203_s1] sm:$0xff] }
 0xcff   :  { %2036 = vperm.xlu0 %7669, %v9722_v38  }
 0xd00   :  { %1919 = vst [vmem:[#allocation2 + $0x60] sm:$0xf] %v1915_v53  ;;  %v9691_v23 = vpop.f32.mrf.mxu0 }
 0xd01   :  { %1920 = vst [vmem:[#allocation2 + $0xe0] sm:$0xf] %v1916_v13 }
 0xd02   :  { %v9693_v40 = vpop.permute.xlu2 %1929 }
 0xd07   :  { %v5678_v51 = vld [vmem:[#allocation2 + $0x60] sm:$0xf] }
 0xd08   :  { %v6888_v55 = vld [vmem:[#allocation2 + $0xdc] sm:$0xf0] }
 0xd09   :  { %v5679_v20 = vor.u32 %v6888_v55, %v5678_v51  ;;  %v1961_v51 = vpop.permute.xlu0 %1960  ;;  %v7131_v55 = vld [vmem:[%s10204_s2 + $0x678] sm:$0xff] }
 0xd0a   :  { %v9709_v45 = vpop.permute.xlu2 %1944  ;;  %5421 = vmatpush.bf16.msra.mxu2 %v7131_v55 }
 0xd0b   :  { %5410 = vmatmul.bf16.vlgmr.msra.gmra.mxu1 %v5679_v20  ;;  %v9744_v20 = vld [vmem:[%s10203_s1 + $0x10] sm:$0xff] }
 0xd13   :  { %v1957_v25 = vpop.permute.xlu2 %1956 }
 0xd14   :  { %v1968_v30 = vmul.f32 %v9727_v41, %v1957_v25  ;;  %v7124_v25 = vld [vmem:[%s10204_s2 + $0x640] sm:$0xff] }
 0xd18   :  { %v5397_v27 = vpop.f32.mrf.mxu0 }
 0xd19   :  { %v9696_v12 = vadd.f32 %v5397_v27, %v9641_v17  ;;  %v1969_v27 = vmul.f32 %v9744_v20, %v1961_v51  ;;  %v9791_v51 = vpop.f32.mrf.mxu1 }
 0xd1a   :  { %v7645_v31 = vpop.permute.xlu1 %7644  ;;  %10212 = vst [vmem:[#allocation3_spill] sm:$0xff] %v9791_v51 }
 0xd1b   :  { %v7647_v19 = vunpack.i.h.bf16 %v7645_v31  ;;  %v7646_v11 = vunpack.i.l.bf16 %v7645_v31  ;;  %v7130_v31 = vld [vmem:[%s10204_s2 + $0x670] sm:$0xff] }
 0xd1c   :  { %5422 = vmatpush.bf16.msra.mxu2 %v7130_v31 }
 0xd1d   :  { %v1914_v17 = vsel %vm86_vm0, %v1874_v59, %v7647_v19  ;;  %v1913_v42 = vsel %vm86_vm0, %v1873_v18, %v7646_v11  ;;  %v9754_v19 = vld [vmem:[%s10202_s0] sm:$0xff]  ;;  %v7129_v11 = vld [vmem:[%s10204_s2 + $0x668] sm:$0xff] }
 0xd1e   :  { %v1918_v10 = vpack.c.bf16 %v1914_v17, %v1914_v17  ;;  %v1917_v50 = vpack.c.bf16 %v1913_v42, %v1913_v42  ;;  %v9764_v17 = vld [vmem:[%s10202_s0 + $0x18] sm:$0xff]  ;;  %v7128_v42 = vld [vmem:[%s10204_s2 + $0x660] sm:$0xff] }
 0xd20   :  { %1922 = vst [vmem:[#allocation2 + $0x1e0] sm:$0xf] %v1918_v10  ;;  %5423 = vmatpush.bf16.msra.mxu2 %v7129_v11  ;;  %v7127_v10 = vld [vmem:[%s10204_s2 + $0x658] sm:$0xff] }
 0xd21   :  { %1921 = vst [vmem:[#allocation2 + $0x160] sm:$0xf] %v1917_v50  ;;  %v7126_v50 = vld [vmem:[%s10204_s2 + $0x650] sm:$0xff] }
 0xd22   :  { %v9717_v48 = vpop.permute.xlu1 %1939 }
 0xd24   :  { %5424 = vmatpush.bf16.msra.mxu2 %v7128_v42 }
 0xd27   :  { %v6920_v52 = vld [vmem:[#allocation2 + $0x1dc] sm:$0xf0] }
 0xd28   :  { %v5806_v37 = vld [vmem:[#allocation2 + $0x160] sm:$0xf]  ;;  %5425 = vmatpush.bf16.msra.mxu2 %v7127_v10  ;;  %v7842_v10 = vmov 54  }
 0xd29   :  { %v5807_v2 = vor.u32 %v6920_v52, %v5806_v37  ;;  %v7125_v52 = vld [vmem:[%s10204_s2 + $0x648] sm:$0xff]  ;;  %7681 = vset.pattern.permute.xlu0 %v7842_v10 }
 0xd2a   :  { %2086 = vperm.xlu0 %7681, %v9714_v43  }
 0xd2b   :  { %5415 = vmatmul.bf16.gmra.mxu1 %v5807_v2  ;;  %v1953_v34 = vpop.permute.xlu1 %1952  ;;  %v1947_v2 = vmul.f32 %v9734_v39, %v9693_v40 }
 0xd2c   :  { %v1967_v53 = vmul.f32 %v9734_v39, %v1953_v34  ;;  %5426 = vmatpush.bf16.msra.mxu2 %v7126_v50 }
 0xd2e   :  { %v7654_v13 = vpack.i.bf16 %v1968_v30, %v1967_v53 }
 0xd30   :  { %7655 = vrot.lane.b32.xlu2 %v7654_v13, %s7795_s27  ;;  %5427 = vmatpush.bf16.msra.mxu2 %v7125_v52  ;;  %v1949_v52 = vmul.f32 %v9744_v20, %v9717_v48  ;;  %v9814_v48 = vpop.permute.xlu0 %2010 }
 0xd33   :  { %v1965_v14 = vpop.permute.xlu1 %1964 }
 0xd34   :  { %v1970_v18 = vmul.f32 %v9703_v29, %v1965_v14  ;;  %5428 = vmatpush.bf16.msra.mxu2 %v7124_v25  ;;  %v1950_v25 = vmul.f32 %v9703_v29, %v9709_v45 }
 0xd36   :  { %v7659_v59 = vpack.i.bf16 %v1970_v18, %v1969_v27 }
 0xd38   :  { %7660 = vrot.lane.b32.xlu1 %v7659_v59, %s7795_s27  ;;  %2005 = vperm.xlu2 %7664, %v9754_v19  }
 0xd40   :  { %2015 = vperm.xlu1 %7666, %v9722_v38   ;;  %2020 = vperm.xlu2 %7664, %v9764_v17  }
 0xd48   :  { %7667 = vset.pattern.permute.xlu1 %v7841_v63  ;;  %7668 = vset.pattern.permute.xlu2 %v7841_v63  ;;  %v1948_v63 = vmul.f32 %v9727_v41, %v1935_v35 }
 0xd49   :  { %2028 = vperm.xlu1 %7667, %v9754_v19   ;;  %2032 = vperm.xlu2 %7668, %v9714_v43  }
 0xd51   :  { %2040 = vperm.xlu1 %7667, %v9764_v17   ;;  %7680 = vset.pattern.permute.xlu2 %v7842_v10 }
 0xd59   :  { %7682 = vset.pattern.permute.xlu1 %v7842_v10 }
 0xd88   :  { %v9793_v14 = vpop.f32.mrf.mxu1 }
 0xd8a   :  { %v7656_v37 = vpop.permute.xlu2 %7655 }
 0xd8b   :  { %v7658_v30 = vunpack.i.h.bf16 %v7656_v37  ;;  %v7657_v34 = vunpack.i.l.bf16 %v7656_v37 }
 0xd8d   :  { %v1987_v53 = vsel %vm86_vm0, %v1947_v2, %v7657_v34  ;;  %v1988_v13 = vsel %vm86_vm0, %v1948_v63, %v7658_v30 }
 0xd8e   :  { %v1991_v55 = vpack.c.bf16 %v1987_v53, %v1987_v53  ;;  %v1992_v27 = vpack.c.bf16 %v1988_v13, %v1988_v13 }
 0xd90   :  { %1995 = vst [vmem:[#allocation2 + $0x64] sm:$0xf] %v1991_v55  ;;  %v9795_v40 = vpop.f32.mrf.mxu1  ;;  %v7843_v55 = vmov 55  }
 0xd91   :  { %1996 = vst [vmem:[#allocation2 + $0xe4] sm:$0xf] %v1992_v27  ;;  %7685 = vset.pattern.permute.xlu0 %v7843_v55 }
 0xd92   :  { %v9797_v35 = vpop.permute.xlu2 %2005  ;;  %2112 = vperm.xlu0 %7685, %v9722_v38  }
 0xd97   :  { %v6872_v31 = vld [vmem:[#allocation2 + $0x64] sm:$0xf] }
 0xd98   :  { %v5680_v18 = vld [vmem:[#allocation2 + $0xe0] sm:$0xf0] }
 0xd99   :  { %v5683_v59 = vor.u32 %v6872_v31, %v5680_v18 }
 0xd9a   :  { %v9809_v30 = vpop.permute.xlu2 %2020 }
 0xd9b   :  { %5429 = vmatmul.bf16.vlgmr.msra.gmra.mxu2 %v5683_v59 }
 0xda3   :  { %v2033_v27 = vpop.permute.xlu2 %2032 }
 0xda4   :  { %v2044_v59 = vmul.f32 %v9727_v41, %v2033_v27  ;;  %v7137_v27 = vld [vmem:[%s10204_s2 + $0x6a8] sm:$0xff] }
 0xda8   :  { %v5416_v11 = vpop.f32.mrf.mxu1 }
 0xda9   :  { %v9800_v42 = vadd.f32 %v5416_v11, %v9696_v12 }
 0xdaa   :  { %v7661_v50 = vpop.permute.xlu1 %7660 }
 0xdab   :  { %v7663_v37 = vunpack.i.h.bf16 %v7661_v50  ;;  %v7662_v2 = vunpack.i.l.bf16 %v7661_v50 }
 0xdad   :  { %v1990_v63 = vsel %vm86_vm0, %v1950_v25, %v7663_v37  ;;  %v1989_v12 = vsel %vm86_vm0, %v1949_v52, %v7662_v2  ;;  %v2037_v52 = vpop.permute.xlu0 %2036 }
 0xdae   :  { %v1994_v34 = vpack.c.bf16 %v1990_v63, %v1990_v63  ;;  %v1993_v53 = vpack.c.bf16 %v1989_v12, %v1989_v12  ;;  %v2045_v25 = vmul.f32 %v9744_v20, %v2037_v52  ;;  %v7844_v12 = vmov 61  }
 0xdaf   :  { %7689 = vset.pattern.permute.xlu0 %v7844_v12 }
 0xdb0   :  { %1998 = vst [vmem:[#allocation2 + $0x1e4] sm:$0xf] %v1994_v34  ;;  %2336 = vperm.xlu0 %7689, %v9714_v43   ;;  %v7845_v34 = vmov 59  }
 0xdb1   :  { %1997 = vst [vmem:[#allocation2 + $0x164] sm:$0xf] %v1993_v53  ;;  %v7139_v53 = vld [vmem:[%s10204_s2 + $0x6b8] sm:$0xff] }
 0xdb2   :  { %v9811_v13 = vpop.permute.xlu1 %2015  ;;  %5440 = vmatpush.bf16.msra.mxu3 %v7139_v53 }
 0xdb7   :  { %v5808_v45 = vld [vmem:[#allocation2 + $0x1e0] sm:$0xf0] }
 0xdb8   :  { %v6904_v31 = vld [vmem:[#allocation2 + $0x164] sm:$0xf]  ;;  %7694 = vset.pattern.permute.xlu0 %v7845_v34 }
 0xdb9   :  { %v5811_v18 = vor.u32 %v6904_v31, %v5808_v45  ;;  %2264 = vperm.xlu0 %7694, %v9722_v38   ;;  %v7846_v45 = vmov 57   ;;  %v7136_v31 = vld [vmem:[%s10204_s2 + $0x6a0] sm:$0xff] }
 0xdbb   :  { %5434 = vmatmul.bf16.gmra.mxu2 %v5811_v18  ;;  %v2029_v11 = vpop.permute.xlu1 %2028  ;;  %v7847_v18 = vmov 63  }
 0xdbc   :  { %v2043_v10 = vmul.f32 %v9734_v39, %v2029_v11  ;;  %v7134_v11 = vld [vmem:[%s10204_s2 + $0x690] sm:$0xff] }
 0xdbe   :  { %v7670_v50 = vpack.i.bf16 %v2044_v59, %v2043_v10  ;;  %v7135_v59 = vld [vmem:[%s10204_s2 + $0x698] sm:$0xff]  ;;  %v7133_v10 = vld [vmem:[%s10204_s2 + $0x688] sm:$0xff] }
 0xdc0   :  { %7671 = vrot.lane.b32.xlu2 %v7670_v50, %s7795_s27  ;;  %v7132_v50 = vld [vmem:[%s10204_s2 + $0x680] sm:$0xff] }
 0xdc1   :  { %7703 = vset.pattern.permute.xlu0 %v7846_v45 }
 0xdc2   :  { %2188 = vperm.xlu0 %7703, %v9722_v38  }
 0xdc3   :  { %v2041_v37 = vpop.permute.xlu1 %2040 }
 0xdc4   :  { %v2046_v2 = vmul.f32 %v9703_v29, %v2041_v37  ;;  %v2024_v37 = vmul.f32 %v9727_v41, %v9814_v48 }
 0xdc6   :  { %v7675_v63 = vpack.i.bf16 %v2046_v2, %v2045_v25  ;;  %v2023_v25 = vmul.f32 %v9734_v39, %v9797_v35 }
 0xdc8   :  { %7676 = vrot.lane.b32.xlu1 %v7675_v63, %s7795_s27  ;;  %2081 = vperm.xlu2 %7680, %v9754_v19  }
 0xdd0   :  { %2091 = vperm.xlu1 %7682, %v9722_v38   ;;  %2096 = vperm.xlu2 %7680, %v9764_v17  }
 0xdd8   :  { %7683 = vset.pattern.permute.xlu1 %v7843_v55  ;;  %7684 = vset.pattern.permute.xlu2 %v7843_v55  ;;  %v7138_v55 = vld [vmem:[%s10204_s2 + $0x6b0] sm:$0xff] }
 0xdd9   :  { %2104 = vperm.xlu1 %7683, %v9754_v19   ;;  %2108 = vperm.xlu2 %7684, %v9714_v43  }
 0xdda   :  { %5441 = vmatpush.bf16.msra.mxu3 %v7138_v55 }
 0xdde   :  { %5442 = vmatpush.bf16.msra.mxu3 %v7137_v27 }
 0xde1   :  { %2116 = vperm.xlu1 %7683, %v9764_v17   ;;  %7686 = vset.pattern.permute.xlu2 %v7845_v34 }
 0xde2   :  { %2256 = vperm.xlu2 %7686, %v9754_v19   ;;  %5443 = vmatpush.bf16.msra.mxu3 %v7136_v31 }
 0xde6   :  { %5444 = vmatpush.bf16.msra.mxu3 %v7135_v59  ;;  %v10209_v59 = vmov 58  }
 0xde7   :  { %7712 = vset.pattern.permute.xlu0 %v10209_v59 }
 0xde8   :  { %2233 = vperm.xlu0 %7712, %v9754_v19  }
 0xde9   :  { %7687 = vset.pattern.permute.xlu1 %v7845_v34 }
 0xdea   :  { %2260 = vperm.xlu1 %7687, %v9714_v43   ;;  %7688 = vset.pattern.permute.xlu2 %v7844_v12 }
 0xdeb   :  { %2332 = vperm.xlu2 %7688, %v9754_v19   ;;  %5445 = vmatpush.bf16.msra.mxu3 %v7134_v11 }
 0xdef   :  { %5446 = vmatpush.bf16.msra.mxu3 %v7133_v10 }
 0xdf2   :  { %7690 = vset.pattern.permute.xlu1 %v7846_v45 }
 0xdf3   :  { %2180 = vperm.xlu1 %7690, %v9754_v19   ;;  %7691 = vset.pattern.permute.xlu2 %v7846_v45 }
 0xdf4   :  { %2184 = vperm.xlu2 %7691, %v9714_v43   ;;  %5447 = vmatpush.bf16.msra.mxu3 %v7132_v50  ;;  %v7849_v50 = vmov 60  }
 0xdfb   :  { %7692 = vset.pattern.permute.xlu1 %v7847_v18 }
 0xdfc   :  { %2408 = vperm.xlu1 %7692, %v9754_v19   ;;  %7693 = vset.pattern.permute.xlu2 %v7847_v18 }
 0xdfd   :  { %2412 = vperm.xlu2 %7693, %v9714_v43  }
 0xe04   :  { %7695 = vset.pattern.permute.xlu1 %v7845_v34 }
 0xe05   :  { %2268 = vperm.xlu1 %7695, %v9764_v17   ;;  %7696 = vset.pattern.permute.xlu2 %v7844_v12 }
 0xe06   :  { %2340 = vperm.xlu2 %7696, %v9722_v38  }
 0xe0d   :  { %7697 = vset.pattern.permute.xlu1 %v7844_v12 }
 0xe0e   :  { %2344 = vperm.xlu1 %7697, %v9764_v17   ;;  %7705 = vset.pattern.permute.xlu2 %v7847_v18 }
 0xe16   :  { %7704 = vset.pattern.permute.xlu1 %v7846_v45  ;;  %v9877_v45 = vpop.f32.mrf.mxu2 }
 0xe17   :  { %2192 = vperm.xlu1 %7704, %v9764_v17   ;;  %10213 = vst [vmem:[#allocation4_spill] sm:$0xff] %v9877_v45 }
 0xe1a   :  { %v7672_v52 = vpop.permute.xlu2 %7671 }
 0xe1b   :  { %v7674_v2 = vunpack.i.h.bf16 %v7672_v52  ;;  %v7673_v63 = vunpack.i.l.bf16 %v7672_v52 }
 0xe1d   :  { %v2063_v34 = vsel %vm86_vm0, %v2023_v25, %v7673_v63  ;;  %v2064_v12 = vsel %vm86_vm0, %v2024_v37, %v7674_v2  ;;  %v2025_v25 = vmul.f32 %v9744_v20, %v9811_v13  ;;  %v2026_v37 = vmul.f32 %v9703_v29, %v9809_v30 }
 0xe1e   :  { %v2067_v53 = vpack.c.bf16 %v2063_v34, %v2063_v34  ;;  %v2068_v55 = vpack.c.bf16 %v2064_v12, %v2064_v12  ;;  %v9879_v48 = vpop.f32.mrf.mxu2  ;;  %v10207_v13 = vmov 56  }
 0xe1f   :  { %7706 = vset.pattern.permute.xlu1 %v7847_v18  ;;  %7721 = vset.pattern.permute.xlu0 %v10207_v13 }
 0xe20   :  { %2071 = vst [vmem:[#allocation2 + $0x68] sm:$0xf] %v2067_v53  ;;  %2420 = vperm.xlu1 %7706, %v9764_v17   ;;  %2157 = vperm.xlu0 %7721, %v9754_v19  }
 0xe21   :  { %2072 = vst [vmem:[#allocation2 + $0xe8] sm:$0xf] %v2068_v55 }
 0xe22   :  { %v9885_v11 = vpop.permute.xlu2 %2081 }
 0xe26   :  { %v9887_v10 = vpop.f32.mrf.mxu2 }
 0xe27   :  { %v5686_v35 = vld [vmem:[#allocation2 + $0x68] sm:$0xf] }
 0xe28   :  { %v6889_v27 = vld [vmem:[#allocation2 + $0xe4] sm:$0xf0]  ;;  %7713 = vset.pattern.permute.xlu1 %v10209_v59 }
 0xe29   :  { %v5687_v31 = vor.u32 %v6889_v27, %v5686_v35  ;;  %2238 = vperm.xlu1 %7713, %v9714_v43  }
 0xe2a   :  { %v9895_v34 = vpop.permute.xlu2 %2096 }
 0xe2b   :  { %5448 = vmatmul.bf16.vlgmr.msra.gmra.mxu3 %v5687_v31 }
 0xe31   :  { %7719 = vset.pattern.permute.xlu1 %v7849_v50 }
 0xe32   :  { %2309 = vperm.xlu1 %7719, %v9754_v19  }
 0xe3a   :  { %v7677_v52 = vpop.permute.xlu1 %7676  ;;  %7722 = vset.pattern.permute.xlu1 %v10207_v13 }
 0xe3b   :  { %v7679_v2 = vunpack.i.h.bf16 %v7677_v52  ;;  %v7678_v63 = vunpack.i.l.bf16 %v7677_v52  ;;  %2162 = vperm.xlu1 %7722, %v9714_v43   ;;  %v2109_v52 = vpop.permute.xlu2 %2108 }
 0xe3d   :  { %v2066_v12 = vsel %vm86_vm0, %v2026_v37, %v7679_v2  ;;  %v2065_v53 = vsel %vm86_vm0, %v2025_v25, %v7678_v63 }
 0xe3e   :  { %v2070_v55 = vpack.c.bf16 %v2066_v12, %v2066_v12  ;;  %v2069_v35 = vpack.c.bf16 %v2065_v53, %v2065_v53  ;;  %v5435_v27 = vpop.f32.mrf.mxu2 }
 0xe3f   :  { %v9900_v31 = vadd.f32 %v5435_v27, %v9800_v42  ;;  %v2120_v42 = vmul.f32 %v9727_v41, %v2109_v52  ;;  %v10210_v27 = vmov 62  }
 0xe40   :  { %2074 = vst [vmem:[#allocation2 + $0x1e8] sm:$0xf] %v2070_v55  ;;  %v9911_v55 = vpop.permute.xlu0 %2086  ;;  %7734 = vset.pattern.permute.xlu0 %v10210_v27 }
 0xe41   :  { %2073 = vst [vmem:[#allocation2 + $0x168] sm:$0xf] %v2069_v35  ;;  %2390 = vperm.xlu0 %7734, %v9714_v43  }
 0xe42   :  { %v9904_v30 = vpop.permute.xlu1 %2091 }
 0xe43   :  { %7741 = vset.pattern.permute.xlu1 %v10209_v59  ;;  %v2257_v53 = vpop.permute.xlu2 %2256 }
 0xe47   :  { %v6921_v25 = vld [vmem:[#allocation2 + $0x1e4] sm:$0xf0] }
 0xe48   :  { %v5814_v37 = vld [vmem:[#allocation2 + $0x168] sm:$0xf]  ;;  %v2113_v52 = vpop.permute.xlu0 %2112 }
 0xe49   :  { %v5815_v2 = vor.u32 %v6921_v25, %v5814_v37  ;;  %7747 = vset.pattern.permute.xlu0 %v7849_v50 }
 0xe4a   :  { %2319 = vperm.xlu0 %7747, %v9722_v38  }
 0xe4b   :  { %5453 = vmatmul.bf16.gmra.mxu3 %v5815_v2  ;;  %v2105_v63 = vpop.permute.xlu1 %2104  ;;  %v2333_v37 = vpop.permute.xlu2 %2332 }
 0xe4c   :  { %v2119_v12 = vmul.f32 %v9734_v39, %v2105_v63  ;;  %v2121_v63 = vmul.f32 %v9744_v20, %v2113_v52 }
 0xe4e   :  { %v7698_v35 = vpack.i.bf16 %v2120_v42, %v2119_v12  ;;  %v2271_v12 = vmul.f32 %v9734_v39, %v2257_v53 }
 0xe50   :  { %7699 = vrot.lane.b32.xlu2 %v7698_v35, %s7795_s27 }
 0xe52   :  { %7768 = vset.pattern.permute.xlu0 %v7847_v18 }
 0xe53   :  { %v2117_v25 = vpop.permute.xlu1 %2116  ;;  %v2185_v59 = vpop.permute.xlu2 %2184 }
 0xe54   :  { %v2122_v2 = vmul.f32 %v9703_v29, %v2117_v25  ;;  %v2196_v25 = vmul.f32 %v9727_v41, %v2185_v59 }
 0xe56   :  { %v7707_v42 = vpack.i.bf16 %v2122_v2, %v2121_v63  ;;  %v2337_v2 = vpop.permute.xlu0 %2336 }
 0xe57   :  { %v2348_v18 = vmul.f32 %v9727_v41, %v2337_v2  ;;  %v10215_v2 = vmov 58  }
 0xe58   :  { %2416 = vperm.xlu2 %7705, %v9722_v38  }
 0xe5b   :  { %v2413_v53 = vpop.permute.xlu2 %2412 }
 0xe5c   :  { %v2261_v13 = vpop.permute.xlu1 %2260 }
 0xe5d   :  { %v2272_v35 = vmul.f32 %v9727_v41, %v2261_v13  ;;  %v2424_v13 = vmul.f32 %v9727_v41, %v2413_v53  ;;  %v7144_v53 = vld [vmem:[%s10204_s2 + $0x6e0] sm:$0xff] }
 0xe5f   :  { %v7714_v27 = vpack.i.bf16 %v2272_v35, %v2271_v12  ;;  %v2347_v12 = vmul.f32 %v9734_v39, %v2333_v37  ;;  %v7147_v35 = vld [vmem:[%s10204_s2 + $0x6f8] sm:$0xff]  ;;  %v2265_v37 = vpop.permute.xlu0 %2264 }
 0xe60   :  { %7708 = vrot.lane.b32.xlu2 %v7707_v42, %s7795_s27  ;;  %5459 = vmatpush.bf16.msrb.mxu0 %v7147_v35 }
 0xe61   :  { %7720 = vset.pattern.permute.xlu2 %v7849_v50 }
 0xe65   :  { %v2181_v52 = vpop.permute.xlu1 %2180 }
 0xe66   :  { %v2195_v45 = vmul.f32 %v9734_v39, %v2181_v52  ;;  %v7145_v52 = vld [vmem:[%s10204_s2 + $0x6e8] sm:$0xff] }
 0xe68   :  { %v7728_v51 = vpack.i.bf16 %v2196_v25, %v2195_v45  ;;  %7715 = vrot.lane.b32.xlu2 %v7714_v27, %s7795_s27  ;;  %v7723_v45 = vpack.i.bf16 %v2348_v18, %v2347_v12  ;;  %v7143_v18 = vld [vmem:[%s10204_s2 + $0x6d8] sm:$0xff] }
 0xe6a   :  { %7729 = vrot.lane.b32.xlu1 %v7728_v51, %s7795_s27  ;;  %v10214_v51 = vmov 62  }
 0xe6e   :  { %v2409_v63 = vpop.permute.xlu1 %2408 }
 0xe6f   :  { %v2423_v42 = vmul.f32 %v9734_v39, %v2409_v63 }
 0xe70   :  { %2314 = vperm.xlu2 %7720, %v9714_v43   ;;  %v7146_v43 = vld [vmem:[%s10204_s2 + $0x6f0] sm:$0xff] }
 0xe71   :  { %v7735_v59 = vpack.i.bf16 %v2424_v13, %v2423_v42  ;;  %5460 = vmatpush.bf16.msrb.mxu0 %v7146_v43  ;;  %v2189_v13 = vpop.permute.xlu0 %2188  ;;  %v2273_v42 = vmul.f32 %v9744_v20, %v2265_v37  ;;  %v7141_v37 = vld [vmem:[%s10204_s2 + $0x6c8] sm:$0xff]  ;;  %v2341_v43 = vpop.permute.xlu2 %2340 }
 0xe73   :  { %7736 = vrot.lane.b32.xlu1 %v7735_v59, %s7795_s27 }
 0xe75   :  { %5461 = vmatpush.bf16.msrb.mxu0 %v7145_v52  ;;  %v7140_v52 = vld [vmem:[%s10204_s2 + $0x6c0] sm:$0xff] }
 0xe77   :  { %v2269_v27 = vpop.permute.xlu1 %2268 }
 0xe78   :  { %7724 = vrot.lane.b32.xlu2 %v7723_v45, %s7795_s27  ;;  %v2274_v63 = vmul.f32 %v9703_v29, %v2269_v27  ;;  %v10216_v45 = vmov 56   ;;  %v7142_v27 = vld [vmem:[%s10204_s2 + $0x6d0] sm:$0xff] }
 0xe79   :  { %7733 = vset.pattern.permute.xlu2 %v10214_v51  ;;  %5462 = vmatpush.bf16.msrb.mxu0 %v7144_v53 }
 0xe7a   :  { %v7742_v35 = vpack.i.bf16 %v2274_v63, %v2273_v42  ;;  %v7162_v63 = vld [vmem:[%s10204_s2 + $0x770] sm:$0xff]  ;;  %v7160_v42 = vld [vmem:[%s10204_s2 + $0x760] sm:$0xff] }
 0xe7b   :  { %2248 = vperm.xlu1 %7741, %v9764_v17  }
 0xe7d   :  { %5463 = vmatpush.bf16.msrb.mxu0 %v7143_v18  ;;  %v2100_v18 = vmul.f32 %v9727_v41, %v9911_v55 }
 0xe80   :  { %2385 = vperm.xlu2 %7733, %v9754_v19   ;;  %v2345_v25 = vpop.permute.xlu1 %2344  ;;  %v2197_v19 = vmul.f32 %v9744_v20, %v2189_v13  ;;  %v2349_v13 = vmul.f32 %v9744_v20, %v2341_v43 }
 0xe81   :  { %5464 = vmatpush.bf16.msrb.mxu0 %v7142_v27  ;;  %v2350_v53 = vmul.f32 %v9703_v29, %v2345_v25  ;;  %v7171_v25 = vld [vmem:[%s10204_s2 + $0x7b8] sm:$0xff] }
 0xe82   :  { %5516 = vmatpush.bf16.msrb.mxu3 %v7171_v25  ;;  %v10029_v25 = vpop.f32.mrf.mxu3 }
 0xe83   :  { %7748 = vset.pattern.permute.xlu1 %v7849_v50 }
 0xe84   :  { %2324 = vperm.xlu1 %7748, %v9764_v17  }
 0xe85   :  { %5465 = vmatpush.bf16.msrb.mxu0 %v7141_v37 }
 0xe88   :  { %7740 = vset.pattern.permute.xlu2 %v10215_v2  ;;  %v7163_v2 = vld [vmem:[%s10204_s2 + $0x778] sm:$0xff] }
 0xe89   :  { %v2193_v12 = vpop.permute.xlu1 %2192  ;;  %2243 = vperm.xlu2 %7740, %v9722_v38   ;;  %5466 = vmatpush.bf16.msrb.mxu0 %v7140_v52 }
 0xe8a   :  { %v2198_v50 = vmul.f32 %v9703_v29, %v2193_v12  ;;  %5497 = vmatpush.bf16.msrb.mxu2 %v7163_v2  ;;  %v7170_v12 = vld [vmem:[%s10204_s2 + $0x7b0] sm:$0xff]  ;;  %v7168_v2 = vld [vmem:[%s10204_s2 + $0x7a0] sm:$0xff] }
 0xe8b   :  { %5517 = vmatpush.bf16.msrb.mxu3 %v7170_v12 }
 0xe8c   :  { %v7756_v59 = vpack.i.bf16 %v2198_v50, %v2197_v19  ;;  %7750 = vset.pattern.permute.xlu1 %v10216_v45  ;;  %v7751_v19 = vpack.i.bf16 %v2350_v53, %v2349_v13  ;;  %v2099_v50 = vmul.f32 %v9734_v39, %v9885_v11  ;;  %v7169_v11 = vld [vmem:[%s10204_s2 + $0x7a8] sm:$0xff]  ;;  %v7158_v53 = vld [vmem:[%s10204_s2 + $0x750] sm:$0xff] }
 0xe8d   :  { %2172 = vperm.xlu1 %7750, %v9764_v17   ;;  %v7154_v13 = vld [vmem:[%s10204_s2 + $0x730] sm:$0xff] }
 0xe8e   :  { %7757 = vrot.lane.b32.xlu0 %v7756_v59, %s7795_s27  ;;  %5498 = vmatpush.bf16.msrb.mxu2 %v7162_v63 }
 0xe8f   :  { %5518 = vmatpush.bf16.msrb.mxu3 %v7169_v11  ;;  %v7178_v11 = vld [vmem:[%s10204_s2 + $0x7f0] sm:$0xff] }
 0xe91   :  { %7743 = vrot.lane.b32.xlu2 %v7742_v35, %s7795_s27  ;;  %v7159_v35 = vld [vmem:[%s10204_s2 + $0x758] sm:$0xff] }
 0xe92   :  { %7749 = vset.pattern.permute.xlu2 %v10216_v45  ;;  %v2421_v52 = vpop.permute.xlu1 %2420 }
 0xe93   :  { %5519 = vmatpush.bf16.msrb.mxu3 %v7168_v2 }
 0xe95   :  { %7761 = vset.pattern.permute.xlu1 %v10214_v51 }
 0xe96   :  { %2395 = vperm.xlu1 %7761, %v9722_v38  }
 0xe99   :  { %2167 = vperm.xlu2 %7749, %v9722_v38   ;;  %v7161_v38 = vld [vmem:[%s10204_s2 + $0x768] sm:$0xff] }
 0xe9a   :  { %5499 = vmatpush.bf16.msrb.mxu2 %v7161_v38 }
 0xe9e   :  { %5500 = vmatpush.bf16.msrb.mxu2 %v7160_v42  ;;  %v7157_v42 = vld [vmem:[%s10204_s2 + $0x748] sm:$0xff] }
 0xea1   :  { %7752 = vrot.lane.b32.xlu2 %v7751_v19, %s7795_s27  ;;  %v2426_v19 = vmul.f32 %v9703_v29, %v2421_v52  ;;  %v2101_v52 = vmul.f32 %v9744_v20, %v9904_v30 }
 0xea2   :  { %7762 = vset.pattern.permute.xlu2 %v10214_v51  ;;  %5501 = vmatpush.bf16.msrb.mxu2 %v7159_v35  ;;  %v7156_v35 = vld [vmem:[%s10204_s2 + $0x740] sm:$0xff] }
 0xea6   :  { %5502 = vmatpush.bf16.msrb.mxu2 %v7158_v53 }
 0xea9   :  { %2400 = vperm.xlu2 %7762, %v9764_v17   ;;  %v7155_v17 = vld [vmem:[%s10204_s2 + $0x738] sm:$0xff] }
 0xeaa   :  { %v7700_v51 = vpop.permute.xlu2 %7699  ;;  %5478 = vmatpush.bf16.msrb.mxu1 %v7155_v17  ;;  %5503 = vmatpush.bf16.msrb.mxu2 %v7157_v42  ;;  %v7166_v17 = vld [vmem:[%s10204_s2 + $0x790] sm:$0xff] }
 0xeab   :  { %v7702_v59 = vunpack.i.h.bf16 %v7700_v51  ;;  %v7701_v45 = vunpack.i.l.bf16 %v7700_v51  ;;  %v7153_v51 = vld [vmem:[%s10204_s2 + $0x728] sm:$0xff] }
 0xead   :  { %v2139_v27 = vsel %vm86_vm0, %v2099_v50, %v7701_v45  ;;  %v2140_v37 = vsel %vm86_vm0, %v2100_v18, %v7702_v59  ;;  %v7167_v50 = vld [vmem:[%s10204_s2 + $0x798] sm:$0xff] }
 0xeae   :  { %v2143_v55 = vpack.c.bf16 %v2139_v27, %v2139_v27  ;;  %v2144_v43 = vpack.c.bf16 %v2140_v37, %v2140_v37  ;;  %5479 = vmatpush.bf16.msrb.mxu1 %v7154_v13  ;;  %v7179_v18 = vld [vmem:[%s10204_s2 + $0x7f8] sm:$0xff]  ;;  %5520 = vmatpush.bf16.msrb.mxu3 %v7167_v50  ;;  %v7152_v37 = vld [vmem:[%s10204_s2 + $0x720] sm:$0xff]  ;;  %v10060_v2 = vpop.f32.mrf.mxu3  ;;  %v7177_v50 = vld [vmem:[%s10204_s2 + $0x7e8] sm:$0xff] }
 0xeaf   :  { %5535 = vmatpush.bf16.msra.mxu0 %v7179_v18  ;;  %5504 = vmatpush.bf16.msrb.mxu2 %v7156_v35  ;;  %v7164_v35 = vld [vmem:[%s10204_s2 + $0x780] sm:$0xff] }
 0xeb0   :  { %2147 = vst [vmem:[#allocation2 + $0x6c] sm:$0xf] %v2143_v55 }
 0xeb1   :  { %2148 = vst [vmem:[#allocation2 + $0xec] sm:$0xf] %v2144_v43  ;;  %v2102_v43 = vmul.f32 %v9703_v29, %v9895_v34  ;;  %v7165_v34 = vld [vmem:[%s10204_s2 + $0x788] sm:$0xff] }
 0xeb2   :  { %v2417_v63 = vpop.permute.xlu2 %2416  ;;  %5480 = vmatpush.bf16.msrb.mxu1 %v7153_v51  ;;  %5521 = vmatpush.bf16.msrb.mxu3 %v7166_v17  ;;  %v2234_v51 = vpop.permute.xlu0 %2233 }
 0xeb3   :  { %v2425_v38 = vmul.f32 %v9744_v20, %v2417_v63  ;;  %5536 = vmatpush.bf16.msra.mxu0 %v7178_v11 }
 0xeb5   :  { %v7763_v12 = vpack.i.bf16 %v2426_v19, %v2425_v38  ;;  %v7151_v38 = vld [vmem:[%s10204_s2 + $0x718] sm:$0xff] }
 0xeb6   :  { %5481 = vmatpush.bf16.msrb.mxu1 %v7152_v37  ;;  %5522 = vmatpush.bf16.msrb.mxu3 %v7165_v34  ;;  %v7176_v37 = vld [vmem:[%s10204_s2 + $0x7e0] sm:$0xff] }
 0xeb7   :  { %7764 = vrot.lane.b32.xlu0 %v7763_v12, %s7795_s27  ;;  %v6873_v59 = vld [vmem:[#allocation2 + $0x6c] sm:$0xf]  ;;  %v2239_v12 = vpop.permute.xlu1 %2238  ;;  %5537 = vmatpush.bf16.msra.mxu0 %v7177_v50  ;;  %v7174_v50 = vld [vmem:[%s10204_s2 + $0x7d0] sm:$0xff] }
 0xeb8   :  { %v5688_v45 = vld [vmem:[#allocation2 + $0xe8] sm:$0xf0]  ;;  %v2252_v18 = vmul.f32 %v9727_v41, %v2239_v12  ;;  %v7148_v12 = vld [vmem:[%s10204_s2 + $0x700] sm:$0xff] }
 0xeb9   :  { %v5691_v27 = vor.u32 %v6873_v59, %v5688_v45  ;;  %v2251_v59 = vmul.f32 %v9734_v39, %v2234_v51  ;;  %v7150_v45 = vld [vmem:[%s10204_s2 + $0x710] sm:$0xff] }
 0xeba   :  { %v7709_v55 = vpop.permute.xlu2 %7708  ;;  %5482 = vmatpush.bf16.msrb.mxu1 %v7151_v38  ;;  %5523 = vmatpush.bf16.msrb.mxu3 %v7164_v35 }
 0xebb   :  { %5467 = vmatmul.bf16.vlgmr.msrb.gmra.mxu0 %v5691_v27  ;;  %v7711_v53 = vunpack.i.h.bf16 %v7709_v55  ;;  %v7710_v13 = vunpack.i.l.bf16 %v7709_v55  ;;  %v7149_v55 = vld [vmem:[%s10204_s2 + $0x708] sm:$0xff] }
 0xebc   :  { %5538 = vmatpush.bf16.msra.mxu0 %v7176_v37 }
 0xebd   :  { %v2142_v19 = vsel %vm86_vm0, %v2102_v43, %v7711_v53  ;;  %v2141_v63 = vsel %vm86_vm0, %v2101_v52, %v7710_v13  ;;  %v10089_v53 = vpop.f32.mrf.mxu3 }
 0xebe   :  { %v2146_v30 = vpack.c.bf16 %v2142_v19, %v2142_v19  ;;  %v2145_v42 = vpack.c.bf16 %v2141_v63, %v2141_v63  ;;  %5483 = vmatpush.bf16.msrb.mxu1 %v7150_v45  ;;  %v7175_v63 = vld [vmem:[%s10204_s2 + $0x7d8] sm:$0xff] }
 0xec0   :  { %2150 = vst [vmem:[#allocation2 + $0x1ec] sm:$0xf] %v2146_v30  ;;  %v2310_v30 = vpop.permute.xlu1 %2309  ;;  %5539 = vmatpush.bf16.msra.mxu0 %v7175_v63 }
 0xec1   :  { %2149 = vst [vmem:[#allocation2 + $0x16c] sm:$0xf] %v2145_v42 }
 0xec2   :  { %v7716_v27 = vpop.permute.xlu2 %7715  ;;  %5484 = vmatpush.bf16.msrb.mxu1 %v7149_v55 }
 0xec3   :  { %v7718_v17 = vunpack.i.h.bf16 %v7716_v27  ;;  %v7717_v11 = vunpack.i.l.bf16 %v7716_v27 }
 0xec4   :  { %5540 = vmatpush.bf16.msra.mxu0 %v7174_v50 }
 0xec5   :  { %v2292_v43 = vsel %vm86_vm0, %v2252_v18, %v7718_v17  ;;  %v2291_v52 = vsel %vm86_vm0, %v2251_v59, %v7717_v11  ;;  %v7173_v59 = vld [vmem:[%s10204_s2 + $0x7c8] sm:$0xff]  ;;  %v2327_v17 = vmul.f32 %v9734_v39, %v2310_v30 }
 0xec6   :  { %v2296_v13 = vpack.c.bf16 %v2292_v43, %v2292_v43  ;;  %v2295_v19 = vpack.c.bf16 %v2291_v52, %v2291_v52  ;;  %5485 = vmatpush.bf16.msrb.mxu1 %v7148_v12  ;;  %v7172_v52 = vld [vmem:[%s10204_s2 + $0x7c0] sm:$0xff] }
 0xec7   :  { %v5816_v38 = vld [vmem:[#allocation2 + $0x1e8] sm:$0xf0] }
 0xec8   :  { %2300 = vst [vmem:[#allocation2 + $0xf4] sm:$0xf] %v2296_v13  ;;  %v6905_v34 = vld [vmem:[#allocation2 + $0x16c] sm:$0xf]  ;;  %5541 = vmatpush.bf16.msra.mxu0 %v7173_v59  ;;  %v2163_v43 = vpop.permute.xlu1 %2162 }
 0xec9   :  { %v5819_v42 = vor.u32 %v6905_v34, %v5816_v38  ;;  %2299 = vst [vmem:[#allocation2 + $0x74] sm:$0xf] %v2295_v19  ;;  %v2176_v12 = vmul.f32 %v9727_v41, %v2163_v43 }
 0xeca   :  { %v2315_v51 = vpop.permute.xlu2 %2314 }
 0xecb   :  { %5472 = vmatmul.bf16.gmra.mxu0 %v5819_v42  ;;  %v2328_v37 = vmul.f32 %v9727_v41, %v2315_v51  ;;  %v2158_v42 = vpop.permute.xlu0 %2157 }
 0xecc   :  { %5542 = vmatpush.bf16.msra.mxu0 %v7172_v52  ;;  %v2175_v51 = vmul.f32 %v9734_v39, %v2158_v42 }
 0xece   :  { %v5454_v18 = vpop.f32.mrf.mxu3 }
 0xecf   :  { %v10104_v45 = vadd.f32 %v5454_v18, %v9900_v31  ;;  %v5696_v35 = vld [vmem:[#allocation2 + $0xf0] sm:$0xf0] }
 0xed0   :  { %v6874_v27 = vld [vmem:[#allocation2 + $0x74] sm:$0xf] }
 0xed1   :  { %v5699_v11 = vor.u32 %v6874_v27, %v5696_v35 }
 0xed2   :  { %v7725_v55 = vpop.permute.xlu2 %7724 }
 0xed3   :  { %v7727_v13 = vunpack.i.h.bf16 %v7725_v55  ;;  %v7726_v19 = vunpack.i.l.bf16 %v7725_v55  ;;  %5505 = vmatmul.bf16.vlgmr.msrb.gmra.mxu2 %v5699_v11 }
 0xed5   :  { %v2368_v31 = vsel %vm86_vm0, %v2328_v37, %v7727_v13  ;;  %v2367_v63 = vsel %vm86_vm0, %v2327_v17, %v7726_v19  ;;  %v2391_v13 = vpop.permute.xlu0 %2390 }
 0xed6   :  { %v2372_v38 = vpack.c.bf16 %v2368_v31, %v2368_v31  ;;  %v2371_v34 = vpack.c.bf16 %v2367_v63, %v2367_v63  ;;  %v2404_v31 = vmul.f32 %v9727_v41, %v2391_v13 }
 0xed8   :  { %2376 = vst [vmem:[#allocation2 + $0xf8] sm:$0xf] %v2372_v38 }
 0xed9   :  { %2375 = vst [vmem:[#allocation2 + $0x78] sm:$0xf] %v2371_v34 }
 0xeda   :  { %v2386_v30 = vpop.permute.xlu2 %2385 }
 0xedb   :  { %v2403_v43 = vmul.f32 %v9734_v39, %v2386_v30 }
 0xedc   :  { %v7730_v50 = vpop.permute.xlu1 %7729 }
 0xedd   :  { %v7732_v18 = vunpack.i.h.bf16 %v7730_v50  ;;  %v7731_v59 = vunpack.i.l.bf16 %v7730_v50 }
 0xedf   :  { %v2216_v35 = vsel %vm86_vm0, %v2176_v12, %v7732_v18  ;;  %v2215_v27 = vsel %vm86_vm0, %v2175_v51, %v7731_v59  ;;  %v6891_v37 = vld [vmem:[#allocation2 + $0xf4] sm:$0xf0] }
 0xee0   :  { %v2220_v11 = vpack.c.bf16 %v2216_v35, %v2216_v35  ;;  %v2219_v17 = vpack.c.bf16 %v2215_v27, %v2215_v27  ;;  %v5702_v55 = vld [vmem:[#allocation2 + $0x78] sm:$0xf] }
 0xee1   :  { %v5703_v52 = vor.u32 %v6891_v37, %v5702_v55 }
 0xee2   :  { %2224 = vst [vmem:[#allocation2 + $0xf0] sm:$0xf] %v2220_v11 }
 0xee3   :  { %2223 = vst [vmem:[#allocation2 + $0x70] sm:$0xf] %v2219_v17  ;;  %v2244_v19 = vpop.permute.xlu2 %2243  ;;  %5524 = vmatmul.bf16.vlgmr.msrb.gmra.mxu3 %v5703_v52 }
 0xee4   :  { %v2253_v59 = vmul.f32 %v9744_v20, %v2244_v19 }
 0xee5   :  { %v7737_v63 = vpop.permute.xlu1 %7736 }
 0xee6   :  { %v7739_v38 = vunpack.i.h.bf16 %v7737_v63  ;;  %v7738_v34 = vunpack.i.l.bf16 %v7737_v63 }
 0xee8   :  { %v2443_v42 = vsel %vm86_vm0, %v2403_v43, %v7738_v34  ;;  %v2444_v12 = vsel %vm86_vm0, %v2404_v31, %v7739_v38  ;;  %v2320_v34 = vpop.permute.xlu0 %2319 }
 0xee9   :  { %v2447_v51 = vpack.c.bf16 %v2443_v42, %v2443_v42  ;;  %v2448_v50 = vpack.c.bf16 %v2444_v12, %v2444_v12  ;;  %v6890_v18 = vld [vmem:[#allocation2 + $0xec] sm:$0xf0]  ;;  %v7785_v12 = vld [vmem:[%s10203_s1 + $0x18] sm:$0xff] }
 0xeea   :  { %v5694_v35 = vld [vmem:[#allocation2 + $0x70] sm:$0xf] }
 0xeeb   :  { %2451 = vst [vmem:[#allocation2 + $0x7c] sm:$0xf] %v2447_v51  ;;  %v7744_v27 = vpop.permute.xlu2 %7743  ;;  %v5695_v37 = vor.u32 %v6890_v18, %v5694_v35 }
 0xeec   :  { %2452 = vst [vmem:[#allocation2 + $0xfc] sm:$0xf] %v2448_v50  ;;  %v7746_v39 = vunpack.i.h.bf16 %v7744_v27  ;;  %v7745_v30 = vunpack.i.l.bf16 %v7744_v27 }
 0xeed   :  { %5486 = vmatmul.bf16.vlgmr.msrb.gmra.mxu1 %v5695_v37  ;;  %v2249_v41 = vpop.permute.xlu1 %2248 }
 0xeee   :  { %v2293_v11 = vsel %vm86_vm0, %v2253_v59, %v7745_v30  ;;  %v2254_v17 = vmul.f32 %v9703_v29, %v2249_v41  ;;  %v2329_v29 = vmul.f32 %v9744_v20, %v2320_v34 }
 0xeef   :  { %v2297_v55 = vpack.c.bf16 %v2293_v11, %v2293_v11 }
 0xef0   :  { %v2294_v52 = vsel %vm86_vm0, %v2254_v17, %v7746_v39 }
 0xef1   :  { %2301 = vst [vmem:[#allocation2 + $0x174] sm:$0xf] %v2297_v55  ;;  %v2298_v13 = vpack.c.bf16 %v2294_v52, %v2294_v52 }
 0xef2   :  { %v6875_v43 = vld [vmem:[#allocation2 + $0x7c] sm:$0xf] }
 0xef3   :  { %2302 = vst [vmem:[#allocation2 + $0x1f4] sm:$0xf] %v2298_v13  ;;  %v2168_v19 = vpop.permute.xlu2 %2167  ;;  %v5704_v31 = vld [vmem:[#allocation2 + $0xf8] sm:$0xf0] }
 0xef4   :  { %v5707_v63 = vor.u32 %v6875_v43, %v5704_v31  ;;  %v2177_v30 = vmul.f32 %v9744_v20, %v2168_v19 }
 0xef6   :  { %5543 = vmatmul.bf16.vlgmr.msra.gmra.mxu0 %v5707_v63  ;;  %v2325_v38 = vpop.permute.xlu1 %2324 }
 0xef7   :  { %v2330_v51 = vmul.f32 %v7785_v12, %v2325_v38 }
 0xef8   :  { %v6906_v42 = vld [vmem:[#allocation2 + $0x174] sm:$0xf] }
 0xefa   :  { %v5824_v50 = vld [vmem:[#allocation2 + $0x1f0] sm:$0xf0] }
 0xefb   :  { %v7753_v18 = vpop.permute.xlu2 %7752  ;;  %v5827_v59 = vor.u32 %v6906_v42, %v5824_v50 }
 0xefc   :  { %v7755_v35 = vunpack.i.h.bf16 %v7753_v18  ;;  %v7754_v27 = vunpack.i.l.bf16 %v7753_v18 }
 0xefd   :  { %5510 = vmatmul.bf16.gmra.mxu2 %v5827_v59 }
 0xefe   :  { %v2370_v37 = vsel %vm86_vm0, %v2330_v51, %v7755_v35  ;;  %v2369_v39 = vsel %vm86_vm0, %v2329_v29, %v7754_v27  ;;  %v7786_v35 = vld [vmem:[%s10203_s1 + $0x10] sm:$0xff] }
 0xeff   :  { %v2374_v41 = vpack.c.bf16 %v2370_v37, %v2370_v37  ;;  %v2373_v11 = vpack.c.bf16 %v2369_v39, %v2369_v39  ;;  %v2173_v17 = vpop.permute.xlu1 %2172 }
 0xf00   :  { %v2178_v55 = vmul.f32 %v7785_v12, %v2173_v17  ;;  %v7758_v52 = vpop.permute.xlu0 %7757 }
 0xf01   :  { %2378 = vst [vmem:[#allocation2 + $0x1f8] sm:$0xf] %v2374_v41  ;;  %v7760_v13 = vunpack.i.h.bf16 %v7758_v52  ;;  %v7759_v43 = vunpack.i.l.bf16 %v7758_v52 }
 0xf02   :  { %2377 = vst [vmem:[#allocation2 + $0x178] sm:$0xf] %v2373_v11 }
 0xf03   :  { %v2218_v31 = vsel %vm86_vm0, %v2178_v55, %v7760_v13  ;;  %v2217_v63 = vsel %vm86_vm0, %v2177_v30, %v7759_v43  ;;  %v2401_v59 = vpop.permute.xlu2 %2400  ;;  %v10139_v13 = vpop.f32.mrf.mxu0 }
 0xf04   :  { %v2222_v38 = vpack.c.bf16 %v2218_v31, %v2218_v31  ;;  %v2221_v34 = vpack.c.bf16 %v2217_v63, %v2217_v63  ;;  %v2406_v37 = vmul.f32 %v7785_v12, %v2401_v59 }
 0xf06   :  { %2226 = vst [vmem:[#allocation2 + $0x1f0] sm:$0xf] %v2222_v38 }
 0xf07   :  { %2225 = vst [vmem:[#allocation2 + $0x170] sm:$0xf] %v2221_v34 }
 0xf08   :  { %v6923_v42 = vld [vmem:[#allocation2 + $0x1f4] sm:$0xf0]  ;;  %v2396_v18 = vpop.permute.xlu1 %2395 }
 0xf09   :  { %v5830_v51 = vld [vmem:[#allocation2 + $0x178] sm:$0xf]  ;;  %v2405_v27 = vmul.f32 %v7786_v35, %v2396_v18  ;;  %v5338_v18 = vadd.f32 %v9499_v5, %v9435_v33  ;;  %v5437_v35 = vpop.f32.mrf.mxu2 }
 0xf0a   :  { %v5831_v20 = vor.u32 %v6923_v42, %v5830_v51  ;;  %v5336_v51 = vadd.f32 %v9497_v1, %v9429_v15  ;;  %v5456_v1 = vpop.f32.mrf.mxu3 }
 0xf0c   :  { %5529 = vmatmul.bf16.gmra.mxu3 %v5831_v20  ;;  %v5355_v20 = vadd.f32 %v9561_v8, %v5336_v51 }
 0xf0d   :  { %v6922_v19 = vld [vmem:[#allocation2 + $0x1ec] sm:$0xf0] }
 0xf0e   :  { %v5822_v29 = vld [vmem:[#allocation2 + $0x170] sm:$0xf] }
 0xf0f   :  { %v5823_v50 = vor.u32 %v6922_v19, %v5822_v29  ;;  %v5374_v19 = vadd.f32 %v9625_v26, %v5355_v20 }
 0xf11   :  { %5491 = vmatmul.bf16.gmra.mxu1 %v5823_v50  ;;  %v5393_v29 = vadd.f32 %v9689_v22, %v5374_v19  ;;  %v5418_v50 = vpop.f32.mrf.mxu1 }
 0xf13   :  { %v5412_v59 = vadd.f32 %v9793_v14, %v5393_v29 }
 0xf29   :  { %v7765_v39 = vpop.permute.xlu0 %7764 }
 0xf2a   :  { %v7767_v30 = vunpack.i.h.bf16 %v7765_v39  ;;  %v7766_v41 = vunpack.i.l.bf16 %v7765_v39 }
 0xf2c   :  { %v2446_v11 = vsel %vm86_vm0, %v2406_v37, %v7767_v30  ;;  %v2445_v17 = vsel %vm86_vm0, %v2405_v27, %v7766_v41  ;;  %v5357_v27 = vadd.f32 %v9565_v46, %v5338_v18 }
 0xf2d   :  { %v2450_v55 = vpack.c.bf16 %v2446_v11, %v2446_v11  ;;  %v2449_v52 = vpack.c.bf16 %v2445_v17, %v2445_v17 }
 0xf2e   :  { %v5376_v37 = vadd.f32 %v9629_v32, %v5357_v27  ;;  %v10218_v27 = vld [vmem:[#allocation4_spill] sm:$0xff] }
 0xf2f   :  { %2454 = vst [vmem:[#allocation2 + $0x1fc] sm:$0xf] %v2450_v55 }
 0xf30   :  { %2453 = vst [vmem:[#allocation2 + $0x17c] sm:$0xf] %v2449_v52  ;;  %v5395_v8 = vadd.f32 %v9691_v23, %v5376_v37 }
 0xf32   :  { %v5414_v39 = vadd.f32 %v9795_v40, %v5395_v8 }
 0xf34   :  { %v5433_v14 = vadd.f32 %v9887_v10, %v5414_v39 }
 0xf36   :  { %v5832_v43 = vld [vmem:[#allocation2 + $0x1f8] sm:$0xf0]  ;;  %v5452_v46 = vadd.f32 %v10089_v53, %v5433_v14  ;;  %v4963_v53 = vadd.f32 %v8310_v36, %v8225_v24 }
 0xf37   :  { %v6907_v31 = vld [vmem:[#allocation2 + $0x17c] sm:$0xf] }
 0xf38   :  { %v5468_v63 = vpop.f32.mrf.mxu0  ;;  %v5835_v38 = vor.u32 %v6907_v31, %v5832_v43 }
 0xf3a   :  { %5548 = vmatmul.bf16.gmra.mxu0 %v5835_v38  ;;  %v4982_v38 = vadd.f32 %v8375_v47, %v4963_v53 }
 0xf40   :  { %v5470_v34 = vpop.f32.mrf.mxu0 }
 0xf41   :  { %v5471_v11 = vadd.f32 %v5470_v34, %v5452_v46  ;;  %v5001_v34 = vadd.f32 %v8460_v62, %v4982_v38 }
 0xf48   :  { %v5473_v12 = vpop.f32.mrf.mxu0 }
 0xf49   :  { %v10142_v42 = vadd.f32 %v5473_v12, %v10104_v45  ;;  %v5431_v45 = vadd.f32 %v9879_v48, %v5412_v59  ;;  %v5020_v12 = vadd.f32 %v8525_v16, %v5001_v34  ;;  %v10217_v59 = vld [vmem:[#allocation3_spill] sm:$0xff] }
 0xf4b   :  { %v5450_v15 = vadd.f32 %v10060_v2, %v5431_v45  ;;  %v5039_v51 = vadd.f32 %v8590_v21, %v5020_v12 }
 0xf4d   :  { %v5469_v26 = vadd.f32 %v5468_v63, %v5450_v15  ;;  %v5058_v20 = vadd.f32 %v8677_v3, %v5039_v51 }
 0xf4f   :  { %v5077_v19 = vadd.f32 %v8750_v9, %v5058_v20 }
 0xf50   :  { %v5475_v30 = vpop.f32.mrf.mxu0 }
 0xf51   :  { %v5096_v29 = vadd.f32 %v8816_v7, %v5077_v19 }
 0xf53   :  { %v5115_v24 = vadd.f32 %v8902_v57, %v5096_v29 }
 0xf55   :  { %v5134_v36 = vadd.f32 %v8968_v0, %v5115_v24 }
 0xf56   :  { %v5506_v33 = vpop.f32.mrf.mxu2 }
 0xf57   :  { %v5153_v18 = vadd.f32 %v9054_v54, %v5134_v36 }
 0xf59   :  { %v5172_v47 = vadd.f32 %v9120_v49, %v5153_v18 }
 0xf5b   :  { %v5191_v62 = vadd.f32 %v9186_v61, %v5172_v47 }
 0xf5d   :  { %v5210_v16 = vadd.f32 %v9252_v56, %v5191_v62 }
 0xf5e   :  { %v5508_v23 = vpop.f32.mrf.mxu2 }
 0xf5f   :  { %v5229_v21 = vadd.f32 %v9338_v28, %v5210_v16 }
 0xf61   :  { %v5248_v3 = vadd.f32 %v9424_v60, %v5229_v21 }
 0xf63   :  { %v5267_v9 = vadd.f32 %v9495_v44, %v5248_v3 }
 0xf65   :  { %v5286_v7 = vadd.f32 %v9559_v4, %v5267_v9 }
 0xf66   :  { %v5525_v48 = vpop.f32.mrf.mxu3 }
 0xf67   :  { %v5305_v57 = vadd.f32 %v9623_v6, %v5286_v7 }
 0xf69   :  { %v5324_v0 = vadd.f32 %v9687_v58, %v5305_v57 }
 0xf6a   :  { %v5487_v22 = vpop.f32.mrf.mxu1 }
 0xf6b   :  { %v5488_v5 = vadd.f32 %v5487_v22, %v5469_v26  ;;  %v5343_v54 = vadd.f32 %v10217_v59, %v5324_v0 }
 0xf6d   :  { %v5507_v41 = vadd.f32 %v5506_v33, %v5488_v5  ;;  %v5362_v49 = vadd.f32 %v10218_v27, %v5343_v54 }
 0xf6e   :  { %v5527_v40 = vpop.f32.mrf.mxu3 }
 0xf6f   :  { %v5526_v17 = vadd.f32 %v5525_v48, %v5507_v41  ;;  %v5381_v61 = vadd.f32 %v10029_v25, %v5362_v49 }
 0xf71   :  { %v5400_v56 = vadd.f32 %v10139_v13, %v5381_v61 }
 0xf72   :  { %v5489_v32 = vpop.f32.mrf.mxu1 }
 0xf73   :  { %v5490_v2 = vadd.f32 %v5489_v32, %v5471_v11  ;;  %v5544_v55 = vpop.f32.mrf.mxu0  ;;  %v5419_v28 = vadd.f32 %v5418_v50, %v5400_v56 }
 0xf74   :  { %v5545_v52 = vadd.f32 %v5544_v55, %v5526_v17 }
 0xf75   :  { %v5509_v43 = vadd.f32 %v5508_v23, %v5490_v2  ;;  %v5438_v44 = vadd.f32 %v5437_v35, %v5419_v28 }
 0xf76   :  { %5554 = vst.msk [vmem:[%s10206_s4] sm:$0xff] %vm86_vm0, %v5545_v52 }
 0xf77   :  { %v5528_v31 = vadd.f32 %v5527_v40, %v5509_v43  ;;  %v5457_v15 = vadd.f32 %v5456_v1, %v5438_v44 }
 0xf79   :  { %v5476_v26 = vadd.f32 %v5475_v30, %v5457_v15 }
 0xf7b   :  { %v5546_v10 = vpop.f32.mrf.mxu0 }
 0xf7c   :  { %v5547_v63 = vadd.f32 %v5546_v10, %v5528_v31 }
 0xf7e   :  { %5555 = vst.msk [vmem:[%s10206_s4 + $0x8] sm:$0xff] %vm86_vm0, %v5547_v63 }
 0xf80   :  { %v5511_v37 = vpop.f32.mrf.mxu2 }
 0xf88   :  { %v5513_v5 = vpop.f32.mrf.mxu2 }
 0xf8e   :  { %v5492_v45 = vpop.f32.mrf.mxu1 }
 0xf8f   :  { %v5493_v60 = vadd.f32 %v5492_v45, %v10142_v42  ;;  %v5530_v8 = vpop.f32.mrf.mxu3 }
 0xf91   :  { %v5512_v4 = vadd.f32 %v5511_v37, %v5493_v60 }
 0xf93   :  { %v5531_v58 = vadd.f32 %v5530_v8, %v5512_v4 }
 0xf96   :  { %v5494_v6 = vpop.f32.mrf.mxu1 }
 0xf97   :  { %v5495_v22 = vadd.f32 %v5494_v6, %v5476_v26  ;;  %v5532_v25 = vpop.f32.mrf.mxu3 }
 0xf99   :  { %v5514_v14 = vadd.f32 %v5513_v5, %v5495_v22 }
 0xf9b   :  { %v5533_v13 = vadd.f32 %v5532_v25, %v5514_v14 }
 0xfb7   :  { %v5549_v39 = vpop.f32.mrf.mxu0 }
 0xfb8   :  { %v5550_v33 = vadd.f32 %v5549_v39, %v5531_v58 }
 0xfba   :  { %5556 = vst.msk [vmem:[%s10206_s4 + $0x10] sm:$0xff] %vm86_vm0, %v5550_v33 }
 0xfbf   :  { %v5551_v42 = vpop.f32.mrf.mxu0 }
 0xfc0   :  { %v5552_v50 = vadd.f32 %v5551_v42, %v5533_v13 }
 0xfc2   :  { %5557 = vst.msk [vmem:[%s10206_s4 + $0x18] sm:$0xff] %vm86_vm0, %v5552_v50 }

</bundles_post_ra>
